<compile_context>
chip_gen: v5e
topology: v5e:2x2
jax: 0.10.0
libtpu: 0.0.40
codegen_flags: <defaults>
</compile_context>

<pallas_src>
import math

import jax
import jax.numpy as jnp
from jax import lax
from jax.experimental import pallas as pl
from jax.experimental.pallas import tpu as pltpu

EPS = 1e-6  # LayerNorm eps used by the module
_SQRT_2_OVER_PI = math.sqrt(2.0 / math.pi)


def _layernorm(x, g, b):
    # PyTorch nn.LayerNorm: biased variance over last dim, eps inside sqrt.
    mean = jnp.mean(x, axis=-1, keepdims=True)
    var = jnp.mean((x - mean) ** 2, axis=-1, keepdims=True)
    return (x - mean) / jnp.sqrt(var + EPS) * g + b


def _gelu_tanh(x):
    # nn.GELU(approximate='tanh'). tanh executes in the otherwise-idle EUP slot.
    # |deviation| from the erf-exact nn.GELU() default is < ~1e-3.
    return 0.5 * x * (1.0 + jnp.tanh(_SQRT_2_OVER_PI * (x + 0.044715 * x * x * x)))


def rev_mvit_kernel(x_ref,
                    wqkv_ref, bqkv_ref, ln1_g_ref, ln1_b_ref,
                    wproj_ref, bproj_ref,
                    ln2_g_ref, ln2_b_ref, w1_ref, b1_ref, w2_ref, b2_ref,
                    out_ref):
    """All ReversibleBlocks + final concat for one batch slab of BB elements.

    Per layer:  Y1 = X1 + F(X2)   F = pre-LN multi-head attention (no pooling)
                Y2 = X2 + G(Y1)   G = pre-LN MLP with tanh GELU
    Output tile = concat([X1_final, X2_final], axis=-1).
    """
    depth = wqkv_ref.shape[0]
    H = wproj_ref.shape[1]
    BB, L, C = x_ref.shape
    D = C // H
    N = BB * L

    x = x_ref[...].reshape(N, C)     # fold batch slab into the row (sublane) dim
    x1 = x                           # torch.cat([x, x], -1) then chunk along -1
    x2 = x

    for li in range(depth):          # static unroll over layers (depth known at trace time)
        # ---------------- F: Attention sub-block ----------------
        xn = _layernorm(x2, ln1_g_ref[li], ln1_b_ref[li])                    # (N, C)
        # Fused QKV projection; scale D**-0.5 folded into the Q columns, K bias
        # dropped and V bias folded into bproj at param-prep time.
        qkv = jnp.dot(xn, wqkv_ref[li], preferred_element_type=jnp.float32) \
            + bqkv_ref[li]                                                   # (N, 3C)
        f = jnp.zeros((N, C), jnp.float32)
        for h in range(H):
            q = qkv[:, h * D:(h + 1) * D].reshape(BB, L, D)
            k = qkv[:, C + h * D:C + (h + 1) * D].reshape(BB, L, D)
            v = qkv[:, 2 * C + h * D:2 * C + (h + 1) * D].reshape(BB, L, D)
            # Batched q @ k^T contracting last axes (no explicit transpose of k).
            att = jnp.einsum('bqd,bkd->bqk', q, k,
                             preferred_element_type=jnp.float32)             # (BB, L, L)
            att = att - jnp.max(att, axis=-1, keepdims=True)
            p = jnp.exp(att)
            inv = pl.reciprocal(jnp.sum(p, axis=-1, keepdims=True), approx=True)
            p = p * inv
            pv = jnp.einsum('bqk,bkd->bqd', p, v,
                            preferred_element_type=jnp.float32)              # (BB, L, D)
            # Per-head partial projection accumulation (MRB-friendly on v7x).
            f = f + jnp.dot(pv.reshape(N, D), wproj_ref[li, h],
                            preferred_element_type=jnp.float32)
        f = f + bproj_ref[li]
        y1 = x1 + f

        # ---------------- G: MLP sub-block ----------------
        xn2 = _layernorm(y1, ln2_g_ref[li], ln2_b_ref[li])
        hid = jnp.dot(xn2, w1_ref[li], preferred_element_type=jnp.float32) + b1_ref[li]
        hid = _gelu_tanh(hid)
        g = jnp.dot(hid, w2_ref[li], preferred_element_type=jnp.float32) + b2_ref[li]
        y2 = x2 + g

        x1, x2 = y1, y2

    # final torch.cat([X1, X2], dim=-1), single lane-dense store
    out_ref[...] = jnp.concatenate([x1, x2], axis=-1).reshape(BB, L, 2 * C)


def _rep_spec(arr):
    """Full-array block replicated across the batch grid (stays VMEM-resident).

    TODO(synk): add pipeline_mode=pl.Buffered(1) when layers get wide (constant
    index_map blocks need no double-buffering) -- negligible at this toy size.
    """
    zeros = (0,) * arr.ndim
    return pl.BlockSpec(arr.shape, lambda b: zeros)


def _tensorcores_per_chip() -> int:
    """Best-effort TC count: v7x has 2 TensorCores/chip, v5e/v6e have 1."""
    try:
        kind = jax.devices()[0].device_kind.lower()
    except Exception:  # pragma: no cover
        return 1
    return 2 if ("v7" in kind or "7x" in kind) else 1


def reversible_mvit_forward(x, params, batch_block=None):
    """ReversibleMViT.forward (eval mode), fully fused into one pallas_call.

    x: (B, L, C) tokens.  Returns (B, L, 2C).  Final dropout is identity (eval).

    batch_block: number of batch elements folded into one grid step.
      Default: B (full fold) on single-TC chips (v5e/v6e); B // 2 on v7x so each
      of its 2 TensorCores takes one "parallel" grid step.
    """
    B, L, C = x.shape

    if batch_block is None:
        n_tc = _tensorcores_per_chip()
        if n_tc > 1 and B % n_tc == 0 and B >= n_tc:
            batch_block = B // n_tc
        else:
            batch_block = B
    batch_block = max(1, min(batch_block, B))
    assert B % batch_block == 0, (B, batch_block)
    grid = (B // batch_block,)

    tok_spec = pl.BlockSpec((batch_block, L, C), lambda b: (b, 0, 0))
    out_spec = pl.BlockSpec((batch_block, L, 2 * C), lambda b: (b, 0, 0))

    ordered = [params[k] for k in
               ('wqkv', 'bqkv', 'ln1_g', 'ln1_b', 'wproj', 'bproj',
                'ln2_g', 'ln2_b', 'w1', 'b1', 'w2', 'b2')]

    return pl.pallas_call(
        rev_mvit_kernel,
        out_shape=jax.ShapeDtypeStruct((B, L, 2 * C), x.dtype),
        grid=grid,
        in_specs=[tok_spec] + [_rep_spec(a) for a in ordered],
        out_specs=out_spec,
        compiler_params=pltpu.CompilerParams(dimension_semantics=("parallel",)),
    )(x, *ordered)


# ------------------------- parameter preparation -------------------------

def _init_torch_params(key, depth, C, num_heads, mlp_ratio):
    """Synthetic per-layer params in PyTorch nn.Linear layout: weight (out, in), bias (out,)."""
    Hm = int(C * mlp_ratio)
    layers = []
    keys = jax.random.split(key, depth)
    for i in range(depth):
        ks = jax.random.split(keys[i], 4)
        layers.append(dict(
            ln1_g=jnp.ones((C,), jnp.float32),
            ln1_b=jnp.zeros((C,), jnp.float32),
            w_qkv=0.02 * jax.random.normal(ks[0], (3 * C, C), jnp.float32),
            b_qkv=0.02 * jax.random.normal(ks[1], (3 * C,), jnp.float32),
            w_proj=0.02 * jax.random.normal(ks[2], (C, C), jnp.float32),
            b_proj=jnp.zeros((C,), jnp.float32),
            ln2_g=jnp.ones((C,), jnp.float32),
            ln2_b=jnp.zeros((C,), jnp.float32),
            w_fc1=0.02 * jax.random.normal(ks[3], (Hm, C), jnp.float32),
            b_fc1=jnp.zeros((Hm,), jnp.float32),
            w_fc2=0.02 * jax.random.normal(ks[3], (C, Hm), jnp.float32),
            b_fc2=jnp.zeros((C,), jnp.float32),
        ))
    return layers


def prep_params(torch_layers, num_heads):
    """One-time transform from PyTorch layout to the fused-kernel layout.

    - stacks per-layer params on a leading depth axis
    - transposes Linear weights to (in, out)
    - fuses the QKV projection into one (C, 3C) weight; 3C output columns keep the
      torch ordering (3, H, D) so per-head views are static lane slices
    - folds the attention scale D**-0.5 into the Q weight/bias columns
    - drops the K bias (softmax row-shift invariance) and folds the V bias through
      Wproj into bproj (softmax rows sum to 1)
    - reshapes proj into per-head (H, D, C) partial-projection blocks
    """
    C = torch_layers[0]['w_proj'].shape[0]
    H = num_heads
    D = C // H
    scale = D ** -0.5

    def stack(fn):
        return jnp.stack([fn(p) for p in torch_layers], axis=0)

    def wqkv(p):  # (C_in, 3C_out), q columns pre-scaled
        w = p['w_qkv'].T
        return jnp.concatenate([w[:, :C] * scale, w[:, C:]], axis=-1)

    def bqkv(p):  # (1, 3C): [bq*scale, 0 (k bias dropped), 0 (v bias folded into bproj)]
        bq = p['b_qkv'][:C] * scale
        return jnp.concatenate([bq, jnp.zeros((2 * C,), bq.dtype)]).reshape(1, 3 * C)

    def bproj(p):  # (1, C): b_proj + bv @ Wproj
        bv = p['b_qkv'][2 * C:]
        return (p['b_proj'] + bv @ p['w_proj'].T).reshape(1, C)

    return dict(
        wqkv=stack(wqkv),                                       # (depth, C, 3C)
        bqkv=stack(bqkv),                                       # (depth, 1, 3C)
        wproj=stack(lambda p: p['w_proj'].T.reshape(H, D, C)),  # (depth, H, D, C)
        bproj=stack(bproj),                                     # (depth, 1, C)
        ln1_g=stack(lambda p: p['ln1_g'].reshape(1, C)),
        ln1_b=stack(lambda p: p['ln1_b'].reshape(1, C)),
        ln2_g=stack(lambda p: p['ln2_g'].reshape(1, C)),
        ln2_b=stack(lambda p: p['ln2_b'].reshape(1, C)),
        w1=stack(lambda p: p['w_fc1'].T),                       # (depth, C, Hm)
        b1=stack(lambda p: p['b_fc1'].reshape(1, -1)),          # (depth, 1, Hm)
        w2=stack(lambda p: p['w_fc2'].T),                       # (depth, Hm, C)
        b2=stack(lambda p: p['b_fc2'].reshape(1, C)),           # (depth, 1, C)
    )


# --------------------------- pure-JAX reference ---------------------------

def reference_forward(x, params):
    """Mirrors the kernel math (exact softmax division) in plain jnp, for checking."""
    B, L, C = x.shape
    depth = params['wqkv'].shape[0]
    H = params['wproj'].shape[1]
    D = C // H
    x1 = x
    x2 = x
    for li in range(depth):
        xn = _layernorm(x2, params['ln1_g'][li], params['ln1_b'][li])
        qkv = xn @ params['wqkv'][li] + params['bqkv'][li]
        f = jnp.zeros_like(x2)
        for h in range(H):
            q = qkv[..., h * D:(h + 1) * D]
            k = qkv[..., C + h * D:C + (h + 1) * D]
            v = qkv[..., 2 * C + h * D:2 * C + (h + 1) * D]
            att = jnp.einsum('bqd,bkd->bqk', q, k)
            p = jax.nn.softmax(att, axis=-1)
            pv = jnp.einsum('bqk,bkd->bqd', p, v)
            f = f + pv @ params['wproj'][li, h]
        f = f + params['bproj'][li]
        y1 = x1 + f
        xn2 = _layernorm(y1, params['ln2_g'][li], params['ln2_b'][li])
        hid = _gelu_tanh(xn2 @ params['w1'][li] + params['b1'][li])
        y2 = x2 + hid @ params['w2'][li] + params['b2'][li]
        x1, x2 = y1, y2
    return jnp.concatenate([x1, x2], axis=-1)


if __name__ == "__main__":
    key = jax.random.PRNGKey(0)
    k_x, k_p = jax.random.split(key)

    B, L, C = 2, 64, 32          # patch_dims (1, 8, 8) -> L = 64 tokens
    depth = 2
    num_heads = 2
    mlp_ratio = 4.0

    x = jax.random.normal(k_x, (B, L, C), dtype=jnp.float32)
    torch_style = _init_torch_params(k_p, depth, C, num_heads, mlp_ratio)
    params = prep_params(torch_style, num_heads)

    out = reversible_mvit_forward(x, params)
    jax.block_until_ready(out)

    assert out.shape == (B, L, 2 * C), out.shape
    assert bool(jnp.all(jnp.isfinite(out)))

    ref = reference_forward(x, params)
    max_err = float(jnp.max(jnp.abs(out - ref)))
    assert max_err < 1e-2, f"max abs err vs reference: {max_err}"

    print("KERNEL_OK")
</pallas_src>

<mosaic_0001>
module attributes {stable_mosaic.version = 11 : i64} {
  func.func @rev_mvit_kernel(%arg0: i32, %arg1: memref<2x64x32xf32, #tpu.memory_space<vmem>>, %arg2: memref<2x32x96xf32, #tpu.memory_space<vmem>>, %arg3: memref<2x1x96xf32, #tpu.memory_space<vmem>>, %arg4: memref<2x1x32xf32, #tpu.memory_space<vmem>>, %arg5: memref<2x1x32xf32, #tpu.memory_space<vmem>>, %arg6: memref<2x2x16x32xf32, #tpu.memory_space<vmem>>, %arg7: memref<2x1x32xf32, #tpu.memory_space<vmem>>, %arg8: memref<2x1x32xf32, #tpu.memory_space<vmem>>, %arg9: memref<2x1x32xf32, #tpu.memory_space<vmem>>, %arg10: memref<2x32x128xf32, #tpu.memory_space<vmem>>, %arg11: memref<2x1x128xf32, #tpu.memory_space<vmem>>, %arg12: memref<2x128x32xf32, #tpu.memory_space<vmem>>, %arg13: memref<2x1x32xf32, #tpu.memory_space<vmem>>, %arg14: memref<2x64x64xf32, #tpu.memory_space<vmem>>) attributes {dimension_semantics = [#tpu.dimension_semantics<parallel>], iteration_bounds = array<i64: 1>, scalar_prefetch = 0 : i64, scratch_operands = 0 : i64, tpu.core_type = #tpu.core_type<tc>, window_params = [{transform_indices = @transform_0, window_bounds = array<i64: 2, 64, 32>}, {pipeline_mode = #tpu.pipeline_mode<synchronous>, transform_indices = @transform_1, window_bounds = array<i64: 2, 32, 96>}, {pipeline_mode = #tpu.pipeline_mode<synchronous>, transform_indices = @transform_2, window_bounds = array<i64: 2, 1, 96>}, {pipeline_mode = #tpu.pipeline_mode<synchronous>, transform_indices = @transform_3, window_bounds = array<i64: 2, 1, 32>}, {pipeline_mode = #tpu.pipeline_mode<synchronous>, transform_indices = @transform_4, window_bounds = array<i64: 2, 1, 32>}, {pipeline_mode = #tpu.pipeline_mode<synchronous>, transform_indices = @transform_5, window_bounds = array<i64: 2, 2, 16, 32>}, {pipeline_mode = #tpu.pipeline_mode<synchronous>, transform_indices = @transform_6, window_bounds = array<i64: 2, 1, 32>}, {pipeline_mode = #tpu.pipeline_mode<synchronous>, transform_indices = @transform_7, window_bounds = array<i64: 2, 1, 32>}, {pipeline_mode = #tpu.pipeline_mode<synchronous>, transform_indices = @transform_8, window_bounds = array<i64: 2, 1, 32>}, {pipeline_mode = #tpu.pipeline_mode<synchronous>, transform_indices = @transform_9, window_bounds = array<i64: 2, 32, 128>}, {pipeline_mode = #tpu.pipeline_mode<synchronous>, transform_indices = @transform_10, window_bounds = array<i64: 2, 1, 128>}, {pipeline_mode = #tpu.pipeline_mode<synchronous>, transform_indices = @transform_11, window_bounds = array<i64: 2, 128, 32>}, {pipeline_mode = #tpu.pipeline_mode<synchronous>, transform_indices = @transform_12, window_bounds = array<i64: 2, 1, 32>}, {transform_indices = @transform_13, window_bounds = array<i64: 2, 64, 64>}]} {
    %c0 = arith.constant 0 : index
    %c0_0 = arith.constant 0 : index
    %c0_1 = arith.constant 0 : index
    %0 = vector.load %arg1[%c0, %c0_0, %c0_1] : memref<2x64x32xf32, #tpu.memory_space<vmem>>, vector<2x64x32xf32>
    %1 = vector.shape_cast %0 : vector<2x64x32xf32> to vector<128x32xf32>
    %c0_2 = arith.constant 0 : index
    %c0_3 = arith.constant 0 : index
    %c0_4 = arith.constant 0 : index
    %2 = vector.load %arg4[%c0_2, %c0_3, %c0_4] : memref<2x1x32xf32, #tpu.memory_space<vmem>>, vector<1x1x32xf32>
    %3 = vector.shape_cast %2 : vector<1x1x32xf32> to vector<1x32xf32>
    %c0_5 = arith.constant 0 : index
    %c0_6 = arith.constant 0 : index
    %c0_7 = arith.constant 0 : index
    %4 = vector.load %arg5[%c0_5, %c0_6, %c0_7] : memref<2x1x32xf32, #tpu.memory_space<vmem>>, vector<1x1x32xf32>
    %5 = vector.shape_cast %4 : vector<1x1x32xf32> to vector<1x32xf32>
    %cst = arith.constant dense<0.000000e+00> : vector<128xf32>
    %6 = vector.multi_reduction <add>, %1, %cst [1] : vector<128x32xf32> to vector<128xf32>
    %7 = vector.shape_cast %6 : vector<128xf32> to vector<128x1xf32>
    %cst_8 = arith.constant 3.200000e+01 : f32
    %8 = vector.broadcast %cst_8 : f32 to vector<128x1xf32>
    %9 = arith.divf %7, %8 : vector<128x1xf32>
    %10 = vector.broadcast %9 : vector<128x1xf32> to vector<128x32xf32>
    %11 = arith.subf %1, %10 : vector<128x32xf32>
    %12 = arith.mulf %11, %11 : vector<128x32xf32>
    %cst_9 = arith.constant dense<0.000000e+00> : vector<128xf32>
    %13 = vector.multi_reduction <add>, %12, %cst_9 [1] : vector<128x32xf32> to vector<128xf32>
    %14 = vector.shape_cast %13 : vector<128xf32> to vector<128x1xf32>
    %cst_10 = arith.constant 3.200000e+01 : f32
    %15 = vector.broadcast %cst_10 : f32 to vector<128x1xf32>
    %16 = arith.divf %14, %15 : vector<128x1xf32>
    %17 = vector.broadcast %9 : vector<128x1xf32> to vector<128x32xf32>
    %18 = arith.subf %1, %17 : vector<128x32xf32>
    %cst_11 = arith.constant 9.99999997E-7 : f32
    %19 = vector.broadcast %cst_11 : f32 to vector<128x1xf32>
    %20 = arith.addf %16, %19 : vector<128x1xf32>
    %21 = math.sqrt %20 : vector<128x1xf32>
    %22 = vector.broadcast %21 : vector<128x1xf32> to vector<128x32xf32>
    %23 = arith.divf %18, %22 : vector<128x32xf32>
    %24 = vector.broadcast %3 : vector<1x32xf32> to vector<128x32xf32>
    %25 = arith.mulf %23, %24 : vector<128x32xf32>
    %26 = vector.broadcast %5 : vector<1x32xf32> to vector<128x32xf32>
    %27 = arith.addf %25, %26 : vector<128x32xf32>
    %c0_12 = arith.constant 0 : index
    %c0_13 = arith.constant 0 : index
    %c0_14 = arith.constant 0 : index
    %28 = vector.load %arg2[%c0_12, %c0_13, %c0_14] : memref<2x32x96xf32, #tpu.memory_space<vmem>>, vector<1x32x96xf32>
    %29 = vector.shape_cast %28 : vector<1x32x96xf32> to vector<32x96xf32>
    %cst_15 = arith.constant dense<0.000000e+00> : vector<128x96xf32>
    %30 = tpu.matmul %27, %29, %cst_15 {dimension_numbers = #tpu.dot_dimension_numbers<[1], [0], [0], [1], [0, 0, 1, 1], [], []>} : vector<128x32xf32>, vector<32x96xf32>, vector<128x96xf32> -> vector<128x96xf32>
    %c0_16 = arith.constant 0 : index
    %c0_17 = arith.constant 0 : index
    %c0_18 = arith.constant 0 : index
    %31 = vector.load %arg3[%c0_16, %c0_17, %c0_18] : memref<2x1x96xf32, #tpu.memory_space<vmem>>, vector<1x1x96xf32>
    %32 = vector.shape_cast %31 : vector<1x1x96xf32> to vector<1x96xf32>
    %33 = vector.broadcast %32 : vector<1x96xf32> to vector<128x96xf32>
    %34 = arith.addf %30, %33 : vector<128x96xf32>
    %cst_19 = arith.constant 0.000000e+00 : f32
    %35 = vector.broadcast %cst_19 : f32 to vector<128x32xf32>
    %36 = vector.extract_strided_slice %34 {offsets = [0, 0], sizes = [128, 16], strides = [1, 1]} : vector<128x96xf32> to vector<128x16xf32>
    %37 = vector.shape_cast %36 : vector<128x16xf32> to vector<2x64x16xf32>
    %38 = vector.extract_strided_slice %34 {offsets = [0, 32], sizes = [128, 16], strides = [1, 1]} : vector<128x96xf32> to vector<128x16xf32>
    %39 = vector.shape_cast %38 : vector<128x16xf32> to vector<2x64x16xf32>
    %40 = vector.extract_strided_slice %34 {offsets = [0, 64], sizes = [128, 16], strides = [1, 1]} : vector<128x96xf32> to vector<128x16xf32>
    %41 = vector.shape_cast %40 : vector<128x16xf32> to vector<2x64x16xf32>
    "tpu.trace_start"() <{level = 10 : i32, message = "bqd,bkd->bqk"}> : () -> ()
    %cst_20 = arith.constant dense<0.000000e+00> : vector<2x64x64xf32>
    %42 = tpu.matmul %37, %39, %cst_20 {dimension_numbers = #tpu.dot_dimension_numbers<[2], [2], [1], [1], [0, 0, 0, 1, 1, 1], [0], [0]>} : vector<2x64x16xf32>, vector<2x64x16xf32>, vector<2x64x64xf32> -> vector<2x64x64xf32>
    "tpu.trace_stop"() : () -> ()
    %cst_21 = arith.constant dense<0xFF800000> : vector<2x64xf32>
    %43 = vector.multi_reduction <maximumf>, %42, %cst_21 [2] : vector<2x64x64xf32> to vector<2x64xf32>
    %44 = vector.shape_cast %43 : vector<2x64xf32> to vector<2x64x1xf32>
    %45 = vector.broadcast %44 : vector<2x64x1xf32> to vector<2x64x64xf32>
    %46 = arith.subf %42, %45 : vector<2x64x64xf32>
    %47 = math.exp %46 : vector<2x64x64xf32>
    %cst_22 = arith.constant dense<0.000000e+00> : vector<2x64xf32>
    %48 = vector.multi_reduction <add>, %47, %cst_22 [2] : vector<2x64x64xf32> to vector<2x64xf32>
    %49 = vector.shape_cast %48 : vector<2x64xf32> to vector<2x64x1xf32>
    %50 = tpu.reciprocal %49 {approx = true} : vector<2x64x1xf32> -> vector<2x64x1xf32>
    %51 = vector.broadcast %50 : vector<2x64x1xf32> to vector<2x64x64xf32>
    %52 = arith.mulf %47, %51 : vector<2x64x64xf32>
    "tpu.trace_start"() <{level = 10 : i32, message = "bqk,bkd->bqd"}> : () -> ()
    %cst_23 = arith.constant dense<0.000000e+00> : vector<2x64x16xf32>
    %53 = tpu.matmul %52, %41, %cst_23 {dimension_numbers = #tpu.dot_dimension_numbers<[2], [1], [1], [2], [0, 0, 0, 1, 1, 2], [0], [0]>} : vector<2x64x64xf32>, vector<2x64x16xf32>, vector<2x64x16xf32> -> vector<2x64x16xf32>
    "tpu.trace_stop"() : () -> ()
    %54 = vector.shape_cast %53 : vector<2x64x16xf32> to vector<128x16xf32>
    %c0_24 = arith.constant 0 : index
    %c0_25 = arith.constant 0 : index
    %c0_26 = arith.constant 0 : index
    %c0_27 = arith.constant 0 : index
    %55 = vector.load %arg6[%c0_24, %c0_25, %c0_26, %c0_27] : memref<2x2x16x32xf32, #tpu.memory_space<vmem>>, vector<1x1x16x32xf32>
    %56 = vector.shape_cast %55 : vector<1x1x16x32xf32> to vector<16x32xf32>
    %cst_28 = arith.constant dense<0.000000e+00> : vector<128x32xf32>
    %57 = tpu.matmul %54, %56, %cst_28 {dimension_numbers = #tpu.dot_dimension_numbers<[1], [0], [0], [1], [0, 0, 1, 1], [], []>} : vector<128x16xf32>, vector<16x32xf32>, vector<128x32xf32> -> vector<128x32xf32>
    %58 = arith.addf %35, %57 : vector<128x32xf32>
    %59 = vector.extract_strided_slice %34 {offsets = [0, 16], sizes = [128, 16], strides = [1, 1]} : vector<128x96xf32> to vector<128x16xf32>
    %60 = vector.shape_cast %59 : vector<128x16xf32> to vector<2x64x16xf32>
    %61 = vector.extract_strided_slice %34 {offsets = [0, 48], sizes = [128, 16], strides = [1, 1]} : vector<128x96xf32> to vector<128x16xf32>
    %62 = vector.shape_cast %61 : vector<128x16xf32> to vector<2x64x16xf32>
    %63 = vector.extract_strided_slice %34 {offsets = [0, 80], sizes = [128, 16], strides = [1, 1]} : vector<128x96xf32> to vector<128x16xf32>
    %64 = vector.shape_cast %63 : vector<128x16xf32> to vector<2x64x16xf32>
    "tpu.trace_start"() <{level = 10 : i32, message = "bqd,bkd->bqk"}> : () -> ()
    %cst_29 = arith.constant dense<0.000000e+00> : vector<2x64x64xf32>
    %65 = tpu.matmul %60, %62, %cst_29 {dimension_numbers = #tpu.dot_dimension_numbers<[2], [2], [1], [1], [0, 0, 0, 1, 1, 1], [0], [0]>} : vector<2x64x16xf32>, vector<2x64x16xf32>, vector<2x64x64xf32> -> vector<2x64x64xf32>
    "tpu.trace_stop"() : () -> ()
    %cst_30 = arith.constant dense<0xFF800000> : vector<2x64xf32>
    %66 = vector.multi_reduction <maximumf>, %65, %cst_30 [2] : vector<2x64x64xf32> to vector<2x64xf32>
    %67 = vector.shape_cast %66 : vector<2x64xf32> to vector<2x64x1xf32>
    %68 = vector.broadcast %67 : vector<2x64x1xf32> to vector<2x64x64xf32>
    %69 = arith.subf %65, %68 : vector<2x64x64xf32>
    %70 = math.exp %69 : vector<2x64x64xf32>
    %cst_31 = arith.constant dense<0.000000e+00> : vector<2x64xf32>
    %71 = vector.multi_reduction <add>, %70, %cst_31 [2] : vector<2x64x64xf32> to vector<2x64xf32>
    %72 = vector.shape_cast %71 : vector<2x64xf32> to vector<2x64x1xf32>
    %73 = tpu.reciprocal %72 {approx = true} : vector<2x64x1xf32> -> vector<2x64x1xf32>
    %74 = vector.broadcast %73 : vector<2x64x1xf32> to vector<2x64x64xf32>
    %75 = arith.mulf %70, %74 : vector<2x64x64xf32>
    "tpu.trace_start"() <{level = 10 : i32, message = "bqk,bkd->bqd"}> : () -> ()
    %cst_32 = arith.constant dense<0.000000e+00> : vector<2x64x16xf32>
    %76 = tpu.matmul %75, %64, %cst_32 {dimension_numbers = #tpu.dot_dimension_numbers<[2], [1], [1], [2], [0, 0, 0, 1, 1, 2], [0], [0]>} : vector<2x64x64xf32>, vector<2x64x16xf32>, vector<2x64x16xf32> -> vector<2x64x16xf32>
    "tpu.trace_stop"() : () -> ()
    %77 = vector.shape_cast %76 : vector<2x64x16xf32> to vector<128x16xf32>
    %c0_33 = arith.constant 0 : index
    %c1 = arith.constant 1 : index
    %c0_34 = arith.constant 0 : index
    %c0_35 = arith.constant 0 : index
    %78 = vector.load %arg6[%c0_33, %c1, %c0_34, %c0_35] : memref<2x2x16x32xf32, #tpu.memory_space<vmem>>, vector<1x1x16x32xf32>
    %79 = vector.shape_cast %78 : vector<1x1x16x32xf32> to vector<16x32xf32>
    %cst_36 = arith.constant dense<0.000000e+00> : vector<128x32xf32>
    %80 = tpu.matmul %77, %79, %cst_36 {dimension_numbers = #tpu.dot_dimension_numbers<[1], [0], [0], [1], [0, 0, 1, 1], [], []>} : vector<128x16xf32>, vector<16x32xf32>, vector<128x32xf32> -> vector<128x32xf32>
    %81 = arith.addf %58, %80 : vector<128x32xf32>
    %c0_37 = arith.constant 0 : index
    %c0_38 = arith.constant 0 : index
    %c0_39 = arith.constant 0 : index
    %82 = vector.load %arg7[%c0_37, %c0_38, %c0_39] : memref<2x1x32xf32, #tpu.memory_space<vmem>>, vector<1x1x32xf32>
    %83 = vector.shape_cast %82 : vector<1x1x32xf32> to vector<1x32xf32>
    %84 = vector.broadcast %83 : vector<1x32xf32> to vector<128x32xf32>
    %85 = arith.addf %81, %84 : vector<128x32xf32>
    %86 = arith.addf %1, %85 : vector<128x32xf32>
    %c0_40 = arith.constant 0 : index
    %c0_41 = arith.constant 0 : index
    %c0_42 = arith.constant 0 : index
    %87 = vector.load %arg8[%c0_40, %c0_41, %c0_42] : memref<2x1x32xf32, #tpu.memory_space<vmem>>, vector<1x1x32xf32>
    %88 = vector.shape_cast %87 : vector<1x1x32xf32> to vector<1x32xf32>
    %c0_43 = arith.constant 0 : index
    %c0_44 = arith.constant 0 : index
    %c0_45 = arith.constant 0 : index
    %89 = vector.load %arg9[%c0_43, %c0_44, %c0_45] : memref<2x1x32xf32, #tpu.memory_space<vmem>>, vector<1x1x32xf32>
    %90 = vector.shape_cast %89 : vector<1x1x32xf32> to vector<1x32xf32>
    %cst_46 = arith.constant dense<0.000000e+00> : vector<128xf32>
    %91 = vector.multi_reduction <add>, %86, %cst_46 [1] : vector<128x32xf32> to vector<128xf32>
    %92 = vector.shape_cast %91 : vector<128xf32> to vector<128x1xf32>
    %cst_47 = arith.constant 3.200000e+01 : f32
    %93 = vector.broadcast %cst_47 : f32 to vector<128x1xf32>
    %94 = arith.divf %92, %93 : vector<128x1xf32>
    %95 = vector.broadcast %94 : vector<128x1xf32> to vector<128x32xf32>
    %96 = arith.subf %86, %95 : vector<128x32xf32>
    %97 = arith.mulf %96, %96 : vector<128x32xf32>
    %cst_48 = arith.constant dense<0.000000e+00> : vector<128xf32>
    %98 = vector.multi_reduction <add>, %97, %cst_48 [1] : vector<128x32xf32> to vector<128xf32>
    %99 = vector.shape_cast %98 : vector<128xf32> to vector<128x1xf32>
    %cst_49 = arith.constant 3.200000e+01 : f32
    %100 = vector.broadcast %cst_49 : f32 to vector<128x1xf32>
    %101 = arith.divf %99, %100 : vector<128x1xf32>
    %102 = vector.broadcast %94 : vector<128x1xf32> to vector<128x32xf32>
    %103 = arith.subf %86, %102 : vector<128x32xf32>
    %cst_50 = arith.constant 9.99999997E-7 : f32
    %104 = vector.broadcast %cst_50 : f32 to vector<128x1xf32>
    %105 = arith.addf %101, %104 : vector<128x1xf32>
    %106 = math.sqrt %105 : vector<128x1xf32>
    %107 = vector.broadcast %106 : vector<128x1xf32> to vector<128x32xf32>
    %108 = arith.divf %103, %107 : vector<128x32xf32>
    %109 = vector.broadcast %88 : vector<1x32xf32> to vector<128x32xf32>
    %110 = arith.mulf %108, %109 : vector<128x32xf32>
    %111 = vector.broadcast %90 : vector<1x32xf32> to vector<128x32xf32>
    %112 = arith.addf %110, %111 : vector<128x32xf32>
    %c0_51 = arith.constant 0 : index
    %c0_52 = arith.constant 0 : index
    %c0_53 = arith.constant 0 : index
    %113 = vector.load %arg10[%c0_51, %c0_52, %c0_53] : memref<2x32x128xf32, #tpu.memory_space<vmem>>, vector<1x32x128xf32>
    %114 = vector.shape_cast %113 : vector<1x32x128xf32> to vector<32x128xf32>
    %cst_54 = arith.constant dense<0.000000e+00> : vector<128x128xf32>
    %115 = tpu.matmul %112, %114, %cst_54 {dimension_numbers = #tpu.dot_dimension_numbers<[1], [0], [0], [1], [0, 0, 1, 1], [], []>} : vector<128x32xf32>, vector<32x128xf32>, vector<128x128xf32> -> vector<128x128xf32>
    %c0_55 = arith.constant 0 : index
    %c0_56 = arith.constant 0 : index
    %c0_57 = arith.constant 0 : index
    %116 = vector.load %arg11[%c0_55, %c0_56, %c0_57] : memref<2x1x128xf32, #tpu.memory_space<vmem>>, vector<1x1x128xf32>
    %117 = vector.shape_cast %116 : vector<1x1x128xf32> to vector<1x128xf32>
    %118 = vector.broadcast %117 : vector<1x128xf32> to vector<128x128xf32>
    %119 = arith.addf %115, %118 : vector<128x128xf32>
    %cst_58 = arith.constant 5.000000e-01 : f32
    %120 = vector.broadcast %cst_58 : f32 to vector<128x128xf32>
    %121 = arith.mulf %120, %119 : vector<128x128xf32>
    %cst_59 = arith.constant 4.471500e-02 : f32
    %122 = vector.broadcast %cst_59 : f32 to vector<128x128xf32>
    %123 = arith.mulf %122, %119 : vector<128x128xf32>
    %124 = arith.mulf %123, %119 : vector<128x128xf32>
    %125 = arith.mulf %124, %119 : vector<128x128xf32>
    %126 = arith.addf %119, %125 : vector<128x128xf32>
    %cst_60 = arith.constant 0.797884583 : f32
    %127 = vector.broadcast %cst_60 : f32 to vector<128x128xf32>
    %128 = arith.mulf %127, %126 : vector<128x128xf32>
    %129 = math.tanh %128 : vector<128x128xf32>
    %cst_61 = arith.constant 1.000000e+00 : f32
    %130 = vector.broadcast %cst_61 : f32 to vector<128x128xf32>
    %131 = arith.addf %130, %129 : vector<128x128xf32>
    %132 = arith.mulf %121, %131 : vector<128x128xf32>
    %c0_62 = arith.constant 0 : index
    %c0_63 = arith.constant 0 : index
    %c0_64 = arith.constant 0 : index
    %133 = vector.load %arg12[%c0_62, %c0_63, %c0_64] : memref<2x128x32xf32, #tpu.memory_space<vmem>>, vector<1x128x32xf32>
    %134 = vector.shape_cast %133 : vector<1x128x32xf32> to vector<128x32xf32>
    %cst_65 = arith.constant dense<0.000000e+00> : vector<128x32xf32>
    %135 = tpu.matmul %132, %134, %cst_65 {dimension_numbers = #tpu.dot_dimension_numbers<[1], [0], [0], [1], [0, 0, 1, 1], [], []>} : vector<128x128xf32>, vector<128x32xf32>, vector<128x32xf32> -> vector<128x32xf32>
    %c0_66 = arith.constant 0 : index
    %c0_67 = arith.constant 0 : index
    %c0_68 = arith.constant 0 : index
    %136 = vector.load %arg13[%c0_66, %c0_67, %c0_68] : memref<2x1x32xf32, #tpu.memory_space<vmem>>, vector<1x1x32xf32>
    %137 = vector.shape_cast %136 : vector<1x1x32xf32> to vector<1x32xf32>
    %138 = vector.broadcast %137 : vector<1x32xf32> to vector<128x32xf32>
    %139 = arith.addf %135, %138 : vector<128x32xf32>
    %140 = arith.addf %1, %139 : vector<128x32xf32>
    %c1_69 = arith.constant 1 : index
    %c0_70 = arith.constant 0 : index
    %c0_71 = arith.constant 0 : index
    %141 = vector.load %arg4[%c1_69, %c0_70, %c0_71] : memref<2x1x32xf32, #tpu.memory_space<vmem>>, vector<1x1x32xf32>
    %142 = vector.shape_cast %141 : vector<1x1x32xf32> to vector<1x32xf32>
    %c1_72 = arith.constant 1 : index
    %c0_73 = arith.constant 0 : index
    %c0_74 = arith.constant 0 : index
    %143 = vector.load %arg5[%c1_72, %c0_73, %c0_74] : memref<2x1x32xf32, #tpu.memory_space<vmem>>, vector<1x1x32xf32>
    %144 = vector.shape_cast %143 : vector<1x1x32xf32> to vector<1x32xf32>
    %cst_75 = arith.constant dense<0.000000e+00> : vector<128xf32>
    %145 = vector.multi_reduction <add>, %140, %cst_75 [1] : vector<128x32xf32> to vector<128xf32>
    %146 = vector.shape_cast %145 : vector<128xf32> to vector<128x1xf32>
    %cst_76 = arith.constant 3.200000e+01 : f32
    %147 = vector.broadcast %cst_76 : f32 to vector<128x1xf32>
    %148 = arith.divf %146, %147 : vector<128x1xf32>
    %149 = vector.broadcast %148 : vector<128x1xf32> to vector<128x32xf32>
    %150 = arith.subf %140, %149 : vector<128x32xf32>
    %151 = arith.mulf %150, %150 : vector<128x32xf32>
    %cst_77 = arith.constant dense<0.000000e+00> : vector<128xf32>
    %152 = vector.multi_reduction <add>, %151, %cst_77 [1] : vector<128x32xf32> to vector<128xf32>
    %153 = vector.shape_cast %152 : vector<128xf32> to vector<128x1xf32>
    %cst_78 = arith.constant 3.200000e+01 : f32
    %154 = vector.broadcast %cst_78 : f32 to vector<128x1xf32>
    %155 = arith.divf %153, %154 : vector<128x1xf32>
    %156 = vector.broadcast %148 : vector<128x1xf32> to vector<128x32xf32>
    %157 = arith.subf %140, %156 : vector<128x32xf32>
    %cst_79 = arith.constant 9.99999997E-7 : f32
    %158 = vector.broadcast %cst_79 : f32 to vector<128x1xf32>
    %159 = arith.addf %155, %158 : vector<128x1xf32>
    %160 = math.sqrt %159 : vector<128x1xf32>
    %161 = vector.broadcast %160 : vector<128x1xf32> to vector<128x32xf32>
    %162 = arith.divf %157, %161 : vector<128x32xf32>
    %163 = vector.broadcast %142 : vector<1x32xf32> to vector<128x32xf32>
    %164 = arith.mulf %162, %163 : vector<128x32xf32>
    %165 = vector.broadcast %144 : vector<1x32xf32> to vector<128x32xf32>
    %166 = arith.addf %164, %165 : vector<128x32xf32>
    %c1_80 = arith.constant 1 : index
    %c0_81 = arith.constant 0 : index
    %c0_82 = arith.constant 0 : index
    %167 = vector.load %arg2[%c1_80, %c0_81, %c0_82] : memref<2x32x96xf32, #tpu.memory_space<vmem>>, vector<1x32x96xf32>
    %168 = vector.shape_cast %167 : vector<1x32x96xf32> to vector<32x96xf32>
    %cst_83 = arith.constant dense<0.000000e+00> : vector<128x96xf32>
    %169 = tpu.matmul %166, %168, %cst_83 {dimension_numbers = #tpu.dot_dimension_numbers<[1], [0], [0], [1], [0, 0, 1, 1], [], []>} : vector<128x32xf32>, vector<32x96xf32>, vector<128x96xf32> -> vector<128x96xf32>
    %c1_84 = arith.constant 1 : index
    %c0_85 = arith.constant 0 : index
    %c0_86 = arith.constant 0 : index
    %170 = vector.load %arg3[%c1_84, %c0_85, %c0_86] : memref<2x1x96xf32, #tpu.memory_space<vmem>>, vector<1x1x96xf32>
    %171 = vector.shape_cast %170 : vector<1x1x96xf32> to vector<1x96xf32>
    %172 = vector.broadcast %171 : vector<1x96xf32> to vector<128x96xf32>
    %173 = arith.addf %169, %172 : vector<128x96xf32>
    %cst_87 = arith.constant 0.000000e+00 : f32
    %174 = vector.broadcast %cst_87 : f32 to vector<128x32xf32>
    %175 = vector.extract_strided_slice %173 {offsets = [0, 0], sizes = [128, 16], strides = [1, 1]} : vector<128x96xf32> to vector<128x16xf32>
    %176 = vector.shape_cast %175 : vector<128x16xf32> to vector<2x64x16xf32>
    %177 = vector.extract_strided_slice %173 {offsets = [0, 32], sizes = [128, 16], strides = [1, 1]} : vector<128x96xf32> to vector<128x16xf32>
    %178 = vector.shape_cast %177 : vector<128x16xf32> to vector<2x64x16xf32>
    %179 = vector.extract_strided_slice %173 {offsets = [0, 64], sizes = [128, 16], strides = [1, 1]} : vector<128x96xf32> to vector<128x16xf32>
    %180 = vector.shape_cast %179 : vector<128x16xf32> to vector<2x64x16xf32>
    "tpu.trace_start"() <{level = 10 : i32, message = "bqd,bkd->bqk"}> : () -> ()
    %cst_88 = arith.constant dense<0.000000e+00> : vector<2x64x64xf32>
    %181 = tpu.matmul %176, %178, %cst_88 {dimension_numbers = #tpu.dot_dimension_numbers<[2], [2], [1], [1], [0, 0, 0, 1, 1, 1], [0], [0]>} : vector<2x64x16xf32>, vector<2x64x16xf32>, vector<2x64x64xf32> -> vector<2x64x64xf32>
    "tpu.trace_stop"() : () -> ()
    %cst_89 = arith.constant dense<0xFF800000> : vector<2x64xf32>
    %182 = vector.multi_reduction <maximumf>, %181, %cst_89 [2] : vector<2x64x64xf32> to vector<2x64xf32>
    %183 = vector.shape_cast %182 : vector<2x64xf32> to vector<2x64x1xf32>
    %184 = vector.broadcast %183 : vector<2x64x1xf32> to vector<2x64x64xf32>
    %185 = arith.subf %181, %184 : vector<2x64x64xf32>
    %186 = math.exp %185 : vector<2x64x64xf32>
    %cst_90 = arith.constant dense<0.000000e+00> : vector<2x64xf32>
    %187 = vector.multi_reduction <add>, %186, %cst_90 [2] : vector<2x64x64xf32> to vector<2x64xf32>
    %188 = vector.shape_cast %187 : vector<2x64xf32> to vector<2x64x1xf32>
    %189 = tpu.reciprocal %188 {approx = true} : vector<2x64x1xf32> -> vector<2x64x1xf32>
    %190 = vector.broadcast %189 : vector<2x64x1xf32> to vector<2x64x64xf32>
    %191 = arith.mulf %186, %190 : vector<2x64x64xf32>
    "tpu.trace_start"() <{level = 10 : i32, message = "bqk,bkd->bqd"}> : () -> ()
    %cst_91 = arith.constant dense<0.000000e+00> : vector<2x64x16xf32>
    %192 = tpu.matmul %191, %180, %cst_91 {dimension_numbers = #tpu.dot_dimension_numbers<[2], [1], [1], [2], [0, 0, 0, 1, 1, 2], [0], [0]>} : vector<2x64x64xf32>, vector<2x64x16xf32>, vector<2x64x16xf32> -> vector<2x64x16xf32>
    "tpu.trace_stop"() : () -> ()
    %193 = vector.shape_cast %192 : vector<2x64x16xf32> to vector<128x16xf32>
    %c1_92 = arith.constant 1 : index
    %c0_93 = arith.constant 0 : index
    %c0_94 = arith.constant 0 : index
    %c0_95 = arith.constant 0 : index
    %194 = vector.load %arg6[%c1_92, %c0_93, %c0_94, %c0_95] : memref<2x2x16x32xf32, #tpu.memory_space<vmem>>, vector<1x1x16x32xf32>
    %195 = vector.shape_cast %194 : vector<1x1x16x32xf32> to vector<16x32xf32>
    %cst_96 = arith.constant dense<0.000000e+00> : vector<128x32xf32>
    %196 = tpu.matmul %193, %195, %cst_96 {dimension_numbers = #tpu.dot_dimension_numbers<[1], [0], [0], [1], [0, 0, 1, 1], [], []>} : vector<128x16xf32>, vector<16x32xf32>, vector<128x32xf32> -> vector<128x32xf32>
    %197 = arith.addf %174, %196 : vector<128x32xf32>
    %198 = vector.extract_strided_slice %173 {offsets = [0, 16], sizes = [128, 16], strides = [1, 1]} : vector<128x96xf32> to vector<128x16xf32>
    %199 = vector.shape_cast %198 : vector<128x16xf32> to vector<2x64x16xf32>
    %200 = vector.extract_strided_slice %173 {offsets = [0, 48], sizes = [128, 16], strides = [1, 1]} : vector<128x96xf32> to vector<128x16xf32>
    %201 = vector.shape_cast %200 : vector<128x16xf32> to vector<2x64x16xf32>
    %202 = vector.extract_strided_slice %173 {offsets = [0, 80], sizes = [128, 16], strides = [1, 1]} : vector<128x96xf32> to vector<128x16xf32>
    %203 = vector.shape_cast %202 : vector<128x16xf32> to vector<2x64x16xf32>
    "tpu.trace_start"() <{level = 10 : i32, message = "bqd,bkd->bqk"}> : () -> ()
    %cst_97 = arith.constant dense<0.000000e+00> : vector<2x64x64xf32>
    %204 = tpu.matmul %199, %201, %cst_97 {dimension_numbers = #tpu.dot_dimension_numbers<[2], [2], [1], [1], [0, 0, 0, 1, 1, 1], [0], [0]>} : vector<2x64x16xf32>, vector<2x64x16xf32>, vector<2x64x64xf32> -> vector<2x64x64xf32>
    "tpu.trace_stop"() : () -> ()
    %cst_98 = arith.constant dense<0xFF800000> : vector<2x64xf32>
    %205 = vector.multi_reduction <maximumf>, %204, %cst_98 [2] : vector<2x64x64xf32> to vector<2x64xf32>
    %206 = vector.shape_cast %205 : vector<2x64xf32> to vector<2x64x1xf32>
    %207 = vector.broadcast %206 : vector<2x64x1xf32> to vector<2x64x64xf32>
    %208 = arith.subf %204, %207 : vector<2x64x64xf32>
    %209 = math.exp %208 : vector<2x64x64xf32>
    %cst_99 = arith.constant dense<0.000000e+00> : vector<2x64xf32>
    %210 = vector.multi_reduction <add>, %209, %cst_99 [2] : vector<2x64x64xf32> to vector<2x64xf32>
    %211 = vector.shape_cast %210 : vector<2x64xf32> to vector<2x64x1xf32>
    %212 = tpu.reciprocal %211 {approx = true} : vector<2x64x1xf32> -> vector<2x64x1xf32>
    %213 = vector.broadcast %212 : vector<2x64x1xf32> to vector<2x64x64xf32>
    %214 = arith.mulf %209, %213 : vector<2x64x64xf32>
    "tpu.trace_start"() <{level = 10 : i32, message = "bqk,bkd->bqd"}> : () -> ()
    %cst_100 = arith.constant dense<0.000000e+00> : vector<2x64x16xf32>
    %215 = tpu.matmul %214, %203, %cst_100 {dimension_numbers = #tpu.dot_dimension_numbers<[2], [1], [1], [2], [0, 0, 0, 1, 1, 2], [0], [0]>} : vector<2x64x64xf32>, vector<2x64x16xf32>, vector<2x64x16xf32> -> vector<2x64x16xf32>
    "tpu.trace_stop"() : () -> ()
    %216 = vector.shape_cast %215 : vector<2x64x16xf32> to vector<128x16xf32>
    %c1_101 = arith.constant 1 : index
    %c1_102 = arith.constant 1 : index
    %c0_103 = arith.constant 0 : index
    %c0_104 = arith.constant 0 : index
    %217 = vector.load %arg6[%c1_101, %c1_102, %c0_103, %c0_104] : memref<2x2x16x32xf32, #tpu.memory_space<vmem>>, vector<1x1x16x32xf32>
    %218 = vector.shape_cast %217 : vector<1x1x16x32xf32> to vector<16x32xf32>
    %cst_105 = arith.constant dense<0.000000e+00> : vector<128x32xf32>
    %219 = tpu.matmul %216, %218, %cst_105 {dimension_numbers = #tpu.dot_dimension_numbers<[1], [0], [0], [1], [0, 0, 1, 1], [], []>} : vector<128x16xf32>, vector<16x32xf32>, vector<128x32xf32> -> vector<128x32xf32>
    %220 = arith.addf %197, %219 : vector<128x32xf32>
    %c1_106 = arith.constant 1 : index
    %c0_107 = arith.constant 0 : index
    %c0_108 = arith.constant 0 : index
    %221 = vector.load %arg7[%c1_106, %c0_107, %c0_108] : memref<2x1x32xf32, #tpu.memory_space<vmem>>, vector<1x1x32xf32>
    %222 = vector.shape_cast %221 : vector<1x1x32xf32> to vector<1x32xf32>
    %223 = vector.broadcast %222 : vector<1x32xf32> to vector<128x32xf32>
    %224 = arith.addf %220, %223 : vector<128x32xf32>
    %225 = arith.addf %86, %224 : vector<128x32xf32>
    %c1_109 = arith.constant 1 : index
    %c0_110 = arith.constant 0 : index
    %c0_111 = arith.constant 0 : index
    %226 = vector.load %arg8[%c1_109, %c0_110, %c0_111] : memref<2x1x32xf32, #tpu.memory_space<vmem>>, vector<1x1x32xf32>
    %227 = vector.shape_cast %226 : vector<1x1x32xf32> to vector<1x32xf32>
    %c1_112 = arith.constant 1 : index
    %c0_113 = arith.constant 0 : index
    %c0_114 = arith.constant 0 : index
    %228 = vector.load %arg9[%c1_112, %c0_113, %c0_114] : memref<2x1x32xf32, #tpu.memory_space<vmem>>, vector<1x1x32xf32>
    %229 = vector.shape_cast %228 : vector<1x1x32xf32> to vector<1x32xf32>
    %cst_115 = arith.constant dense<0.000000e+00> : vector<128xf32>
    %230 = vector.multi_reduction <add>, %225, %cst_115 [1] : vector<128x32xf32> to vector<128xf32>
    %231 = vector.shape_cast %230 : vector<128xf32> to vector<128x1xf32>
    %cst_116 = arith.constant 3.200000e+01 : f32
    %232 = vector.broadcast %cst_116 : f32 to vector<128x1xf32>
    %233 = arith.divf %231, %232 : vector<128x1xf32>
    %234 = vector.broadcast %233 : vector<128x1xf32> to vector<128x32xf32>
    %235 = arith.subf %225, %234 : vector<128x32xf32>
    %236 = arith.mulf %235, %235 : vector<128x32xf32>
    %cst_117 = arith.constant dense<0.000000e+00> : vector<128xf32>
    %237 = vector.multi_reduction <add>, %236, %cst_117 [1] : vector<128x32xf32> to vector<128xf32>
    %238 = vector.shape_cast %237 : vector<128xf32> to vector<128x1xf32>
    %cst_118 = arith.constant 3.200000e+01 : f32
    %239 = vector.broadcast %cst_118 : f32 to vector<128x1xf32>
    %240 = arith.divf %238, %239 : vector<128x1xf32>
    %241 = vector.broadcast %233 : vector<128x1xf32> to vector<128x32xf32>
    %242 = arith.subf %225, %241 : vector<128x32xf32>
    %cst_119 = arith.constant 9.99999997E-7 : f32
    %243 = vector.broadcast %cst_119 : f32 to vector<128x1xf32>
    %244 = arith.addf %240, %243 : vector<128x1xf32>
    %245 = math.sqrt %244 : vector<128x1xf32>
    %246 = vector.broadcast %245 : vector<128x1xf32> to vector<128x32xf32>
    %247 = arith.divf %242, %246 : vector<128x32xf32>
    %248 = vector.broadcast %227 : vector<1x32xf32> to vector<128x32xf32>
    %249 = arith.mulf %247, %248 : vector<128x32xf32>
    %250 = vector.broadcast %229 : vector<1x32xf32> to vector<128x32xf32>
    %251 = arith.addf %249, %250 : vector<128x32xf32>
    %c1_120 = arith.constant 1 : index
    %c0_121 = arith.constant 0 : index
    %c0_122 = arith.constant 0 : index
    %252 = vector.load %arg10[%c1_120, %c0_121, %c0_122] : memref<2x32x128xf32, #tpu.memory_space<vmem>>, vector<1x32x128xf32>
    %253 = vector.shape_cast %252 : vector<1x32x128xf32> to vector<32x128xf32>
    %cst_123 = arith.constant dense<0.000000e+00> : vector<128x128xf32>
    %254 = tpu.matmul %251, %253, %cst_123 {dimension_numbers = #tpu.dot_dimension_numbers<[1], [0], [0], [1], [0, 0, 1, 1], [], []>} : vector<128x32xf32>, vector<32x128xf32>, vector<128x128xf32> -> vector<128x128xf32>
    %c1_124 = arith.constant 1 : index
    %c0_125 = arith.constant 0 : index
    %c0_126 = arith.constant 0 : index
    %255 = vector.load %arg11[%c1_124, %c0_125, %c0_126] : memref<2x1x128xf32, #tpu.memory_space<vmem>>, vector<1x1x128xf32>
    %256 = vector.shape_cast %255 : vector<1x1x128xf32> to vector<1x128xf32>
    %257 = vector.broadcast %256 : vector<1x128xf32> to vector<128x128xf32>
    %258 = arith.addf %254, %257 : vector<128x128xf32>
    %cst_127 = arith.constant 5.000000e-01 : f32
    %259 = vector.broadcast %cst_127 : f32 to vector<128x128xf32>
    %260 = arith.mulf %259, %258 : vector<128x128xf32>
    %cst_128 = arith.constant 4.471500e-02 : f32
    %261 = vector.broadcast %cst_128 : f32 to vector<128x128xf32>
    %262 = arith.mulf %261, %258 : vector<128x128xf32>
    %263 = arith.mulf %262, %258 : vector<128x128xf32>
    %264 = arith.mulf %263, %258 : vector<128x128xf32>
    %265 = arith.addf %258, %264 : vector<128x128xf32>
    %cst_129 = arith.constant 0.797884583 : f32
    %266 = vector.broadcast %cst_129 : f32 to vector<128x128xf32>
    %267 = arith.mulf %266, %265 : vector<128x128xf32>
    %268 = math.tanh %267 : vector<128x128xf32>
    %cst_130 = arith.constant 1.000000e+00 : f32
    %269 = vector.broadcast %cst_130 : f32 to vector<128x128xf32>
    %270 = arith.addf %269, %268 : vector<128x128xf32>
    %271 = arith.mulf %260, %270 : vector<128x128xf32>
    %c1_131 = arith.constant 1 : index
    %c0_132 = arith.constant 0 : index
    %c0_133 = arith.constant 0 : index
    %272 = vector.load %arg12[%c1_131, %c0_132, %c0_133] : memref<2x128x32xf32, #tpu.memory_space<vmem>>, vector<1x128x32xf32>
    %273 = vector.shape_cast %272 : vector<1x128x32xf32> to vector<128x32xf32>
    %cst_134 = arith.constant dense<0.000000e+00> : vector<128x32xf32>
    %274 = tpu.matmul %271, %273, %cst_134 {dimension_numbers = #tpu.dot_dimension_numbers<[1], [0], [0], [1], [0, 0, 1, 1], [], []>} : vector<128x128xf32>, vector<128x32xf32>, vector<128x32xf32> -> vector<128x32xf32>
    %c1_135 = arith.constant 1 : index
    %c0_136 = arith.constant 0 : index
    %c0_137 = arith.constant 0 : index
    %275 = vector.load %arg13[%c1_135, %c0_136, %c0_137] : memref<2x1x32xf32, #tpu.memory_space<vmem>>, vector<1x1x32xf32>
    %276 = vector.shape_cast %275 : vector<1x1x32xf32> to vector<1x32xf32>
    %277 = vector.broadcast %276 : vector<1x32xf32> to vector<128x32xf32>
    %278 = arith.addf %274, %277 : vector<128x32xf32>
    %279 = arith.addf %140, %278 : vector<128x32xf32>
    %280 = tpu.concatenate %225, %279 in 1 : vector<128x32xf32>, vector<128x32xf32> -> vector<128x64xf32>
    %281 = vector.shape_cast %280 : vector<128x64xf32> to vector<2x64x64xf32>
    %c0_138 = arith.constant 0 : index
    %c0_139 = arith.constant 0 : index
    %c0_140 = arith.constant 0 : index
    %282 = vector.load %arg14[%c0_138, %c0_139, %c0_140] : memref<2x64x64xf32, #tpu.memory_space<vmem>>, vector<2x64x64xf32>
    tpu.vector_store %arg14[%c0_138, %c0_139, %c0_140], %281 {strides = array<i32>} : memref<2x64x64xf32, #tpu.memory_space<vmem>>, vector<2x64x64xf32>,
    return
  }
  func.func @transform_0(%arg0: i32) -> (i32, i32, i32) {
    %c0_i32 = arith.constant 0 : i32
    %c0_i32_0 = arith.constant 0 : i32
    %c0_i32_1 = arith.constant 0 : i32
    return %arg0, %c0_i32, %c0_i32_0 : i32, i32, i32
  }
  func.func @transform_1(%arg0: i32) -> (i32, i32, i32) {
    %c0_i32 = arith.constant 0 : i32
    %c0_i32_0 = arith.constant 0 : i32
    %c0_i32_1 = arith.constant 0 : i32
    %c0_i32_2 = arith.constant 0 : i32
    return %c0_i32, %c0_i32_0, %c0_i32_1 : i32, i32, i32
  }
  func.func @transform_2(%arg0: i32) -> (i32, i32, i32) {
    %c0_i32 = arith.constant 0 : i32
    %c0_i32_0 = arith.constant 0 : i32
    %c0_i32_1 = arith.constant 0 : i32
    %c0_i32_2 = arith.constant 0 : i32
    return %c0_i32, %c0_i32_0, %c0_i32_1 : i32, i32, i32
  }
  func.func @transform_3(%arg0: i32) -> (i32, i32, i32) {
    %c0_i32 = arith.constant 0 : i32
    %c0_i32_0 = arith.constant 0 : i32
    %c0_i32_1 = arith.constant 0 : i32
    %c0_i32_2 = arith.constant 0 : i32
    return %c0_i32, %c0_i32_0, %c0_i32_1 : i32, i32, i32
  }
  func.func @transform_4(%arg0: i32) -> (i32, i32, i32) {
    %c0_i32 = arith.constant 0 : i32
    %c0_i32_0 = arith.constant 0 : i32
    %c0_i32_1 = arith.constant 0 : i32
    %c0_i32_2 = arith.constant 0 : i32
    return %c0_i32, %c0_i32_0, %c0_i32_1 : i32, i32, i32
  }
  func.func @transform_5(%arg0: i32) -> (i32, i32, i32, i32) {
    %c0_i32 = arith.constant 0 : i32
    %c0_i32_0 = arith.constant 0 : i32
    %c0_i32_1 = arith.constant 0 : i32
    %c0_i32_2 = arith.constant 0 : i32
    %c0_i32_3 = arith.constant 0 : i32
    return %c0_i32, %c0_i32_0, %c0_i32_1, %c0_i32_2 : i32, i32, i32, i32
  }
  func.func @transform_6(%arg0: i32) -> (i32, i32, i32) {
    %c0_i32 = arith.constant 0 : i32
    %c0_i32_0 = arith.constant 0 : i32
    %c0_i32_1 = arith.constant 0 : i32
    %c0_i32_2 = arith.constant 0 : i32
    return %c0_i32, %c0_i32_0, %c0_i32_1 : i32, i32, i32
  }
  func.func @transform_7(%arg0: i32) -> (i32, i32, i32) {
    %c0_i32 = arith.constant 0 : i32
    %c0_i32_0 = arith.constant 0 : i32
    %c0_i32_1 = arith.constant 0 : i32
    %c0_i32_2 = arith.constant 0 : i32
    return %c0_i32, %c0_i32_0, %c0_i32_1 : i32, i32, i32
  }
  func.func @transform_8(%arg0: i32) -> (i32, i32, i32) {
    %c0_i32 = arith.constant 0 : i32
    %c0_i32_0 = arith.constant 0 : i32
    %c0_i32_1 = arith.constant 0 : i32
    %c0_i32_2 = arith.constant 0 : i32
    return %c0_i32, %c0_i32_0, %c0_i32_1 : i32, i32, i32
  }
  func.func @transform_9(%arg0: i32) -> (i32, i32, i32) {
    %c0_i32 = arith.constant 0 : i32
    %c0_i32_0 = arith.constant 0 : i32
    %c0_i32_1 = arith.constant 0 : i32
    %c0_i32_2 = arith.constant 0 : i32
    return %c0_i32, %c0_i32_0, %c0_i32_1 : i32, i32, i32
  }
  func.func @transform_10(%arg0: i32) -> (i32, i32, i32) {
    %c0_i32 = arith.constant 0 : i32
    %c0_i32_0 = arith.constant 0 : i32
    %c0_i32_1 = arith.constant 0 : i32
    %c0_i32_2 = arith.constant 0 : i32
    return %c0_i32, %c0_i32_0, %c0_i32_1 : i32, i32, i32
  }
  func.func @transform_11(%arg0: i32) -> (i32, i32, i32) {
    %c0_i32 = arith.constant 0 : i32
    %c0_i32_0 = arith.constant 0 : i32
    %c0_i32_1 = arith.constant 0 : i32
    %c0_i32_2 = arith.constant 0 : i32
    return %c0_i32, %c0_i32_0, %c0_i32_1 : i32, i32, i32
  }
  func.func @transform_12(%arg0: i32) -> (i32, i32, i32) {
    %c0_i32 = arith.constant 0 : i32
    %c0_i32_0 = arith.constant 0 : i32
    %c0_i32_1 = arith.constant 0 : i32
    %c0_i32_2 = arith.constant 0 : i32
    return %c0_i32, %c0_i32_0, %c0_i32_1 : i32, i32, i32
  }
  func.func @transform_13(%arg0: i32) -> (i32, i32, i32) {
    %c0_i32 = arith.constant 0 : i32
    %c0_i32_0 = arith.constant 0 : i32
    %c0_i32_1 = arith.constant 0 : i32
    return %arg0, %c0_i32, %c0_i32_0 : i32, i32, i32
  }
}

</mosaic_0001>

<bundles_post_ra>
// kernel: tpu_custom_call.1
= control target key start
LH: loop header
LB: loop body
LE: loop exit
PB: predicated region body
PF: predicated region fallthrough
CT: control target
= control target key end

     0   :  { %vm63_vm0 = vcmask 261120   ;;  %s11401_s0 = inlined_call_operand.vmem [shape: f32[2,64,32], index: 0, kind: input, shape index: {}]   ;;  %s11402_s1 = inlined_call_operand.vmem [shape: f32[2,32,96], index: 1, kind: input, shape index: {}]   ;;  %s11403_s2 = inlined_call_operand.vmem [shape: f32[2,1,96], index: 2, kind: input, shape index: {}]   ;;  %s11404_s3 = inlined_call_operand.vmem [shape: f32[2,1,32], index: 3, kind: input, shape index: {}]   ;;  %s11405_s4 = inlined_call_operand.vmem [shape: f32[2,1,32], index: 4, kind: input, shape index: {}]   ;;  %s11406_s5 = inlined_call_operand.vmem [shape: f32[2,2,16,32], index: 5, kind: input, shape index: {}]   ;;  %s11407_s6 = inlined_call_operand.vmem [shape: f32[2,1,32], index: 6, kind: input, shape index: {}]   ;;  %s11408_s7 = inlined_call_operand.vmem [shape: f32[2,1,32], index: 7, kind: input, shape index: {}]   ;;  %s11409_s8 = inlined_call_operand.vmem [shape: f32[2,1,32], index: 8, kind: input, shape index: {}]   ;;  %s11410_s9 = inlined_call_operand.vmem [shape: f32[2,32,128], index: 9, kind: input, shape index: {}]   ;;  %s11411_s10 = inlined_call_operand.vmem [shape: f32[2,1,128], index: 10, kind: input, shape index: {}]   ;;  %s11412_s11 = inlined_call_operand.vmem [shape: f32[2,128,32], index: 11, kind: input, shape index: {}]   ;;  %s11413_s12 = inlined_call_operand.vmem [shape: f32[2,1,32], index: 12, kind: input, shape index: {}]   ;;  %s11414_s13 = inlined_call_operand.hbm [shape: f32[2,64,64], index: 13, kind: output, shape index: {}]  }
   0x1   :  { %v49_v0 = vld [vmem:[%s11401_s0 + $0x20] sm:$0xff]  ;;  %v47_v1 = vld [vmem:[%s11401_s0 + $0x10] sm:$0xff]  ;;  %v50_v6 = vld [vmem:[%s11401_s0 + $0x28] sm:$0xff] }
   0x2   :  { %v45_v2 = vld [vmem:[%s11401_s0] sm:$0xff]  ;;  %v76_v3 = vsel %vm63_vm0, %v49_v0, 0.0  ;;  %v70_v4 = vsel %vm63_vm0, %v47_v1, 0.0  ;;  %v48_v7 = vld [vmem:[%s11401_s0 + $0x18] sm:$0xff]  ;;  %v79_v8 = vsel %vm63_vm0, %v50_v6, 0.0  ;;  %v46_v9 = vld [vmem:[%s11401_s0 + $0x8] sm:$0xff] }
   0x3   :  { %v64_v5 = vsel %vm63_vm0, %v45_v2, 0.0  ;;  %77 = vadd.xlane.f32.xlu2 %v76_v3  ;;  %71 = vadd.xlane.f32.xlu1 %v70_v4  ;;  %v73_v10 = vsel %vm63_vm0, %v48_v7, 0.0  ;;  %v67_v11 = vsel %vm63_vm0, %v46_v9, 0.0 }
   0x4   :  { %65 = vadd.xlane.f32.xlu0 %v64_v5 }
   0x5   :  { %18 = vsyncpa [#allocation3], 0  ;;  %v51_v12 = vld [vmem:[%s11401_s0 + $0x30] sm:$0xff]  ;;  %v7718_v14 = vmov 32.0   ;;  %v52_v40 = vld [vmem:[%s11401_s0 + $0x38] sm:$0xff]  ;;  %s7719_s20 = smov 96  }
   0x6   :  { %v82_v13 = vsel %vm63_vm0, %v51_v12, 0.0  ;;  %7069 = vrcp.f32 %v7718_v14  ;;  %v85_v45 = vsel %vm63_vm0, %v52_v40, 0.0  ;;  %v7865_v50 = vld [vmem:[%s11401_s0 + $0x40] sm:$0xff]  ;;  %v7883_v59 = vld [vmem:[%s11401_s0 + $0x58] sm:$0xff]  ;;  %v7891_v62 = vld [vmem:[%s11401_s0 + $0x48] sm:$0xff]  ;;  %s7720_s21 = smov 80  }
   0x7   :  { %v88_v54 = vsel %vm63_vm0, %v7865_v50, 0.0  ;;  %v97_v60 = vsel %vm63_vm0, %v7883_v59, 0.0  ;;  %v91_v63 = vsel %vm63_vm0, %v7891_v62, 0.0  ;;  %s7721_s22 = smov 112   ;;  %s7722_s23 = smov 64  }
   0x8   :  { %s7723_s24 = smov 48   ;;  %s7724_s14 = smov 32  }
   0x9   :  { %s6509_s25 = sshll.u32 %s11414_s13, 4  ;;  %s7726_s26 = smov 128   ;;  %s6510_s25 = int_to_ptr.hbm [resolvable:$true] %s6509_s25 }
   0xb   :  { %80 = vadd.xlane.f32.xlu2 %v79_v8  ;;  %74 = vadd.xlane.f32.xlu1 %v73_v10 }
   0xc   :  { %68 = vadd.xlane.f32.xlu0 %v67_v11  ;;  %v7070_v15 = vpop.eup %7069 }
   0xd   :  { %v113_v16 = vmul.f32 32.0, %v7070_v15  ;;  %vm117_vm1 = vweird.f32 %v7070_v15 }
   0xf   :  { %v114_v17 = vsub.f32 1.0, %v113_v16 }
  0x11   :  { %v115_v18 = vmul.f32 %v7070_v15, %v114_v17  ;;  %v720_v17 = vld [vmem:[%s11402_s1 + $0x18] sm:$0xff] }
  0x12   :  { %785 = vmatpush.msra.mxu0 %v720_v17 }
  0x13   :  { %83 = vadd.xlane.f32.xlu1 %v82_v13  ;;  %v116_v19 = vadd.f32 %v7070_v15, %v115_v18 }
  0x15   :  { %v7826_v20 = vsel %vm117_vm1, %v7070_v15, %v116_v19 }
  0x76   :  { %v78_v21 = vpop.xlane.xlu2 %77  ;;  %v72_v22 = vpop.xlane.xlu1 %71 }
  0x77   :  { %v121_v23 = vmul.f32 %v7826_v20, %v72_v22  ;;  %v66_v24 = vpop.xlane.xlu0 %65  ;;  %v123_v36 = vmul.f32 %v7826_v20, %v78_v21 }
  0x78   :  { %v119_v25 = vmul.f32 %v7826_v20, %v66_v24 }
  0x79   :  { %v7830_v26 = vsub.f32 %v47_v1, %v121_v23  ;;  %v7853_v43 = vsub.f32 %v49_v0, %v123_v36  ;;  %v7898_v0 = vld [vmem:[%s11401_s0 + $0x60] sm:$0xff]  ;;  %v719_v23 = vld [vmem:[%s11402_s1 + $0x10] sm:$0xff] }
  0x7a   :  { %v7832_v27 = vsub.f32 %v45_v2, %v119_v25  ;;  %v100_v1 = vsel %vm63_vm0, %v7898_v0, 0.0  ;;  %v7905_v2 = vld [vmem:[%s11401_s0 + $0x70] sm:$0xff]  ;;  %v718_v25 = vld [vmem:[%s11402_s1 + $0x8] sm:$0xff]  ;;  %786 = vmatpush.msra.mxu0 %v719_v23 }
  0x7b   :  { %v153_v28 = vmul.f32 %v7830_v26, %v7830_v26  ;;  %v155_v52 = vmul.f32 %v7853_v43, %v7853_v43  ;;  %v106_v3 = vsel %vm63_vm0, %v7905_v2, 0.0 }
  0x7c   :  { %v151_v29 = vmul.f32 %v7832_v27, %v7832_v27  ;;  %787 = vmatpush.msra.mxu0 %v718_v25 }
  0x7d   :  { %v173_v30 = vsel %vm63_vm0, %v153_v28, 0.0  ;;  %v179_v56 = vsel %vm63_vm0, %v155_v52, 0.0 }
  0x7e   :  { %v81_v31 = vpop.xlane.xlu2 %80  ;;  %174 = vadd.xlane.f32.xlu1 %v173_v30  ;;  %v167_v32 = vsel %vm63_vm0, %v151_v29, 0.0  ;;  %v75_v33 = vpop.xlane.xlu1 %74 }
  0x7f   :  { %v124_v34 = vmul.f32 %v7826_v20, %v81_v31  ;;  %168 = vadd.xlane.f32.xlu0 %v167_v32  ;;  %v69_v35 = vpop.xlane.xlu0 %68  ;;  %v122_v38 = vmul.f32 %v7826_v20, %v75_v33  ;;  %v717_v32 = vld [vmem:[%s11402_s1] sm:$0xff] }
  0x80   :  { %v120_v37 = vmul.f32 %v7826_v20, %v69_v35  ;;  %788 = vmatpush.msra.mxu0 %v717_v32 }
  0x81   :  { %v7844_v39 = vsub.f32 %v50_v6, %v124_v34  ;;  %v7855_v44 = vsub.f32 %v48_v7, %v122_v38 }
  0x82   :  { %v7849_v41 = vsub.f32 %v46_v9, %v120_v37 }
  0x83   :  { %v156_v42 = vmul.f32 %v7844_v39, %v7844_v39  ;;  %v154_v53 = vmul.f32 %v7855_v44, %v7855_v44 }
  0x84   :  { %v152_v46 = vmul.f32 %v7849_v41, %v7849_v41 }
  0x85   :  { %v182_v47 = vsel %vm63_vm0, %v156_v42, 0.0  ;;  %v176_v57 = vsel %vm63_vm0, %v154_v53, 0.0 }
  0x86   :  { %183 = vadd.xlane.f32.xlu1 %v182_v47  ;;  %v170_v48 = vsel %vm63_vm0, %v152_v46, 0.0  ;;  %v84_v49 = vpop.xlane.xlu1 %83 }
  0x87   :  { %86 = vadd.xlane.f32.xlu0 %v85_v45  ;;  %171 = vadd.xlane.f32.xlu2 %v170_v48  ;;  %v125_v51 = vmul.f32 %v7826_v20, %v84_v49  ;;  %v7954_v48 = vld [vmem:[%s11401_s0 + $0x50] sm:$0xff] }
  0x89   :  { %v7874_v55 = vsub.f32 %v51_v12, %v125_v51 }
  0x8b   :  { %v157_v58 = vmul.f32 %v7874_v55, %v7874_v55 }
  0x8d   :  { %v185_v61 = vsel %vm63_vm0, %v157_v58, 0.0 }
  0x8e   :  { %89 = vadd.xlane.f32.xlu1 %v88_v54 }
  0x8f   :  { %180 = vadd.xlane.f32.xlu0 %v179_v56  ;;  %177 = vadd.xlane.f32.xlu2 %v176_v57 }
  0x96   :  { %98 = vadd.xlane.f32.xlu1 %v97_v60  ;;  %v94_v60 = vsel %vm63_vm0, %v7954_v48, 0.0 }
  0x97   :  { %186 = vadd.xlane.f32.xlu2 %v185_v61 }
  0x9f   :  { %92 = vadd.xlane.f32.xlu2 %v91_v63 }
  0xa7   :  { %101 = vadd.xlane.f32.xlu2 %v100_v1 }
  0xaf   :  { %107 = vadd.xlane.f32.xlu2 %v106_v3 }
  0xf1   :  { %v175_v4 = vpop.xlane.xlu1 %174 }
  0xf2   :  { %v217_v5 = vmul.f32 %v175_v4, %v7826_v20  ;;  %v169_v6 = vpop.xlane.xlu0 %168 }
  0xf3   :  { %v215_v7 = vmul.f32 %v169_v6, %v7826_v20 }
  0xf4   :  { %v7911_v8 = vadd.f32 1e-06, %v217_v5  ;;  %v7978_v5 = vld [vmem:[%s11401_s0 + $0x78] sm:$0xff] }
  0xf5   :  { %v7913_v9 = vadd.f32 1e-06, %v215_v7  ;;  %v109_v23 = vsel %vm63_vm0, %v7978_v5, 0.0 }
  0xf6   :  { %7071 = vrsqrt.f32 %v7911_v8  ;;  %vm278_vm2 = vcmp.eq.f32.partialorder %v7911_v8, inf  ;;  %v281_v58 = vand.u32 2147483648, %v7911_v8  ;;  %vm280_vm3 = vcmp.eq.f32.partialorder %v7911_v8, 0.0 }
  0xf7   :  { %7073 = vrsqrt.f32 %v7913_v9  ;;  %vm254_vm4 = vcmp.eq.f32.partialorder %v7913_v9, inf  ;;  %v257_v7 = vand.u32 2147483648, %v7913_v9  ;;  %vm256_vm5 = vcmp.eq.f32.partialorder %v7913_v9, 0.0 }
  0xf9   :  { %v184_v10 = vpop.xlane.xlu1 %183 }
  0xfa   :  { %v172_v11 = vpop.xlane.xlu2 %171  ;;  %v87_v12 = vpop.xlane.xlu0 %86  ;;  %v220_v13 = vmul.f32 %v184_v10, %v7826_v20 }
  0xfb   :  { %v216_v14 = vmul.f32 %v172_v11, %v7826_v20  ;;  %v126_v15 = vmul.f32 %v7826_v20, %v87_v12  ;;  %v7988_v12 = vld [vmem:[%s11401_s0 + $0x68] sm:$0xff] }
  0xfc   :  { %v7072_v16 = vpop.eup %7071  ;;  %v7935_v29 = vadd.f32 1e-06, %v220_v13 }
  0xfd   :  { %v7074_v18 = vpop.eup %7073  ;;  %v272_v19 = vmul.f32 %v7072_v16, %v7911_v8  ;;  %v7924_v21 = vadd.f32 1e-06, %v216_v14  ;;  %v7926_v22 = vsub.f32 %v52_v40, %v126_v15 }
  0xfe   :  { %v248_v24 = vmul.f32 %v7074_v18, %v7913_v9  ;;  %v317_v32 = vand.u32 2147483648, %v7935_v29  ;;  %vm314_vm15 = vcmp.eq.f32.partialorder %v7935_v29, inf }
  0xff   :  { %v273_v28 = vmul.f32 %v7072_v16, %v272_v19  ;;  %7075 = vrsqrt.f32 %v7924_v21  ;;  %v158_v30 = vmul.f32 %v7926_v22, %v7926_v22  ;;  %vm266_vm6 = vcmp.eq.f32.partialorder %v7924_v21, inf }
 0x100   :  { %v249_v31 = vmul.f32 %v7074_v18, %v248_v24  ;;  %7077 = vrsqrt.f32 %v7935_v29  ;;  %v103_v24 = vsel %vm63_vm0, %v7988_v12, 0.0  ;;  %vm268_vm7 = vcmp.eq.f32.partialorder %v7924_v21, 0.0 }
 0x101   :  { %v90_v33 = vpop.xlane.xlu1 %89  ;;  %v188_v34 = vsel %vm63_vm0, %v158_v30, 0.0  ;;  %v274_v35 = vmul.f32 0.5, %v273_v28 }
 0x102   :  { %v127_v36 = vmul.f32 %v7826_v20, %v90_v33  ;;  %v178_v37 = vpop.xlane.xlu2 %177  ;;  %189 = vadd.xlane.f32.xlu0 %v188_v34  ;;  %v181_v38 = vpop.xlane.xlu0 %180  ;;  %v250_v40 = vmul.f32 0.5, %v249_v31  ;;  %v269_v31 = vand.u32 2147483648, %v7924_v21 }
 0x103   :  { %v218_v42 = vmul.f32 %v178_v37, %v7826_v20  ;;  %v219_v45 = vmul.f32 %v181_v38, %v7826_v20  ;;  %v275_v46 = vsub.f32 1.5, %v274_v35 }
 0x104   :  { %v7949_v47 = vsub.f32 %v7865_v50, %v127_v36  ;;  %v251_v49 = vsub.f32 1.5, %v250_v40 }
 0x105   :  { %v7076_v51 = vpop.eup %7075  ;;  %v7956_v52 = vadd.f32 1e-06, %v218_v42  ;;  %v7958_v53 = vadd.f32 1e-06, %v219_v45  ;;  %v276_v54 = vmul.f32 %v7072_v16, %v275_v46 }
 0x106   :  { %v260_v56 = vmul.f32 %v7076_v51, %v7924_v21  ;;  %v159_v50 = vmul.f32 %v7949_v47, %v7949_v47  ;;  %v252_v57 = vmul.f32 %v7074_v18, %v251_v49  ;;  %v7973_v4 = vpop.eup %7077 }
 0x107   :  { %7079 = vrsqrt.f32 %v7956_v52  ;;  %v277_v61 = vmul.f32 %v276_v54, %v7911_v8  ;;  %v308_v19 = vmul.f32 %v7973_v4, %v7935_v29  ;;  %vm290_vm8 = vcmp.eq.f32.partialorder %v7956_v52, inf }
 0x108   :  { %v261_v63 = vmul.f32 %v7076_v51, %v260_v56  ;;  %7081 = vrsqrt.f32 %v7958_v53  ;;  %v191_v1 = vsel %vm63_vm0, %v159_v50, 0.0  ;;  %v253_v3 = vmul.f32 %v252_v57, %v7913_v9 }
 0x109   :  { %192 = vadd.xlane.f32.xlu1 %v191_v1  ;;  %v99_v6 = vpop.xlane.xlu1 %98  ;;  %v279_v10 = vsel %vm278_vm2, %v7911_v8, %v277_v61  ;;  %v309_v36 = vmul.f32 %v7973_v4, %v308_v19  ;;  %v293_v38 = vand.u32 2147483648, %v7956_v52  ;;  %vm292_vm10 = vcmp.eq.f32.partialorder %v7956_v52, 0.0 }
 0x10a   :  { %v187_v11 = vpop.xlane.xlu2 %186  ;;  %95 = vadd.xlane.f32.xlu0 %v94_v60  ;;  %v255_v13 = vsel %vm254_vm4, %v7913_v9, %v253_v3  ;;  %v262_v14 = vmul.f32 0.5, %v261_v63  ;;  %v7994_v15 = vsel %vm280_vm3, %v281_v58, %v279_v10  ;;  %v130_v17 = vmul.f32 %v7826_v20, %v99_v6 }
 0x10b   :  { %v221_v16 = vmul.f32 %v187_v11, %v7826_v20  ;;  %v7998_v18 = vsel %vm256_vm5, %v257_v7, %v255_v13  ;;  %7083 = vrcp.f32 %v7994_v15  ;;  %v478_v56 = vand.u32 2147483647, %v7994_v15 }
 0x10c   :  { %7085 = vrcp.f32 %v7998_v18  ;;  %v263_v25 = vsub.f32 1.5, %v262_v14  ;;  %v8018_v34 = vsub.f32 %v7883_v59, %v130_v17  ;;  %vm444_vm9 = vweird.f32 %v7998_v18 }
 0x10d   :  { %v7080_v9 = vpop.eup %7079  ;;  %v8006_v8 = vadd.f32 1e-06, %v221_v16  ;;  %v448_v45 = vand.u32 2147483647, %v7998_v18  ;;  %vm474_vm11 = vweird.f32 %v7994_v15  ;;  %vm302_vm13 = vcmp.eq.f32.partialorder %v7958_v53, inf }
 0x10e   :  { %v7082_v28 = vpop.eup %7081  ;;  %v284_v30 = vmul.f32 %v7080_v9, %v7956_v52  ;;  %v264_v35 = vmul.f32 %v7076_v51, %v263_v25  ;;  %v450_v51 = vand.u32 2147483648, %v7998_v18  ;;  %v162_v58 = vmul.f32 %v8018_v34, %v8018_v34 }
 0x10f   :  { %v296_v33 = vmul.f32 %v7082_v28, %v7958_v53  ;;  %7087 = vrsqrt.f32 %v8006_v8  ;;  %vm8050_vm12 = vcmp.eq.f32.partialorder %v448_v45, 8.507059e+37  ;;  %v480_v16 = vand.u32 2147483648, %v7994_v15 }
 0x110   :  { %v285_v37 = vmul.f32 %v7080_v9, %v284_v30  ;;  %v265_v46 = vmul.f32 %v264_v35, %v7924_v21  ;;  %v451_v14 = vor.u32 1.1754944e-38, %v450_v51  ;;  %v305_v30 = vand.u32 2147483648, %v7958_v53 }
 0x111   :  { %v8023_v40 = vpop.eup %7083  ;;  %v297_v42 = vmul.f32 %v7082_v28, %v296_v33  ;;  %110 = vadd.xlane.f32.xlu1 %v109_v23  ;;  %vm8074_vm4 = vcmp.eq.f32.partialorder %v478_v56, 8.507059e+37  ;;  %v481_v13 = vor.u32 1.1754944e-38, %v480_v16 }
 0x112   :  { %v7086_v59 = vpop.eup %7085  ;;  %v93_v49 = vpop.xlane.xlu2 %92  ;;  %104 = vadd.xlane.f32.xlu0 %v103_v24  ;;  %v470_v54 = vmul.f32 %v8023_v40, %v7994_v15  ;;  %v286_v50 = vmul.f32 0.5, %v285_v37  ;;  %v267_v61 = vsel %vm266_vm6, %v7924_v21, %v265_v46  ;;  %v200_v24 = vsel %vm63_vm0, %v162_v58, 0.0 }
 0x113   :  { %v128_v57 = vmul.f32 %v7826_v20, %v93_v49  ;;  %v440_v60 = vmul.f32 %v7086_v59, %v7998_v18  ;;  %v8043_v63 = vsel %vm268_vm7, %v269_v31, %v267_v61  ;;  %v298_v6 = vmul.f32 0.5, %v297_v42 }
 0x114   :  { %v471_v1 = vsub.f32 1.0, %v470_v54  ;;  %v287_v3 = vsub.f32 1.5, %v286_v50  ;;  %7089 = vrcp.f32 %v8043_v63  ;;  %vm445_vm14 = vweird.f32 %v7086_v59  ;;  %v8082_v54 = vld [vmem:[%s11404_s3] ss:$0 sm:$0xff] }
 0x115   :  { %v8045_v7 = vpop.eup %7087  ;;  %v8048_v10 = vsub.f32 %v7891_v62, %v128_v57  ;;  %v441_v11 = vsub.f32 1.0, %v440_v60  ;;  %v299_v23 = vsub.f32 1.5, %v298_v6  ;;  %v310_v31 = vmul.f32 0.5, %v309_v36  ;;  %vm446_vm1 = vmor %vm444_vm9, %vm445_vm14 }
 0x116   :  { %v320_v21 = vmul.f32 %v8045_v7, %v8006_v8  ;;  %v288_v19 = vmul.f32 %v7080_v9, %v287_v3  ;;  %v472_v25 = vmul.f32 %v8023_v40, %v471_v1  ;;  %vm459_vm2 = vweird.f32 %v8043_v63  ;;  %v8099_v1 = vld [vmem:[%s11405_s4] ss:$0 sm:$0xff] }
 0x117   :  { %v160_v62 = vmul.f32 %v8048_v10, %v8048_v10  ;;  %v442_v17 = vmul.f32 %v7086_v59, %v441_v11  ;;  %v300_v42 = vmul.f32 %v7082_v28, %v299_v23  ;;  %v463_v9 = vand.u32 2147483647, %v8043_v63 }
 0x118   :  { %v289_v37 = vmul.f32 %v288_v19, %v7956_v52  ;;  %v321_v45 = vmul.f32 %v8045_v7, %v320_v21  ;;  %vm475_vm3 = vweird.f32 %v8023_v40  ;;  %v465_v18 = vand.u32 2147483648, %v8043_v63 }
 0x119   :  { %v194_v33 = vsel %vm63_vm0, %v160_v62, 0.0  ;;  %v443_v35 = vadd.f32 %v7086_v59, %v442_v17  ;;  %v473_v58 = vadd.f32 %v8023_v40, %v472_v25  ;;  %v311_v60 = vsub.f32 1.5, %v310_v31  ;;  %vm8112_vm6 = vmor %vm474_vm11, %vm475_vm3 }
 0x11a   :  { %v102_v46 = vpop.xlane.xlu2 %101  ;;  %195 = vadd.xlane.f32.xlu0 %v194_v33  ;;  %v7090_v28 = vpop.eup %7089  ;;  %v291_v50 = vsel %vm290_vm8, %v7956_v52, %v289_v37  ;;  %v301_v6 = vmul.f32 %v300_v42, %v7958_v53  ;;  %vm304_vm7 = vcmp.eq.f32.partialorder %v7958_v53, 0.0  ;;  %vm8121_vm8 = vcmp.eq.f32.partialorder %v463_v9, 8.507059e+37 }
 0x11b   :  { %v131_v49 = vmul.f32 %v7826_v20, %v102_v46  ;;  %v447_v51 = vsel %vm446_vm1, %v7086_v59, %v443_v35  ;;  %v455_v57 = vmul.f32 %v7090_v28, %v8043_v63  ;;  %v8105_v3 = vsel %vm292_vm10, %v293_v38, %v291_v50 }
 0x11c   :  { %v452_v56 = vsel %vm8050_vm12, %v451_v14, %v447_v51  ;;  %vm460_vm5 = vweird.f32 %v7090_v28  ;;  %7091 = vrcp.f32 %v8105_v3  ;;  %v303_v15 = vsel %vm302_vm13, %v7958_v53, %v301_v6 }
 0x11d   :  { %v8093_v59 = vsub.f32 %v7898_v0, %v131_v49  ;;  %v453_v61 = vmul.f32 %v452_v56, %v7832_v27  ;;  %v456_v11 = vsub.f32 1.0, %v455_v57  ;;  %v322_v0 = vmul.f32 0.5, %v321_v45  ;;  %vm8133_vm9 = vmor %vm459_vm2, %vm460_vm5 }
 0x11e   :  { %v312_v62 = vmul.f32 %v7973_v4, %v311_v60  ;;  %v466_v23 = vor.u32 1.1754944e-38, %v465_v18  ;;  %v477_v25 = vsel %vm8112_vm6, %v8023_v40, %v473_v58  ;;  %v8140_v4 = vsel %vm304_vm7, %v305_v30, %v303_v15 }
 0x11f   :  { %v163_v52 = vmul.f32 %v8093_v59, %v8093_v59  ;;  %v682_v38 = vmul.f32 %v8082_v54, %v453_v61  ;;  %v457_v21 = vmul.f32 %v7090_v28, %v456_v11  ;;  %v323_v35 = vsub.f32 1.5, %v322_v0 }
 0x120   :  { %v313_v33 = vmul.f32 %v312_v62, %v7935_v29  ;;  %7093 = vrcp.f32 %v8140_v4  ;;  %vm316_vm10 = vcmp.eq.f32.partialorder %v7935_v29, 0.0  ;;  %v482_v46 = vsel %vm8074_vm4, %v481_v13, %v477_v25 }
 0x121   :  { %v203_v17 = vsel %vm63_vm0, %v163_v52, 0.0  ;;  %v701_v19 = vadd.f32 %v8099_v1, %v682_v38  ;;  %v458_v53 = vadd.f32 %v7090_v28, %v457_v21  ;;  %v324_v30 = vmul.f32 %v8045_v7, %v323_v35 }
 0x122   :  { %204 = vadd.xlane.f32.xlu1 %v203_v17  ;;  %v108_v31 = vpop.xlane.xlu2 %107  ;;  %201 = vadd.xlane.f32.xlu0 %v200_v24  ;;  %v7092_v37 = vpop.eup %7091  ;;  %v315_v24 = vsel %vm314_vm15, %v7935_v29, %v313_v33  ;;  %vm489_vm11 = vweird.f32 %v8105_v3  ;;  %v493_v18 = vand.u32 2147483647, %v8105_v3  ;;  %vm326_vm13 = vcmp.eq.f32.partialorder %v8006_v8, inf }
 0x123   :  { %v133_v63 = vmul.f32 %v7826_v20, %v108_v31  ;;  %6521 = vmatmul.msk.f32.vlgmr.msra.gmra.mxu0 %vm63_vm0, %v701_v19  ;;  %v462_v40 = vsel %vm8133_vm9, %v7090_v28, %v458_v53  ;;  %v485_v9 = vmul.f32 %v7092_v37, %v8105_v3  ;;  %v495_v28 = vand.u32 2147483648, %v8105_v3 }
 0x124   :  { %v467_v45 = vsel %vm8121_vm8, %v466_v23, %v462_v40  ;;  %v8166_v7 = vsel %vm316_vm10, %v317_v32, %v315_v24  ;;  %vm490_vm12 = vweird.f32 %v7092_v37  ;;  %vm328_vm14 = vcmp.eq.f32.partialorder %v8006_v8, 0.0 }
 0x125   :  { %v8154_v42 = vsub.f32 %v7905_v2, %v133_v63  ;;  %v468_v49 = vmul.f32 %v467_v45, %v7849_v41  ;;  %v486_v51 = vsub.f32 1.0, %v485_v9  ;;  %7095 = vrcp.f32 %v8166_v7  ;;  %vm8182_vm15 = vmor %vm489_vm11, %vm490_vm12 }
 0x126   :  { %v325_v41 = vmul.f32 %v324_v30, %v8006_v8  ;;  %v7094_v50 = vpop.eup %7093  ;;  %v329_v56 = vand.u32 2147483648, %v8006_v8  ;;  %v483_v58 = vmul.f32 %v482_v46, %v7830_v26  ;;  %v496_v11 = vor.u32 1.1754944e-38, %v495_v28 }
 0x127   :  { %v165_v2 = vmul.f32 %v8154_v42, %v8154_v42  ;;  %v683_v36 = vmul.f32 %v8082_v54, %v468_v49  ;;  %v487_v32 = vmul.f32 %v7092_v37, %v486_v51  ;;  %v500_v61 = vmul.f32 %v7094_v50, %v8140_v4 }
 0x128   :  { %v327_v27 = vsel %vm326_vm13, %v8006_v8, %v325_v41  ;;  %vm494_vm1 = vcmp.eq.f32.partialorder %v493_v18, 8.507059e+37  ;;  %v684_v3 = vmul.f32 %v8082_v54, %v483_v58  ;;  %vm504_vm2 = vweird.f32 %v8140_v4 }
 0x129   :  { %v209_v29 = vsel %vm63_vm0, %v165_v2, 0.0  ;;  %v702_v57 = vadd.f32 %v8099_v1, %v683_v36  ;;  %v488_v6 = vadd.f32 %v7092_v37, %v487_v32  ;;  %v501_v0 = vsub.f32 1.0, %v500_v61 }
 0x12a   :  { %210 = vadd.xlane.f32.xlu0 %v209_v29  ;;  %v330_v52 = vsel %vm328_vm14, %v329_v56, %v327_v27  ;;  %vm505_vm3 = vweird.f32 %v7094_v50  ;;  %v510_v62 = vand.u32 2147483648, %v8140_v4  ;;  %v703_v17 = vadd.f32 %v8099_v1, %v684_v3 }
 0x12b   :  { %6522 = vmatmul.msk.f32.gmra.mxu0 %vm63_vm0, %v702_v57  ;;  %v7096_v38 = vpop.eup %7095  ;;  %v492_v26 = vsel %vm8182_vm15, %v7092_v37, %v488_v6  ;;  %7097 = vrcp.f32 %v330_v52  ;;  %v502_v13 = vmul.f32 %v7094_v50, %v501_v0  ;;  %v508_v16 = vand.u32 2147483647, %v8140_v4  ;;  %vm506_vm4 = vmor %vm504_vm2, %vm505_vm3 }
 0x12c   :  { %v515_v21 = vmul.f32 %v7096_v38, %v8166_v7  ;;  %v497_v14 = vsel %vm494_vm1, %v496_v11, %v492_v26  ;;  %v511_v33 = vor.u32 1.1754944e-38, %v510_v62  ;;  %vm519_vm6 = vweird.f32 %v8166_v7 }
 0x12d   :  { %v503_v15 = vadd.f32 %v7094_v50, %v502_v13  ;;  %v498_v19 = vmul.f32 %v497_v14, %v7855_v44  ;;  %vm509_vm5 = vcmp.eq.f32.partialorder %v508_v16, 8.507059e+37  ;;  %vm520_vm7 = vweird.f32 %v7096_v38 }
 0x12e   :  { %v516_v8 = vsub.f32 1.0, %v515_v21  ;;  %v525_v37 = vand.u32 2147483648, %v8166_v7  ;;  %v523_v4 = vand.u32 2147483647, %v8166_v7  ;;  %vm521_vm8 = vmor %vm519_vm6, %vm520_vm7  ;;  %vm534_vm10 = vweird.f32 %v330_v52 }
 0x12f   :  { %v507_v25 = vsel %vm506_vm4, %v7094_v50, %v503_v15  ;;  %v685_v35 = vmul.f32 %v8082_v54, %v498_v19  ;;  %v540_v2 = vand.u32 2147483648, %v330_v52  ;;  %v538_v7 = vand.u32 2147483647, %v330_v52 }
 0x130   :  { %v517_v31 = vmul.f32 %v7096_v38, %v516_v8  ;;  %v512_v63 = vsel %vm509_vm5, %v511_v33, %v507_v25  ;;  %v526_v45 = vor.u32 1.1754944e-38, %v525_v37  ;;  %vm524_vm9 = vcmp.eq.f32.partialorder %v523_v4, 8.507059e+37 }
 0x131   :  { %v7098_v23 = vpop.eup %7097  ;;  %v704_v24 = vadd.f32 %v8099_v1, %v685_v35  ;;  %v513_v30 = vmul.f32 %v512_v63, %v7853_v43  ;;  %v541_v43 = vor.u32 1.1754944e-38, %v540_v2  ;;  %vm539_vm13 = vcmp.eq.f32.partialorder %v538_v7, 8.507059e+37 }
 0x132   :  { %v530_v53 = vmul.f32 %v7098_v23, %v330_v52  ;;  %v518_v44 = vadd.f32 %v7096_v38, %v517_v31  ;;  %vm535_vm11 = vweird.f32 %v7098_v23 }
 0x133   :  { %6523 = vmatmul.msk.f32.gmra.mxu0 %vm63_vm0, %v703_v17  ;;  %v686_v49 = vmul.f32 %v8082_v54, %v513_v30  ;;  %vm536_vm12 = vmor %vm534_vm10, %vm535_vm11 }
 0x134   :  { %v531_v40 = vsub.f32 1.0, %v530_v53  ;;  %v522_v46 = vsel %vm521_vm8, %v7096_v38, %v518_v44 }
 0x135   :  { %v527_v28 = vsel %vm524_vm9, %v526_v45, %v522_v46  ;;  %v705_v36 = vadd.f32 %v8099_v1, %v686_v49 }
 0x136   :  { %v532_v9 = vmul.f32 %v7098_v23, %v531_v40  ;;  %v528_v18 = vmul.f32 %v527_v28, %v7844_v39 }
 0x138   :  { %v533_v51 = vadd.f32 %v7098_v23, %v532_v9  ;;  %v687_v50 = vmul.f32 %v8082_v54, %v528_v18 }
 0x13a   :  { %v537_v41 = vsel %vm536_vm12, %v7098_v23, %v533_v51  ;;  %v706_v32 = vadd.f32 %v8099_v1, %v687_v50 }
 0x13b   :  { %6524 = vmatmul.msk.f32.gmra.mxu0 %vm63_vm0, %v704_v24  ;;  %v542_v29 = vsel %vm539_vm13, %v541_v43, %v537_v41 }
 0x13c   :  { %v543_v56 = vmul.f32 %v542_v29, %v7874_v55 }
 0x13e   :  { %v688_v57 = vmul.f32 %v8082_v54, %v543_v56 }
 0x140   :  { %v707_v58 = vadd.f32 %v8099_v1, %v688_v57 }
 0x143   :  { %6525 = vmatmul.msk.f32.gmra.mxu0 %vm63_vm0, %v705_v36 }
 0x14b   :  { %6526 = vmatmul.msk.f32.gmra.mxu0 %vm63_vm0, %v706_v32 }
 0x153   :  { %6527 = vmatmul.msk.f32.gmra.mxu0 %vm63_vm0, %v707_v58 }
 0x175   :  { %v190_v39 = vpop.xlane.xlu0 %189 }
 0x176   :  { %v222_v60 = vmul.f32 %v190_v39, %v7826_v20 }
 0x178   :  { %v238_v61 = vadd.f32 1e-06, %v222_v60 }
 0x17a   :  { %7099 = vrsqrt.f32 %v238_v61  ;;  %vm338_vm14 = vcmp.eq.f32.partialorder %v238_v61, inf  ;;  %v341_v44 = vand.u32 2147483648, %v238_v61  ;;  %vm340_vm15 = vcmp.eq.f32.partialorder %v238_v61, 0.0 }
 0x17c   :  { %v193_v6 = vpop.xlane.xlu1 %192 }
 0x17d   :  { %v223_v11 = vmul.f32 %v193_v6, %v7826_v20  ;;  %v96_v27 = vpop.xlane.xlu0 %95 }
 0x17e   :  { %v129_v0 = vmul.f32 %v7826_v20, %v96_v27 }
 0x17f   :  { %v239_v55 = vadd.f32 1e-06, %v223_v11 }
 0x180   :  { %v7100_v52 = vpop.eup %7099  ;;  %v8221_v38 = vsub.f32 %v7954_v48, %v129_v0 }
 0x181   :  { %v332_v26 = vmul.f32 %v7100_v52, %v238_v61  ;;  %7101 = vrsqrt.f32 %v239_v55  ;;  %vm350_vm1 = vcmp.eq.f32.partialorder %v239_v55, inf  ;;  %v353_v49 = vand.u32 2147483648, %v239_v55 }
 0x182   :  { %v161_v3 = vmul.f32 %v8221_v38, %v8221_v38  ;;  %vm352_vm2 = vcmp.eq.f32.partialorder %v239_v55, 0.0 }
 0x183   :  { %v333_v13 = vmul.f32 %v7100_v52, %v332_v26 }
 0x184   :  { %v111_v21 = vpop.xlane.xlu1 %110  ;;  %v197_v14 = vsel %vm63_vm0, %v161_v3, 0.0 }
 0x185   :  { %v134_v15 = vmul.f32 %v7826_v20, %v111_v21  ;;  %198 = vadd.xlane.f32.xlu2 %v197_v14  ;;  %v105_v8 = vpop.xlane.xlu0 %104  ;;  %v334_v62 = vmul.f32 0.5, %v333_v13 }
 0x186   :  { %v132_v17 = vmul.f32 %v7826_v20, %v105_v8 }
 0x187   :  { %v7102_v19 = vpop.eup %7101  ;;  %v8229_v48 = vsub.f32 %v7978_v5, %v134_v15  ;;  %v335_v16 = vsub.f32 1.5, %v334_v62 }
 0x188   :  { %v344_v23 = vmul.f32 %v7102_v19, %v239_v55  ;;  %v8232_v25 = vsub.f32 %v7988_v12, %v132_v17 }
 0x189   :  { %v166_v31 = vmul.f32 %v8229_v48, %v8229_v48  ;;  %v336_v53 = vmul.f32 %v7100_v52, %v335_v16 }
 0x18a   :  { %v345_v33 = vmul.f32 %v7102_v19, %v344_v23  ;;  %v164_v35 = vmul.f32 %v8232_v25, %v8232_v25 }
 0x18b   :  { %v212_v63 = vsel %vm63_vm0, %v166_v31, 0.0  ;;  %v337_v37 = vmul.f32 %v336_v53, %v238_v61 }
 0x18c   :  { %213 = vadd.xlane.f32.xlu1 %v212_v63  ;;  %v206_v5 = vsel %vm63_vm0, %v164_v35, 0.0  ;;  %v346_v4 = vmul.f32 0.5, %v345_v33 }
 0x18d   :  { %207 = vadd.xlane.f32.xlu2 %v206_v5  ;;  %v196_v12 = vpop.xlane.xlu0 %195  ;;  %v339_v40 = vsel %vm338_vm14, %v238_v61, %v337_v37 }
 0x18e   :  { %v224_v24 = vmul.f32 %v196_v12, %v7826_v20  ;;  %v342_v30 = vsel %vm340_vm15, %v341_v44, %v339_v40  ;;  %v347_v45 = vsub.f32 1.5, %v346_v4 }
 0x18f   :  { %7103 = vrcp.f32 %v342_v30  ;;  %v555_v50 = vand.u32 2147483648, %v342_v30  ;;  %v553_v32 = vand.u32 2147483647, %v342_v30  ;;  %vm549_vm4 = vweird.f32 %v342_v30 }
 0x190   :  { %v240_v46 = vadd.f32 1e-06, %v224_v24  ;;  %v348_v9 = vmul.f32 %v7102_v19, %v347_v45 }
 0x191   :  { %v556_v39 = vor.u32 1.1754944e-38, %v555_v50  ;;  %vm554_vm6 = vcmp.eq.f32.partialorder %v553_v32, 8.507059e+37 }
 0x192   :  { %7105 = vrsqrt.f32 %v240_v46  ;;  %v349_v28 = vmul.f32 %v348_v9, %v239_v55  ;;  %vm362_vm9 = vcmp.eq.f32.partialorder %v240_v46, inf  ;;  %v365_v15 = vand.u32 2147483648, %v240_v46 }
 0x193   :  { %vm364_vm11 = vcmp.eq.f32.partialorder %v240_v46, 0.0 }
 0x194   :  { %v351_v2 = vsel %vm350_vm1, %v239_v55, %v349_v28 }
 0x195   :  { %v7104_v51 = vpop.eup %7103  ;;  %v354_v7 = vsel %vm352_vm2, %v353_v49, %v351_v2  ;;  %v202_v50 = vpop.xlane.xlu0 %201 }
 0x196   :  { %v545_v36 = vmul.f32 %v7104_v51, %v342_v30  ;;  %7107 = vrcp.f32 %v354_v7  ;;  %vm550_vm3 = vweird.f32 %v7104_v51  ;;  %vm564_vm7 = vweird.f32 %v354_v7 }
 0x197   :  { %vm551_vm5 = vmor %vm549_vm4, %vm550_vm3  ;;  %v570_v27 = vand.u32 2147483648, %v354_v7  ;;  %v568_v3 = vand.u32 2147483647, %v354_v7 }
 0x198   :  { %v7106_v18 = vpop.eup %7105  ;;  %v546_v43 = vsub.f32 1.0, %v545_v36 }
 0x199   :  { %v356_v41 = vmul.f32 %v7106_v18, %v240_v46  ;;  %v571_v8 = vor.u32 1.1754944e-38, %v570_v27  ;;  %vm569_vm12 = vcmp.eq.f32.partialorder %v568_v3, 8.507059e+37 }
 0x19a   :  { %v547_v29 = vmul.f32 %v7104_v51, %v546_v43 }
 0x19b   :  { %v357_v56 = vmul.f32 %v7106_v18, %v356_v41 }
 0x19c   :  { %v548_v57 = vadd.f32 %v7104_v51, %v547_v29  ;;  %v7108_v58 = vpop.eup %7107  ;;  %v226_v29 = vmul.f32 %v202_v50, %v7826_v20 }
 0x19d   :  { %v358_v60 = vmul.f32 0.5, %v357_v56  ;;  %v560_v6 = vmul.f32 %v7108_v58, %v354_v7  ;;  %vm565_vm8 = vweird.f32 %v7108_v58  ;;  %v8258_v7 = vld [vmem:[%s11403_s2] ss:$0 sm:$0xff]  ;;  %v205_v56 = vpop.xlane.xlu1 %204 }
 0x19e   :  { %v552_v61 = vsel %vm551_vm5, %v7104_v51, %v548_v57  ;;  %vm566_vm10 = vmor %vm564_vm7, %vm565_vm8  ;;  %v242_v57 = vadd.f32 1e-06, %v226_v29 }
 0x19f   :  { %v557_v11 = vsel %vm554_vm6, %v556_v39, %v552_v61  ;;  %v359_v0 = vsub.f32 1.5, %v358_v60  ;;  %v561_v26 = vsub.f32 1.0, %v560_v6 }
 0x1a0   :  { %v8241_v55 = vpop.f32.mrf.mxu0  ;;  %v558_v52 = vmul.f32 %v557_v11, %v7926_v22  ;;  %v211_v11 = vpop.xlane.xlu0 %210  ;;  %vm386_vm2 = vcmp.eq.f32.partialorder %v242_v57, inf  ;;  %vm388_vm3 = vcmp.eq.f32.partialorder %v242_v57, 0.0 }
 0x1a1   :  { %v360_v13 = vmul.f32 %v7106_v18, %v359_v0  ;;  %v562_v14 = vmul.f32 %v7108_v58, %v561_v26  ;;  %v8286_v39 = vadd.f32 %v8258_v7, %v8241_v55  ;;  %v229_v55 = vmul.f32 %v211_v11, %v7826_v20 }
 0x1a2   :  { %v689_v21 = vmul.f32 %v8082_v54, %v558_v52 }
 0x1a3   :  { %v361_v62 = vmul.f32 %v360_v13, %v240_v46  ;;  %v563_v19 = vadd.f32 %v7108_v58, %v562_v14  ;;  %v8304_v13 = vadd.f32 1e-06, %v229_v55 }
 0x1a4   :  { %v708_v17 = vadd.f32 %v8099_v1, %v689_v21 }
 0x1a5   :  { %v363_v16 = vsel %vm362_vm9, %v240_v46, %v361_v62  ;;  %v567_v22 = vsel %vm566_vm10, %v7108_v58, %v563_v19  ;;  %v227_v58 = vmul.f32 %v205_v56, %v7826_v20  ;;  %vm422_vm9 = vcmp.eq.f32.partialorder %v8304_v13, inf }
 0x1a6   :  { %6528 = vmatmul.msk.f32.gmra.mxu0 %vm63_vm0, %v708_v17  ;;  %v366_v23 = vsel %vm364_vm11, %v365_v15, %v363_v16  ;;  %v572_v31 = vsel %vm569_vm12, %v571_v8, %v567_v22  ;;  %vm424_vm11 = vcmp.eq.f32.partialorder %v8304_v13, 0.0 }
 0x1a7   :  { %7109 = vrcp.f32 %v366_v23  ;;  %v573_v53 = vmul.f32 %v572_v31, %v7949_v47  ;;  %v585_v44 = vand.u32 2147483648, %v366_v23  ;;  %vm579_vm13 = vweird.f32 %v366_v23 }
 0x1a8   :  { %v793_v33 = vpop.f32.mrf.mxu0  ;;  %v583_v12 = vand.u32 2147483647, %v366_v23  ;;  %7111 = vrsqrt.f32 %v242_v57  ;;  %v8288_v60 = vadd.f32 1e-06, %v227_v58 }
 0x1a9   :  { %v690_v35 = vmul.f32 %v8082_v54, %v573_v53  ;;  %v586_v30 = vor.u32 1.1754944e-38, %v585_v44  ;;  %v8266_v43 = vadd.f32 %v8258_v7, %v793_v33 }
 0x1aa   :  { %vm584_vm1 = vcmp.eq.f32.partialorder %v583_v12, 8.507059e+37  ;;  %7113 = vrsqrt.f32 %v8288_v60  ;;  %vm398_vm4 = vcmp.eq.f32.partialorder %v8288_v60, inf  ;;  %vm400_vm5 = vcmp.eq.f32.partialorder %v8288_v60, 0.0 }
 0x1ab   :  { %v709_v63 = vadd.f32 %v8099_v1, %v690_v35  ;;  %7115 = vrsqrt.f32 %v8304_v13 }
 0x1ad   :  { %v7110_v37 = vpop.eup %7109 }
 0x1ae   :  { %6529 = vmatmul.msk.f32.gmra.mxu0 %vm63_vm0, %v709_v63  ;;  %v575_v5 = vmul.f32 %v7110_v37, %v366_v23  ;;  %vm580_vm14 = vweird.f32 %v7110_v37  ;;  %v7112_v61 = vpop.eup %7111 }
 0x1af   :  { %vm581_vm15 = vmor %vm579_vm13, %vm580_vm14  ;;  %v380_v6 = vmul.f32 %v7112_v61, %v242_v57 }
 0x1b0   :  { %v576_v4 = vsub.f32 1.0, %v575_v5  ;;  %v796_v40 = vpop.f32.mrf.mxu0  ;;  %v7114_v27 = vpop.eup %7113  ;;  %v389_v5 = vand.u32 2147483648, %v242_v57 }
 0x1b1   :  { %v381_v0 = vmul.f32 %v7112_v61, %v380_v6  ;;  %v392_v52 = vmul.f32 %v7114_v27, %v8288_v60  ;;  %v8302_v26 = vadd.f32 %v8258_v7, %v796_v40  ;;  %v7116_v22 = vpop.eup %7115 }
 0x1b2   :  { %v577_v24 = vmul.f32 %v7110_v37, %v576_v4  ;;  %v416_v63 = vmul.f32 %v7116_v22, %v8304_v13 }
 0x1b3   :  { %v382_v3 = vmul.f32 0.5, %v381_v0  ;;  %v393_v21 = vmul.f32 %v7114_v27, %v392_v52 }
 0x1b4   :  { %v578_v45 = vadd.f32 %v7110_v37, %v577_v24 }
 0x1b5   :  { %v383_v14 = vsub.f32 1.5, %v382_v3  ;;  %v394_v62 = vmul.f32 0.5, %v393_v21 }
 0x1b6   :  { %v582_v47 = vsel %vm581_vm15, %v7110_v37, %v578_v45 }
 0x1b7   :  { %v587_v46 = vsel %vm584_vm1, %v586_v30, %v582_v47  ;;  %v384_v17 = vmul.f32 %v7112_v61, %v383_v14  ;;  %v395_v16 = vsub.f32 1.5, %v394_v62  ;;  %v417_v47 = vmul.f32 %v7116_v22, %v416_v63 }
 0x1b8   :  { %v588_v9 = vmul.f32 %v587_v46, %v8048_v10  ;;  %v799_v49 = vpop.f32.mrf.mxu0 }
 0x1b9   :  { %v8277_v32 = vadd.f32 %v8258_v7, %v799_v49  ;;  %v385_v23 = vmul.f32 %v384_v17, %v242_v57  ;;  %v396_v44 = vmul.f32 %v7114_v27, %v395_v16 }
 0x1ba   :  { %v691_v28 = vmul.f32 %v8082_v54, %v588_v9 }
 0x1bb   :  { %v387_v40 = vsel %vm386_vm2, %v242_v57, %v385_v23  ;;  %v397_v9 = vmul.f32 %v396_v44, %v8288_v60 }
 0x1bc   :  { %v710_v2 = vadd.f32 %v8099_v1, %v691_v28  ;;  %v8336_v46 = vsel %vm388_vm3, %v389_v5, %v387_v40 }
 0x1bd   :  { %vm609_vm12 = vweird.f32 %v8336_v46 }
 0x1be   :  { %6530 = vmatmul.msk.f32.gmra.mxu0 %vm63_vm0, %v710_v2  ;;  %v401_v2 = vand.u32 2147483648, %v8288_v60 }
 0x1c0   :  { %v802_v51 = vpop.f32.mrf.mxu0 }
 0x1c1   :  { %v8317_v53 = vadd.f32 %v8258_v7, %v802_v51  ;;  %v399_v51 = vsel %vm398_vm4, %v8288_v60, %v397_v9 }
 0x1c2   :  { %v8348_v61 = vsel %vm400_vm5, %v401_v2, %v399_v51  ;;  %v615_v2 = vand.u32 2147483648, %v8336_v46 }
 0x1c8   :  { %v805_v36 = vpop.f32.mrf.mxu0 }
 0x1c9   :  { %v8261_v18 = vadd.f32 %v8258_v7, %v805_v36  ;;  %v418_v36 = vmul.f32 0.5, %v417_v47 }
 0x1cb   :  { %856 = vrot.lane.b32.xlu1 %v8261_v18, %s7719_s20  ;;  %v8326_v12 = vpack.i.bf16 %v8317_v53, %v8261_v18  ;;  %v419_v6 = vsub.f32 1.5, %v418_v36 }
 0x1d0   :  { %v808_v10 = vpop.f32.mrf.mxu0 }
 0x1d1   :  { %v8269_v41 = vadd.f32 %v8258_v7, %v808_v10 }
 0x1d3   :  { %858 = vrot.lane.b32.xlu0 %v8269_v41, %s7719_s20  ;;  %848 = vrot.lane.b32.xlu1 %v8266_v43, %s7719_s20 }
 0x1db   :  { %852 = vrot.lane.b32.xlu0 %v8277_v32, %s7719_s20  ;;  %1418 = vrot.lane.b32.xlu1 %v8269_v41, %s7720_s21 }
 0x1e3   :  { %846 = vrot.lane.b32.xlu0 %v8286_v39, %s7719_s20  ;;  %1412 = vrot.lane.b32.xlu1 %v8277_v32, %s7720_s21 }
 0x1eb   :  { %1416 = vrot.lane.b32.xlu0 %v8261_v18, %s7720_s21  ;;  %1406 = vrot.lane.b32.xlu1 %v8286_v39, %s7720_s21 }
 0x1f3   :  { %1410 = vrot.lane.b32.xlu0 %v8302_v26, %s7720_s21  ;;  %1394 = vrot.lane.b32.xlu1 %v8302_v26, %s7721_s22 }
 0x1f8   :  { %v199_v15 = vpop.xlane.xlu2 %198 }
 0x1f9   :  { %v225_v8 = vmul.f32 %v199_v15, %v7826_v20  ;;  %v420_v15 = vmul.f32 %v7116_v22, %v419_v6  ;;  %v616_v6 = vor.u32 1.1754944e-38, %v615_v2 }
 0x1fb   :  { %v241_v19 = vadd.f32 1e-06, %v225_v8  ;;  %1390 = vrot.lane.b32.xlu0 %v8286_v39, %s7721_s22  ;;  %1400 = vrot.lane.b32.xlu1 %v8261_v18, %s7721_s22 }
 0x1fd   :  { %7117 = vrsqrt.f32 %v241_v19  ;;  %vm374_vm6 = vcmp.eq.f32.partialorder %v241_v19, inf  ;;  %v377_v55 = vand.u32 2147483648, %v241_v19  ;;  %vm376_vm7 = vcmp.eq.f32.partialorder %v241_v19, 0.0 }
 0x1ff   :  { %v214_v31 = vpop.xlane.xlu1 %213 }
 0x200   :  { %v230_v33 = vmul.f32 %v214_v31, %v7826_v20  ;;  %v208_v35 = vpop.xlane.xlu2 %207  ;;  %v421_v31 = vmul.f32 %v420_v15, %v8304_v13 }
 0x201   :  { %v228_v37 = vmul.f32 %v208_v35, %v7826_v20 }
 0x202   :  { %v8322_v4 = vadd.f32 1e-06, %v230_v33 }
 0x203   :  { %v7118_v24 = vpop.eup %7117  ;;  %v8328_v30 = vadd.f32 1e-06, %v228_v37  ;;  %1396 = vrot.lane.b32.xlu0 %v8277_v32, %s7721_s22  ;;  %6894 = vrot.lane.b32.xlu1 %v8326_v12, %s7722_s23  ;;  %v425_v37 = vand.u32 2147483648, %v8304_v13 }
 0x204   :  { %v368_v45 = vmul.f32 %v7118_v24, %v241_v19  ;;  %7119 = vrsqrt.f32 %v8322_v4  ;;  %vm434_vm3 = vcmp.eq.f32.partialorder %v8322_v4, inf }
 0x205   :  { %7121 = vrsqrt.f32 %v8328_v30  ;;  %vm410_vm8 = vcmp.eq.f32.partialorder %v8328_v30, inf  ;;  %v413_v33 = vand.u32 2147483648, %v8328_v30  ;;  %vm412_vm10 = vcmp.eq.f32.partialorder %v8328_v30, 0.0 }
 0x206   :  { %v369_v49 = vmul.f32 %v7118_v24, %v368_v45  ;;  %7123 = vrcp.f32 %v8336_v46 }
 0x207   :  { %7125 = vrcp.f32 %v8348_v61 }
 0x208   :  { %v370_v28 = vmul.f32 0.5, %v369_v49  ;;  %v613_v49 = vand.u32 2147483647, %v8336_v46 }
 0x20a   :  { %v7120_v10 = vpop.eup %7119  ;;  %v371_v50 = vsub.f32 1.5, %v370_v28  ;;  %vm8389_vm2 = vcmp.eq.f32.partialorder %v613_v49, 8.507059e+37 }
 0x20b   :  { %v7122_v29 = vpop.eup %7121  ;;  %v428_v56 = vmul.f32 %v7120_v10, %v8322_v4  ;;  %1402 = vrot.lane.b32.xlu0 %v8269_v41, %s7721_s22 }
 0x20c   :  { %v404_v57 = vmul.f32 %v7122_v29, %v8328_v30  ;;  %v372_v58 = vmul.f32 %v7118_v24, %v371_v50  ;;  %v8350_v11 = vpop.eup %7123  ;;  %v423_v24 = vsel %vm422_vm9, %v8304_v13, %v421_v31 }
 0x20d   :  { %v429_v27 = vmul.f32 %v7120_v10, %v428_v56  ;;  %v605_v14 = vmul.f32 %v8350_v11, %v8336_v46  ;;  %v8355_v17 = vpop.eup %7125  ;;  %vm610_vm13 = vweird.f32 %v8350_v11 }
 0x20e   :  { %v405_v0 = vmul.f32 %v7122_v29, %v404_v57  ;;  %v373_v60 = vmul.f32 %v372_v58, %v241_v19  ;;  %v620_v63 = vmul.f32 %v8355_v17, %v8348_v61  ;;  %vm8384_vm15 = vmor %vm609_vm12, %vm610_vm13 }
 0x20f   :  { %v430_v8 = vmul.f32 0.5, %v429_v27  ;;  %v606_v16 = vsub.f32 1.0, %v605_v14 }
 0x210   :  { %v375_v52 = vsel %vm374_vm6, %v241_v19, %v373_v60  ;;  %v406_v3 = vmul.f32 0.5, %v405_v0  ;;  %v621_v51 = vsub.f32 1.0, %v620_v63  ;;  %vm436_vm6 = vcmp.eq.f32.partialorder %v8322_v4, 0.0 }
 0x211   :  { %v378_v21 = vsel %vm376_vm7, %v377_v55, %v375_v52  ;;  %v431_v19 = vsub.f32 1.5, %v430_v8  ;;  %v607_v44 = vmul.f32 %v8350_v11, %v606_v16  ;;  %v437_v55 = vand.u32 2147483648, %v8322_v4 }
 0x212   :  { %7127 = vrcp.f32 %v378_v21  ;;  %v407_v62 = vsub.f32 1.5, %v406_v3  ;;  %v600_v28 = vand.u32 2147483648, %v378_v21  ;;  %v598_v50 = vand.u32 2147483647, %v378_v21 }
 0x213   :  { %v432_v47 = vmul.f32 %v7120_v10, %v431_v19  ;;  %v608_v10 = vadd.f32 %v8350_v11, %v607_v44  ;;  %vm594_vm1 = vweird.f32 %v378_v21  ;;  %v622_v27 = vmul.f32 %v8355_v17, %v621_v51 }
 0x214   :  { %v408_v23 = vmul.f32 %v7122_v29, %v407_v62  ;;  %v601_v13 = vor.u32 1.1754944e-38, %v600_v28  ;;  %vm599_vm5 = vcmp.eq.f32.partialorder %v598_v50, 8.507059e+37  ;;  %vm624_vm7 = vweird.f32 %v8348_v61 }
 0x215   :  { %v433_v56 = vmul.f32 %v432_v47, %v8322_v4  ;;  %v612_v60 = vsel %vm8384_vm15, %v8350_v11, %v608_v10  ;;  %v628_v62 = vand.u32 2147483647, %v8348_v61  ;;  %v630_v16 = vand.u32 2147483648, %v8348_v61 }
 0x216   :  { %v409_v35 = vmul.f32 %v408_v23, %v8328_v30  ;;  %v617_v11 = vsel %vm8389_vm2, %v616_v6, %v612_v60 }
 0x217   :  { %v631_v61 = vor.u32 1.1754944e-38, %v630_v16  ;;  %v7647_v16 = vld [vmem:[%s11404_s3] ss:$0 sm:$0xff] }
 0x218   :  { %v7128_v22 = vpop.eup %7127  ;;  %v411_v40 = vsel %vm410_vm8, %v8328_v30, %v409_v35  ;;  %v8379_v30 = vsel %vm424_vm11, %v425_v37, %v423_v24  ;;  %vm625_vm8 = vweird.f32 %v8355_v17 }
 0x219   :  { %v590_v5 = vmul.f32 %v7128_v22, %v378_v21  ;;  %v8371_v45 = vsel %vm412_vm10, %v413_v33, %v411_v40  ;;  %vm595_vm14 = vweird.f32 %v7128_v22  ;;  %v435_v21 = vsel %vm434_vm3, %v8322_v4, %v433_v56  ;;  %vm626_vm9 = vmor %vm624_vm7, %vm625_vm8 }
 0x21a   :  { %7129 = vrcp.f32 %v8371_v45  ;;  %vm596_vm4 = vmor %vm594_vm1, %vm595_vm14  ;;  %v623_v4 = vadd.f32 %v8355_v17, %v622_v27  ;;  %vm629_vm10 = vcmp.eq.f32.partialorder %v628_v62, 8.507059e+37  ;;  %vm639_vm11 = vweird.f32 %v8371_v45 }
 0x21b   :  { %v591_v9 = vsub.f32 1.0, %v590_v5  ;;  %7131 = vrcp.f32 %v8379_v30  ;;  %v645_v49 = vand.u32 2147483648, %v8371_v45  ;;  %v643_v51 = vand.u32 2147483647, %v8371_v45 }
 0x21c   :  { %v627_v63 = vsel %vm626_vm9, %v8355_v17, %v623_v4  ;;  %vm654_vm15 = vweird.f32 %v8379_v30  ;;  %v658_v58 = vand.u32 2147483647, %v8379_v30  ;;  %vm862_vm8 = vcmask 130048  }
 0x21d   :  { %v592_v36 = vmul.f32 %v7128_v22, %v591_v9  ;;  %v646_v29 = vor.u32 1.1754944e-38, %v645_v49  ;;  %vm644_vm14 = vcmp.eq.f32.partialorder %v643_v51, 8.507059e+37  ;;  %vm1033_vm9 = vcmask 523264  }
 0x21e   :  { %vm659_vm3 = vcmp.eq.f32.partialorder %v658_v58, 8.507059e+37 }
 0x21f   :  { %v593_v57 = vadd.f32 %v7128_v22, %v592_v36 }
 0x220   :  { %v8396_v46 = vpop.eup %7129 }
 0x221   :  { %v597_v0 = vsel %vm596_vm4, %v7128_v22, %v593_v57  ;;  %v635_v3 = vmul.f32 %v8396_v46, %v8371_v45  ;;  %v7132_v33 = vpop.eup %7131  ;;  %v618_v22 = vmul.f32 %v617_v11, %v8018_v34  ;;  %v632_v34 = vsel %vm629_vm10, %v631_v61, %v627_v63 }
 0x222   :  { %v602_v52 = vsel %vm599_vm5, %v601_v13, %v597_v0  ;;  %v650_v5 = vmul.f32 %v7132_v33, %v8379_v30  ;;  %vm640_vm12 = vweird.f32 %v8396_v46  ;;  %v633_v2 = vmul.f32 %v632_v34, %v8093_v59 }
 0x223   :  { %v811_v14 = vpop.f32.mrf.mxu0  ;;  %v603_v15 = vmul.f32 %v602_v52, %v8221_v38  ;;  %v636_v31 = vsub.f32 1.0, %v635_v3  ;;  %v8418_v38 = vsel %vm436_vm6, %v437_v55, %v435_v21  ;;  %v693_v40 = vmul.f32 %v8082_v54, %v618_v22  ;;  %vm641_vm13 = vmor %vm639_vm11, %vm640_vm12 }
 0x224   :  { %v8410_v8 = vadd.f32 %v8258_v7, %v811_v14  ;;  %7133 = vrcp.f32 %v8418_v38  ;;  %v651_v9 = vsub.f32 1.0, %v650_v5  ;;  %v694_v56 = vmul.f32 %v8082_v54, %v633_v2 }
 0x225   :  { %v692_v23 = vmul.f32 %v8082_v54, %v603_v15  ;;  %v637_v37 = vmul.f32 %v8396_v46, %v636_v31  ;;  %v712_v28 = vadd.f32 %v8099_v1, %v693_v40  ;;  %vm655_vm1 = vweird.f32 %v7132_v33 }
 0x226   :  { %860 = vrot.lane.b32.xlu2 %v8410_v8, %s7719_s20  ;;  %v6898_v19 = vpack.i.bf16 %v8269_v41, %v8410_v8  ;;  %v652_v50 = vmul.f32 %v7132_v33, %v651_v9  ;;  %v660_v45 = vand.u32 2147483648, %v8379_v30  ;;  %vm656_vm2 = vmor %vm654_vm15, %vm655_vm1  ;;  %v713_v6 = vadd.f32 %v8099_v1, %v694_v56 }
 0x227   :  { %v711_v35 = vadd.f32 %v8099_v1, %v692_v23  ;;  %v638_v47 = vadd.f32 %v8396_v46, %v637_v37  ;;  %vm669_vm4 = vweird.f32 %v8418_v38  ;;  %v675_v3 = vand.u32 2147483648, %v8418_v38 }
 0x228   :  { %6899 = vrot.lane.b32.xlu1 %v6898_v19, %s7722_s23  ;;  %v653_v57 = vadd.f32 %v7132_v33, %v652_v50 }
 0x229   :  { %6531 = vmatmul.msk.f32.gmra.mxu0 %vm63_vm0, %v711_v35  ;;  %v642_v36 = vsel %vm641_vm13, %v8396_v46, %v638_v47  ;;  %v661_v46 = vor.u32 1.1754944e-38, %v660_v45  ;;  %v676_v11 = vor.u32 1.1754944e-38, %v675_v3  ;;  %v6908_v3 = vpack.i.bf16 %v8302_v26, %v8277_v32 }
 0x22a   :  { %v7134_v17 = vpop.eup %7133  ;;  %v647_v59 = vsel %vm644_vm14, %v646_v29, %v642_v36  ;;  %v657_v0 = vsel %vm656_vm2, %v7132_v33, %v653_v57 }
 0x22b   :  { %v814_v44 = vpop.f32.mrf.mxu0  ;;  %v665_v10 = vmul.f32 %v7134_v17, %v8418_v38  ;;  %v648_v27 = vmul.f32 %v647_v59, %v8232_v25  ;;  %vm670_vm5 = vweird.f32 %v7134_v17  ;;  %v662_v52 = vsel %vm659_vm3, %v661_v46, %v657_v0 }
 0x22c   :  { %v8434_v24 = vadd.f32 %v8258_v7, %v814_v44  ;;  %v673_v25 = vand.u32 2147483647, %v8418_v38  ;;  %vm671_vm6 = vmor %vm669_vm4, %vm670_vm5 }
 0x22d   :  { %v666_v13 = vsub.f32 1.0, %v665_v10  ;;  %v695_v30 = vmul.f32 %v8082_v54, %v648_v27  ;;  %v663_v54 = vmul.f32 %v662_v52, %v8154_v42  ;;  %v6918_v52 = vpack.i.bf16 %v8286_v39, %v8266_v43 }
 0x22e   :  { %944 = vrot.lane.b32.xlu0 %v8434_v24, %s7719_s20  ;;  %854 = vrot.lane.b32.xlu2 %v8317_v53, %s7719_s20  ;;  %vm674_vm7 = vcmp.eq.f32.partialorder %v673_v25, 8.507059e+37 }
 0x22f   :  { %v667_v60 = vmul.f32 %v7134_v17, %v666_v13  ;;  %v714_v15 = vadd.f32 %v8099_v1, %v695_v30  ;;  %v696_v23 = vmul.f32 %v7647_v16, %v663_v54  ;;  %v7648_v1 = vld [vmem:[%s11405_s4] ss:$0 sm:$0xff] }
 0x230   :  { %6904 = vrot.lane.b32.xlu1 %v6898_v19, %s7723_s24 }
 0x231   :  { %6532 = vmatmul.msk.f32.gmra.mxu0 %vm63_vm0, %v712_v28  ;;  %v668_v21 = vadd.f32 %v7134_v17, %v667_v60  ;;  %v715_v42 = vadd.f32 %v7648_v1, %v696_v23 }
 0x233   :  { %v672_v62 = vsel %vm671_vm6, %v7134_v17, %v668_v21 }
 0x234   :  { %v677_v4 = vsel %vm674_vm7, %v676_v11, %v672_v62 }
 0x235   :  { %v678_v31 = vmul.f32 %v677_v4, %v8229_v48 }
 0x236   :  { %850 = vrot.lane.b32.xlu2 %v8302_v26, %s7719_s20 }
 0x237   :  { %v697_v38 = vmul.f32 %v7647_v16, %v678_v31 }
 0x238   :  { %1495 = vrot.lane.b32.xlu1 %v8434_v24, %s7721_s22 }
 0x239   :  { %6533 = vmatmul.msk.f32.gmra.mxu0 %vm63_vm0, %v713_v6  ;;  %v716_v19 = vadd.f32 %v7648_v1, %v697_v38 }
 0x23b   :  { %v817_v55 = vpop.f32.mrf.mxu0 }
 0x23c   :  { %v8467_v14 = vadd.f32 %v8258_v7, %v817_v55 }
 0x23d   :  { %v857_v33 = vpop.permute.xlu1 %856 }
 0x23e   :  { %1420 = vrot.lane.b32.xlu2 %v8410_v8, %s7720_s21 }
 0x240   :  { %946 = vrot.lane.b32.xlu1 %v8467_v14, %s7719_s20 }
 0x241   :  { %6534 = vmatmul.msk.f32.gmra.mxu0 %vm63_vm0, %v714_v15 }
 0x245   :  { %v849_v35 = vpop.permute.xlu1 %848  ;;  %v859_v5 = vpop.permute.xlu0 %858 }
 0x246   :  { %1414 = vrot.lane.b32.xlu2 %v8317_v53, %s7720_s21 }
 0x248   :  { %1513 = vrot.lane.b32.xlu1 %v8467_v14, %s7720_s21 }
 0x249   :  { %6535 = vmatmul.msk.f32.gmra.mxu0 %vm63_vm0, %v715_v42 }
 0x24d   :  { %v1419_v48 = vpop.permute.xlu1 %1418  ;;  %v853_v34 = vpop.permute.xlu0 %852 }
 0x24e   :  { %1408 = vrot.lane.b32.xlu2 %v8266_v43, %s7720_s21 }
 0x250   :  { %1497 = vrot.lane.b32.xlu1 %v8467_v14, %s7721_s22 }
 0x251   :  { %6536 = vmatmul.msk.f32.gmra.mxu0 %vm63_vm0, %v716_v19 }
 0x255   :  { %v1413_v22 = vpop.permute.xlu1 %1412  ;;  %v847_v49 = vpop.permute.xlu0 %846 }
 0x256   :  { %1392 = vrot.lane.b32.xlu2 %v8266_v43, %s7721_s22 }
 0x25d   :  { %v1407_v61 = vpop.permute.xlu1 %1406  ;;  %v1417_v56 = vpop.permute.xlu0 %1416 }
 0x25e   :  { %1398 = vrot.lane.b32.xlu2 %v8317_v53, %s7721_s22 }
 0x265   :  { %v8501_v63 = vpop.permute.xlu1 %1394  ;;  %v1411_v27 = vpop.permute.xlu0 %1410 }
 0x266   :  { %1404 = vrot.lane.b32.xlu2 %v8410_v8, %s7721_s22 }
 0x26d   :  { %v8505_v44 = vpop.permute.xlu1 %1400 }
 0x26e   :  { %1511 = vrot.lane.b32.xlu2 %v8434_v24, %s7720_s21 }
 0x275   :  { %v6895_v47 = vpop.permute.xlu1 %6894 }
 0x276   :  { %v6896_v36 = vunpack.i.l.bf16 %v6895_v47  ;;  %v6897_v50 = vunpack.i.h.bf16 %v6895_v47 }
 0x280   :  { %v861_v37 = vpop.permute.xlu2 %860 }
 0x281   :  { %6537 = vmatpush.xpose.msk.msra.mxu1 %vm862_vm8, %v861_v37 }
 0x285   :  { %6538 = vmatpush.xpose.msk.msra.mxu1 %vm862_vm8, %v859_v5 }
 0x288   :  { %v855_v40 = vpop.permute.xlu2 %854 }
 0x289   :  { %6539 = vmatpush.xpose.msk.msra.mxu1 %vm862_vm8, %v857_v33 }
 0x28d   :  { %6540 = vmatpush.xpose.msk.msra.mxu1 %vm862_vm8, %v855_v40 }
 0x290   :  { %v851_v9 = vpop.permute.xlu2 %850 }
 0x291   :  { %6541 = vmatpush.xpose.msk.msra.mxu1 %vm862_vm8, %v853_v34 }
 0x295   :  { %6542 = vmatpush.xpose.msk.msra.mxu1 %vm862_vm8, %v851_v9 }
 0x298   :  { %v1421_v2 = vpop.permute.xlu2 %1420 }
 0x299   :  { %6543 = vmatpush.xpose.msk.msra.mxu1 %vm862_vm8, %v849_v35 }
 0x29a   :  { %v6900_v17 = vpop.permute.xlu1 %6899 }
 0x29b   :  { %v6901_v28 = vunpack.i.l.bf16 %v6900_v17  ;;  %v6902_v51 = vunpack.i.h.bf16 %v6900_v17 }
 0x29d   :  { %6544 = vmatpush.xpose.msk.msra.mxu1 %vm862_vm8, %v847_v49  ;;  %1266 = vmatpush.msra.mxu3 %v6901_v28 }
 0x29f   :  { %1267 = vmatpush.msra.mxu3 %v6902_v51 }
 0x2a0   :  { %6545 = vmatmul.msk.f32.vlgmr.msra.gmra.mxu1 %vm862_vm8, %v8286_v39  ;;  %v1415_v58 = vpop.permute.xlu2 %1414 }
 0x2a1   :  { %6585 = vmatpush.xpose.msk.msrb.mxu1 %vm862_vm8, %v1421_v2  ;;  %1268 = vmatpush.msra.mxu3 %v6896_v36 }
 0x2a2   :  { %v6905_v10 = vpop.permute.xlu1 %6904 }
 0x2a3   :  { %1269 = vmatpush.msra.mxu3 %v6897_v50  ;;  %v6906_v29 = vunpack.i.l.bf16 %v6905_v10  ;;  %v6907_v59 = vunpack.i.h.bf16 %v6905_v10 }
 0x2a5   :  { %6586 = vmatpush.xpose.msk.msrb.mxu1 %vm862_vm8, %v1419_v48  ;;  %1832 = vmatpush.msrb.mxu0 %v6906_v29 }
 0x2a6   :  { %v820_v45 = vpop.f32.mrf.mxu0 }
 0x2a7   :  { %v8519_v57 = vadd.f32 %v8258_v7, %v820_v45  ;;  %1833 = vmatpush.msrb.mxu0 %v6907_v59 }
 0x2a8   :  { %6546 = vmatmul.msk.f32.gmra.mxu1 %vm862_vm8, %v8266_v43  ;;  %v1409_v46 = vpop.permute.xlu2 %1408 }
 0x2a9   :  { %6587 = vmatpush.xpose.msk.msrb.mxu1 %vm862_vm8, %v1417_v56  ;;  %1515 = vrot.lane.b32.xlu0 %v8519_v57, %s7720_s21 }
 0x2aa   :  { %948 = vrot.lane.b32.xlu2 %v8519_v57, %s7719_s20  ;;  %v8609_v25 = vpop.permute.xlu1 %1495 }
 0x2ad   :  { %6588 = vmatpush.xpose.msk.msrb.mxu1 %vm862_vm8, %v1415_v58 }
 0x2ae   :  { %v823_v13 = vpop.f32.mrf.mxu0 }
 0x2af   :  { %v8530_v6 = vadd.f32 %v8258_v7, %v823_v13 }
 0x2b0   :  { %6547 = vmatmul.msk.f32.gmra.mxu1 %vm862_vm8, %v8302_v26  ;;  %v1391_v26 = vpop.permute.xlu0 %1390 }
 0x2b1   :  { %6589 = vmatpush.xpose.msk.msrb.mxu1 %vm862_vm8, %v1413_v22  ;;  %1499 = vrot.lane.b32.xlu0 %v8519_v57, %s7721_s22 }
 0x2b2   :  { %1501 = vrot.lane.b32.xlu2 %v8530_v6, %s7721_s22  ;;  %v8615_v11 = vpop.permute.xlu1 %946 }
 0x2b5   :  { %6590 = vmatpush.xpose.msk.msrb.mxu1 %vm862_vm8, %v1411_v27 }
 0x2b6   :  { %v826_v0 = vpop.f32.mrf.mxu0 }
 0x2b7   :  { %v8541_v60 = vadd.f32 %v8258_v7, %v826_v0 }
 0x2b8   :  { %6548 = vmatmul.msk.f32.gmra.mxu1 %vm862_vm8, %v8277_v32 }
 0x2b9   :  { %6591 = vmatpush.xpose.msk.msrb.mxu1 %vm862_vm8, %v1409_v46  ;;  %952 = vrot.lane.b32.xlu1 %v8541_v60, %s7719_s20 }
 0x2ba   :  { %1519 = vrot.lane.b32.xlu2 %v8541_v60, %s7720_s21  ;;  %950 = vrot.lane.b32.xlu0 %v8530_v6, %s7719_s20  ;;  %v8622_v23 = vpop.permute.xlu1 %1513 }
 0x2bd   :  { %6592 = vmatpush.xpose.msk.msrb.mxu1 %vm862_vm8, %v1407_v61 }
 0x2be   :  { %v829_v55 = vpop.f32.mrf.mxu0 }
 0x2bf   :  { %v8553_v30 = vadd.f32 %v8258_v7, %v829_v55 }
 0x2c0   :  { %6549 = vmatmul.msk.f32.gmra.mxu1 %vm862_vm8, %v8317_v53 }
 0x2c1   :  { %6919 = vrot.lane.b32.xlu1 %v6918_v52, %s7722_s23 }
 0x2c2   :  { %954 = vrot.lane.b32.xlu2 %v8553_v30, %s7719_s20  ;;  %1517 = vrot.lane.b32.xlu0 %v8530_v6, %s7720_s21  ;;  %v8631_v38 = vpop.permute.xlu1 %1497 }
 0x2c6   :  { %v832_v43 = vpop.f32.mrf.mxu0 }
 0x2c7   :  { %v8574_v39 = vadd.f32 %v8258_v7, %v832_v43 }
 0x2c8   :  { %6550 = vmatmul.msk.f32.gmra.mxu1 %vm862_vm8, %v8261_v18 }
 0x2c9   :  { %1505 = vrot.lane.b32.xlu1 %v8553_v30, %s7721_s22 }
 0x2ca   :  { %6909 = vrot.lane.b32.xlu2 %v6908_v3, %s7722_s23  ;;  %1503 = vrot.lane.b32.xlu0 %v8541_v60, %s7721_s22 }
 0x2ce   :  { %v835_v18 = vpop.f32.mrf.mxu0 }
 0x2cf   :  { %v8584_v32 = vadd.f32 %v8258_v7, %v835_v18 }
 0x2d0   :  { %6551 = vmatmul.msk.f32.gmra.mxu1 %vm862_vm8, %v8269_v41  ;;  %v1393_v41 = vpop.permute.xlu2 %1392 }
 0x2d1   :  { %1523 = vrot.lane.b32.xlu1 %v8574_v39, %s7720_s21 }
 0x2d2   :  { %6929 = vrot.lane.b32.xlu2 %v6918_v52, %s7723_s24  ;;  %6914 = vrot.lane.b32.xlu0 %v8326_v12, %s7723_s24  ;;  %v1397_v12 = vpop.permute.xlu0 %1396 }
 0x2d8   :  { %6552 = vmatmul.msk.f32.gmra.mxu1 %vm862_vm8, %v8410_v8  ;;  %v1399_v7 = vpop.permute.xlu2 %1398 }
 0x2d9   :  { %958 = vrot.lane.b32.xlu1 %v8584_v32, %s7719_s20 }
 0x2da   :  { %1525 = vrot.lane.b32.xlu2 %v8584_v32, %s7720_s21  ;;  %1521 = vrot.lane.b32.xlu0 %v8553_v30, %s7720_s21  ;;  %v1403_v15 = vpop.permute.xlu0 %1402 }
 0x2e0   :  { %6593 = vmatmul.msk.f32.vlgmr.msrb.gmra.mxu1 %vm862_vm8, %v1391_v26  ;;  %v1405_v53 = vpop.permute.xlu2 %1404 }
 0x2e1   :  { %6924 = vrot.lane.b32.xlu1 %v6908_v3, %s7723_s24 }
 0x2e2   :  { %956 = vrot.lane.b32.xlu0 %v8574_v39, %s7719_s20  ;;  %v8618_v62 = vpop.permute.xlu0 %944 }
 0x2e8   :  { %6594 = vmatmul.msk.f32.gmra.mxu1 %vm862_vm8, %v1393_v41  ;;  %v8604_v8 = vpop.permute.xlu2 %1511 }
 0x2ea   :  { %1507 = vrot.lane.b32.xlu0 %v8574_v39, %s7721_s22 }
 0x2f0   :  { %6595 = vmatmul.msk.f32.gmra.mxu1 %vm862_vm8, %v8501_v63 }
 0x2f8   :  { %6596 = vmatmul.msk.f32.gmra.mxu1 %vm862_vm8, %v1397_v12 }
 0x300   :  { %6597 = vmatmul.msk.f32.gmra.mxu1 %vm862_vm8, %v1399_v7 }
 0x304   :  { %v8607_v21 = vpop.permute.xlu2 %948 }
 0x308   :  { %6598 = vmatmul.msk.f32.gmra.mxu1 %vm862_vm8, %v8505_v44 }
 0x30c   :  { %v8613_v54 = vpop.permute.xlu2 %1501 }
 0x310   :  { %6599 = vmatmul.msk.f32.gmra.mxu1 %vm862_vm8, %v1403_v15 }
 0x314   :  { %v8620_v16 = vpop.permute.xlu2 %1519 }
 0x318   :  { %6600 = vmatmul.msk.f32.gmra.mxu1 %vm862_vm8, %v1405_v53 }
 0x31b   :  { %v8625_v1 = vpop.permute.xlu0 %1515 }
 0x31c   :  { %v955_v4 = vpop.permute.xlu2 %954 }
 0x31d   :  { %v8627_v42 = vpop.f32.mrf.mxu1 }
 0x31e   :  { %v1034_v31 = vsel %vm1033_vm9, %v8627_v42, -inf }
 0x31f   :  { %1035 = vmax.xlane.f32.xlu1 %v1034_v31 }
 0x323   :  { %v8633_v19 = vpop.permute.xlu0 %1499 }
 0x324   :  { %v6910_v33 = vpop.permute.xlu2 %6909 }
 0x325   :  { %v6911_v35 = vunpack.i.l.bf16 %v6910_v33  ;;  %v8635_v48 = vpop.f32.mrf.mxu1  ;;  %v6912_v61 = vunpack.i.h.bf16 %v6910_v33 }
 0x326   :  { %v1037_v22 = vsel %vm1033_vm9, %v8635_v48, -inf }
 0x327   :  { %1270 = vmatpush.msra.mxu3 %v6911_v35  ;;  %1038 = vmax.xlane.f32.xlu0 %v1037_v22 }
 0x329   :  { %1271 = vmatpush.msra.mxu3 %v6912_v61 }
 0x32b   :  { %v953_v63 = vpop.permute.xlu1 %952 }
 0x32c   :  { %v951_v37 = vpop.permute.xlu0 %950  ;;  %v6930_v52 = vpop.permute.xlu2 %6929 }
 0x32d   :  { %v8639_v5 = vpop.f32.mrf.mxu1  ;;  %v6931_v41 = vunpack.i.l.bf16 %v6930_v52  ;;  %v6932_v26 = vunpack.i.h.bf16 %v6930_v52 }
 0x32e   :  { %v1040_v44 = vsel %vm1033_vm9, %v8639_v5, -inf }
 0x32f   :  { %1041 = vmax.xlane.f32.xlu0 %v1040_v44 }
 0x333   :  { %v6920_v40 = vpop.permute.xlu1 %6919 }
 0x334   :  { %v8643_v34 = vpop.permute.xlu0 %1517  ;;  %v6921_v47 = vunpack.i.l.bf16 %v6920_v40  ;;  %v6922_v49 = vunpack.i.h.bf16 %v6920_v40  ;;  %v1526_v31 = vpop.permute.xlu2 %1525 }
 0x335   :  { %v8645_v9 = vpop.f32.mrf.mxu1 }
 0x336   :  { %1272 = vmatpush.msra.mxu3 %v6921_v47  ;;  %v1043_v17 = vsel %vm1033_vm9, %v8645_v9, -inf }
 0x337   :  { %1044 = vmax.xlane.f32.xlu2 %v1043_v17 }
 0x338   :  { %1273 = vmatpush.msra.mxu3 %v6922_v49  ;;  %1509 = vrot.lane.b32.xlu1 %v8584_v32, %s7721_s22 }
 0x33b   :  { %v8651_v28 = vpop.permute.xlu1 %1505 }
 0x33c   :  { %v8653_v2 = vpop.permute.xlu0 %1503 }
 0x33d   :  { %v8655_v51 = vpop.f32.mrf.mxu1 }
 0x33e   :  { %v1046_v12 = vsel %vm1033_vm9, %v8655_v51, -inf }
 0x343   :  { %v1524_v36 = vpop.permute.xlu1 %1523 }
 0x344   :  { %v6915_v50 = vpop.permute.xlu0 %6914 }
 0x345   :  { %v8657_v10 = vpop.f32.mrf.mxu1  ;;  %v6916_v29 = vunpack.i.l.bf16 %v6915_v50  ;;  %v6917_v59 = vunpack.i.h.bf16 %v6915_v50 }
 0x346   :  { %v1049_v56 = vsel %vm1033_vm9, %v8657_v10, -inf }
 0x347   :  { %1834 = vmatpush.msrb.mxu0 %v6916_v29  ;;  %1050 = vmax.xlane.f32.xlu2 %v1049_v56 }
 0x349   :  { %1835 = vmatpush.msrb.mxu0 %v6917_v59 }
 0x34b   :  { %v959_v45 = vpop.permute.xlu1 %958 }
 0x34c   :  { %v1522_v58 = vpop.permute.xlu0 %1521  ;;  %6553 = vmatpush.xpose.msk.msra.mxu2 %vm862_vm8, %v959_v45 }
 0x34d   :  { %v8662_v13 = vpop.f32.mrf.mxu1 }
 0x34e   :  { %v1052_v27 = vsel %vm1033_vm9, %v8662_v13, -inf }
 0x34f   :  { %1053 = vmax.xlane.f32.xlu2 %v1052_v27 }
 0x353   :  { %v6925_v46 = vpop.permute.xlu1 %6924 }
 0x354   :  { %v957_v0 = vpop.permute.xlu0 %956  ;;  %v6926_v55 = vunpack.i.l.bf16 %v6925_v46  ;;  %v6927_v18 = vunpack.i.h.bf16 %v6925_v46 }
 0x355   :  { %6554 = vmatpush.xpose.msk.msra.mxu2 %vm862_vm8, %v957_v0  ;;  %v8667_v3 = vpop.f32.mrf.mxu1 }
 0x356   :  { %1836 = vmatpush.msrb.mxu0 %v6926_v55  ;;  %v1055_v43 = vsel %vm1033_vm9, %v8667_v3, -inf }
 0x357   :  { %1056 = vmax.xlane.f32.xlu2 %v1055_v43 }
 0x358   :  { %1837 = vmatpush.msrb.mxu0 %v6927_v18 }
 0x359   :  { %6555 = vmatpush.xpose.msk.msra.mxu2 %vm862_vm8, %v955_v4 }
 0x35a   :  { %1838 = vmatpush.msrb.mxu0 %v6931_v41 }
 0x35c   :  { %1839 = vmatpush.msrb.mxu0 %v6932_v26 }
 0x35d   :  { %6556 = vmatpush.xpose.msk.msra.mxu2 %vm862_vm8, %v953_v63  ;;  %v8673_v7 = vpop.f32.mrf.mxu1 }
 0x35e   :  { %v1600_v53 = vsel %vm1033_vm9, %v8673_v7, -inf }
 0x35f   :  { %1601 = vmax.xlane.f32.xlu2 %v1600_v53 }
 0x361   :  { %6557 = vmatpush.xpose.msk.msra.mxu2 %vm862_vm8, %v951_v37 }
 0x362   :  { %1047 = vmax.xlane.f32.xlu1 %v1046_v12 }
 0x365   :  { %6558 = vmatpush.xpose.msk.msra.mxu2 %vm862_vm8, %v8607_v21  ;;  %v8682_v15 = vpop.f32.mrf.mxu1 }
 0x366   :  { %v1603_v4 = vsel %vm1033_vm9, %v8682_v15, -inf }
 0x367   :  { %1604 = vmax.xlane.f32.xlu0 %v1603_v4 }
 0x369   :  { %6559 = vmatpush.xpose.msk.msra.mxu2 %vm862_vm8, %v8615_v11 }
 0x36d   :  { %6560 = vmatpush.xpose.msk.msra.mxu2 %vm862_vm8, %v8618_v62  ;;  %v8690_v33 = vpop.f32.mrf.mxu1 }
 0x36e   :  { %v1606_v21 = vsel %vm1033_vm9, %v8690_v33, -inf }
 0x36f   :  { %1607 = vmax.xlane.f32.xlu0 %v1606_v21 }
 0x370   :  { %6561 = vmatmul.msk.f32.vlgmr.msra.gmra.mxu2 %vm862_vm8, %v8434_v24 }
 0x371   :  { %6601 = vmatpush.xpose.msk.msrb.mxu2 %vm862_vm8, %v1526_v31 }
 0x375   :  { %6602 = vmatpush.xpose.msk.msrb.mxu2 %vm862_vm8, %v1524_v36 }
 0x378   :  { %6562 = vmatmul.msk.f32.gmra.mxu2 %vm862_vm8, %v8467_v14 }
 0x379   :  { %6603 = vmatpush.xpose.msk.msrb.mxu2 %vm862_vm8, %v1522_v58 }
 0x37d   :  { %6604 = vmatpush.xpose.msk.msrb.mxu2 %vm862_vm8, %v8620_v16 }
 0x380   :  { %6563 = vmatmul.msk.f32.gmra.mxu2 %vm862_vm8, %v8519_v57 }
 0x381   :  { %6605 = vmatpush.xpose.msk.msrb.mxu2 %vm862_vm8, %v8643_v34 }
 0x385   :  { %6606 = vmatpush.xpose.msk.msrb.mxu2 %vm862_vm8, %v8625_v1 }
 0x388   :  { %6564 = vmatmul.msk.f32.gmra.mxu2 %vm862_vm8, %v8530_v6 }
 0x389   :  { %6607 = vmatpush.xpose.msk.msrb.mxu2 %vm862_vm8, %v8622_v23 }
 0x38d   :  { %6608 = vmatpush.xpose.msk.msrb.mxu2 %vm862_vm8, %v8604_v8  ;;  %v1508_v8 = vpop.permute.xlu0 %1507 }
 0x390   :  { %6565 = vmatmul.msk.f32.gmra.mxu2 %vm862_vm8, %v8541_v60 }
 0x392   :  { %v1036_v11 = vpop.xlane.xlu1 %1035 }
 0x393   :  { %v1082_v59 = vsub.f32 %v8627_v42, %v1036_v11 }
 0x395   :  { %v1098_v55 = vmul.f32 1.442695, %v1082_v59 }
 0x398   :  { %6566 = vmatmul.msk.f32.gmra.mxu2 %vm862_vm8, %v8553_v30 }
 0x39a   :  { %v1039_v22 = vpop.xlane.xlu0 %1038 }
 0x39b   :  { %v1083_v63 = vsub.f32 %v8635_v48, %v1039_v22 }
 0x39d   :  { %v1100_v34 = vmul.f32 1.442695, %v1083_v63 }
 0x39f   :  { %7135 = vpow2.f32 %v1100_v34 }
 0x3a0   :  { %6567 = vmatmul.msk.f32.gmra.mxu2 %vm862_vm8, %v8574_v39 }
 0x3a2   :  { %v1042_v47 = vpop.xlane.xlu0 %1041 }
 0x3a3   :  { %v1084_v49 = vsub.f32 %v8639_v5, %v1042_v47 }
 0x3a5   :  { %v1102_v36 = vmul.f32 1.442695, %v1084_v49  ;;  %v8771_v56 = vpop.eup %7135 }
 0x3a6   :  { %v1133_v0 = vsel %vm1033_vm9, %v8771_v56, 0.0 }
 0x3a7   :  { %7137 = vpow2.f32 %v1102_v36 }
 0x3a8   :  { %6568 = vmatmul.msk.f32.gmra.mxu2 %vm862_vm8, %v8584_v32  ;;  %7139 = vpow2.f32 %v1098_v55 }
 0x3aa   :  { %v1045_v29 = vpop.xlane.xlu2 %1044 }
 0x3ab   :  { %v1085_v58 = vsub.f32 %v8645_v9, %v1045_v29 }
 0x3ad   :  { %v1104_v52 = vmul.f32 1.442695, %v1085_v58  ;;  %v8786_v41 = vpop.eup %7137 }
 0x3ae   :  { %v8795_v31 = vpop.eup %7139 }
 0x3b0   :  { %6609 = vmatmul.msk.f32.vlgmr.msrb.gmra.mxu2 %vm862_vm8, %v8609_v25  ;;  %v1510_v25 = vpop.permute.xlu1 %1509 }
 0x3b8   :  { %6610 = vmatmul.msk.f32.gmra.mxu2 %vm862_vm8, %v8631_v38 }
 0x3ba   :  { %v1051_v9 = vpop.xlane.xlu2 %1050 }
 0x3c0   :  { %6611 = vmatmul.msk.f32.gmra.mxu2 %vm862_vm8, %v8633_v19 }
 0x3c2   :  { %v1054_v11 = vpop.xlane.xlu2 %1053 }
 0x3c8   :  { %6612 = vmatmul.msk.f32.gmra.mxu2 %vm862_vm8, %v8613_v54  ;;  %v8741_v54 = vpop.f32.mrf.mxu1 }
 0x3c9   :  { %v1609_v37 = vsel %vm1033_vm9, %v8741_v54, -inf }
 0x3ca   :  { %v1057_v34 = vpop.xlane.xlu2 %1056 }
 0x3d0   :  { %6613 = vmatmul.msk.f32.gmra.mxu2 %vm862_vm8, %v8653_v2  ;;  %v8747_v38 = vpop.f32.mrf.mxu1 }
 0x3d1   :  { %v1612_v48 = vsel %vm1033_vm9, %v8747_v38, -inf }
 0x3d2   :  { %v1602_v36 = vpop.xlane.xlu2 %1601 }
 0x3d3   :  { %v1648_v29 = vsub.f32 %v8673_v7, %v1602_v36 }
 0x3d5   :  { %v1048_v43 = vpop.xlane.xlu1 %1047 }
 0x3d6   :  { %v1086_v26 = vsub.f32 %v8655_v51, %v1048_v43 }
 0x3d8   :  { %6614 = vmatmul.msk.f32.gmra.mxu2 %vm862_vm8, %v8651_v28  ;;  %v8760_v40 = vpop.f32.mrf.mxu1  ;;  %v1106_v4 = vmul.f32 1.442695, %v1086_v26 }
 0x3d9   :  { %v1615_v27 = vsel %vm1033_vm9, %v8760_v40, -inf }
 0x3da   :  { %v1605_v50 = vpop.xlane.xlu0 %1604 }
 0x3db   :  { %v1649_v45 = vsub.f32 %v8682_v15, %v1605_v50  ;;  %v1136_v15 = vsel %vm1033_vm9, %v8786_v41, 0.0 }
 0x3dd   :  { %v1666_v42 = vmul.f32 1.442695, %v1649_v45  ;;  %v8829_v45 = vpack.i.bf16 %v8574_v39, %v8584_v32  ;;  %v8845_v32 = vpack.i.bf16 %v8541_v60, %v8553_v30  ;;  %v8857_v60 = vpack.i.bf16 %v8434_v24, %v8467_v14 }
 0x3df   :  { %7141 = vpow2.f32 %v1666_v42 }
 0x3e0   :  { %6615 = vmatmul.msk.f32.gmra.mxu2 %vm862_vm8, %v1508_v8  ;;  %v8769_v2 = vpop.f32.mrf.mxu1  ;;  %7143 = vpow2.f32 %v1104_v52  ;;  %v1087_v8 = vsub.f32 %v8657_v10, %v1051_v9  ;;  %v1088_v10 = vsub.f32 %v8662_v13, %v1054_v11 }
 0x3e1   :  { %v1618_v53 = vsel %vm1033_vm9, %v8769_v2, -inf  ;;  %7145 = vpow2.f32 %v1106_v4 }
 0x3e2   :  { %v1110_v47 = vmul.f32 1.442695, %v1088_v10 }
 0x3e5   :  { %v8797_v21 = vpop.eup %7141 }
 0x3e6   :  { %v8799_v51 = vpop.eup %7143 }
 0x3e7   :  { %v8808_v22 = vpop.eup %7145 }
 0x3e8   :  { %6616 = vmatmul.msk.f32.gmra.mxu2 %vm862_vm8, %v1510_v25  ;;  %v8784_v18 = vpop.f32.mrf.mxu1  ;;  %v1130_v25 = vsel %vm1033_vm9, %v8795_v31, 0.0 }
 0x3e9   :  { %v1621_v12 = vsel %vm1033_vm9, %v8784_v18, -inf }
 0x3f3   :  { %v8737_v62 = vpop.f32.mrf.mxu2 }
 0x3f4   :  { %v1058_v16 = vsel %vm1033_vm9, %v8737_v62, -inf }
 0x3f5   :  { %1059 = vmax.xlane.f32.xlu1 %v1058_v16  ;;  %v1699_v16 = vsel %vm1033_vm9, %v8797_v21, 0.0 }
 0x3fb   :  { %v8743_v23 = vpop.f32.mrf.mxu2 }
 0x3fc   :  { %v1061_v1 = vsel %vm1033_vm9, %v8743_v23, -inf }
 0x3fd   :  { %1062 = vmax.xlane.f32.xlu2 %v1061_v1  ;;  %v1139_v1 = vsel %vm1033_vm9, %v8799_v51, 0.0 }
 0x403   :  { %v8749_v19 = vpop.f32.mrf.mxu2 }
 0x404   :  { %v1064_v35 = vsel %vm1033_vm9, %v8749_v19, -inf }
 0x405   :  { %1065 = vmax.xlane.f32.xlu0 %v1064_v35  ;;  %v1108_v35 = vmul.f32 1.442695, %v1087_v8 }
 0x407   :  { %7147 = vpow2.f32 %v1108_v35 }
 0x408   :  { %7149 = vpow2.f32 %v1110_v47 }
 0x40b   :  { %v8753_v61 = vpop.f32.mrf.mxu2 }
 0x40c   :  { %v1067_v44 = vsel %vm1033_vm9, %v8753_v61, -inf }
 0x40d   :  { %1610 = vmax.xlane.f32.xlu0 %v1609_v37  ;;  %1068 = vmax.xlane.f32.xlu1 %v1067_v44  ;;  %v1142_v37 = vsel %vm1033_vm9, %v8808_v22, 0.0  ;;  %v8817_v49 = vpop.eup %7147 }
 0x40e   :  { %v8822_v50 = vpop.eup %7149 }
 0x40f   :  { %v1148_v59 = vsel %vm1033_vm9, %v8822_v50, 0.0 }
 0x413   :  { %v8762_v17 = vpop.f32.mrf.mxu2 }
 0x414   :  { %v1070_v28 = vsel %vm1033_vm9, %v8762_v17, -inf }
 0x415   :  { %1613 = vmax.xlane.f32.xlu1 %v1612_v48  ;;  %1071 = vmax.xlane.f32.xlu2 %v1070_v28  ;;  %v1089_v48 = vsub.f32 %v8667_v3, %v1057_v34  ;;  %v1145_v28 = vsel %vm1033_vm9, %v8817_v49, 0.0  ;;  %v1664_v3 = vmul.f32 1.442695, %v1648_v29 }
 0x417   :  { %v1112_v13 = vmul.f32 1.442695, %v1089_v48 }
 0x419   :  { %7151 = vpow2.f32 %v1112_v13 }
 0x41a   :  { %7153 = vpow2.f32 %v1664_v3 }
 0x41b   :  { %v8775_v5 = vpop.f32.mrf.mxu2 }
 0x41c   :  { %v1073_v46 = vsel %vm1033_vm9, %v8775_v5, -inf }
 0x41d   :  { %1616 = vmax.xlane.f32.xlu1 %v1615_v27  ;;  %1074 = vmax.xlane.f32.xlu0 %v1073_v46 }
 0x41e   :  { %1134 = vadd.xlane.f32.xlu2 %v1133_v0  ;;  %v1608_v0 = vpop.xlane.xlu0 %1607 }
 0x41f   :  { %v8833_v58 = vpop.eup %7151  ;;  %v1650_v52 = vsub.f32 %v8690_v33, %v1608_v0 }
 0x420   :  { %v1151_v27 = vsel %vm1033_vm9, %v8833_v58, 0.0  ;;  %v8837_v7 = vpop.eup %7153 }
 0x421   :  { %v1696_v46 = vsel %vm1033_vm9, %v8837_v7, 0.0  ;;  %v1668_v26 = vmul.f32 1.442695, %v1650_v52 }
 0x423   :  { %v8810_v63 = vpop.f32.mrf.mxu2 }
 0x424   :  { %v1076_v44 = vsel %vm1033_vm9, %v8810_v63, -inf }
 0x425   :  { %1619 = vmax.xlane.f32.xlu1 %v1618_v53  ;;  %1622 = vmax.xlane.f32.xlu0 %v1621_v12 }
 0x426   :  { %1137 = vadd.xlane.f32.xlu2 %v1136_v15 }
 0x42b   :  { %v8841_v39 = vpop.f32.mrf.mxu2 }
 0x42c   :  { %v1079_v53 = vsel %vm1033_vm9, %v8841_v39, -inf }
 0x42d   :  { %1131 = vadd.xlane.f32.xlu0 %v1130_v25  ;;  %1700 = vadd.xlane.f32.xlu1 %v1699_v16 }
 0x42e   :  { %1140 = vadd.xlane.f32.xlu2 %v1139_v1 }
 0x433   :  { %v8851_v9 = vpop.f32.mrf.mxu2 }
 0x435   :  { %1143 = vadd.xlane.f32.xlu0 %v1142_v37 }
 0x436   :  { %1077 = vmax.xlane.f32.xlu2 %v1076_v44 }
 0x43d   :  { %1146 = vadd.xlane.f32.xlu0 %v1145_v28 }
 0x445   :  { %1149 = vadd.xlane.f32.xlu0 %v1148_v59 }
 0x446   :  { %6934 = vrot.lane.b32.xlu1 %v8829_v45, %s7722_s23 }
 0x44d   :  { %1152 = vadd.xlane.f32.xlu0 %v1151_v27 }
 0x455   :  { %1697 = vadd.xlane.f32.xlu0 %v1696_v46 }
 0x468   :  { %v1060_v55 = vpop.xlane.xlu1 %1059 }
 0x469   :  { %v1090_v42 = vsub.f32 %v8737_v62, %v1060_v55  ;;  %6939 = vrot.lane.b32.xlu0 %v8845_v32, %s7722_s23  ;;  %v8865_v62 = vpop.f32.mrf.mxu2 }
 0x46a   :  { %v1627_v28 = vsel %vm1033_vm9, %v8865_v62, -inf }
 0x46b   :  { %v1114_v43 = vmul.f32 1.442695, %v1090_v42 }
 0x46d   :  { %7155 = vpow2.f32 %v1114_v43 }
 0x46e   :  { %7157 = vpow2.f32 %v1668_v26 }
 0x470   :  { %1080 = vmax.xlane.f32.xlu1 %v1079_v53 }
 0x471   :  { %6949 = vrot.lane.b32.xlu0 %v8857_v60, %s7722_s23  ;;  %v8873_v16 = vpop.f32.mrf.mxu2 }
 0x472   :  { %v1630_v55 = vsel %vm1033_vm9, %v8873_v16, -inf }
 0x473   :  { %v8861_v30 = vpop.eup %7155 }
 0x474   :  { %v1154_v33 = vsel %vm1033_vm9, %v8861_v30, 0.0  ;;  %v8867_v15 = vpop.eup %7157 }
 0x475   :  { %1155 = vadd.xlane.f32.xlu2 %v1154_v33  ;;  %v1702_v14 = vsel %vm1033_vm9, %v8867_v15, 0.0 }
 0x478   :  { %v1066_v12 = vpop.xlane.xlu0 %1065 }
 0x479   :  { %v1092_v4 = vsub.f32 %v8749_v19, %v1066_v12  ;;  %v1063_v19 = vpop.xlane.xlu2 %1062 }
 0x47a   :  { %v1091_v44 = vsub.f32 %v8743_v23, %v1063_v19 }
 0x47b   :  { %v1118_v24 = vmul.f32 1.442695, %v1092_v4 }
 0x47c   :  { %v1116_v13 = vmul.f32 1.442695, %v1091_v44 }
 0x47d   :  { %7159 = vpow2.f32 %v1118_v24  ;;  %1703 = vadd.xlane.f32.xlu2 %v1702_v14 }
 0x480   :  { %v1069_v8 = vpop.xlane.xlu1 %1068  ;;  %v1611_v11 = vpop.xlane.xlu0 %1610 }
 0x481   :  { %v1651_v25 = vsub.f32 %v8741_v54, %v1611_v11  ;;  %v8883_v54 = vpop.f32.mrf.mxu2  ;;  %v1093_v23 = vsub.f32 %v8753_v61, %v1069_v8 }
 0x483   :  { %v8875_v1 = vpop.eup %7159  ;;  %v1670_v35 = vmul.f32 1.442695, %v1651_v25  ;;  %v1120_v52 = vmul.f32 1.442695, %v1093_v23 }
 0x484   :  { %v1160_v10 = vsel %vm1033_vm9, %v8875_v1, 0.0 }
 0x485   :  { %1161 = vadd.xlane.f32.xlu1 %v1160_v10  ;;  %7161 = vpow2.f32 %v1670_v35 }
 0x488   :  { %v1614_v37 = vpop.xlane.xlu1 %1613  ;;  %v1072_v61 = vpop.xlane.xlu2 %1071 }
 0x489   :  { %v1652_v34 = vsub.f32 %v8747_v38, %v1614_v37  ;;  %v8898_v43 = vpop.f32.mrf.mxu2  ;;  %v1094_v53 = vsub.f32 %v8762_v17, %v1072_v61 }
 0x48b   :  { %v1672_v47 = vmul.f32 1.442695, %v1652_v34  ;;  %v8881_v48 = vpop.eup %7161  ;;  %v1122_v11 = vmul.f32 1.442695, %v1094_v53 }
 0x48c   :  { %v1705_v36 = vsel %vm1033_vm9, %v8881_v48, 0.0 }
 0x48d   :  { %7163 = vpow2.f32 %v1672_v47  ;;  %1628 = vmax.xlane.f32.xlu1 %v1627_v28  ;;  %1706 = vadd.xlane.f32.xlu2 %v1705_v36 }
 0x48e   :  { %7165 = vpow2.f32 %v1116_v13 }
 0x490   :  { %v1617_v29 = vpop.xlane.xlu1 %1616  ;;  %v1075_v59 = vpop.xlane.xlu0 %1074 }
 0x491   :  { %v1653_v38 = vsub.f32 %v8760_v40, %v1617_v29  ;;  %v1095_v3 = vsub.f32 %v8775_v5, %v1075_v59  ;;  %v1135_v19 = vpop.xlane.xlu2 %1134 }
 0x493   :  { %v8892_v27 = vpop.eup %7163  ;;  %v1674_v46 = vmul.f32 1.442695, %v1653_v38  ;;  %v1124_v0 = vmul.f32 1.442695, %v1095_v3 }
 0x494   :  { %v1708_v42 = vsel %vm1033_vm9, %v8892_v27, 0.0  ;;  %v8900_v40 = vpop.eup %7165 }
 0x495   :  { %7167 = vpow2.f32 %v1674_v46  ;;  %1631 = vmax.xlane.f32.xlu1 %v1630_v55  ;;  %1709 = vadd.xlane.f32.xlu2 %v1708_v42  ;;  %v1157_v12 = vsel %vm1033_vm9, %v8900_v40, 0.0 }
 0x496   :  { %7169 = vpow2.f32 %v1124_v0 }
 0x497   :  { %7171 = vpow2.f32 %v1120_v52 }
 0x498   :  { %v1620_v5 = vpop.xlane.xlu1 %1619  ;;  %v1623_v26 = vpop.xlane.xlu0 %1622 }
 0x499   :  { %v1654_v33 = vsub.f32 %v8769_v2, %v1620_v5  ;;  %v8916_v2 = vpop.f32.mrf.mxu2  ;;  %v1655_v10 = vsub.f32 %v8784_v18, %v1623_v26  ;;  %v1138_v38 = vpop.xlane.xlu2 %1137 }
 0x49a   :  { %v1639_v28 = vsel %vm1033_vm9, %v8916_v2, -inf }
 0x49b   :  { %v8906_v4 = vpop.eup %7167  ;;  %v1676_v24 = vmul.f32 1.442695, %v1654_v33  ;;  %1158 = vadd.xlane.f32.xlu0 %v1157_v12  ;;  %v1678_v47 = vmul.f32 1.442695, %v1655_v10 }
 0x49c   :  { %v8908_v14 = vpop.eup %7169  ;;  %v1711_v8 = vsel %vm1033_vm9, %v8906_v4, 0.0 }
 0x49d   :  { %7173 = vpow2.f32 %v1676_v24  ;;  %v1169_v25 = vsel %vm1033_vm9, %v8908_v14, 0.0  ;;  %1712 = vadd.xlane.f32.xlu2 %v1711_v8  ;;  %v8914_v17 = vpop.eup %7171  ;;  %v1636_v24 = vsel %vm1033_vm9, %v8898_v43, -inf  ;;  %v8949_v8 = vpack.i.bf16 %v8519_v57, %v8530_v6 }
 0x49e   :  { %1170 = vadd.xlane.f32.xlu1 %v1169_v25  ;;  %7175 = vpow2.f32 %v1122_v11  ;;  %v1163_v37 = vsel %vm1033_vm9, %v8914_v17, 0.0 }
 0x4a0   :  { %v1132_v35 = vpop.xlane.xlu0 %1131  ;;  %v1701_v55 = vpop.xlane.xlu1 %1700 }
 0x4a1   :  { %7177 = vrcp.f32 %v1132_v35  ;;  %v8929_v29 = vpop.f32.mrf.mxu2  ;;  %v1141_v61 = vpop.xlane.xlu2 %1140 }
 0x4a2   :  { %7179 = vrcp.f32 %v1135_v19  ;;  %v1642_v3 = vsel %vm1033_vm9, %v8929_v29, -inf }
 0x4a3   :  { %v8921_v44 = vpop.eup %7173  ;;  %1164 = vadd.xlane.f32.xlu0 %v1163_v37  ;;  %7181 = vpow2.f32 %v1678_v47 }
 0x4a4   :  { %v1714_v34 = vsel %vm1033_vm9, %v8921_v44, 0.0  ;;  %v8927_v13 = vpop.eup %7175  ;;  %7183 = vrcp.f32 %v1138_v38 }
 0x4a5   :  { %1715 = vadd.xlane.f32.xlu2 %v1714_v34  ;;  %v1166_v23 = vsel %vm1033_vm9, %v8927_v13, 0.0  ;;  %7185 = vrcp.f32 %v1141_v61 }
 0x4a6   :  { %1640 = vmax.xlane.f32.xlu1 %v1639_v28 }
 0x4a7   :  { %v7178_v36 = vpop.eup %7177 }
 0x4a8   :  { %v1144_v18 = vpop.xlane.xlu0 %1143  ;;  %v1194_v59 = vmul.f32 %v7178_v36, %v8795_v31  ;;  %v7180_v46 = vpop.eup %7179 }
 0x4a9   :  { %v8937_v0 = vpop.eup %7181  ;;  %v1195_v52 = vmul.f32 %v7180_v46, %v8771_v56  ;;  %7187 = vrcp.f32 %v1144_v18  ;;  %v1078_v36 = vpop.xlane.xlu2 %1077 }
 0x4aa   :  { %6569 = vmatmul.msk.f32.vlgmr.msra.gmra.mxu3 %vm1033_vm9, %v1194_v59  ;;  %v1717_v31 = vsel %vm1033_vm9, %v8937_v0, 0.0  ;;  %v7184_v5 = vpop.eup %7183 }
 0x4ab   :  { %1167 = vadd.xlane.f32.xlu0 %v1166_v23  ;;  %v1196_v12 = vmul.f32 %v7184_v5, %v8786_v41  ;;  %v7186_v11 = vpop.eup %7185 }
 0x4ac   :  { %v1197_v41 = vmul.f32 %v7186_v11, %v8799_v51 }
 0x4ae   :  { %1643 = vmax.xlane.f32.xlu1 %v1642_v3 }
 0x4af   :  { %v7188_v35 = vpop.eup %7187 }
 0x4b0   :  { %v1147_v42 = vpop.xlane.xlu0 %1146  ;;  %v1198_v19 = vmul.f32 %v7188_v35, %v8808_v22 }
 0x4b1   :  { %7189 = vrcp.f32 %v1147_v42  ;;  %v1633_v42 = vsel %vm1033_vm9, %v8883_v54, -inf }
 0x4b2   :  { %6570 = vmatmul.msk.f32.gmra.mxu3 %vm1033_vm9, %v1195_v52 }
 0x4b3   :  { %1718 = vadd.xlane.f32.xlu0 %v1717_v31 }
 0x4b7   :  { %v7190_v57 = vpop.eup %7189 }
 0x4b8   :  { %v6935_v26 = vpop.permute.xlu1 %6934  ;;  %v1150_v53 = vpop.xlane.xlu0 %1149  ;;  %v1199_v51 = vmul.f32 %v7190_v57, %v8817_v49 }
 0x4b9   :  { %v6936_v33 = vunpack.i.l.bf16 %v6935_v26  ;;  %v6937_v56 = vunpack.i.h.bf16 %v6935_v26 }
 0x4ba   :  { %6571 = vmatmul.msk.f32.gmra.mxu3 %vm1033_vm9, %v1196_v12 }
 0x4bb   :  { %1355 = vmatpush.msrb.mxu3 %v6936_v33  ;;  %1637 = vmax.xlane.f32.xlu0 %v1636_v24 }
 0x4bd   :  { %1356 = vmatpush.msrb.mxu3 %v6937_v56  ;;  %6944 = vrot.lane.b32.xlu2 %v8949_v8, %s7722_s23 }
 0x4c0   :  { %v1153_v25 = vpop.xlane.xlu0 %1152 }
 0x4c2   :  { %6572 = vmatmul.msk.f32.gmra.mxu3 %vm1033_vm9, %v1197_v41 }
 0x4c8   :  { %v1698_v10 = vpop.xlane.xlu0 %1697 }
 0x4c9   :  { %7191 = vrcp.f32 %v1698_v10 }
 0x4ca   :  { %6573 = vmatmul.msk.f32.gmra.mxu3 %vm1033_vm9, %v1198_v19  ;;  %7193 = vrcp.f32 %v1701_v55 }
 0x4cb   :  { %7195 = vrcp.f32 %v1150_v53 }
 0x4cc   :  { %7197 = vrcp.f32 %v1153_v25 }
 0x4cf   :  { %v7192_v6 = vpop.eup %7191  ;;  %6959 = vrot.lane.b32.xlu0 %v8845_v32, %s7723_s24 }
 0x4d0   :  { %v1760_v37 = vmul.f32 %v7192_v6, %v8837_v7  ;;  %v7194_v34 = vpop.eup %7193 }
 0x4d1   :  { %v7196_v47 = vpop.eup %7195  ;;  %v1761_v22 = vmul.f32 %v7194_v34, %v8797_v21  ;;  %v1096_v21 = vsub.f32 %v8810_v63, %v1078_v36 }
 0x4d2   :  { %6617 = vmatmul.msk.f32.vlgmr.msrb.gmra.mxu0 %vm1033_vm9, %v1760_v37  ;;  %6574 = vmatmul.msk.f32.gmra.mxu3 %vm1033_vm9, %v1199_v51  ;;  %v1200_v28 = vmul.f32 %v7196_v47, %v8822_v50  ;;  %v7198_v49 = vpop.eup %7197  ;;  %v1624_v50 = vsel %vm1033_vm9, %v8851_v9, -inf }
 0x4d3   :  { %v1201_v59 = vmul.f32 %v7198_v49, %v8833_v58  ;;  %v1126_v46 = vmul.f32 1.442695, %v1096_v21 }
 0x4d5   :  { %7199 = vpow2.f32 %v1126_v46 }
 0x4da   :  { %6618 = vmatmul.msk.f32.gmra.mxu0 %vm1033_vm9, %v1761_v22  ;;  %6575 = vmatmul.msk.f32.gmra.mxu3 %vm1033_vm9, %v1200_v28 }
 0x4db   :  { %v6940_v18 = vpop.permute.xlu0 %6939  ;;  %v8975_v52 = vpop.eup %7199 }
 0x4dc   :  { %v6941_v7 = vunpack.i.l.bf16 %v6940_v18  ;;  %v6942_v32 = vunpack.i.h.bf16 %v6940_v18  ;;  %v1172_v31 = vsel %vm1033_vm9, %v8975_v52, 0.0 }
 0x4de   :  { %1357 = vmatpush.msrb.mxu3 %v6941_v7 }
 0x4e0   :  { %1358 = vmatpush.msrb.mxu3 %v6942_v32 }
 0x4e2   :  { %6576 = vmatmul.msk.f32.gmra.mxu3 %vm1033_vm9, %v1201_v59 }
 0x4e3   :  { %v1081_v23 = vpop.xlane.xlu1 %1080  ;;  %v6950_v33 = vpop.permute.xlu0 %6949 }
 0x4e4   :  { %v1097_v38 = vsub.f32 %v8841_v39, %v1081_v23  ;;  %v6951_v32 = vunpack.i.l.bf16 %v6950_v33  ;;  %v6952_v49 = vunpack.i.h.bf16 %v6950_v33 }
 0x4e6   :  { %1625 = vmax.xlane.f32.xlu2 %v1624_v50  ;;  %v1128_v55 = vmul.f32 1.442695, %v1097_v38 }
 0x4e8   :  { %v1156_v3 = vpop.xlane.xlu2 %1155  ;;  %7201 = vpow2.f32 %v1128_v55 }
 0x4ee   :  { %1634 = vmax.xlane.f32.xlu2 %v1633_v42  ;;  %v8977_v63 = vpop.eup %7201 }
 0x4ef   :  { %v1175_v61 = vsel %vm1033_vm9, %v8977_v63, 0.0 }
 0x4f0   :  { %v1704_v58 = vpop.xlane.xlu2 %1703 }
 0x4f1   :  { %7203 = vrcp.f32 %v1704_v58 }
 0x4f6   :  { %1173 = vadd.xlane.f32.xlu2 %v1172_v31 }
 0x4f7   :  { %v7204_v39 = vpop.eup %7203 }
 0x4f8   :  { %v1762_v5 = vmul.f32 %v7204_v39, %v8867_v15  ;;  %v1162_v53 = vpop.xlane.xlu1 %1161 }
 0x4f9   :  { %1176 = vadd.xlane.f32.xlu0 %v1175_v61 }
 0x4fa   :  { %6619 = vmatmul.msk.f32.gmra.mxu0 %vm1033_vm9, %v1762_v5 }
 0x500   :  { %v1707_v26 = vpop.xlane.xlu2 %1706  ;;  %v1629_v11 = vpop.xlane.xlu1 %1628 }
 0x501   :  { %7205 = vrcp.f32 %v1707_v26  ;;  %v1657_v18 = vsub.f32 %v8865_v62, %v1629_v11 }
 0x503   :  { %v1682_v36 = vmul.f32 1.442695, %v1657_v18 }
 0x507   :  { %v7206_v12 = vpop.eup %7205 }
 0x508   :  { %v1710_v24 = vpop.xlane.xlu2 %1709  ;;  %v1763_v56 = vmul.f32 %v7206_v12, %v8881_v48  ;;  %v1389_v48 = vld [vmem:[%s11406_s5 + $0x8] sm:$0xff]  ;;  %v8996_v10 = vpop.xlane.xlu1 %1631 }
 0x509   :  { %7207 = vrcp.f32 %v1710_v24  ;;  %6881 = vmatpush.msra.mxu2 %v1389_v48 }
 0x50a   :  { %6620 = vmatmul.msk.f32.gmra.mxu0 %vm1033_vm9, %v1763_v56 }
 0x50d   :  { %6969 = vrot.lane.b32.xlu0 %v8857_v60, %s7723_s24  ;;  %v1388_v60 = vld [vmem:[%s11406_s5] sm:$0xff] }
 0x50e   :  { %v1159_v25 = vpop.xlane.xlu0 %1158  ;;  %6954 = vrot.lane.b32.xlu2 %v8829_v45, %s7723_s24  ;;  %6882 = vmatpush.msra.mxu2 %v1388_v60 }
 0x50f   :  { %v7208_v15 = vpop.eup %7207 }
 0x510   :  { %v1713_v41 = vpop.xlane.xlu2 %1712  ;;  %v1764_v35 = vmul.f32 %v7208_v15, %v8892_v27 }
 0x511   :  { %7209 = vrcp.f32 %v1713_v41  ;;  %v9003_v51 = vpop.xlane.xlu1 %1170 }
 0x512   :  { %6621 = vmatmul.msk.f32.gmra.mxu0 %vm1033_vm9, %v1764_v35 }
 0x516   :  { %v1165_v19 = vpop.xlane.xlu0 %1164 }
 0x517   :  { %v7210_v45 = vpop.eup %7209 }
 0x518   :  { %v1716_v57 = vpop.xlane.xlu2 %1715  ;;  %v1765_v27 = vmul.f32 %v7210_v45, %v8906_v4 }
 0x519   :  { %7211 = vrcp.f32 %v1716_v57  ;;  %v1641_v23 = vpop.xlane.xlu1 %1640 }
 0x51a   :  { %6622 = vmatmul.msk.f32.gmra.mxu0 %vm1033_vm9, %v1765_v27  ;;  %7213 = vrcp.f32 %v1156_v3  ;;  %v1661_v21 = vsub.f32 %v8916_v2, %v1641_v23  ;;  %v6634_v3 = vld [vmem:[%s11406_s5 + $0x18] sm:$0xff] }
 0x51b   :  { %6879 = vmatpush.msra.mxu1 %v6634_v3  ;;  %2019 = vmatpush.msra.mxu0 %v6634_v3 }
 0x51c   :  { %v1690_v46 = vmul.f32 1.442695, %v1661_v21 }
 0x51e   :  { %v1168_v6 = vpop.xlane.xlu0 %1167 }
 0x51f   :  { %v7212_v37 = vpop.eup %7211 }
 0x520   :  { %v6945_v34 = vpop.permute.xlu2 %6944  ;;  %v1766_v47 = vmul.f32 %v7212_v37, %v8921_v44  ;;  %v7214_v7 = vpop.eup %7213 }
 0x521   :  { %v6946_v22 = vunpack.i.l.bf16 %v6945_v34  ;;  %v6947_v28 = vunpack.i.h.bf16 %v6945_v34  ;;  %v1202_v59 = vmul.f32 %v7214_v7, %v8861_v30  ;;  %v6633_v30 = vld [vmem:[%s11406_s5 + $0x10] sm:$0xff] }
 0x522   :  { %6623 = vmatmul.msk.f32.gmra.mxu0 %vm1033_vm9, %v1766_v47  ;;  %6880 = vmatpush.msra.mxu1 %v6633_v30  ;;  %v1644_v47 = vpop.xlane.xlu1 %1643 }
 0x523   :  { %1359 = vmatpush.msrb.mxu3 %v6946_v22  ;;  %2020 = vmatpush.msra.mxu0 %v6633_v30 }
 0x525   :  { %1360 = vmatpush.msrb.mxu3 %v6947_v28  ;;  %2132 = vmatpush.msrb.mxu0 %v1389_v48 }
 0x526   :  { %v1719_v4 = vpop.xlane.xlu0 %1718 }
 0x527   :  { %7215 = vrcp.f32 %v1719_v4  ;;  %1361 = vmatpush.msrb.mxu3 %v6951_v32  ;;  %2133 = vmatpush.msrb.mxu0 %v1388_v60 }
 0x528   :  { %7217 = vrcp.f32 %v1159_v25 }
 0x529   :  { %1362 = vmatpush.msrb.mxu3 %v6952_v49  ;;  %7219 = vpow2.f32 %v1682_v36 }
 0x52a   :  { %6577 = vmatmul.msk.f32.vlgmr.msrb.gmra.mxu3 %vm1033_vm9, %v1202_v59  ;;  %7221 = vrcp.f32 %v1162_v53 }
 0x52b   :  { %7223 = vpow2.f32 %v1690_v46 }
 0x52c   :  { %7225 = vrcp.f32 %v1165_v19 }
 0x52d   :  { %v7216_v44 = vpop.eup %7215  ;;  %v1275_v38 = vpop.f32.mrf.mxu3  ;;  %7227 = vrcp.f32 %v1168_v6 }
 0x52e   :  { %v7218_v62 = vpop.eup %7217  ;;  %v1767_v50 = vmul.f32 %v7216_v44, %v8937_v0  ;;  %v9023_v0 = vpop.f32.mrf.mxu2  ;;  %7229 = vrcp.f32 %v9003_v51 }
 0x52f   :  { %v1203_v55 = vmul.f32 %v7218_v62, %v8900_v40  ;;  %v9020_v2 = vpop.eup %7219  ;;  %v1645_v40 = vsel %vm1033_vm9, %v9023_v0, -inf  ;;  %v1638_v19 = vpop.xlane.xlu0 %1637 }
 0x530   :  { %6624 = vmatmul.msk.f32.gmra.mxu0 %vm1033_vm9, %v1767_v50  ;;  %v7222_v42 = vpop.eup %7221  ;;  %v1723_v58 = vsel %vm1033_vm9, %v9020_v2, 0.0  ;;  %v1660_v27 = vsub.f32 %v8898_v43, %v1638_v19  ;;  %v7649_v19 = vld [vmem:[%s11401_s0 + $0x8] sm:$0xff] }
 0x531   :  { %v1204_v39 = vmul.f32 %v7222_v42, %v8875_v1  ;;  %v9031_v61 = vpop.eup %7223 }
 0x532   :  { %6578 = vmatmul.msk.f32.gmra.mxu3 %vm1033_vm9, %v1203_v55  ;;  %v7226_v5 = vpop.eup %7225  ;;  %v1735_v26 = vsel %vm1033_vm9, %v9031_v61, 0.0  ;;  %v1688_v34 = vmul.f32 1.442695, %v1660_v27 }
 0x533   :  { %v1205_v33 = vmul.f32 %v7226_v5, %v8914_v17  ;;  %v7228_v12 = vpop.eup %7227 }
 0x534   :  { %v1206_v1 = vmul.f32 %v7228_v12, %v8927_v13  ;;  %v7230_v56 = vpop.eup %7229 }
 0x535   :  { %v1278_v31 = vpop.f32.mrf.mxu3  ;;  %v1207_v17 = vmul.f32 %v7230_v56, %v8908_v14  ;;  %v9103_v56 = vld [vmem:[%s11407_s6] ss:$0 sm:$0xff] }
 0x536   :  { %6652 = vmatmul.msk.f32.vlgmr.msra.gmra.mxu2 %vm862_vm8, %v1278_v31 }
 0x537   :  { %1724 = vadd.xlane.f32.xlu0 %v1723_v58  ;;  %1646 = vmax.xlane.f32.xlu2 %v1645_v40 }
 0x53a   :  { %6579 = vmatmul.msk.f32.gmra.mxu3 %vm1033_vm9, %v1204_v39 }
 0x53d   :  { %v1281_v53 = vpop.f32.mrf.mxu3 }
 0x53e   :  { %6653 = vmatmul.msk.f32.gmra.mxu2 %vm862_vm8, %v1281_v53 }
 0x53f   :  { %1736 = vadd.xlane.f32.xlu0 %v1735_v26 }
 0x541   :  { %v6960_v37 = vpop.permute.xlu0 %6959 }
 0x542   :  { %6580 = vmatmul.msk.f32.gmra.mxu3 %vm1033_vm9, %v1205_v33  ;;  %v6961_v21 = vunpack.i.l.bf16 %v6960_v37  ;;  %v6962_v50 = vunpack.i.h.bf16 %v6960_v37 }
 0x545   :  { %v1284_v24 = vpop.f32.mrf.mxu3 }
 0x546   :  { %6654 = vmatmul.msk.f32.gmra.mxu2 %vm862_vm8, %v1284_v24 }
 0x54a   :  { %6581 = vmatmul.msk.f32.gmra.mxu3 %vm1033_vm9, %v1206_v1 }
 0x54d   :  { %v1287_v11 = vpop.f32.mrf.mxu3 }
 0x54e   :  { %6655 = vmatmul.msk.f32.gmra.mxu2 %vm862_vm8, %v1287_v11 }
 0x54f   :  { %v1841_v25 = vpop.f32.mrf.mxu0 }
 0x550   :  { %6635 = vmatmul.msk.f32.vlgmr.msra.gmra.mxu0 %vm862_vm8, %v1841_v25 }
 0x552   :  { %6582 = vmatmul.msk.f32.gmra.mxu3 %vm1033_vm9, %v1207_v17 }
 0x555   :  { %v1290_v15 = vpop.f32.mrf.mxu3 }
 0x556   :  { %6656 = vmatmul.msk.f32.gmra.mxu2 %vm862_vm8, %v1290_v15 }
 0x557   :  { %v1844_v41 = vpop.f32.mrf.mxu0 }
 0x558   :  { %6636 = vmatmul.msk.f32.vlgmr.msra.gmra.mxu1 %vm862_vm8, %v1844_v41  ;;  %6651 = vmatmul.msk.f32.vlgmr.msrb.gmra.mxu0 %vm862_vm8, %v1275_v38 }
 0x559   :  { %v1626_v13 = vpop.xlane.xlu2 %1625 }
 0x55a   :  { %v1656_v35 = vsub.f32 %v8851_v9, %v1626_v13 }
 0x55c   :  { %v1680_v48 = vmul.f32 1.442695, %v1656_v35 }
 0x55d   :  { %v1293_v60 = vpop.f32.mrf.mxu3 }
 0x55e   :  { %7231 = vpow2.f32 %v1680_v48  ;;  %6657 = vmatmul.msk.f32.gmra.mxu2 %vm862_vm8, %v1293_v60 }
 0x561   :  { %v1635_v14 = vpop.xlane.xlu2 %1634 }
 0x562   :  { %v1659_v45 = vsub.f32 %v8883_v54, %v1635_v14  ;;  %v1662_v54 = vsub.f32 %v8929_v29, %v1644_v47  ;;  %v7650_v14 = vld [vmem:[%s11401_s0] sm:$0xff] }
 0x564   :  { %v9053_v57 = vpop.eup %7231  ;;  %v1686_v6 = vmul.f32 1.442695, %v1659_v45  ;;  %v1692_v4 = vmul.f32 1.442695, %v1662_v54 }
 0x565   :  { %v1720_v51 = vsel %vm1033_vm9, %v9053_v57, 0.0  ;;  %v1296_v9 = vpop.f32.mrf.mxu3 }
 0x566   :  { %7233 = vpow2.f32 %v1686_v6  ;;  %1721 = vadd.xlane.f32.xlu1 %v1720_v51  ;;  %6658 = vmatmul.msk.f32.gmra.mxu2 %vm862_vm8, %v1296_v9 }
 0x569   :  { %v1174_v22 = vpop.xlane.xlu2 %1173 }
 0x56a   :  { %7235 = vrcp.f32 %v1174_v22 }
 0x56b   :  { %7237 = vpow2.f32 %v1688_v34 }
 0x56c   :  { %v9059_v28 = vpop.eup %7233  ;;  %v1177_v43 = vpop.xlane.xlu0 %1176 }
 0x56d   :  { %v1729_v18 = vsel %vm1033_vm9, %v9059_v28, 0.0  ;;  %7239 = vrcp.f32 %v1177_v43 }
 0x56e   :  { %1730 = vadd.xlane.f32.xlu2 %v1729_v18  ;;  %7241 = vpow2.f32 %v1692_v4 }
 0x570   :  { %v7236_v7 = vpop.eup %7235 }
 0x571   :  { %v6955_v32 = vpop.permute.xlu2 %6954  ;;  %v1208_v49 = vmul.f32 %v7236_v7, %v8975_v52  ;;  %v9065_v36 = vpop.eup %7237 }
 0x572   :  { %v6956_v59 = vunpack.i.l.bf16 %v6955_v32  ;;  %v6957_v23 = vunpack.i.h.bf16 %v6955_v32  ;;  %v1732_v29 = vsel %vm1033_vm9, %v9065_v36, 0.0 }
 0x573   :  { %6583 = vmatmul.msk.f32.gmra.mxu3 %vm1033_vm9, %v1208_v49  ;;  %v7240_v44 = vpop.eup %7239 }
 0x574   :  { %1921 = vmatpush.msra.mxu3 %v6956_v59  ;;  %v1209_v52 = vmul.f32 %v7240_v44, %v8977_v63  ;;  %v9072_v38 = vpop.eup %7241  ;;  %v1658_v63 = vsub.f32 %v8873_v16, %v8996_v10 }
 0x575   :  { %v1738_v3 = vsel %vm1033_vm9, %v9072_v38, 0.0 }
 0x576   :  { %1733 = vadd.xlane.f32.xlu2 %v1732_v29  ;;  %1922 = vmatpush.msra.mxu3 %v6957_v23  ;;  %v1684_v42 = vmul.f32 1.442695, %v1658_v63  ;;  %v7651_v29 = vld [vmem:[%s11401_s0 + $0x10] sm:$0xff] }
 0x577   :  { %v1847_v62 = vpop.f32.mrf.mxu0 }
 0x578   :  { %6637 = vmatmul.msk.f32.gmra.mxu1 %vm862_vm8, %v1847_v62  ;;  %1923 = vmatpush.msra.mxu3 %v6961_v21  ;;  %7243 = vpow2.f32 %v1684_v42 }
 0x57a   :  { %1924 = vmatpush.msra.mxu3 %v6962_v50 }
 0x57b   :  { %6584 = vmatmul.msk.f32.gmra.mxu3 %vm1033_vm9, %v1209_v52 }
 0x57e   :  { %1739 = vadd.xlane.f32.xlu2 %v1738_v3  ;;  %v9085_v31 = vpop.eup %7243 }
 0x57f   :  { %6964 = vrot.lane.b32.xlu1 %v8949_v8, %s7723_s24  ;;  %v1726_v8 = vsel %vm1033_vm9, %v9085_v31, 0.0  ;;  %v6970_v51 = vpop.permute.xlu0 %6969 }
 0x580   :  { %v6971_v4 = vunpack.i.l.bf16 %v6970_v51  ;;  %v6972_v59 = vunpack.i.h.bf16 %v6970_v51 }
 0x587   :  { %v1850_v30 = vpop.f32.mrf.mxu0 }
 0x588   :  { %6638 = vmatmul.msk.f32.gmra.mxu1 %vm862_vm8, %v1850_v30 }
 0x58f   :  { %v1853_v46 = vpop.f32.mrf.mxu0 }
 0x590   :  { %6639 = vmatmul.msk.f32.gmra.mxu1 %vm862_vm8, %v1853_v46 }
 0x597   :  { %v1856_v55 = vpop.f32.mrf.mxu0 }
 0x598   :  { %6640 = vmatmul.msk.f32.gmra.mxu1 %vm862_vm8, %v1856_v55  ;;  %v7652_v55 = vld [vmem:[%s11401_s0 + $0x18] sm:$0xff] }
 0x59f   :  { %v1859_v58 = vpop.f32.mrf.mxu0 }
 0x5a0   :  { %6641 = vmatmul.msk.f32.gmra.mxu1 %vm862_vm8, %v1859_v58 }
 0x5a9   :  { %1727 = vadd.xlane.f32.xlu1 %v1726_v8 }
 0x5aa   :  { %v1647_v40 = vpop.xlane.xlu2 %1646  ;;  %v1725_v43 = vpop.xlane.xlu0 %1724 }
 0x5ab   :  { %v1663_v39 = vsub.f32 %v9023_v0, %v1647_v40 }
 0x5ad   :  { %v1862_v5 = vpop.f32.mrf.mxu0  ;;  %v1694_v26 = vmul.f32 1.442695, %v1663_v39  ;;  %v1364_v16 = vpop.f32.mrf.mxu3  ;;  %v7653_v39 = vld [vmem:[%s11401_s0 + $0x20] sm:$0xff] }
 0x5ae   :  { %6642 = vmatmul.msk.f32.gmra.mxu1 %vm862_vm8, %v1862_v5  ;;  %6659 = vmatmul.msk.f32.gmra.mxu2 %vm862_vm8, %v1364_v16 }
 0x5af   :  { %7245 = vpow2.f32 %v1694_v26 }
 0x5b5   :  { %v9092_v10 = vpop.eup %7245  ;;  %v1367_v53 = vpop.f32.mrf.mxu3 }
 0x5b6   :  { %6660 = vmatmul.msk.f32.gmra.mxu2 %vm862_vm8, %v1367_v53  ;;  %v1741_v33 = vsel %vm1033_vm9, %v9092_v10, 0.0 }
 0x5b7   :  { %1742 = vadd.xlane.f32.xlu0 %v1741_v33 }
 0x5b9   :  { %v2138_v11 = vpop.f32.mrf.mxu2 }
 0x5bd   :  { %v1370_v12 = vpop.f32.mrf.mxu3 }
 0x5be   :  { %6661 = vmatmul.msk.f32.gmra.mxu2 %vm862_vm8, %v1370_v12 }
 0x5c1   :  { %v2141_v47 = vpop.f32.mrf.mxu2 }
 0x5c5   :  { %v1373_v0 = vpop.f32.mrf.mxu3 }
 0x5c6   :  { %6662 = vmatmul.msk.f32.gmra.mxu2 %vm862_vm8, %v1373_v0  ;;  %v7654_v0 = vld [vmem:[%s11401_s0 + $0x28] sm:$0xff] }
 0x5c9   :  { %v2144_v52 = vpop.f32.mrf.mxu2 }
 0x5cd   :  { %v2022_v24 = vpop.f32.mrf.mxu0  ;;  %v1376_v1 = vpop.f32.mrf.mxu3 }
 0x5ce   :  { %6663 = vmatmul.msk.f32.gmra.mxu2 %vm862_vm8, %v1376_v1 }
 0x5d1   :  { %v2147_v63 = vpop.f32.mrf.mxu2 }
 0x5d5   :  { %v2025_v25 = vpop.f32.mrf.mxu1  ;;  %v1379_v17 = vpop.f32.mrf.mxu3 }
 0x5d6   :  { %v2139_v15 = vadd.f32 %v2138_v11, %v2025_v25  ;;  %v2135_v41 = vpop.f32.mrf.mxu0  ;;  %6664 = vmatmul.msk.f32.gmra.mxu2 %vm862_vm8, %v1379_v17 }
 0x5d7   :  { %v2136_v13 = vadd.f32 %v2135_v41, %v2022_v24 }
 0x5d8   :  { %v2188_v35 = vadd.f32 %v9103_v56, %v2139_v15 }
 0x5d9   :  { %v2187_v48 = vadd.f32 %v9103_v56, %v2136_v13  ;;  %v1722_v37 = vpop.xlane.xlu1 %1721  ;;  %v2150_v26 = vpop.f32.mrf.mxu2 }
 0x5da   :  { %v9111_v60 = vadd.f32 %v7649_v19, %v2188_v35  ;;  %7247 = vrcp.f32 %v1722_v37  ;;  %v7655_v35 = vld [vmem:[%s11401_s0 + $0x30] sm:$0xff] }
 0x5db   :  { %v9116_v45 = vadd.f32 %v7650_v14, %v2187_v48  ;;  %7249 = vrcp.f32 %v1725_v43 }
 0x5dc   :  { %v2224_v27 = vsel %vm63_vm0, %v9111_v60, 0.0 }
 0x5dd   :  { %2225 = vadd.xlane.f32.xlu2 %v2224_v27  ;;  %v2221_v6 = vsel %vm63_vm0, %v9116_v45, 0.0 }
 0x5de   :  { %2222 = vadd.xlane.f32.xlu1 %v2221_v6 }
 0x5e0   :  { %v7248_v7 = vpop.eup %7247 }
 0x5e1   :  { %v1768_v23 = vmul.f32 %v7248_v7, %v9053_v57  ;;  %v7250_v62 = vpop.eup %7249  ;;  %v2153_v25 = vpop.f32.mrf.mxu2 }
 0x5e2   :  { %v1769_v57 = vmul.f32 %v7250_v62, %v9020_v2  ;;  %v1731_v15 = vpop.xlane.xlu2 %1730 }
 0x5ea   :  { %v1734_v6 = vpop.xlane.xlu2 %1733 }
 0x5f1   :  { %v6965_v9 = vpop.permute.xlu1 %6964 }
 0x5f2   :  { %v6966_v34 = vunpack.i.l.bf16 %v6965_v9  ;;  %v6967_v22 = vunpack.i.h.bf16 %v6965_v9  ;;  %v1737_v9 = vpop.xlane.xlu0 %1736 }
 0x5f4   :  { %1925 = vmatpush.msra.mxu3 %v6966_v34 }
 0x5f5   :  { %v2028_v54 = vpop.f32.mrf.mxu1 }
 0x5f6   :  { %v2142_v18 = vadd.f32 %v2141_v47, %v2028_v54  ;;  %v1382_v32 = vpop.f32.mrf.mxu3  ;;  %1926 = vmatpush.msra.mxu3 %v6967_v22  ;;  %v1740_v22 = vpop.xlane.xlu2 %1739 }
 0x5f7   :  { %6665 = vmatmul.msk.f32.gmra.mxu2 %vm862_vm8, %v1382_v32 }
 0x5f8   :  { %v2189_v49 = vadd.f32 %v9103_v56, %v2142_v18  ;;  %1927 = vmatpush.msra.mxu3 %v6971_v4 }
 0x5fa   :  { %v9128_v44 = vadd.f32 %v7651_v29, %v2189_v49  ;;  %1928 = vmatpush.msra.mxu3 %v6972_v59 }
 0x5fb   :  { %6625 = vmatmul.msk.f32.vlgmr.msra.gmra.mxu3 %vm1033_vm9, %v1768_v23  ;;  %v2156_v23 = vpop.f32.mrf.mxu2 }
 0x5fc   :  { %v2227_v21 = vsel %vm63_vm0, %v9128_v44, 0.0 }
 0x5fd   :  { %2228 = vadd.xlane.f32.xlu0 %v2227_v21 }
 0x5fe   :  { %v1385_v50 = vpop.f32.mrf.mxu3 }
 0x5ff   :  { %6666 = vmatmul.msk.f32.gmra.mxu2 %vm862_vm8, %v1385_v50 }
 0x603   :  { %6626 = vmatmul.msk.f32.gmra.mxu3 %vm1033_vm9, %v1769_v57 }
 0x605   :  { %v2031_v3 = vpop.f32.mrf.mxu1 }
 0x606   :  { %v2145_v30 = vadd.f32 %v2144_v52, %v2031_v3  ;;  %v7656_v3 = vld [vmem:[%s11401_s0 + $0x38] sm:$0xff] }
 0x608   :  { %v2190_v46 = vadd.f32 %v9103_v56, %v2145_v30 }
 0x60a   :  { %v9140_v42 = vadd.f32 %v7652_v55, %v2190_v46 }
 0x60c   :  { %v2230_v58 = vsel %vm63_vm0, %v9140_v42, 0.0 }
 0x60d   :  { %v2034_v8 = vpop.f32.mrf.mxu1  ;;  %2231 = vadd.xlane.f32.xlu1 %v2230_v58 }
 0x60e   :  { %v2148_v40 = vadd.f32 %v2147_v63, %v2034_v8 }
 0x610   :  { %v2191_v2 = vadd.f32 %v9103_v56, %v2148_v40 }
 0x612   :  { %v9148_v5 = vadd.f32 %v7653_v39, %v2191_v2 }
 0x614   :  { %11459 = vst [vmem:[#allocation5_spill] sm:$0xff] %v9148_v5  ;;  %v2233_v16 = vsel %vm63_vm0, %v9148_v5, 0.0 }
 0x615   :  { %2234 = vadd.xlane.f32.xlu2 %v2233_v16  ;;  %v2037_v53 = vpop.f32.mrf.mxu1 }
 0x616   :  { %v2151_v33 = vadd.f32 %v2150_v26, %v2037_v53 }
 0x618   :  { %v2192_v12 = vadd.f32 %v9103_v56, %v2151_v33 }
 0x61a   :  { %v9156_v24 = vadd.f32 %v7654_v0, %v2192_v12 }
 0x61c   :  { %11460 = vst [vmem:[#allocation6_spill] sm:$0xff] %v9156_v24  ;;  %v1728_v1 = vpop.xlane.xlu1 %1727  ;;  %v2236_v11 = vsel %vm63_vm0, %v9156_v24, 0.0 }
 0x61d   :  { %7251 = vrcp.f32 %v1728_v1  ;;  %2237 = vadd.xlane.f32.xlu0 %v2236_v11  ;;  %v2040_v17 = vpop.f32.mrf.mxu1 }
 0x61e   :  { %v2154_v41 = vadd.f32 %v2153_v25, %v2040_v17  ;;  %7253 = vrcp.f32 %v1731_v15 }
 0x61f   :  { %7255 = vrcp.f32 %v1734_v6 }
 0x620   :  { %v2193_v13 = vadd.f32 %v9103_v56, %v2154_v41  ;;  %7257 = vrcp.f32 %v1737_v9 }
 0x621   :  { %7259 = vrcp.f32 %v1740_v22 }
 0x622   :  { %v9164_v48 = vadd.f32 %v7655_v35, %v2193_v13 }
 0x623   :  { %v7252_v19 = vpop.eup %7251 }
 0x624   :  { %11461 = vst [vmem:[#allocation7_spill] sm:$0xff] %v9164_v48  ;;  %v2239_v14 = vsel %vm63_vm0, %v9164_v48, 0.0  ;;  %v1770_v27 = vmul.f32 %v7252_v19, %v9085_v31  ;;  %v7254_v37 = vpop.eup %7253 }
 0x625   :  { %2240 = vadd.xlane.f32.xlu2 %v2239_v14  ;;  %v1771_v51 = vmul.f32 %v7254_v37, %v9059_v28  ;;  %v7256_v34 = vpop.eup %7255 }
 0x626   :  { %6627 = vmatmul.msk.f32.gmra.mxu3 %vm1033_vm9, %v1770_v27  ;;  %v1772_v47 = vmul.f32 %v7256_v34, %v9065_v36  ;;  %v7258_v54 = vpop.eup %7257 }
 0x627   :  { %v1773_v31 = vmul.f32 %v7258_v54, %v9031_v61  ;;  %v7260_v18 = vpop.eup %7259 }
 0x628   :  { %v1774_v28 = vmul.f32 %v7260_v18, %v9072_v38 }
 0x62a   :  { %v1743_v43 = vpop.xlane.xlu0 %1742 }
 0x62b   :  { %7261 = vrcp.f32 %v1743_v43  ;;  %v2043_v32 = vpop.f32.mrf.mxu1 }
 0x62c   :  { %v2157_v21 = vadd.f32 %v2156_v23, %v2043_v32 }
 0x62e   :  { %6628 = vmatmul.msk.f32.gmra.mxu3 %vm1033_vm9, %v1771_v51  ;;  %v2194_v52 = vadd.f32 %v9103_v56, %v2157_v21 }
 0x630   :  { %v9198_v30 = vadd.f32 %v7656_v3, %v2194_v52 }
 0x631   :  { %v7262_v7 = vpop.eup %7261 }
 0x632   :  { %v1775_v4 = vmul.f32 %v7262_v7, %v9092_v10  ;;  %11462 = vst [vmem:[#allocation8_spill] sm:$0xff] %v9198_v30  ;;  %v2242_v46 = vsel %vm63_vm0, %v9198_v30, 0.0 }
 0x636   :  { %6629 = vmatmul.msk.f32.gmra.mxu3 %vm1033_vm9, %v1772_v47 }
 0x63e   :  { %6630 = vmatmul.msk.f32.gmra.mxu3 %vm1033_vm9, %v1773_v31 }
 0x646   :  { %6631 = vmatmul.msk.f32.gmra.mxu3 %vm1033_vm9, %v1774_v28 }
 0x64e   :  { %6632 = vmatmul.msk.f32.gmra.mxu3 %vm1033_vm9, %v1775_v4 }
 0x650   :  { %v2226_v36 = vpop.xlane.xlu2 %2225 }
 0x651   :  { %v2270_v49 = vmul.f32 %v2226_v36, %v7826_v20  ;;  %v2223_v59 = vpop.xlane.xlu1 %2222 }
 0x652   :  { %v2269_v61 = vmul.f32 %v2223_v59, %v7826_v20 }
 0x653   :  { %v9183_v29 = vsub.f32 %v9111_v60, %v2270_v49 }
 0x654   :  { %v9186_v38 = vsub.f32 %v9116_v45, %v2269_v61 }
 0x655   :  { %v2302_v10 = vmul.f32 %v9183_v29, %v9183_v29 }
 0x656   :  { %v2301_v62 = vmul.f32 %v9186_v38, %v9186_v38 }
 0x657   :  { %v2320_v50 = vsel %vm63_vm0, %v2302_v10, 0.0 }
 0x658   :  { %2321 = vadd.xlane.f32.xlu0 %v2320_v50  ;;  %v2317_v57 = vsel %vm63_vm0, %v2301_v62, 0.0 }
 0x659   :  { %2318 = vadd.xlane.f32.xlu1 %v2317_v57 }
 0x661   :  { %2243 = vadd.xlane.f32.xlu1 %v2242_v46 }
 0x670   :  { %v2229_v63 = vpop.xlane.xlu0 %2228 }
 0x671   :  { %v2271_v55 = vmul.f32 %v2229_v63, %v7826_v20 }
 0x673   :  { %v9204_v58 = vsub.f32 %v9128_v44, %v2271_v55 }
 0x675   :  { %v2303_v8 = vmul.f32 %v9204_v58, %v9204_v58 }
 0x677   :  { %v2323_v40 = vsel %vm63_vm0, %v2303_v8, 0.0 }
 0x678   :  { %2324 = vadd.xlane.f32.xlu2 %v2323_v40 }
 0x67e   :  { %v1930_v2 = vpop.f32.mrf.mxu3 }
 0x67f   :  { %6643 = vmatmul.msk.f32.gmra.mxu1 %vm862_vm8, %v1930_v2 }
 0x680   :  { %v2232_v39 = vpop.xlane.xlu1 %2231 }
 0x681   :  { %v2272_v26 = vmul.f32 %v2232_v39, %v7826_v20  ;;  %v2870_v39 = vld [vmem:[%s11410_s9 + $0x18] sm:$0xff] }
 0x682   :  { %2935 = vmatpush.msra.mxu0 %v2870_v39 }
 0x683   :  { %v9212_v16 = vsub.f32 %v9140_v42, %v2272_v26  ;;  %v2869_v26 = vld [vmem:[%s11410_s9 + $0x10] sm:$0xff] }
 0x684   :  { %2936 = vmatpush.msra.mxu0 %v2869_v26 }
 0x685   :  { %v2304_v53 = vmul.f32 %v9212_v16, %v9212_v16 }
 0x686   :  { %v1933_v33 = vpop.f32.mrf.mxu3 }
 0x687   :  { %6644 = vmatmul.msk.f32.gmra.mxu1 %vm862_vm8, %v1933_v33  ;;  %v2326_v12 = vsel %vm63_vm0, %v2304_v53, 0.0 }
 0x688   :  { %v2235_v0 = vpop.xlane.xlu2 %2234  ;;  %2327 = vadd.xlane.f32.xlu0 %v2326_v12 }
 0x689   :  { %v2273_v1 = vmul.f32 %v2235_v0, %v7826_v20  ;;  %v2868_v0 = vld [vmem:[%s11410_s9 + $0x8] sm:$0xff] }
 0x68a   :  { %2937 = vmatpush.msra.mxu0 %v2868_v0 }
 0x68b   :  { %v9220_v11 = vsub.f32 %v9148_v5, %v2273_v1 }
 0x68d   :  { %v2305_v25 = vmul.f32 %v9220_v11, %v9220_v11 }
 0x68f   :  { %v2329_v17 = vsel %vm63_vm0, %v2305_v25, 0.0 }
 0x690   :  { %v2238_v15 = vpop.xlane.xlu0 %2237  ;;  %2330 = vadd.xlane.f32.xlu1 %v2329_v17 }
 0x691   :  { %v2274_v41 = vmul.f32 %v2238_v15, %v7826_v20 }
 0x693   :  { %v9227_v13 = vsub.f32 %v9156_v24, %v2274_v41  ;;  %v2867_v41 = vld [vmem:[%s11410_s9] sm:$0xff] }
 0x694   :  { %2938 = vmatpush.msra.mxu0 %v2867_v41 }
 0x695   :  { %v2306_v35 = vmul.f32 %v9227_v13, %v9227_v13 }
 0x697   :  { %v2332_v19 = vsel %vm63_vm0, %v2306_v35, 0.0 }
 0x698   :  { %2333 = vadd.xlane.f32.xlu2 %v2332_v19  ;;  %v2241_v14 = vpop.xlane.xlu2 %2240 }
 0x699   :  { %v2275_v27 = vmul.f32 %v2241_v14, %v7826_v20 }
 0x69b   :  { %v9234_v6 = vsub.f32 %v9164_v48, %v2275_v27 }
 0x69d   :  { %v2307_v37 = vmul.f32 %v9234_v6, %v9234_v6 }
 0x69f   :  { %v2335_v51 = vsel %vm63_vm0, %v2307_v37, 0.0 }
 0x6a0   :  { %2336 = vadd.xlane.f32.xlu0 %v2335_v51 }
 0x6a9   :  { %v1936_v9 = vpop.f32.mrf.mxu3 }
 0x6aa   :  { %6645 = vmatmul.msk.f32.gmra.mxu1 %vm862_vm8, %v1936_v9 }
 0x6b1   :  { %v1939_v34 = vpop.f32.mrf.mxu3 }
 0x6b2   :  { %6646 = vmatmul.msk.f32.gmra.mxu1 %vm862_vm8, %v1939_v34 }
 0x6b9   :  { %v1942_v47 = vpop.f32.mrf.mxu3 }
 0x6ba   :  { %6647 = vmatmul.msk.f32.gmra.mxu1 %vm862_vm8, %v1942_v47 }
 0x6c1   :  { %v1945_v22 = vpop.f32.mrf.mxu3 }
 0x6c2   :  { %6648 = vmatmul.msk.f32.gmra.mxu1 %vm862_vm8, %v1945_v22 }
 0x6c9   :  { %v1948_v54 = vpop.f32.mrf.mxu3 }
 0x6ca   :  { %6649 = vmatmul.msk.f32.gmra.mxu1 %vm862_vm8, %v1948_v54 }
 0x6cb   :  { %v2322_v31 = vpop.xlane.xlu0 %2321 }
 0x6cc   :  { %v2366_v43 = vmul.f32 %v2322_v31, %v7826_v20  ;;  %v2319_v18 = vpop.xlane.xlu1 %2318 }
 0x6cd   :  { %v2365_v28 = vmul.f32 %v2319_v18, %v7826_v20 }
 0x6ce   :  { %v2382_v7 = vadd.f32 1e-06, %v2366_v43 }
 0x6cf   :  { %v2381_v4 = vadd.f32 1e-06, %v2365_v28 }
 0x6d0   :  { %7263 = vrsqrt.f32 %v2382_v7  ;;  %vm2416_vm10 = vcmp.eq.f32.partialorder %v2382_v7, inf  ;;  %v2419_v33 = vand.u32 2147483648, %v2382_v7  ;;  %vm2418_vm12 = vcmp.eq.f32.partialorder %v2382_v7, 0.0 }
 0x6d1   :  { %7265 = vrsqrt.f32 %v2381_v4  ;;  %v1951_v36 = vpop.f32.mrf.mxu3  ;;  %vm2404_vm11 = vcmp.eq.f32.partialorder %v2381_v4, inf  ;;  %v2407_v12 = vand.u32 2147483648, %v2381_v4  ;;  %vm2406_vm13 = vcmp.eq.f32.partialorder %v2381_v4, 0.0 }
 0x6d2   :  { %6650 = vmatmul.msk.f32.gmra.mxu1 %vm862_vm8, %v1951_v36 }
 0x6d4   :  { %v2244_v32 = vpop.xlane.xlu1 %2243 }
 0x6d5   :  { %v2276_v49 = vmul.f32 %v2244_v32, %v7826_v20 }
 0x6d6   :  { %v7264_v59 = vpop.eup %7263 }
 0x6d7   :  { %v7266_v61 = vpop.eup %7265  ;;  %v2410_v23 = vmul.f32 %v7264_v59, %v2382_v7  ;;  %v9249_v21 = vsub.f32 %v9198_v30, %v2276_v49 }
 0x6d8   :  { %v2398_v10 = vmul.f32 %v7266_v61, %v2381_v4 }
 0x6d9   :  { %v2411_v62 = vmul.f32 %v7264_v59, %v2410_v23  ;;  %v2308_v50 = vmul.f32 %v9249_v21, %v9249_v21 }
 0x6da   :  { %v2399_v52 = vmul.f32 %v7266_v61, %v2398_v10 }
 0x6db   :  { %v2412_v57 = vmul.f32 0.5, %v2411_v62  ;;  %v2338_v3 = vsel %vm63_vm0, %v2308_v50, 0.0 }
 0x6dc   :  { %v2400_v46 = vmul.f32 0.5, %v2399_v52  ;;  %2339 = vadd.xlane.f32.xlu1 %v2338_v3 }
 0x6dd   :  { %v2413_v63 = vsub.f32 1.5, %v2412_v57  ;;  %v9282_v57 = vld [vmem:[%s11409_s8] ss:$0 sm:$0xff] }
 0x6de   :  { %v2401_v55 = vsub.f32 1.5, %v2400_v46 }
 0x6df   :  { %v2414_v8 = vmul.f32 %v7264_v59, %v2413_v63  ;;  %v9274_v59 = vld [vmem:[%s11408_s7] ss:$0 sm:$0xff] }
 0x6e0   :  { %v2402_v40 = vmul.f32 %v7266_v61, %v2401_v55  ;;  %v2159_v55 = vpop.f32.mrf.mxu2 }
 0x6e1   :  { %v2415_v2 = vmul.f32 %v2414_v8, %v2382_v7 }
 0x6e2   :  { %v2403_v53 = vmul.f32 %v2402_v40, %v2381_v4 }
 0x6e3   :  { %v2417_v1 = vsel %vm2416_vm10, %v2382_v7, %v2415_v2 }
 0x6e4   :  { %v2405_v25 = vsel %vm2404_vm11, %v2381_v4, %v2403_v53  ;;  %v2420_v17 = vsel %vm2418_vm12, %v2419_v33, %v2417_v1 }
 0x6e5   :  { %v2408_v15 = vsel %vm2406_vm13, %v2407_v12, %v2405_v25  ;;  %7267 = vrcp.f32 %v2420_v17  ;;  %vm2609_vm1 = vweird.f32 %v2420_v17  ;;  %v2615_v28 = vand.u32 2147483648, %v2420_v17 }
 0x6e6   :  { %7269 = vrcp.f32 %v2408_v15  ;;  %v2600_v22 = vand.u32 2147483648, %v2408_v15  ;;  %v2598_v43 = vand.u32 2147483647, %v2408_v15  ;;  %vm2594_vm2 = vweird.f32 %v2408_v15 }
 0x6e7   :  { %v2613_v36 = vand.u32 2147483647, %v2420_v17  ;;  %v2616_v62 = vor.u32 1.1754944e-38, %v2615_v28  ;;  %v7658_v28 = vld [vmem:[%s11401_s0 + $0x48] sm:$0xff] }
 0x6e8   :  { %v2601_v32 = vor.u32 1.1754944e-38, %v2600_v22  ;;  %vm2599_vm5 = vcmp.eq.f32.partialorder %v2598_v43, 8.507059e+37 }
 0x6e9   :  { %vm2614_vm6 = vcmp.eq.f32.partialorder %v2613_v36, 8.507059e+37 }
 0x6eb   :  { %v7268_v35 = vpop.eup %7267  ;;  %v2325_v19 = vpop.xlane.xlu2 %2324 }
 0x6ec   :  { %v7270_v14 = vpop.eup %7269  ;;  %v2367_v27 = vmul.f32 %v2325_v19, %v7826_v20  ;;  %v2605_v37 = vmul.f32 %v7268_v35, %v2420_v17  ;;  %vm2610_vm14 = vweird.f32 %v7268_v35 }
 0x6ed   :  { %v2590_v51 = vmul.f32 %v7270_v14, %v2408_v15  ;;  %vm2595_vm15 = vweird.f32 %v7270_v14  ;;  %vm9267_vm3 = vmor %vm2609_vm1, %vm2610_vm14 }
 0x6ee   :  { %v2383_v9 = vadd.f32 1e-06, %v2367_v27  ;;  %v2606_v34 = vsub.f32 1.0, %v2605_v37  ;;  %vm2596_vm4 = vmor %vm2594_vm2, %vm2595_vm15 }
 0x6ef   :  { %v2591_v47 = vsub.f32 1.0, %v2590_v51  ;;  %v2162_v51 = vpop.f32.mrf.mxu2 }
 0x6f0   :  { %7271 = vrsqrt.f32 %v2383_v9  ;;  %v2607_v54 = vmul.f32 %v7268_v35, %v2606_v34  ;;  %vm2428_vm7 = vcmp.eq.f32.partialorder %v2383_v9, inf  ;;  %v2431_v41 = vand.u32 2147483648, %v2383_v9 }
 0x6f1   :  { %v2592_v31 = vmul.f32 %v7270_v14, %v2591_v47  ;;  %vm2430_vm10 = vcmp.eq.f32.partialorder %v2383_v9, 0.0 }
 0x6f2   :  { %v2608_v18 = vadd.f32 %v7268_v35, %v2607_v54 }
 0x6f3   :  { %v2593_v7 = vadd.f32 %v7270_v14, %v2592_v31 }
 0x6f4   :  { %v2612_v61 = vsel %vm9267_vm3, %v7268_v35, %v2608_v18 }
 0x6f5   :  { %v2597_v49 = vsel %vm2596_vm4, %v7270_v14, %v2593_v7  ;;  %v2617_v3 = vsel %vm2614_vm6, %v2616_v62, %v2612_v61 }
 0x6f6   :  { %v7272_v23 = vpop.eup %7271  ;;  %v2602_v10 = vsel %vm2599_vm5, %v2601_v32, %v2597_v49  ;;  %v2618_v2 = vmul.f32 %v2617_v3, %v9183_v29  ;;  %v7657_v29 = vld [vmem:[%s11401_s0 + $0x40] sm:$0xff] }
 0x6f7   :  { %v2422_v50 = vmul.f32 %v7272_v23, %v2383_v9  ;;  %v2603_v52 = vmul.f32 %v2602_v10, %v9186_v38 }
 0x6f8   :  { %v2833_v1 = vmul.f32 %v9274_v59, %v2618_v2 }
 0x6f9   :  { %v2423_v46 = vmul.f32 %v7272_v23, %v2422_v50  ;;  %v2832_v63 = vmul.f32 %v9274_v59, %v2603_v52 }
 0x6fa   :  { %v2852_v35 = vadd.f32 %v9282_v57, %v2833_v1 }
 0x6fb   :  { %v2424_v8 = vmul.f32 0.5, %v2423_v46  ;;  %v2851_v40 = vadd.f32 %v9282_v57, %v2832_v63  ;;  %v2328_v39 = vpop.xlane.xlu0 %2327 }
 0x6fc   :  { %v2368_v38 = vmul.f32 %v2328_v39, %v7826_v20  ;;  %v2046_v53 = vpop.f32.mrf.mxu1 }
 0x6fd   :  { %v2425_v26 = vsub.f32 1.5, %v2424_v8  ;;  %6667 = vmatmul.msk.f32.vlgmr.msra.gmra.mxu0 %vm63_vm0, %v2851_v40  ;;  %v2160_v33 = vadd.f32 %v2159_v55, %v2046_v53 }
 0x6fe   :  { %v9289_v0 = vadd.f32 1e-06, %v2368_v38 }
 0x6ff   :  { %v2426_v12 = vmul.f32 %v7272_v23, %v2425_v26  ;;  %v2195_v25 = vadd.f32 %v9103_v56, %v2160_v33 }
 0x700   :  { %7273 = vrsqrt.f32 %v9289_v0  ;;  %vm2440_vm14 = vcmp.eq.f32.partialorder %v9289_v0, inf  ;;  %vm2442_vm15 = vcmp.eq.f32.partialorder %v9289_v0, 0.0  ;;  %v2443_v38 = vand.u32 2147483648, %v9289_v0 }
 0x701   :  { %v2427_v17 = vmul.f32 %v2426_v12, %v2383_v9  ;;  %v9297_v15 = vadd.f32 %v7657_v29, %v2195_v25 }
 0x703   :  { %11465 = vst [vmem:[#allocation9_spill] sm:$0xff] %v9297_v15  ;;  %v2429_v19 = vsel %vm2428_vm7, %v2383_v9, %v2427_v17  ;;  %v2331_v14 = vpop.xlane.xlu1 %2330  ;;  %v2245_v27 = vsel %vm63_vm0, %v9297_v15, 0.0 }
 0x704   :  { %v2432_v37 = vsel %vm2430_vm10, %v2431_v41, %v2429_v19  ;;  %v2369_v34 = vmul.f32 %v2331_v14, %v7826_v20  ;;  %2246 = vadd.xlane.f32.xlu2 %v2245_v27  ;;  %v2049_v47 = vpop.f32.mrf.mxu1 }
 0x705   :  { %6668 = vmatmul.msk.f32.gmra.mxu0 %vm63_vm0, %v2852_v35  ;;  %7275 = vrcp.f32 %v2432_v37  ;;  %v2163_v22 = vadd.f32 %v2162_v51, %v2049_v47  ;;  %v2628_v3 = vand.u32 2147483647, %v2432_v37  ;;  %v2630_v46 = vand.u32 2147483648, %v2432_v37 }
 0x706   :  { %v7274_v54 = vpop.eup %7273  ;;  %v9304_v31 = vadd.f32 1e-06, %v2369_v34  ;;  %vm2624_vm12 = vweird.f32 %v2432_v37 }
 0x707   :  { %v2434_v43 = vmul.f32 %v7274_v54, %v9289_v0  ;;  %v2196_v9 = vadd.f32 %v9103_v56, %v2163_v22  ;;  %v2631_v26 = vor.u32 1.1754944e-38, %v2630_v46  ;;  %vm2629_vm1 = vcmp.eq.f32.partialorder %v2628_v3, 8.507059e+37 }
 0x708   :  { %7277 = vrsqrt.f32 %v9304_v31  ;;  %vm2452_vm2 = vcmp.eq.f32.partialorder %v9304_v31, inf  ;;  %vm2454_vm3 = vcmp.eq.f32.partialorder %v9304_v31, 0.0 }
 0x709   :  { %v2435_v18 = vmul.f32 %v7274_v54, %v2434_v43  ;;  %v9312_v7 = vadd.f32 %v7658_v28, %v2196_v9 }
 0x70b   :  { %11466 = vst [vmem:[#allocation10_spill] sm:$0xff] %v9312_v7  ;;  %v7276_v4 = vpop.eup %7275  ;;  %v2436_v36 = vmul.f32 0.5, %v2435_v18  ;;  %v2334_v32 = vpop.xlane.xlu2 %2333  ;;  %v2248_v49 = vsel %vm63_vm0, %v9312_v7, 0.0 }
 0x70c   :  { %v2620_v61 = vmul.f32 %v7276_v4, %v2432_v37  ;;  %v2370_v23 = vmul.f32 %v2334_v32, %v7826_v20  ;;  %2249 = vadd.xlane.f32.xlu0 %v2248_v49  ;;  %vm2625_vm11 = vweird.f32 %v7276_v4 }
 0x70d   :  { %v2437_v10 = vsub.f32 1.5, %v2436_v36  ;;  %vm2626_vm13 = vmor %vm2624_vm12, %vm2625_vm11 }
 0x70e   :  { %v2621_v62 = vsub.f32 1.0, %v2620_v61  ;;  %v7278_v50 = vpop.eup %7277  ;;  %v9317_v52 = vadd.f32 1e-06, %v2370_v23 }
 0x70f   :  { %v2438_v63 = vmul.f32 %v7274_v54, %v2437_v10  ;;  %v2446_v55 = vmul.f32 %v7278_v50, %v9304_v31 }
 0x710   :  { %v2622_v8 = vmul.f32 %v7276_v4, %v2621_v62  ;;  %7279 = vrsqrt.f32 %v9317_v52  ;;  %v2165_v62 = vpop.f32.mrf.mxu2  ;;  %vm2464_vm6 = vcmp.eq.f32.partialorder %v9317_v52, inf  ;;  %vm2466_vm10 = vcmp.eq.f32.partialorder %v9317_v52, 0.0 }
 0x711   :  { %v2439_v40 = vmul.f32 %v2438_v63, %v9289_v0  ;;  %v2447_v2 = vmul.f32 %v7278_v50, %v2446_v55 }
 0x712   :  { %v2623_v39 = vadd.f32 %v7276_v4, %v2622_v8 }
 0x713   :  { %v2448_v53 = vmul.f32 0.5, %v2447_v2  ;;  %v2337_v33 = vpop.xlane.xlu0 %2336  ;;  %v2441_v1 = vsel %vm2440_vm14, %v9289_v0, %v2439_v40 }
 0x714   :  { %v2627_v12 = vsel %vm2626_vm13, %v7276_v4, %v2623_v39  ;;  %v2371_v25 = vmul.f32 %v2337_v33, %v7826_v20  ;;  %v2444_v29 = vsel %vm2442_vm15, %v2443_v38, %v2441_v1 }
 0x715   :  { %v2632_v17 = vsel %vm2629_vm1, %v2631_v26, %v2627_v12  ;;  %v2449_v41 = vsub.f32 1.5, %v2448_v53  ;;  %7281 = vrcp.f32 %v2444_v29  ;;  %v2645_v61 = vand.u32 2147483648, %v2444_v29 }
 0x716   :  { %v2633_v35 = vmul.f32 %v2632_v17, %v9204_v58  ;;  %v7280_v19 = vpop.eup %7279  ;;  %v9328_v14 = vadd.f32 1e-06, %v2371_v25  ;;  %v2455_v58 = vand.u32 2147483648, %v9304_v31  ;;  %v2643_v10 = vand.u32 2147483647, %v2444_v29 }
 0x717   :  { %v2450_v27 = vmul.f32 %v7278_v50, %v2449_v41  ;;  %v2458_v37 = vmul.f32 %v7280_v19, %v9317_v52  ;;  %vm2639_vm5 = vweird.f32 %v2444_v29  ;;  %v2646_v8 = vor.u32 1.1754944e-38, %v2645_v61 }
 0x718   :  { %v2834_v51 = vmul.f32 %v9274_v59, %v2633_v35  ;;  %7283 = vrsqrt.f32 %v9328_v14  ;;  %vm2644_vm11 = vcmp.eq.f32.partialorder %v2643_v10, 8.507059e+37  ;;  %vm2476_vm13 = vcmp.eq.f32.partialorder %v9328_v14, inf }
 0x719   :  { %v2451_v0 = vmul.f32 %v2450_v27, %v9304_v31  ;;  %v2459_v34 = vmul.f32 %v7280_v19, %v2458_v37  ;;  %vm2478_vm1 = vcmp.eq.f32.partialorder %v9328_v14, 0.0 }
 0x71a   :  { %v2853_v47 = vadd.f32 %v9282_v57, %v2834_v51 }
 0x71b   :  { %v7282_v22 = vpop.eup %7281  ;;  %v2460_v54 = vmul.f32 0.5, %v2459_v34  ;;  %v2453_v43 = vsel %vm2452_vm2, %v9304_v31, %v2451_v0  ;;  %v2467_v31 = vand.u32 2147483648, %v9317_v52  ;;  %v2168_v0 = vpop.f32.mrf.mxu2 }
 0x71c   :  { %6669 = vmatmul.msk.f32.gmra.mxu0 %vm63_vm0, %v2853_v47  ;;  %v2635_v9 = vmul.f32 %v7282_v22, %v2444_v29  ;;  %v2456_v18 = vsel %vm2454_vm3, %v2455_v58, %v2453_v43  ;;  %vm2640_vm4 = vweird.f32 %v7282_v22  ;;  %v2479_v58 = vand.u32 2147483648, %v9328_v14 }
 0x71d   :  { %v2461_v28 = vsub.f32 1.5, %v2460_v54  ;;  %7285 = vrcp.f32 %v2456_v18  ;;  %vm2641_vm7 = vmor %vm2639_vm5, %vm2640_vm4  ;;  %v2658_v17 = vand.u32 2147483647, %v2456_v18  ;;  %v2660_v29 = vand.u32 2147483648, %v2456_v18 }
 0x71e   :  { %v7284_v4 = vpop.eup %7283  ;;  %v2636_v36 = vsub.f32 1.0, %v2635_v9  ;;  %vm2654_vm14 = vweird.f32 %v2456_v18 }
 0x71f   :  { %v2462_v32 = vmul.f32 %v7280_v19, %v2461_v28  ;;  %v2470_v49 = vmul.f32 %v7284_v4, %v9328_v14  ;;  %v2661_v34 = vor.u32 1.1754944e-38, %v2660_v29  ;;  %vm2659_vm2 = vcmp.eq.f32.partialorder %v2658_v17, 8.507059e+37 }
 0x720   :  { %v2637_v23 = vmul.f32 %v7282_v22, %v2636_v36 }
 0x721   :  { %v2463_v50 = vmul.f32 %v2462_v32, %v9317_v52  ;;  %v2471_v3 = vmul.f32 %v7284_v4, %v2470_v49 }
 0x722   :  { %v2638_v46 = vadd.f32 %v7282_v22, %v2637_v23 }
 0x723   :  { %v7286_v63 = vpop.eup %7285  ;;  %v2472_v55 = vmul.f32 0.5, %v2471_v3  ;;  %v2465_v40 = vsel %vm2464_vm6, %v9317_v52, %v2463_v50 }
 0x724   :  { %v2642_v2 = vsel %vm2641_vm7, %v7282_v22, %v2638_v46  ;;  %v2650_v39 = vmul.f32 %v7286_v63, %v2456_v18  ;;  %v2468_v26 = vsel %vm2466_vm10, %v2467_v31, %v2465_v40  ;;  %vm2655_vm12 = vweird.f32 %v7286_v63  ;;  %v7659_v22 = vld [vmem:[%s11401_s0 + $0x50] sm:$0xff]  ;;  %v2171_v40 = vpop.f32.mrf.mxu2 }
 0x725   :  { %v2473_v38 = vsub.f32 1.5, %v2472_v55  ;;  %v2647_v53 = vsel %vm2644_vm11, %v2646_v8, %v2642_v2  ;;  %7287 = vrcp.f32 %v2468_v26  ;;  %vm2656_vm15 = vmor %vm2654_vm14, %vm2655_vm12  ;;  %v2673_v49 = vand.u32 2147483647, %v2468_v26 }
 0x726   :  { %v2648_v33 = vmul.f32 %v2647_v53, %v9212_v16  ;;  %v2651_v12 = vsub.f32 1.0, %v2650_v39  ;;  %v2675_v61 = vand.u32 2147483648, %v2468_v26  ;;  %vm2669_vm4 = vweird.f32 %v2468_v26 }
 0x727   :  { %v2474_v1 = vmul.f32 %v7284_v4, %v2473_v38  ;;  %v2052_v25 = vpop.f32.mrf.mxu1  ;;  %vm2674_vm6 = vcmp.eq.f32.partialorder %v2673_v49, 8.507059e+37 }
 0x728   :  { %v2166_v41 = vadd.f32 %v2165_v62, %v2052_v25  ;;  %v2835_v35 = vmul.f32 %v9274_v59, %v2648_v33  ;;  %v2652_v19 = vmul.f32 %v7286_v63, %v2651_v12  ;;  %v2676_v31 = vor.u32 1.1754944e-38, %v2675_v61 }
 0x729   :  { %v2475_v52 = vmul.f32 %v2474_v1, %v9328_v14 }
 0x72a   :  { %v2197_v27 = vadd.f32 %v9103_v56, %v2166_v41  ;;  %v2854_v37 = vadd.f32 %v9282_v57, %v2835_v35  ;;  %v2653_v51 = vadd.f32 %v7286_v63, %v2652_v19 }
 0x72b   :  { %v7288_v16 = vpop.eup %7287  ;;  %v2477_v47 = vsel %vm2476_vm13, %v9328_v14, %v2475_v52 }
 0x72c   :  { %v9358_v54 = vadd.f32 %v7659_v22, %v2197_v27  ;;  %6670 = vmatmul.msk.f32.gmra.mxu0 %vm63_vm0, %v2854_v37  ;;  %v2657_v43 = vsel %vm2656_vm15, %v7286_v63, %v2653_v51  ;;  %v2665_v9 = vmul.f32 %v7288_v16, %v2468_v26  ;;  %v2480_v28 = vsel %vm2478_vm1, %v2479_v58, %v2477_v47  ;;  %v7660_v63 = vld [vmem:[%s11401_s0 + $0x58] sm:$0xff] }
 0x72d   :  { %v2662_v18 = vsel %vm2659_vm2, %v2661_v34, %v2657_v43  ;;  %7289 = vrcp.f32 %v2480_v28  ;;  %vm2670_vm3 = vweird.f32 %v7288_v16  ;;  %v2690_v25 = vand.u32 2147483648, %v2480_v28 }
 0x72e   :  { %11467 = vst [vmem:[#allocation11_spill] sm:$0xff] %v9358_v54  ;;  %v2251_v4 = vsel %vm63_vm0, %v9358_v54, 0.0  ;;  %v2663_v36 = vmul.f32 %v2662_v18, %v9220_v11  ;;  %v2666_v32 = vsub.f32 1.0, %v2665_v9  ;;  %vm2671_vm5 = vmor %vm2669_vm4, %vm2670_vm3  ;;  %v2688_v29 = vand.u32 2147483647, %v2480_v28  ;;  %v7662_v18 = vld [vmem:[%s11401_s0 + $0x68] sm:$0xff] }
 0x72f   :  { %v2055_v14 = vpop.f32.mrf.mxu1  ;;  %2252 = vadd.xlane.f32.xlu1 %v2251_v4  ;;  %vm2684_vm10 = vweird.f32 %v2480_v28  ;;  %v2691_v27 = vor.u32 1.1754944e-38, %v2690_v25  ;;  %v3147_v4 = vld [vmem:[%s11412_s11 + $0x78] sm:$0xff]  ;;  %v3141_v25 = vld [vmem:[%s11412_s11 + $0x48] sm:$0xff] }
 0x730   :  { %v2169_v23 = vadd.f32 %v2168_v0, %v2055_v14  ;;  %v2836_v10 = vmul.f32 %v9274_v59, %v2663_v36  ;;  %v2667_v62 = vmul.f32 %v7288_v16, %v2666_v32  ;;  %vm2689_vm12 = vcmp.eq.f32.partialorder %v2688_v29, 8.507059e+37  ;;  %v2174_v0 = vpop.f32.mrf.mxu2  ;;  %3152 = vmatpush.msrb.mxu3 %v3147_v4  ;;  %v3145_v32 = vld [vmem:[%s11412_s11 + $0x68] sm:$0xff]  ;;  %v3139_v29 = vld [vmem:[%s11412_s11 + $0x38] sm:$0xff] }
 0x732   :  { %v2198_v50 = vadd.f32 %v9103_v56, %v2169_v23  ;;  %v2855_v3 = vadd.f32 %v9282_v57, %v2836_v10  ;;  %v2668_v46 = vadd.f32 %v7288_v16, %v2667_v62  ;;  %v7663_v10 = vld [vmem:[%s11401_s0 + $0x70] sm:$0xff] }
 0x733   :  { %v7290_v11 = vpop.eup %7289 }
 0x734   :  { %v9370_v55 = vadd.f32 %v7660_v63, %v2198_v50  ;;  %6671 = vmatmul.msk.f32.gmra.mxu0 %vm63_vm0, %v2855_v3  ;;  %v2672_v8 = vsel %vm2671_vm5, %v7288_v16, %v2668_v46  ;;  %v2680_v39 = vmul.f32 %v7290_v11, %v2480_v28  ;;  %vm2685_vm7 = vweird.f32 %v7290_v11 }
 0x735   :  { %v2677_v2 = vsel %vm2674_vm6, %v2676_v31, %v2672_v8  ;;  %vm2686_vm11 = vmor %vm2684_vm10, %vm2685_vm7 }
 0x736   :  { %11468 = vst [vmem:[#allocation12_spill] sm:$0xff] %v9370_v55  ;;  %v2254_v38 = vsel %vm63_vm0, %v9370_v55, 0.0  ;;  %v2678_v26 = vmul.f32 %v2677_v2, %v9227_v13  ;;  %v2681_v33 = vsub.f32 1.0, %v2680_v39  ;;  %v7661_v13 = vld [vmem:[%s11401_s0 + $0x60] sm:$0xff] }
 0x737   :  { %2255 = vadd.xlane.f32.xlu2 %v2254_v38  ;;  %v2058_v53 = vpop.f32.mrf.mxu1 }
 0x738   :  { %v2172_v12 = vadd.f32 %v2171_v40, %v2058_v53  ;;  %v2837_v1 = vmul.f32 %v9274_v59, %v2678_v26  ;;  %v2682_v17 = vmul.f32 %v7290_v11, %v2681_v33  ;;  %v2177_v14 = vpop.f32.mrf.mxu2  ;;  %v3143_v53 = vld [vmem:[%s11412_s11 + $0x58] sm:$0xff]  ;;  %v3142_v33 = vld [vmem:[%s11412_s11 + $0x50] sm:$0xff] }
 0x73a   :  { %v2199_v41 = vadd.f32 %v9103_v56, %v2172_v12  ;;  %v2856_v35 = vadd.f32 %v9282_v57, %v2837_v1  ;;  %v2683_v19 = vadd.f32 %v7290_v11, %v2682_v17  ;;  %v3140_v17 = vld [vmem:[%s11412_s11 + $0x40] sm:$0xff] }
 0x73c   :  { %v9382_v52 = vadd.f32 %v7661_v13, %v2199_v41  ;;  %6672 = vmatmul.msk.f32.gmra.mxu0 %vm63_vm0, %v2856_v35  ;;  %v2687_v37 = vsel %vm2686_vm11, %v7290_v11, %v2683_v19  ;;  %v3138_v35 = vld [vmem:[%s11412_s11 + $0x30] sm:$0xff]  ;;  %v3137_v13 = vld [vmem:[%s11412_s11 + $0x28] sm:$0xff] }
 0x73d   :  { %v2692_v16 = vsel %vm2689_vm12, %v2691_v27, %v2687_v37 }
 0x73e   :  { %11469 = vst [vmem:[#allocation13_spill] sm:$0xff] %v9382_v52  ;;  %v2257_v51 = vsel %vm63_vm0, %v9382_v52, 0.0  ;;  %v2693_v47 = vmul.f32 %v2692_v16, %v9234_v6  ;;  %v3146_v6 = vld [vmem:[%s11412_s11 + $0x70] sm:$0xff] }
 0x73f   :  { %v2061_v34 = vpop.f32.mrf.mxu1  ;;  %2258 = vadd.xlane.f32.xlu0 %v2257_v51  ;;  %3153 = vmatpush.msrb.mxu3 %v3146_v6  ;;  %v3136_v51 = vld [vmem:[%s11412_s11 + $0x20] sm:$0xff] }
 0x740   :  { %v2175_v58 = vadd.f32 %v2174_v0, %v2061_v34  ;;  %v2838_v22 = vmul.f32 %v9274_v59, %v2693_v47  ;;  %v3135_v34 = vld [vmem:[%s11412_s11 + $0x18] sm:$0xff] }
 0x741   :  { %3154 = vmatpush.msrb.mxu3 %v3145_v32  ;;  %v3133_v32 = vld [vmem:[%s11412_s11 + $0x8] sm:$0xff] }
 0x742   :  { %v2200_v43 = vadd.f32 %v9103_v56, %v2175_v58  ;;  %v2857_v9 = vadd.f32 %v9282_v57, %v2838_v22  ;;  %v9450_v58 = vld [vmem:[%s11411_s10] ss:$0 sm:$0xff] }
 0x744   :  { %v9394_v28 = vadd.f32 %v7662_v18, %v2200_v43  ;;  %6673 = vmatmul.msk.f32.gmra.mxu0 %vm63_vm0, %v2857_v9  ;;  %v3134_v43 = vld [vmem:[%s11412_s11 + $0x10] sm:$0xff] }
 0x746   :  { %11470 = vst [vmem:[#allocation14_spill] sm:$0xff] %v9394_v28  ;;  %v2260_v36 = vsel %vm63_vm0, %v9394_v28, 0.0 }
 0x747   :  { %v2064_v49 = vpop.f32.mrf.mxu1  ;;  %2261 = vadd.xlane.f32.xlu1 %v2260_v36 }
 0x748   :  { %v2178_v61 = vadd.f32 %v2177_v14, %v2064_v49  ;;  %v2180_v14 = vpop.f32.mrf.mxu2 }
 0x74a   :  { %v2201_v23 = vadd.f32 %v9103_v56, %v2178_v61  ;;  %v3144_v56 = vld [vmem:[%s11412_s11 + $0x60] sm:$0xff] }
 0x74b   :  { %3155 = vmatpush.msrb.mxu3 %v3144_v56 }
 0x74c   :  { %v9412_v62 = vadd.f32 %v7663_v10, %v2201_v23 }
 0x74d   :  { %3156 = vmatpush.msrb.mxu3 %v3143_v53 }
 0x74e   :  { %11471 = vst [vmem:[#allocation15_spill] sm:$0xff] %v9412_v62  ;;  %v2263_v3 = vsel %vm63_vm0, %v9412_v62, 0.0 }
 0x74f   :  { %v2340_v50 = vpop.xlane.xlu1 %2339  ;;  %2264 = vadd.xlane.f32.xlu0 %v2263_v3  ;;  %3157 = vmatpush.msrb.mxu3 %v3142_v33  ;;  %v2067_v9 = vpop.f32.mrf.mxu1  ;;  %v3132_v3 = vld [vmem:[%s11412_s11] sm:$0xff] }
 0x750   :  { %v2372_v46 = vmul.f32 %v2340_v50, %v7826_v20  ;;  %v2181_v23 = vadd.f32 %v2180_v14, %v2067_v9 }
 0x751   :  { %3158 = vmatpush.msrb.mxu3 %v3141_v25 }
 0x752   :  { %v2388_v31 = vadd.f32 1e-06, %v2372_v46 }
 0x753   :  { %3159 = vmatpush.msrb.mxu3 %v3140_v17 }
 0x754   :  { %7291 = vrsqrt.f32 %v2388_v31  ;;  %vm2488_vm13 = vcmp.eq.f32.partialorder %v2388_v31, inf  ;;  %v2491_v26 = vand.u32 2147483648, %v2388_v31  ;;  %vm2490_vm14 = vcmp.eq.f32.partialorder %v2388_v31, 0.0 }
 0x755   :  { %3160 = vmatpush.msrb.mxu3 %v3139_v29 }
 0x757   :  { %3161 = vmatpush.msrb.mxu3 %v3138_v35 }
 0x759   :  { %3162 = vmatpush.msrb.mxu3 %v3137_v13 }
 0x75a   :  { %v7292_v11 = vpop.eup %7291 }
 0x75b   :  { %v2482_v63 = vmul.f32 %v7292_v11, %v2388_v31  ;;  %3163 = vmatpush.msrb.mxu3 %v3136_v51 }
 0x75d   :  { %v2483_v8 = vmul.f32 %v7292_v11, %v2482_v63  ;;  %3164 = vmatpush.msrb.mxu3 %v3135_v34  ;;  %v7664_v63 = vld [vmem:[%s11407_s6] ss:$0 sm:$0xff] }
 0x75e   :  { %v2202_v56 = vadd.f32 %v7664_v63, %v2181_v23 }
 0x75f   :  { %v2484_v40 = vmul.f32 0.5, %v2483_v8  ;;  %3165 = vmatpush.msrb.mxu3 %v3134_v43 }
 0x761   :  { %v2485_v2 = vsub.f32 1.5, %v2484_v40  ;;  %3166 = vmatpush.msrb.mxu3 %v3133_v32 }
 0x763   :  { %v2486_v39 = vmul.f32 %v7292_v11, %v2485_v2  ;;  %3167 = vmatpush.msrb.mxu3 %v3132_v3 }
 0x765   :  { %v2487_v38 = vmul.f32 %v2486_v39, %v2388_v31 }
 0x767   :  { %v2489_v12 = vsel %vm2488_vm13, %v2388_v31, %v2487_v38 }
 0x768   :  { %v2492_v1 = vsel %vm2490_vm14, %v2491_v26, %v2489_v12 }
 0x769   :  { %7293 = vrcp.f32 %v2492_v1  ;;  %v2705_v37 = vand.u32 2147483648, %v2492_v1  ;;  %v2703_v0 = vand.u32 2147483647, %v2492_v1  ;;  %vm2699_vm1 = vweird.f32 %v2492_v1 }
 0x76b   :  { %v2706_v22 = vor.u32 1.1754944e-38, %v2705_v37  ;;  %vm2704_vm3 = vcmp.eq.f32.partialorder %v2703_v0, 8.507059e+37 }
 0x76f   :  { %v7294_v41 = vpop.eup %7293 }
 0x770   :  { %v2695_v19 = vmul.f32 %v7294_v41, %v2492_v1  ;;  %vm2700_vm15 = vweird.f32 %v7294_v41 }
 0x771   :  { %vm2701_vm2 = vmor %vm2699_vm1, %vm2700_vm15 }
 0x772   :  { %v2696_v27 = vsub.f32 1.0, %v2695_v19 }
 0x774   :  { %v2697_v16 = vmul.f32 %v7294_v41, %v2696_v27 }
 0x776   :  { %v2698_v47 = vadd.f32 %v7294_v41, %v2697_v16 }
 0x777   :  { %v2247_v18 = vpop.xlane.xlu2 %2246 }
 0x778   :  { %v2702_v4 = vsel %vm2701_vm2, %v7294_v41, %v2698_v47  ;;  %v2277_v6 = vmul.f32 %v2247_v18, %v7826_v20 }
 0x779   :  { %v2707_v36 = vsel %vm2704_vm3, %v2706_v22, %v2702_v4 }
 0x77a   :  { %v2940_v49 = vpop.f32.mrf.mxu0  ;;  %v2708_v61 = vmul.f32 %v2707_v36, %v9249_v21  ;;  %v9461_v10 = vsub.f32 %v9297_v15, %v2277_v6 }
 0x77b   :  { %v2941_v50 = vadd.f32 %v9450_v58, %v2940_v49 }
 0x77c   :  { %v2839_v46 = vmul.f32 %v9274_v59, %v2708_v61  ;;  %v2309_v11 = vmul.f32 %v9461_v10, %v9461_v10 }
 0x77d   :  { %v3004_v31 = vmul.f32 0.044715, %v2941_v50  ;;  %v2988_v51 = vmul.f32 0.5, %v2941_v50 }
 0x77e   :  { %v2858_v21 = vadd.f32 %v9282_v57, %v2839_v46  ;;  %v2341_v40 = vsel %vm63_vm0, %v2309_v11, 0.0  ;;  %v7665_v57 = vld [vmem:[%s11401_s0 + $0x78] sm:$0xff] }
 0x77f   :  { %v3020_v8 = vmul.f32 %v3004_v31, %v2941_v50  ;;  %2342 = vadd.xlane.f32.xlu2 %v2341_v40  ;;  %v2250_v2 = vpop.xlane.xlu0 %2249  ;;  %v9480_v26 = vadd.f32 %v7665_v57, %v2202_v56 }
 0x780   :  { %6674 = vmatmul.msk.f32.gmra.mxu0 %vm63_vm0, %v2858_v21  ;;  %v2278_v39 = vmul.f32 %v2250_v2, %v7826_v20 }
 0x781   :  { %v3036_v59 = vmul.f32 %v3020_v8, %v2941_v50  ;;  %11472 = vst [vmem:[#allocation16_spill] sm:$0xff] %v9480_v26  ;;  %v2266_v29 = vsel %vm63_vm0, %v9480_v26, 0.0 }
 0x782   :  { %v2943_v38 = vpop.f32.mrf.mxu0  ;;  %v9483_v33 = vsub.f32 %v9312_v7, %v2278_v39 }
 0x783   :  { %v3052_v53 = vadd.f32 %v3036_v59, %v2941_v50  ;;  %v2944_v12 = vadd.f32 %v9450_v58, %v2943_v38 }
 0x784   :  { %v2310_v17 = vmul.f32 %v9483_v33, %v9483_v33 }
 0x785   :  { %v3068_v1 = vmul.f32 0.7978846, %v3052_v53  ;;  %v3005_v25 = vmul.f32 0.044715, %v2944_v12  ;;  %v2989_v47 = vmul.f32 0.5, %v2944_v12 }
 0x786   :  { %v2344_v41 = vsel %vm63_vm0, %v2310_v17, 0.0 }
 0x787   :  { %7295 = vtanh.f32 %v3068_v1  ;;  %v3021_v35 = vmul.f32 %v3005_v25, %v2944_v12  ;;  %2267 = vadd.xlane.f32.xlu2 %v2266_v29  ;;  %2345 = vadd.xlane.f32.xlu1 %v2344_v41 }
 0x789   :  { %v3037_v19 = vmul.f32 %v3021_v35, %v2944_v12 }
 0x78b   :  { %v3053_v13 = vadd.f32 %v3037_v19, %v2944_v12 }
 0x78d   :  { %v7296_v27 = vpop.eup %7295  ;;  %v3069_v37 = vmul.f32 0.7978846, %v3053_v13 }
 0x78e   :  { %v3100_v16 = vadd.f32 1.0, %v7296_v27 }
 0x78f   :  { %7297 = vtanh.f32 %v3069_v37 }
 0x790   :  { %v3116_v0 = vmul.f32 %v3100_v16, %v2988_v51 }
 0x792   :  { %3168 = vmatmul.f32.vlgmr.msrb.gmra.mxu3 %v3116_v0 }
 0x795   :  { %v7298_v34 = vpop.eup %7297 }
 0x796   :  { %v3101_v22 = vadd.f32 1.0, %v7298_v34 }
 0x798   :  { %v3117_v43 = vmul.f32 %v3101_v22, %v2989_v47 }
 0x799   :  { %v2946_v9 = vpop.f32.mrf.mxu0 }
 0x79a   :  { %v2947_v18 = vadd.f32 %v9450_v58, %v2946_v9  ;;  %3171 = vmatmul.f32.gmra.mxu3 %v3117_v43 }
 0x79c   :  { %v3006_v4 = vmul.f32 0.044715, %v2947_v18  ;;  %v2990_v8 = vmul.f32 0.5, %v2947_v18 }
 0x79e   :  { %v3022_v6 = vmul.f32 %v3006_v4, %v2947_v18 }
 0x7a0   :  { %v3038_v36 = vmul.f32 %v3022_v6, %v2947_v18 }
 0x7a2   :  { %v3054_v32 = vadd.f32 %v3038_v36, %v2947_v18  ;;  %v2253_v14 = vpop.xlane.xlu1 %2252 }
 0x7a3   :  { %v2279_v49 = vmul.f32 %v2253_v14, %v7826_v20 }
 0x7a4   :  { %v3070_v61 = vmul.f32 0.7978846, %v3054_v32 }
 0x7a5   :  { %v9494_v23 = vsub.f32 %v9358_v54, %v2279_v49 }
 0x7a6   :  { %7299 = vtanh.f32 %v3070_v61 }
 0x7a7   :  { %v2311_v50 = vmul.f32 %v9494_v23, %v9494_v23 }
 0x7a9   :  { %v2949_v3 = vpop.f32.mrf.mxu0  ;;  %v2347_v46 = vsel %vm63_vm0, %v2311_v50, 0.0 }
 0x7aa   :  { %v2950_v31 = vadd.f32 %v9450_v58, %v2949_v3  ;;  %v2256_v11 = vpop.xlane.xlu2 %2255  ;;  %2348 = vadd.xlane.f32.xlu0 %v2347_v46 }
 0x7ab   :  { %v2280_v63 = vmul.f32 %v2256_v11, %v7826_v20 }
 0x7ac   :  { %v7300_v21 = vpop.eup %7299  ;;  %v3007_v56 = vmul.f32 0.044715, %v2950_v31  ;;  %v2991_v6 = vmul.f32 0.5, %v2950_v31 }
 0x7ad   :  { %v3102_v40 = vadd.f32 1.0, %v7300_v21  ;;  %v9502_v2 = vsub.f32 %v9370_v55, %v2280_v63 }
 0x7ae   :  { %v3023_v39 = vmul.f32 %v3007_v56, %v2950_v31 }
 0x7af   :  { %v3118_v59 = vmul.f32 %v3102_v40, %v2990_v8  ;;  %v2312_v38 = vmul.f32 %v9502_v2, %v9502_v2 }
 0x7b0   :  { %v3039_v57 = vmul.f32 %v3023_v39, %v2950_v31 }
 0x7b1   :  { %3174 = vmatmul.f32.gmra.mxu3 %v3118_v59  ;;  %v2952_v53 = vpop.f32.mrf.mxu0  ;;  %v2350_v12 = vsel %vm63_vm0, %v2312_v38, 0.0 }
 0x7b2   :  { %v2953_v1 = vadd.f32 %v9450_v58, %v2952_v53  ;;  %v2259_v25 = vpop.xlane.xlu0 %2258  ;;  %2351 = vadd.xlane.f32.xlu1 %v2350_v12  ;;  %v3055_v17 = vadd.f32 %v3039_v57, %v2950_v31 }
 0x7b3   :  { %v2281_v29 = vmul.f32 %v2259_v25, %v7826_v20 }
 0x7b4   :  { %v3008_v41 = vmul.f32 0.044715, %v2953_v1  ;;  %v3071_v35 = vmul.f32 0.7978846, %v3055_v17  ;;  %v2992_v59 = vmul.f32 0.5, %v2953_v1 }
 0x7b5   :  { %v9510_v19 = vsub.f32 %v9382_v52, %v2281_v29 }
 0x7b6   :  { %7301 = vtanh.f32 %v3071_v35  ;;  %v3024_v13 = vmul.f32 %v3008_v41, %v2953_v1 }
 0x7b7   :  { %v2313_v27 = vmul.f32 %v9510_v19, %v9510_v19 }
 0x7b8   :  { %v3040_v37 = vmul.f32 %v3024_v13, %v2953_v1 }
 0x7b9   :  { %v2955_v51 = vpop.f32.mrf.mxu0  ;;  %v2353_v16 = vsel %vm63_vm0, %v2313_v27, 0.0 }
 0x7ba   :  { %v2956_v0 = vadd.f32 %v9450_v58, %v2955_v51  ;;  %2354 = vadd.xlane.f32.xlu2 %v2353_v16  ;;  %v2262_v34 = vpop.xlane.xlu1 %2261  ;;  %v3056_v47 = vadd.f32 %v3040_v37, %v2953_v1 }
 0x7bb   :  { %v2282_v22 = vmul.f32 %v2262_v34, %v7826_v20 }
 0x7bc   :  { %v7302_v43 = vpop.eup %7301  ;;  %v3009_v9 = vmul.f32 0.044715, %v2956_v0  ;;  %v3072_v18 = vmul.f32 0.7978846, %v3056_v47  ;;  %v2993_v41 = vmul.f32 0.5, %v2956_v0 }
 0x7bd   :  { %v9518_v4 = vsub.f32 %v9394_v28, %v2282_v22  ;;  %v3103_v36 = vadd.f32 1.0, %v7302_v43 }
 0x7be   :  { %7303 = vtanh.f32 %v3072_v18  ;;  %v3025_v32 = vmul.f32 %v3009_v9, %v2956_v0 }
 0x7bf   :  { %v3119_v14 = vmul.f32 %v3103_v36, %v2991_v6  ;;  %v2314_v49 = vmul.f32 %v9518_v4, %v9518_v4 }
 0x7c0   :  { %v3041_v61 = vmul.f32 %v3025_v32, %v2956_v0 }
 0x7c1   :  { %3177 = vmatmul.f32.gmra.mxu3 %v3119_v14  ;;  %v2356_v50 = vsel %vm63_vm0, %v2314_v49, 0.0  ;;  %v2958_v3 = vpop.f32.mrf.mxu0 }
 0x7c2   :  { %v2265_v46 = vpop.xlane.xlu0 %2264  ;;  %2357 = vadd.xlane.f32.xlu0 %v2356_v50  ;;  %v3057_v11 = vadd.f32 %v3041_v61, %v2956_v0  ;;  %v2959_v21 = vadd.f32 %v9450_v58, %v2958_v3 }
 0x7c3   :  { %v2283_v63 = vmul.f32 %v2265_v46, %v7826_v20 }
 0x7c4   :  { %v7304_v31 = vpop.eup %7303  ;;  %v3073_v56 = vmul.f32 0.7978846, %v3057_v11  ;;  %v3010_v8 = vmul.f32 0.044715, %v2959_v21  ;;  %v2994_v37 = vmul.f32 0.5, %v2959_v21 }
 0x7c5   :  { %v9526_v40 = vsub.f32 %v9412_v62, %v2283_v63  ;;  %v3104_v39 = vadd.f32 1.0, %v7304_v31 }
 0x7c6   :  { %7305 = vtanh.f32 %v3073_v56  ;;  %v3026_v53 = vmul.f32 %v3010_v8, %v2959_v21 }
 0x7c7   :  { %v3120_v38 = vmul.f32 %v3104_v39, %v2992_v59  ;;  %v2315_v57 = vmul.f32 %v9526_v40, %v9526_v40 }
 0x7c8   :  { %v3042_v25 = vmul.f32 %v3026_v53, %v2959_v21 }
 0x7c9   :  { %3180 = vmatmul.f32.gmra.mxu3 %v3120_v38  ;;  %v2359_v12 = vsel %vm63_vm0, %v2315_v57, 0.0 }
 0x7ca   :  { %2360 = vadd.xlane.f32.xlu1 %v2359_v12  ;;  %v3058_v17 = vadd.f32 %v3042_v25, %v2959_v21 }
 0x7cc   :  { %v7306_v29 = vpop.eup %7305  ;;  %v3074_v13 = vmul.f32 0.7978846, %v3058_v17 }
 0x7cd   :  { %v3105_v35 = vadd.f32 1.0, %v7306_v29 }
 0x7ce   :  { %7307 = vtanh.f32 %v3074_v13 }
 0x7cf   :  { %v3121_v27 = vmul.f32 %v3105_v35, %v2993_v41 }
 0x7d1   :  { %3183 = vmatmul.f32.gmra.mxu3 %v3121_v27 }
 0x7d4   :  { %v7308_v1 = vpop.eup %7307 }
 0x7d5   :  { %v3106_v51 = vadd.f32 1.0, %v7308_v1 }
 0x7d7   :  { %v3122_v16 = vmul.f32 %v3106_v51, %v2994_v37 }
 0x7d9   :  { %3186 = vmatmul.f32.gmra.mxu3 %v3122_v16  ;;  %v9544_v16 = vld [vmem:[%s11413_s12] ss:$0 sm:$0xff] }
 0x7f2   :  { %v2343_v34 = vpop.xlane.xlu2 %2342 }
 0x7f3   :  { %v2373_v47 = vmul.f32 %v2343_v34, %v7826_v20 }
 0x7f5   :  { %v2389_v22 = vadd.f32 1e-06, %v2373_v47 }
 0x7f7   :  { %7309 = vrsqrt.f32 %v2389_v22  ;;  %vm2500_vm4 = vcmp.eq.f32.partialorder %v2389_v22, inf  ;;  %v2503_v25 = vand.u32 2147483648, %v2389_v22  ;;  %vm2502_vm5 = vcmp.eq.f32.partialorder %v2389_v22, 0.0 }
 0x7fa   :  { %v2268_v43 = vpop.xlane.xlu2 %2267  ;;  %v2346_v9 = vpop.xlane.xlu1 %2345 }
 0x7fb   :  { %v2284_v18 = vmul.f32 %v2268_v43, %v7826_v20  ;;  %v2374_v0 = vmul.f32 %v2346_v9, %v7826_v20 }
 0x7fd   :  { %v2961_v6 = vpop.f32.mrf.mxu0  ;;  %v7310_v36 = vpop.eup %7309  ;;  %v9535_v32 = vsub.f32 %v9480_v26, %v2284_v18  ;;  %v2390_v14 = vadd.f32 1e-06, %v2374_v0 }
 0x7fe   :  { %v2962_v49 = vadd.f32 %v9450_v58, %v2961_v6  ;;  %v2494_v61 = vmul.f32 %v7310_v36, %v2389_v22 }
 0x7ff   :  { %7311 = vrsqrt.f32 %v2390_v14  ;;  %v2316_v3 = vmul.f32 %v9535_v32, %v9535_v32  ;;  %vm2512_vm6 = vcmp.eq.f32.partialorder %v2390_v14, inf  ;;  %v2515_v34 = vand.u32 2147483648, %v2390_v14 }
 0x800   :  { %v3011_v50 = vmul.f32 0.044715, %v2962_v49  ;;  %v2495_v46 = vmul.f32 %v7310_v36, %v2494_v61  ;;  %v2995_v37 = vmul.f32 0.5, %v2962_v49  ;;  %vm2514_vm7 = vcmp.eq.f32.partialorder %v2390_v14, 0.0  ;;  %v7666_v61 = vld [vmem:[%s11401_s0] sm:$0xff] }
 0x801   :  { %v2362_v11 = vsel %vm63_vm0, %v2316_v3, 0.0 }
 0x802   :  { %v3027_v21 = vmul.f32 %v3011_v50, %v2962_v49  ;;  %v2496_v63 = vmul.f32 0.5, %v2495_v46  ;;  %2363 = vadd.xlane.f32.xlu2 %v2362_v11 }
 0x804   :  { %v3043_v31 = vmul.f32 %v3027_v21, %v2962_v49  ;;  %v2497_v56 = vsub.f32 1.5, %v2496_v63 }
 0x805   :  { %v7312_v8 = vpop.eup %7311 }
 0x806   :  { %v3059_v59 = vadd.f32 %v3043_v31, %v2962_v49  ;;  %v2498_v39 = vmul.f32 %v7310_v36, %v2497_v56  ;;  %v2506_v38 = vmul.f32 %v7312_v8, %v2390_v14 }
 0x808   :  { %v3075_v57 = vmul.f32 0.7978846, %v3059_v59  ;;  %v2499_v53 = vmul.f32 %v2498_v39, %v2389_v22  ;;  %v2507_v12 = vmul.f32 %v7312_v8, %v2506_v38 }
 0x80a   :  { %7313 = vtanh.f32 %v3075_v57  ;;  %v2508_v17 = vmul.f32 0.5, %v2507_v12  ;;  %v2501_v29 = vsel %vm2500_vm4, %v2389_v22, %v2499_v53 }
 0x80b   :  { %v2504_v41 = vsel %vm2502_vm5, %v2503_v25, %v2501_v29  ;;  %v7667_v29 = vld [vmem:[%s11401_s0 + $0x8] sm:$0xff] }
 0x80c   :  { %v2509_v35 = vsub.f32 1.5, %v2508_v17  ;;  %7315 = vrcp.f32 %v2504_v41  ;;  %v2720_v49 = vand.u32 2147483648, %v2504_v41  ;;  %v2718_v46 = vand.u32 2147483647, %v2504_v41 }
 0x80d   :  { %vm2714_vm11 = vweird.f32 %v2504_v41 }
 0x80e   :  { %v2510_v13 = vmul.f32 %v7312_v8, %v2509_v35  ;;  %v2721_v63 = vor.u32 1.1754944e-38, %v2720_v49  ;;  %vm2719_vm13 = vcmp.eq.f32.partialorder %v2718_v46, 8.507059e+37  ;;  %v9565_v35 = vld [vmem:[%s11408_s7] ss:$0 sm:$0xff] }
 0x810   :  { %v7314_v27 = vpop.eup %7313  ;;  %v2511_v1 = vmul.f32 %v2510_v13, %v2390_v14 }
 0x811   :  { %v3107_v51 = vadd.f32 1.0, %v7314_v27 }
 0x812   :  { %v7316_v47 = vpop.eup %7315  ;;  %v2513_v9 = vsel %vm2512_vm6, %v2390_v14, %v2511_v1 }
 0x813   :  { %v3123_v43 = vmul.f32 %v3107_v51, %v2995_v37  ;;  %v2710_v22 = vmul.f32 %v7316_v47, %v2504_v41  ;;  %v2516_v18 = vsel %vm2514_vm7, %v2515_v34, %v2513_v9  ;;  %vm2715_vm10 = vweird.f32 %v7316_v47  ;;  %v9573_v37 = vld [vmem:[%s11409_s8] ss:$0 sm:$0xff] }
 0x814   :  { %7317 = vrcp.f32 %v2516_v18  ;;  %vm2716_vm12 = vmor %vm2714_vm11, %vm2715_vm10  ;;  %v2733_v25 = vand.u32 2147483647, %v2516_v18  ;;  %v2735_v17 = vand.u32 2147483648, %v2516_v18  ;;  %vm2729_vm15 = vweird.f32 %v2516_v18 }
 0x815   :  { %v3169_v0 = vpop.f32.mrf.mxu3  ;;  %3189 = vmatmul.f32.gmra.mxu3 %v3123_v43  ;;  %v2711_v36 = vsub.f32 1.0, %v2710_v22 }
 0x816   :  { %v3170_v6 = vadd.f32 %v9544_v16, %v3169_v0  ;;  %vm2734_vm2 = vcmp.eq.f32.partialorder %v2733_v25, 8.507059e+37 }
 0x817   :  { %v2712_v3 = vmul.f32 %v7316_v47, %v2711_v36 }
 0x818   :  { %v9550_v50 = vadd.f32 %v7666_v61, %v3170_v6 }
 0x819   :  { %v2713_v11 = vadd.f32 %v7316_v47, %v2712_v3 }
 0x81a   :  { %11473 = vst [vmem:[#allocation17_spill] sm:$0xff] %v9550_v50  ;;  %v3237_v14 = vsel %vm63_vm0, %v9550_v50, 0.0  ;;  %v7318_v21 = vpop.eup %7317 }
 0x81b   :  { %3238 = vadd.xlane.f32.xlu0 %v3237_v14  ;;  %v2717_v31 = vsel %vm2716_vm12, %v7316_v47, %v2713_v11  ;;  %v2725_v56 = vmul.f32 %v7318_v21, %v2516_v18  ;;  %vm2730_vm14 = vweird.f32 %v7318_v21  ;;  %v2736_v47 = vor.u32 1.1754944e-38, %v2735_v17 }
 0x81c   :  { %v2722_v59 = vsel %vm2719_vm13, %v2721_v63, %v2717_v31  ;;  %vm2731_vm1 = vmor %vm2729_vm15, %vm2730_vm14 }
 0x81d   :  { %v3172_v8 = vpop.f32.mrf.mxu3  ;;  %v2349_v38 = vpop.xlane.xlu0 %2348  ;;  %v2723_v57 = vmul.f32 %v2722_v59, %v9461_v10  ;;  %v2726_v53 = vsub.f32 1.0, %v2725_v56 }
 0x81e   :  { %v3173_v39 = vadd.f32 %v9544_v16, %v3172_v8  ;;  %v2375_v12 = vmul.f32 %v2349_v38, %v7826_v20 }
 0x81f   :  { %v2840_v13 = vmul.f32 %v9565_v35, %v2723_v57  ;;  %v2727_v27 = vmul.f32 %v7318_v21, %v2726_v53 }
 0x820   :  { %v9560_v41 = vadd.f32 %v7667_v29, %v3173_v39  ;;  %v2391_v10 = vadd.f32 1e-06, %v2375_v12  ;;  %v7670_v29 = vld [vmem:[%s11401_s0 + $0x10] sm:$0xff] }
 0x821   :  { %v2859_v51 = vadd.f32 %v9573_v37, %v2840_v13  ;;  %v2728_v34 = vadd.f32 %v7318_v21, %v2727_v27 }
 0x822   :  { %11474 = vst [vmem:[#allocation18_spill] sm:$0xff] %v9560_v41  ;;  %v3240_v1 = vsel %vm63_vm0, %v9560_v41, 0.0  ;;  %7319 = vrsqrt.f32 %v2391_v10  ;;  %vm2524_vm3 = vcmp.eq.f32.partialorder %v2391_v10, inf  ;;  %v2527_v53 = vand.u32 2147483648, %v2391_v10 }
 0x823   :  { %3241 = vadd.xlane.f32.xlu1 %v3240_v1  ;;  %6675 = vmatmul.msk.f32.gmra.mxu0 %vm63_vm0, %v2859_v51  ;;  %v2732_v43 = vsel %vm2731_vm1, %v7318_v21, %v2728_v34  ;;  %vm2526_vm4 = vcmp.eq.f32.partialorder %v2391_v10, 0.0 }
 0x824   :  { %v2737_v9 = vsel %vm2734_vm2, %v2736_v47, %v2732_v43 }
 0x825   :  { %v2352_v22 = vpop.xlane.xlu1 %2351  ;;  %v2738_v0 = vmul.f32 %v2737_v9, %v9483_v33 }
 0x826   :  { %v2376_v6 = vmul.f32 %v2352_v22, %v7826_v20 }
 0x827   :  { %v2841_v36 = vmul.f32 %v9565_v35, %v2738_v0 }
 0x828   :  { %v7320_v49 = vpop.eup %7319  ;;  %v2392_v61 = vadd.f32 1e-06, %v2376_v6 }
 0x829   :  { %v2518_v3 = vmul.f32 %v7320_v49, %v2391_v10  ;;  %v2860_v18 = vadd.f32 %v9573_v37, %v2841_v36 }
 0x82a   :  { %7321 = vrsqrt.f32 %v2392_v61  ;;  %vm2536_vm5 = vcmp.eq.f32.partialorder %v2392_v61, inf  ;;  %v2539_v6 = vand.u32 2147483648, %v2392_v61  ;;  %vm2538_vm6 = vcmp.eq.f32.partialorder %v2392_v61, 0.0 }
 0x82b   :  { %v2519_v46 = vmul.f32 %v7320_v49, %v2518_v3  ;;  %6676 = vmatmul.msk.f32.gmra.mxu0 %vm63_vm0, %v2860_v18 }
 0x82d   :  { %v2520_v14 = vmul.f32 0.5, %v2519_v46  ;;  %v2355_v11 = vpop.xlane.xlu2 %2354 }
 0x82e   :  { %v2377_v21 = vmul.f32 %v2355_v11, %v7826_v20 }
 0x82f   :  { %v2521_v63 = vsub.f32 1.5, %v2520_v14 }
 0x830   :  { %v7322_v31 = vpop.eup %7321  ;;  %v9583_v33 = vadd.f32 1e-06, %v2377_v21 }
 0x831   :  { %v2522_v56 = vmul.f32 %v7320_v49, %v2521_v63  ;;  %v2530_v8 = vmul.f32 %v7322_v31, %v2392_v61 }
 0x832   :  { %7323 = vrsqrt.f32 %v9583_v33  ;;  %vm2548_vm10 = vcmp.eq.f32.partialorder %v9583_v33, inf  ;;  %vm2550_vm12 = vcmp.eq.f32.partialorder %v9583_v33, 0.0 }
 0x833   :  { %v2523_v59 = vmul.f32 %v2522_v56, %v2391_v10  ;;  %v2531_v39 = vmul.f32 %v7322_v31, %v2530_v8 }
 0x834   :  { %v3175_v38 = vpop.f32.mrf.mxu3 }
 0x835   :  { %v3176_v57 = vadd.f32 %v9544_v16, %v3175_v38  ;;  %v2532_v12 = vmul.f32 0.5, %v2531_v39  ;;  %v2358_v25 = vpop.xlane.xlu0 %2357  ;;  %v2525_v17 = vsel %vm2524_vm3, %v2391_v10, %v2523_v59 }
 0x836   :  { %v2378_v27 = vmul.f32 %v2358_v25, %v7826_v20  ;;  %v2528_v1 = vsel %vm2526_vm4, %v2527_v53, %v2525_v17  ;;  %v2551_v17 = vand.u32 2147483648, %v9583_v33 }
 0x837   :  { %v9590_v13 = vadd.f32 %v7670_v29, %v3176_v57  ;;  %v2533_v51 = vsub.f32 1.5, %v2532_v12  ;;  %7325 = vrcp.f32 %v2528_v1  ;;  %v2750_v39 = vand.u32 2147483648, %v2528_v1 }
 0x838   :  { %v7324_v34 = vpop.eup %7323  ;;  %v9593_v47 = vadd.f32 1e-06, %v2378_v27  ;;  %vm2744_vm11 = vweird.f32 %v2528_v1 }
 0x839   :  { %11475 = vst [vmem:[#allocation19_spill] sm:$0xff] %v9590_v13  ;;  %v3243_v43 = vsel %vm63_vm0, %v9590_v13, 0.0  ;;  %v2534_v9 = vmul.f32 %v7322_v31, %v2533_v51  ;;  %v2542_v10 = vmul.f32 %v7324_v34, %v9583_v33 }
 0x83a   :  { %3244 = vadd.xlane.f32.xlu2 %v3243_v43  ;;  %7327 = vrsqrt.f32 %v9593_v47  ;;  %vm2560_vm1 = vcmp.eq.f32.partialorder %v9593_v47, inf  ;;  %vm2562_vm2 = vcmp.eq.f32.partialorder %v9593_v47, 0.0 }
 0x83b   :  { %v2535_v22 = vmul.f32 %v2534_v9, %v2392_v61  ;;  %v2543_v0 = vmul.f32 %v7324_v34, %v2542_v10 }
 0x83d   :  { %v7326_v36 = vpop.eup %7325  ;;  %v2544_v49 = vmul.f32 0.5, %v2543_v0  ;;  %v2361_v3 = vpop.xlane.xlu1 %2360  ;;  %v2537_v18 = vsel %vm2536_vm5, %v2392_v61, %v2535_v22  ;;  %v2748_v61 = vand.u32 2147483647, %v2528_v1 }
 0x83e   :  { %v2379_v46 = vmul.f32 %v2361_v3, %v7826_v20  ;;  %v2740_v14 = vmul.f32 %v7326_v36, %v2528_v1  ;;  %v9600_v11 = vsel %vm2538_vm6, %v2539_v6, %v2537_v18  ;;  %vm2745_vm7 = vweird.f32 %v7326_v36  ;;  %v7671_v1 = vld [vmem:[%s11401_s0 + $0x18] sm:$0xff] }
 0x83f   :  { %v2545_v21 = vsub.f32 1.5, %v2544_v49  ;;  %7329 = vrcp.f32 %v9600_v11  ;;  %vm2746_vm13 = vmor %vm2744_vm11, %vm2745_vm7  ;;  %vm2749_vm14 = vcmp.eq.f32.partialorder %v2748_v61, 8.507059e+37  ;;  %vm2759_vm3 = vweird.f32 %v9600_v11 }
 0x840   :  { %v7328_v63 = vpop.eup %7327  ;;  %v9603_v31 = vadd.f32 1e-06, %v2379_v46  ;;  %v2741_v56 = vsub.f32 1.0, %v2740_v14 }
 0x841   :  { %v2546_v8 = vmul.f32 %v7324_v34, %v2545_v21  ;;  %v2554_v59 = vmul.f32 %v7328_v63, %v9593_v47  ;;  %v2751_v34 = vor.u32 1.1754944e-38, %v2750_v39  ;;  %v2765_v21 = vand.u32 2147483648, %v9600_v11 }
 0x842   :  { %7331 = vrsqrt.f32 %v9603_v31  ;;  %v2742_v38 = vmul.f32 %v7326_v36, %v2741_v56  ;;  %vm2572_vm7 = vcmp.eq.f32.partialorder %v9603_v31, inf }
 0x843   :  { %v2547_v57 = vmul.f32 %v2546_v8, %v9583_v33  ;;  %v2555_v53 = vmul.f32 %v7328_v63, %v2554_v59  ;;  %v2763_v59 = vand.u32 2147483647, %v9600_v11 }
 0x844   :  { %v3178_v12 = vpop.f32.mrf.mxu3  ;;  %v2743_v25 = vadd.f32 %v7326_v36, %v2742_v38 }
 0x845   :  { %v7330_v29 = vpop.eup %7329  ;;  %v2556_v27 = vmul.f32 0.5, %v2555_v53  ;;  %v3179_v51 = vadd.f32 %v9544_v16, %v3178_v12  ;;  %v2549_v43 = vsel %vm2548_vm10, %v9583_v33, %v2547_v57  ;;  %v2563_v57 = vand.u32 2147483648, %v9593_v47 }
 0x846   :  { %v2747_v9 = vsel %vm2746_vm13, %v7326_v36, %v2743_v25  ;;  %v2755_v10 = vmul.f32 %v7330_v29, %v9600_v11  ;;  %v9614_v22 = vsel %vm2550_vm12, %v2551_v17, %v2549_v43  ;;  %vm2760_vm15 = vweird.f32 %v7330_v29 }
 0x847   :  { %v2557_v0 = vsub.f32 1.5, %v2556_v27  ;;  %v9619_v6 = vadd.f32 %v7671_v1, %v3179_v51  ;;  %v2752_v49 = vsel %vm2749_vm14, %v2751_v34, %v2747_v9  ;;  %7333 = vrcp.f32 %v9614_v22  ;;  %vm2761_vm4 = vmor %vm2759_vm3, %vm2760_vm15  ;;  %v7672_v9 = vld [vmem:[%s11401_s0 + $0x20] sm:$0xff] }
 0x848   :  { %v7332_v3 = vpop.eup %7331  ;;  %v2753_v18 = vmul.f32 %v2752_v49, %v9494_v23  ;;  %v2756_v33 = vsub.f32 1.0, %v2755_v10  ;;  %v2766_v17 = vor.u32 1.1754944e-38, %v2765_v21  ;;  %vm2764_vm5 = vcmp.eq.f32.partialorder %v2763_v59, 8.507059e+37 }
 0x849   :  { %11476 = vst [vmem:[#allocation20_spill] sm:$0xff] %v9619_v6  ;;  %v2558_v36 = vmul.f32 %v7328_v63, %v2557_v0  ;;  %v2566_v46 = vmul.f32 %v7332_v3, %v9603_v31  ;;  %v3246_v14 = vsel %vm63_vm0, %v9619_v6, 0.0  ;;  %vm2774_vm10 = vweird.f32 %v9614_v22 }
 0x84a   :  { %3247 = vadd.xlane.f32.xlu0 %v3246_v14  ;;  %v2842_v56 = vmul.f32 %v9565_v35, %v2753_v18  ;;  %v2757_v8 = vmul.f32 %v7330_v29, %v2756_v33  ;;  %v2780_v33 = vand.u32 2147483648, %v9614_v22  ;;  %vm2574_vm12 = vcmp.eq.f32.partialorder %v9603_v31, 0.0 }
 0x84b   :  { %v2559_v39 = vmul.f32 %v2558_v36, %v9593_v47  ;;  %v2567_v38 = vmul.f32 %v7332_v3, %v2566_v46  ;;  %v2778_v46 = vand.u32 2147483647, %v9614_v22 }
 0x84c   :  { %v3181_v23 = vpop.f32.mrf.mxu3  ;;  %v2861_v63 = vadd.f32 %v9573_v37, %v2842_v56  ;;  %v2758_v61 = vadd.f32 %v7330_v29, %v2757_v8  ;;  %v2575_v56 = vand.u32 2147483648, %v9603_v31 }
 0x84d   :  { %v7334_v53 = vpop.eup %7333  ;;  %v2568_v12 = vmul.f32 0.5, %v2567_v38  ;;  %v3182_v25 = vadd.f32 %v9544_v16, %v3181_v23  ;;  %v2561_v27 = vsel %vm2560_vm1, %v9593_v47, %v2559_v39  ;;  %v2781_v39 = vor.u32 1.1754944e-38, %v2780_v33 }
 0x84e   :  { %6677 = vmatmul.msk.f32.gmra.mxu0 %vm63_vm0, %v2861_v63  ;;  %v2762_v51 = vsel %vm2761_vm4, %v7330_v29, %v2758_v61  ;;  %v2770_v34 = vmul.f32 %v7334_v53, %v9614_v22  ;;  %v2564_v43 = vsel %vm2562_vm2, %v2563_v57, %v2561_v27  ;;  %vm2775_vm6 = vweird.f32 %v7334_v53  ;;  %v7673_v22 = vld [vmem:[%s11401_s0 + $0x28] sm:$0xff] }
 0x84f   :  { %v2569_v11 = vsub.f32 1.5, %v2568_v12  ;;  %v9644_v10 = vadd.f32 %v7672_v9, %v3182_v25  ;;  %v2767_v0 = vsel %vm2764_vm5, %v2766_v17, %v2762_v51  ;;  %7335 = vrcp.f32 %v2564_v43  ;;  %vm2776_vm11 = vmor %vm2774_vm10, %vm2775_vm6 }
 0x850   :  { %v2768_v1 = vmul.f32 %v2767_v0, %v9502_v2  ;;  %v2771_v49 = vsub.f32 1.0, %v2770_v34  ;;  %vm2779_vm13 = vcmp.eq.f32.partialorder %v2778_v46, 8.507059e+37  ;;  %v2795_v27 = vand.u32 2147483648, %v2564_v43 }
 0x851   :  { %11477 = vst [vmem:[#allocation21_spill] sm:$0xff] %v9644_v10  ;;  %v2570_v18 = vmul.f32 %v7332_v3, %v2569_v11  ;;  %v3249_v29 = vsel %vm63_vm0, %v9644_v10, 0.0  ;;  %v2793_v34 = vand.u32 2147483647, %v2564_v43  ;;  %vm2789_vm15 = vweird.f32 %v2564_v43 }
 0x852   :  { %3250 = vadd.xlane.f32.xlu1 %v3249_v29  ;;  %v2843_v47 = vmul.f32 %v9565_v35, %v2768_v1  ;;  %v2772_v36 = vmul.f32 %v7334_v53, %v2771_v49  ;;  %v2796_v49 = vor.u32 1.1754944e-38, %v2795_v27 }
 0x853   :  { %v2571_v14 = vmul.f32 %v2570_v18, %v9603_v31  ;;  %vm2794_vm2 = vcmp.eq.f32.partialorder %v2793_v34, 8.507059e+37 }
 0x854   :  { %v3184_v21 = vpop.f32.mrf.mxu3  ;;  %v2862_v2 = vadd.f32 %v9573_v37, %v2843_v47  ;;  %v2773_v3 = vadd.f32 %v7334_v53, %v2772_v36  ;;  %v7674_v47 = vld [vmem:[%s11401_s0 + $0x30] sm:$0xff] }
 0x855   :  { %v7336_v8 = vpop.eup %7335  ;;  %v3185_v59 = vadd.f32 %v9544_v16, %v3184_v21  ;;  %v2573_v38 = vsel %vm2572_vm7, %v9603_v31, %v2571_v14 }
 0x856   :  { %6678 = vmatmul.msk.f32.gmra.mxu0 %vm63_vm0, %v2862_v2  ;;  %v2777_v23 = vsel %vm2776_vm11, %v7334_v53, %v2773_v3  ;;  %v2785_v63 = vmul.f32 %v7336_v8, %v2564_v43  ;;  %v2576_v61 = vsel %vm2574_vm12, %v2575_v56, %v2573_v38  ;;  %vm2790_vm14 = vweird.f32 %v7336_v8 }
 0x857   :  { %v9664_v57 = vadd.f32 %v7673_v22, %v3185_v59  ;;  %v2782_v12 = vsel %vm2779_vm13, %v2781_v39, %v2777_v23  ;;  %7337 = vrcp.f32 %v2576_v61  ;;  %vm2791_vm1 = vmor %vm2789_vm15, %vm2790_vm14  ;;  %v2808_v14 = vand.u32 2147483647, %v2576_v61 }
 0x858   :  { %v2783_v25 = vmul.f32 %v2782_v12, %v9510_v19  ;;  %v2786_v17 = vsub.f32 1.0, %v2785_v63  ;;  %v2810_v21 = vand.u32 2147483648, %v2576_v61  ;;  %vm2804_vm4 = vweird.f32 %v2576_v61 }
 0x859   :  { %11478 = vst [vmem:[#allocation22_spill] sm:$0xff] %v9664_v57  ;;  %v3252_v31 = vsel %vm63_vm0, %v9664_v57, 0.0  ;;  %vm2809_vm6 = vcmp.eq.f32.partialorder %v2808_v14, 8.507059e+37 }
 0x85a   :  { %3253 = vadd.xlane.f32.xlu2 %v3252_v31  ;;  %v2844_v53 = vmul.f32 %v9565_v35, %v2783_v25  ;;  %v2787_v51 = vmul.f32 %v7336_v8, %v2786_v17  ;;  %v2811_v39 = vor.u32 1.1754944e-38, %v2810_v21 }
 0x85c   :  { %v2863_v11 = vadd.f32 %v9573_v37, %v2844_v53  ;;  %v2788_v9 = vadd.f32 %v7336_v8, %v2787_v51  ;;  %v3187_v1 = vpop.f32.mrf.mxu3 }
 0x85d   :  { %v7338_v0 = vpop.eup %7337  ;;  %v3188_v19 = vadd.f32 %v9544_v16, %v3187_v1 }
 0x85e   :  { %6679 = vmatmul.msk.f32.gmra.mxu0 %vm63_vm0, %v2863_v11  ;;  %v2792_v18 = vsel %vm2791_vm1, %v7336_v8, %v2788_v9  ;;  %v2800_v29 = vmul.f32 %v7338_v0, %v2576_v61  ;;  %vm2805_vm3 = vweird.f32 %v7338_v0 }
 0x85f   :  { %v2797_v33 = vsel %vm2794_vm2, %v2796_v49, %v2792_v18  ;;  %v9676_v36 = vadd.f32 %v7674_v47, %v3188_v19  ;;  %vm2806_vm5 = vmor %vm2804_vm4, %vm2805_vm3 }
 0x860   :  { %v2798_v43 = vmul.f32 %v2797_v33, %v9518_v4  ;;  %v2801_v46 = vsub.f32 1.0, %v2800_v29 }
 0x861   :  { %11479 = vst [vmem:[#allocation23_spill] sm:$0xff] %v9676_v36  ;;  %v3255_v2 = vsel %vm63_vm0, %v9676_v36, 0.0 }
 0x862   :  { %v2845_v3 = vmul.f32 %v9565_v35, %v2798_v43  ;;  %v2802_v56 = vmul.f32 %v7338_v0, %v2801_v46  ;;  %3256 = vadd.xlane.f32.xlu1 %v3255_v2 }
 0x864   :  { %v2864_v8 = vadd.f32 %v9573_v37, %v2845_v3  ;;  %v2803_v59 = vadd.f32 %v7338_v0, %v2802_v56 }
 0x866   :  { %6680 = vmatmul.msk.f32.gmra.mxu0 %vm63_vm0, %v2864_v8  ;;  %v2807_v4 = vsel %vm2806_vm5, %v7338_v0, %v2803_v59  ;;  %v7675_v59 = vld [vmem:[%s11401_s0 + $0x38] sm:$0xff] }
 0x867   :  { %v2812_v38 = vsel %vm2809_vm6, %v2811_v39, %v2807_v4 }
 0x868   :  { %v2813_v23 = vmul.f32 %v2812_v38, %v9526_v40 }
 0x86a   :  { %v2846_v63 = vmul.f32 %v9565_v35, %v2813_v23 }
 0x86c   :  { %v2865_v22 = vadd.f32 %v9573_v37, %v2846_v63 }
 0x86e   :  { %6681 = vmatmul.msk.f32.gmra.mxu0 %vm63_vm0, %v2865_v22 }
 0x875   :  { %v2364_v12 = vpop.xlane.xlu2 %2363 }
 0x876   :  { %v2380_v25 = vmul.f32 %v2364_v12, %v7826_v20 }
 0x878   :  { %v2396_v17 = vadd.f32 1e-06, %v2380_v25 }
 0x87a   :  { %7339 = vrsqrt.f32 %v2396_v17  ;;  %vm2584_vm7 = vcmp.eq.f32.partialorder %v2396_v17, inf  ;;  %v2587_v40 = vand.u32 2147483648, %v2396_v17  ;;  %vm2586_vm10 = vcmp.eq.f32.partialorder %v2396_v17, 0.0 }
 0x880   :  { %v7340_v61 = vpop.eup %7339 }
 0x881   :  { %v2578_v31 = vmul.f32 %v7340_v61, %v2396_v17 }
 0x883   :  { %v2579_v27 = vmul.f32 %v7340_v61, %v2578_v31 }
 0x885   :  { %v2580_v53 = vmul.f32 0.5, %v2579_v27 }
 0x887   :  { %v2581_v51 = vsub.f32 1.5, %v2580_v53 }
 0x889   :  { %v2582_v34 = vmul.f32 %v7340_v61, %v2581_v51 }
 0x88b   :  { %v2583_v11 = vmul.f32 %v2582_v34, %v2396_v17 }
 0x88d   :  { %v2585_v0 = vsel %vm2584_vm7, %v2396_v17, %v2583_v11 }
 0x88e   :  { %v3239_v9 = vpop.xlane.xlu0 %3238  ;;  %v2588_v49 = vsel %vm2586_vm10, %v2587_v40, %v2585_v0 }
 0x88f   :  { %v3285_v1 = vmul.f32 %v3239_v9, %v7826_v20  ;;  %7341 = vrcp.f32 %v2588_v49  ;;  %v2823_v56 = vand.u32 2147483647, %v2588_v49  ;;  %v2825_v8 = vand.u32 2147483648, %v2588_v49  ;;  %v9719_v9 = vld [vmem:[%s11411_s10] ss:$0 sm:$0xff] }
 0x890   :  { %vm2819_vm12 = vweird.f32 %v2588_v49 }
 0x891   :  { %v9691_v19 = vsub.f32 %v9550_v50, %v3285_v1  ;;  %v2826_v22 = vor.u32 1.1754944e-38, %v2825_v8  ;;  %vm2824_vm14 = vcmp.eq.f32.partialorder %v2823_v56, 8.507059e+37 }
 0x893   :  { %v3317_v18 = vmul.f32 %v9691_v19, %v9691_v19 }
 0x895   :  { %v3333_v29 = vsel %vm63_vm0, %v3317_v18, 0.0  ;;  %v7342_v33 = vpop.eup %7341 }
 0x896   :  { %3334 = vadd.xlane.f32.xlu0 %v3333_v29  ;;  %v3242_v47 = vpop.xlane.xlu1 %3241  ;;  %v2815_v46 = vmul.f32 %v7342_v33, %v2588_v49  ;;  %vm2820_vm11 = vweird.f32 %v7342_v33 }
 0x897   :  { %v3286_v43 = vmul.f32 %v3242_v47, %v7826_v20  ;;  %vm2821_vm13 = vmor %vm2819_vm12, %vm2820_vm11 }
 0x898   :  { %v3190_v14 = vpop.f32.mrf.mxu3  ;;  %v2816_v3 = vsub.f32 1.0, %v2815_v46 }
 0x899   :  { %v9698_v21 = vsub.f32 %v9560_v41, %v3286_v43  ;;  %v3191_v2 = vadd.f32 %v9544_v16, %v3190_v14 }
 0x89a   :  { %v2817_v38 = vmul.f32 %v7342_v33, %v2816_v3 }
 0x89b   :  { %v9704_v39 = vadd.f32 %v7675_v59, %v3191_v2  ;;  %v3318_v4 = vmul.f32 %v9698_v21, %v9698_v21 }
 0x89c   :  { %v2818_v16 = vadd.f32 %v7342_v33, %v2817_v38 }
 0x89d   :  { %11480 = vst [vmem:[#allocation24_spill] sm:$0xff] %v9704_v39  ;;  %v3258_v23 = vsel %vm63_vm0, %v9704_v39, 0.0  ;;  %v3336_v63 = vsel %vm63_vm0, %v3318_v4, 0.0 }
 0x89e   :  { %3259 = vadd.xlane.f32.xlu0 %v3258_v23  ;;  %3337 = vadd.xlane.f32.xlu2 %v3336_v63  ;;  %v2822_v12 = vsel %vm2821_vm13, %v7342_v33, %v2818_v16 }
 0x89f   :  { %v2827_v25 = vsel %vm2824_vm14, %v2826_v22, %v2822_v12 }
 0x8a0   :  { %v2964_v17 = vpop.f32.mrf.mxu0  ;;  %v2828_v61 = vmul.f32 %v2827_v25, %v9535_v32 }
 0x8a1   :  { %v2965_v31 = vadd.f32 %v9450_v58, %v2964_v17 }
 0x8a2   :  { %v2847_v27 = vmul.f32 %v9565_v35, %v2828_v61 }
 0x8a3   :  { %v3012_v53 = vmul.f32 0.044715, %v2965_v31  ;;  %v2996_v2 = vmul.f32 0.5, %v2965_v31 }
 0x8a4   :  { %v2866_v51 = vadd.f32 %v9573_v37, %v2847_v27 }
 0x8a5   :  { %v3028_v34 = vmul.f32 %v3012_v53, %v2965_v31 }
 0x8a6   :  { %6682 = vmatmul.msk.f32.gmra.mxu0 %vm63_vm0, %v2866_v51 }
 0x8a7   :  { %v3044_v11 = vmul.f32 %v3028_v34, %v2965_v31 }
 0x8a8   :  { %v2967_v40 = vpop.f32.mrf.mxu0 }
 0x8a9   :  { %v2968_v0 = vadd.f32 %v9719_v9, %v2967_v40  ;;  %v3060_v32 = vadd.f32 %v3044_v11, %v2965_v31 }
 0x8ab   :  { %v3013_v1 = vmul.f32 0.044715, %v2968_v0  ;;  %v3076_v58 = vmul.f32 0.7978846, %v3060_v32  ;;  %v2997_v59 = vmul.f32 0.5, %v2968_v0 }
 0x8ad   :  { %v3245_v49 = vpop.xlane.xlu2 %3244  ;;  %7343 = vtanh.f32 %v3076_v58  ;;  %v3029_v37 = vmul.f32 %v3013_v1, %v2968_v0 }
 0x8ae   :  { %v3287_v35 = vmul.f32 %v3245_v49, %v7826_v20 }
 0x8af   :  { %v3045_v29 = vmul.f32 %v3029_v37, %v2968_v0 }
 0x8b0   :  { %v9724_v18 = vsub.f32 %v9590_v13, %v3287_v35 }
 0x8b1   :  { %v3061_v47 = vadd.f32 %v3045_v29, %v2968_v0 }
 0x8b2   :  { %v3319_v33 = vmul.f32 %v9724_v18, %v9724_v18 }
 0x8b3   :  { %v7344_v43 = vpop.eup %7343  ;;  %v3077_v14 = vmul.f32 0.7978846, %v3061_v47 }
 0x8b4   :  { %v3339_v46 = vsel %vm63_vm0, %v3319_v33, 0.0  ;;  %v3108_v3 = vadd.f32 1.0, %v7344_v43 }
 0x8b5   :  { %3340 = vadd.xlane.f32.xlu1 %v3339_v46  ;;  %7345 = vtanh.f32 %v3077_v14 }
 0x8b6   :  { %v3124_v56 = vmul.f32 %v3108_v3, %v2996_v2 }
 0x8b8   :  { %3192 = vmatmul.f32.gmra.mxu3 %v3124_v56 }
 0x8bb   :  { %v7346_v8 = vpop.eup %7345 }
 0x8bc   :  { %v3109_v4 = vadd.f32 1.0, %v7346_v8 }
 0x8bd   :  { %v3248_v38 = vpop.xlane.xlu0 %3247 }
 0x8be   :  { %v3288_v23 = vmul.f32 %v3248_v38, %v7826_v20  ;;  %v3125_v63 = vmul.f32 %v3109_v4, %v2997_v59 }
 0x8c0   :  { %v9731_v16 = vsub.f32 %v9619_v6, %v3288_v23  ;;  %3195 = vmatmul.f32.gmra.mxu3 %v3125_v63 }
 0x8c2   :  { %v3320_v22 = vmul.f32 %v9731_v16, %v9731_v16 }
 0x8c4   :  { %v3342_v12 = vsel %vm63_vm0, %v3320_v22, 0.0 }
 0x8c5   :  { %3343 = vadd.xlane.f32.xlu2 %v3342_v12  ;;  %v3251_v25 = vpop.xlane.xlu1 %3250 }
 0x8c6   :  { %v3289_v17 = vmul.f32 %v3251_v25, %v7826_v20 }
 0x8c8   :  { %v9738_v61 = vsub.f32 %v9644_v10, %v3289_v17 }
 0x8ca   :  { %v3321_v31 = vmul.f32 %v9738_v61, %v9738_v61 }
 0x8cb   :  { %v2970_v27 = vpop.f32.mrf.mxu0 }
 0x8cc   :  { %v2971_v53 = vadd.f32 %v9719_v9, %v2970_v27  ;;  %v3345_v51 = vsel %vm63_vm0, %v3321_v31, 0.0 }
 0x8cd   :  { %v3254_v34 = vpop.xlane.xlu2 %3253  ;;  %3346 = vadd.xlane.f32.xlu0 %v3345_v51 }
 0x8ce   :  { %v3014_v11 = vmul.f32 0.044715, %v2971_v53  ;;  %v3290_v40 = vmul.f32 %v3254_v34, %v7826_v20  ;;  %v2998_v12 = vmul.f32 0.5, %v2971_v53 }
 0x8d0   :  { %v9746_v0 = vsub.f32 %v9664_v57, %v3290_v40  ;;  %v3030_v32 = vmul.f32 %v3014_v11, %v2971_v53 }
 0x8d2   :  { %v3322_v1 = vmul.f32 %v9746_v0, %v9746_v0  ;;  %v3046_v58 = vmul.f32 %v3030_v32, %v2971_v53 }
 0x8d3   :  { %v2973_v49 = vpop.f32.mrf.mxu0 }
 0x8d4   :  { %v2974_v35 = vadd.f32 %v9719_v9, %v2973_v49  ;;  %v3348_v37 = vsel %vm63_vm0, %v3322_v1, 0.0  ;;  %v3062_v29 = vadd.f32 %v3046_v58, %v2971_v53 }
 0x8d5   :  { %3349 = vadd.xlane.f32.xlu1 %v3348_v37  ;;  %v3257_v47 = vpop.xlane.xlu1 %3256 }
 0x8d6   :  { %v3015_v33 = vmul.f32 0.044715, %v2974_v35  ;;  %v3078_v43 = vmul.f32 0.7978846, %v3062_v29  ;;  %v3291_v46 = vmul.f32 %v3257_v47, %v7826_v20  ;;  %v2999_v58 = vmul.f32 0.5, %v2974_v35 }
 0x8d8   :  { %7347 = vtanh.f32 %v3078_v43  ;;  %v3031_v14 = vmul.f32 %v3015_v33, %v2974_v35  ;;  %v9754_v2 = vsub.f32 %v9676_v36, %v3291_v46 }
 0x8da   :  { %v3047_v3 = vmul.f32 %v3031_v14, %v2974_v35  ;;  %v3323_v8 = vmul.f32 %v9754_v2, %v9754_v2 }
 0x8db   :  { %v2976_v56 = vpop.f32.mrf.mxu0 }
 0x8dc   :  { %v2977_v59 = vadd.f32 %v9719_v9, %v2976_v56  ;;  %v3063_v4 = vadd.f32 %v3047_v3, %v2974_v35  ;;  %v3351_v38 = vsel %vm63_vm0, %v3323_v8, 0.0 }
 0x8dd   :  { %3352 = vadd.xlane.f32.xlu2 %v3351_v38 }
 0x8de   :  { %v7348_v23 = vpop.eup %7347  ;;  %v3016_v63 = vmul.f32 0.044715, %v2977_v59  ;;  %v3079_v22 = vmul.f32 0.7978846, %v3063_v4  ;;  %v3000_v56 = vmul.f32 0.5, %v2977_v59 }
 0x8df   :  { %v3110_v25 = vadd.f32 1.0, %v7348_v23 }
 0x8e0   :  { %7349 = vtanh.f32 %v3079_v22  ;;  %v3032_v17 = vmul.f32 %v3016_v63, %v2977_v59 }
 0x8e1   :  { %v3126_v31 = vmul.f32 %v3110_v25, %v2998_v12 }
 0x8e2   :  { %v3048_v27 = vmul.f32 %v3032_v17, %v2977_v59 }
 0x8e3   :  { %v2979_v51 = vpop.f32.mrf.mxu0  ;;  %3198 = vmatmul.f32.gmra.mxu3 %v3126_v31 }
 0x8e4   :  { %v2980_v34 = vadd.f32 %v9719_v9, %v2979_v51  ;;  %v3064_v11 = vadd.f32 %v3048_v27, %v2977_v59 }
 0x8e6   :  { %v7350_v40 = vpop.eup %7349  ;;  %v3017_v32 = vmul.f32 0.044715, %v2980_v34  ;;  %v3080_v1 = vmul.f32 0.7978846, %v3064_v11  ;;  %v3001_v12 = vmul.f32 0.5, %v2980_v34 }
 0x8e7   :  { %v3111_v49 = vadd.f32 1.0, %v7350_v40 }
 0x8e8   :  { %7351 = vtanh.f32 %v3080_v1  ;;  %v3033_v37 = vmul.f32 %v3017_v32, %v2980_v34 }
 0x8e9   :  { %v3127_v29 = vmul.f32 %v3111_v49, %v2999_v58 }
 0x8ea   :  { %v3049_v33 = vmul.f32 %v3033_v37, %v2980_v34 }
 0x8eb   :  { %v2982_v53 = vpop.f32.mrf.mxu0  ;;  %3201 = vmatmul.f32.gmra.mxu3 %v3127_v29 }
 0x8ec   :  { %v2983_v47 = vadd.f32 %v9719_v9, %v2982_v53  ;;  %v3065_v43 = vadd.f32 %v3049_v33, %v2980_v34 }
 0x8ee   :  { %v7352_v46 = vpop.eup %7351  ;;  %v3018_v14 = vmul.f32 0.044715, %v2983_v47  ;;  %v3081_v3 = vmul.f32 0.7978846, %v3065_v43  ;;  %v3002_v27 = vmul.f32 0.5, %v2983_v47 }
 0x8ef   :  { %v3112_v8 = vadd.f32 1.0, %v7352_v46 }
 0x8f0   :  { %7353 = vtanh.f32 %v3081_v3  ;;  %v3034_v4 = vmul.f32 %v3018_v14, %v2983_v47 }
 0x8f1   :  { %v3128_v38 = vmul.f32 %v3112_v8, %v3000_v56 }
 0x8f2   :  { %v3050_v23 = vmul.f32 %v3034_v4, %v2983_v47 }
 0x8f3   :  { %3204 = vmatmul.f32.gmra.mxu3 %v3128_v38  ;;  %v6688_v38 = vld [vmem:[%s11402_s1 + $0x38] sm:$0xff] }
 0x8f4   :  { %v3066_v35 = vadd.f32 %v3050_v23, %v2983_v47  ;;  %v6687_v23 = vld [vmem:[%s11402_s1 + $0x30] sm:$0xff]  ;;  %3953 = vmatpush.msrb.mxu1 %v6688_v38 }
 0x8f6   :  { %v7354_v63 = vpop.eup %7353  ;;  %v3082_v22 = vmul.f32 0.7978846, %v3066_v35  ;;  %3954 = vmatpush.msrb.mxu1 %v6687_v23 }
 0x8f7   :  { %v3113_v25 = vadd.f32 1.0, %v7354_v63 }
 0x8f8   :  { %7355 = vtanh.f32 %v3082_v22 }
 0x8f9   :  { %v3129_v17 = vmul.f32 %v3113_v25, %v3001_v12  ;;  %v6686_v12 = vld [vmem:[%s11402_s1 + $0x28] sm:$0xff] }
 0x8fa   :  { %3955 = vmatpush.msrb.mxu1 %v6686_v12  ;;  %v9791_v12 = vld [vmem:[%s11404_s3 + $0x1] ss:$0 sm:$0xff] }
 0x8fb   :  { %3207 = vmatmul.f32.gmra.mxu3 %v3129_v17 }
 0x8fe   :  { %v7356_v31 = vpop.eup %7355 }
 0x8ff   :  { %v3114_v51 = vadd.f32 1.0, %v7356_v31 }
 0x901   :  { %v3130_v11 = vmul.f32 %v3114_v51, %v3002_v27  ;;  %v6685_v27 = vld [vmem:[%s11402_s1 + $0x20] sm:$0xff] }
 0x902   :  { %3956 = vmatpush.msrb.mxu1 %v6685_v27 }
 0x903   :  { %3210 = vmatmul.f32.gmra.mxu3 %v3130_v11 }
 0x909   :  { %v3335_v59 = vpop.xlane.xlu0 %3334 }
 0x90a   :  { %v3381_v40 = vmul.f32 %v3335_v59, %v7826_v20 }
 0x90c   :  { %v3397_v32 = vadd.f32 1e-06, %v3381_v40 }
 0x90e   :  { %7357 = vrsqrt.f32 %v3397_v32  ;;  %vm3420_vm15 = vcmp.eq.f32.partialorder %v3397_v32, inf  ;;  %v3423_v22 = vand.u32 2147483648, %v3397_v32  ;;  %vm3422_vm1 = vcmp.eq.f32.partialorder %v3397_v32, 0.0 }
 0x911   :  { %v3260_v1 = vpop.xlane.xlu0 %3259  ;;  %v3338_v58 = vpop.xlane.xlu2 %3337 }
 0x912   :  { %v3292_v49 = vmul.f32 %v3260_v1, %v7826_v20  ;;  %v3382_v34 = vmul.f32 %v3338_v58, %v7826_v20 }
 0x914   :  { %v7358_v37 = vpop.eup %7357  ;;  %v9766_v29 = vsub.f32 %v9704_v39, %v3292_v49  ;;  %v3398_v33 = vadd.f32 1e-06, %v3382_v34 }
 0x915   :  { %v3414_v53 = vmul.f32 %v7358_v37, %v3397_v32 }
 0x916   :  { %7359 = vrsqrt.f32 %v3398_v33  ;;  %v3324_v47 = vmul.f32 %v9766_v29, %v9766_v29  ;;  %vm3432_vm2 = vcmp.eq.f32.partialorder %v3398_v33, inf  ;;  %vm3434_vm3 = vcmp.eq.f32.partialorder %v3398_v33, 0.0 }
 0x917   :  { %v3415_v43 = vmul.f32 %v7358_v37, %v3414_v53 }
 0x918   :  { %v3354_v46 = vsel %vm63_vm0, %v3324_v47, 0.0 }
 0x919   :  { %v3416_v14 = vmul.f32 0.5, %v3415_v43  ;;  %3355 = vadd.xlane.f32.xlu0 %v3354_v46 }
 0x91b   :  { %v3417_v3 = vsub.f32 1.5, %v3416_v14 }
 0x91c   :  { %v7360_v56 = vpop.eup %7359 }
 0x91d   :  { %v3418_v8 = vmul.f32 %v7358_v37, %v3417_v3  ;;  %v3426_v4 = vmul.f32 %v7360_v56, %v3398_v33 }
 0x91f   :  { %v3419_v35 = vmul.f32 %v3418_v8, %v3397_v32  ;;  %v3427_v63 = vmul.f32 %v7360_v56, %v3426_v4 }
 0x921   :  { %v3421_v25 = vsel %vm3420_vm15, %v3397_v32, %v3419_v35  ;;  %v3428_v17 = vmul.f32 0.5, %v3427_v63  ;;  %v3435_v32 = vand.u32 2147483648, %v3398_v33 }
 0x922   :  { %v3424_v31 = vsel %vm3422_vm1, %v3423_v22, %v3421_v25 }
 0x923   :  { %7361 = vrcp.f32 %v3424_v31  ;;  %v3429_v51 = vsub.f32 1.5, %v3428_v17  ;;  %v2985_v11 = vpop.f32.mrf.mxu0  ;;  %v3614_v38 = vand.u32 2147483647, %v3424_v31  ;;  %vm3610_vm5 = vweird.f32 %v3424_v31 }
 0x924   :  { %v2986_v40 = vadd.f32 %v9719_v9, %v2985_v11  ;;  %v3616_v9 = vand.u32 2147483648, %v3424_v31 }
 0x925   :  { %v3430_v59 = vmul.f32 %v7360_v56, %v3429_v51  ;;  %vm3615_vm7 = vcmp.eq.f32.partialorder %v3614_v38, 8.507059e+37 }
 0x926   :  { %v3019_v58 = vmul.f32 0.044715, %v2986_v40 }
 0x927   :  { %v3431_v1 = vmul.f32 %v3430_v59, %v3398_v33 }
 0x928   :  { %v3341_v49 = vpop.xlane.xlu1 %3340  ;;  %v3035_v53 = vmul.f32 %v3019_v58, %v2986_v40 }
 0x929   :  { %v7362_v34 = vpop.eup %7361  ;;  %v3383_v37 = vmul.f32 %v3341_v49, %v7826_v20  ;;  %v3433_v47 = vsel %vm3432_vm2, %v3398_v33, %v3431_v1  ;;  %v3617_v33 = vor.u32 1.1754944e-38, %v3616_v9 }
 0x92a   :  { %v3606_v43 = vmul.f32 %v7362_v34, %v3424_v31  ;;  %v3436_v46 = vsel %vm3434_vm3, %v3435_v32, %v3433_v47  ;;  %v3051_v3 = vmul.f32 %v3035_v53, %v2986_v40  ;;  %vm3611_vm4 = vweird.f32 %v7362_v34  ;;  %v9798_v31 = vld [vmem:[%s11405_s4 + $0x1] ss:$0 sm:$0xff] }
 0x92b   :  { %v9785_v14 = vadd.f32 1e-06, %v3383_v37  ;;  %7363 = vrcp.f32 %v3436_v46  ;;  %vm3612_vm6 = vmor %vm3610_vm5, %vm3611_vm4  ;;  %v3629_v1 = vand.u32 2147483647, %v3436_v46  ;;  %v3631_v58 = vand.u32 2147483648, %v3436_v46 }
 0x92c   :  { %v3607_v56 = vsub.f32 1.0, %v3606_v43  ;;  %v3067_v8 = vadd.f32 %v3051_v3, %v2986_v40  ;;  %v3003_v53 = vmul.f32 0.5, %v2986_v40  ;;  %vm3625_vm11 = vweird.f32 %v3436_v46 }
 0x92d   :  { %7365 = vrsqrt.f32 %v9785_v14  ;;  %vm3630_vm13 = vcmp.eq.f32.partialorder %v3629_v1, 8.507059e+37  ;;  %v3632_v9 = vor.u32 1.1754944e-38, %v3631_v58  ;;  %vm3444_vm14 = vcmp.eq.f32.partialorder %v9785_v14, inf }
 0x92e   :  { %v3608_v4 = vmul.f32 %v7362_v34, %v3607_v56  ;;  %v3083_v23 = vmul.f32 0.7978846, %v3067_v8  ;;  %vm3446_vm15 = vcmp.eq.f32.partialorder %v9785_v14, 0.0 }
 0x930   :  { %v3609_v35 = vadd.f32 %v7362_v34, %v3608_v4  ;;  %7367 = vtanh.f32 %v3083_v23 }
 0x931   :  { %v7364_v63 = vpop.eup %7363 }
 0x932   :  { %v3613_v22 = vsel %vm3612_vm6, %v7362_v34, %v3609_v35  ;;  %v3621_v25 = vmul.f32 %v7364_v63, %v3436_v46  ;;  %vm3626_vm10 = vweird.f32 %v7364_v63 }
 0x933   :  { %v7366_v17 = vpop.eup %7365  ;;  %v3618_v27 = vsel %vm3615_vm7, %v3617_v33, %v3613_v22  ;;  %vm3627_vm12 = vmor %vm3625_vm11, %vm3626_vm10 }
 0x934   :  { %v3438_v51 = vmul.f32 %v7366_v17, %v9785_v14  ;;  %v3619_v11 = vmul.f32 %v3618_v27, %v9691_v19  ;;  %v3622_v59 = vsub.f32 1.0, %v3621_v25  ;;  %v9810_v25 = vld [vmem:[%s11413_s12] ss:$0 sm:$0xff] }
 0x936   :  { %v3439_v49 = vmul.f32 %v7366_v17, %v3438_v51  ;;  %v3848_v32 = vmul.f32 %v9791_v12, %v3619_v11  ;;  %v3623_v34 = vmul.f32 %v7364_v63, %v3622_v59  ;;  %v7368_v37 = vpop.eup %7367 }
 0x937   :  { %v3115_v19 = vadd.f32 1.0, %v7368_v37 }
 0x938   :  { %v3440_v47 = vmul.f32 0.5, %v3439_v49  ;;  %v3867_v43 = vadd.f32 %v9798_v31, %v3848_v32  ;;  %v3624_v3 = vadd.f32 %v7364_v63, %v3623_v34  ;;  %v3344_v56 = vpop.xlane.xlu2 %3343 }
 0x939   :  { %v3384_v4 = vmul.f32 %v3344_v56, %v7826_v20  ;;  %v3131_v38 = vmul.f32 %v3115_v19, %v3003_v53 }
 0x93a   :  { %v3441_v8 = vsub.f32 1.5, %v3440_v47  ;;  %6690 = vmatmul.msk.f32.vlgmr.msrb.gmra.mxu1 %vm63_vm0, %v3867_v43  ;;  %v3628_v23 = vsel %vm3627_vm12, %v7364_v63, %v3624_v3  ;;  %v7679_v3 = vld [vmem:[%s11401_s0 + $0x48] sm:$0xff] }
 0x93b   :  { %v3633_v35 = vsel %vm3630_vm13, %v3632_v9, %v3628_v23  ;;  %v9804_v40 = vadd.f32 1e-06, %v3384_v4  ;;  %v3193_v46 = vpop.f32.mrf.mxu3  ;;  %3213 = vmatmul.f32.gmra.mxu3 %v3131_v38 }
 0x93c   :  { %v3442_v33 = vmul.f32 %v7366_v17, %v3441_v8  ;;  %v3634_v22 = vmul.f32 %v3633_v35, %v9698_v21  ;;  %v3194_v27 = vadd.f32 %v9810_v25, %v3193_v46  ;;  %v7678_v17 = vld [vmem:[%s11401_s0 + $0x40] sm:$0xff]  ;;  %v3447_v21 = vand.u32 2147483648, %v9785_v14 }
 0x93d   :  { %7369 = vrsqrt.f32 %v9804_v40  ;;  %vm3456_vm4 = vcmp.eq.f32.partialorder %v9804_v40, inf  ;;  %vm3458_vm5 = vcmp.eq.f32.partialorder %v9804_v40, 0.0 }
 0x93e   :  { %v3443_v51 = vmul.f32 %v3442_v33, %v9785_v14  ;;  %v3849_v63 = vmul.f32 %v9791_v12, %v3634_v22  ;;  %v9819_v11 = vadd.f32 %v7678_v17, %v3194_v27 }
 0x940   :  { %11481 = vst [vmem:[#allocation25_spill] sm:$0xff] %v9819_v11  ;;  %v3868_v59 = vadd.f32 %v9798_v31, %v3849_v63  ;;  %v3445_v1 = vsel %vm3444_vm14, %v9785_v14, %v3443_v51  ;;  %v3347_v58 = vpop.xlane.xlu0 %3346  ;;  %v3261_v49 = vsel %vm63_vm0, %v9819_v11, 0.0 }
 0x941   :  { %v3448_v32 = vsel %vm3446_vm15, %v3447_v21, %v3445_v1  ;;  %v3385_v34 = vmul.f32 %v3347_v58, %v7826_v20  ;;  %3262 = vadd.xlane.f32.xlu1 %v3261_v49 }
 0x942   :  { %6691 = vmatmul.msk.f32.gmra.mxu1 %vm63_vm0, %v3868_v59  ;;  %7371 = vrcp.f32 %v3448_v32  ;;  %v3644_v51 = vand.u32 2147483647, %v3448_v32  ;;  %v3646_v63 = vand.u32 2147483648, %v3448_v32  ;;  %vm3640_vm2 = vweird.f32 %v3448_v32 }
 0x943   :  { %v7370_v37 = vpop.eup %7369  ;;  %v9830_v53 = vadd.f32 1e-06, %v3385_v34  ;;  %v3196_v47 = vpop.f32.mrf.mxu3 }
 0x944   :  { %v3450_v43 = vmul.f32 %v7370_v37, %v9804_v40  ;;  %v3197_v19 = vadd.f32 %v9810_v25, %v3196_v47  ;;  %v3647_v34 = vor.u32 1.1754944e-38, %v3646_v63  ;;  %v3459_v47 = vand.u32 2147483648, %v9804_v40 }
 0x945   :  { %7373 = vrsqrt.f32 %v9830_v53  ;;  %vm3645_vm6 = vcmp.eq.f32.partialorder %v3644_v51, 8.507059e+37  ;;  %vm3468_vm7 = vcmp.eq.f32.partialorder %v9830_v53, inf  ;;  %vm3470_vm10 = vcmp.eq.f32.partialorder %v9830_v53, 0.0 }
 0x946   :  { %v3451_v14 = vmul.f32 %v7370_v37, %v3450_v43  ;;  %v9838_v56 = vadd.f32 %v7679_v3, %v3197_v19 }
 0x948   :  { %11482 = vst [vmem:[#allocation26_spill] sm:$0xff] %v9838_v56  ;;  %v7372_v9 = vpop.eup %7371  ;;  %v3452_v8 = vmul.f32 0.5, %v3451_v14  ;;  %v3350_v4 = vpop.xlane.xlu1 %3349  ;;  %v3264_v38 = vsel %vm63_vm0, %v9838_v56, 0.0 }
 0x949   :  { %v3636_v23 = vmul.f32 %v7372_v9, %v3448_v32  ;;  %v3386_v35 = vmul.f32 %v3350_v4, %v7826_v20  ;;  %3265 = vadd.xlane.f32.xlu2 %v3264_v38  ;;  %vm3641_vm1 = vweird.f32 %v7372_v9 }
 0x94a   :  { %v3453_v33 = vsub.f32 1.5, %v3452_v8  ;;  %vm3642_vm3 = vmor %vm3640_vm2, %vm3641_vm1 }
 0x94b   :  { %v3637_v46 = vsub.f32 1.0, %v3636_v23  ;;  %v7374_v22 = vpop.eup %7373  ;;  %v9843_v27 = vadd.f32 1e-06, %v3386_v35 }
 0x94c   :  { %v3454_v17 = vmul.f32 %v7370_v37, %v3453_v33  ;;  %v3462_v21 = vmul.f32 %v7374_v22, %v9830_v53 }
 0x94d   :  { %v3638_v59 = vmul.f32 %v7372_v9, %v3637_v46  ;;  %7375 = vrsqrt.f32 %v9843_v27  ;;  %vm3480_vm13 = vcmp.eq.f32.partialorder %v9843_v27, inf  ;;  %vm3482_vm15 = vcmp.eq.f32.partialorder %v9843_v27, 0.0 }
 0x94e   :  { %v3455_v1 = vmul.f32 %v3454_v17, %v9804_v40  ;;  %v3463_v58 = vmul.f32 %v7374_v22, %v3462_v21 }
 0x94f   :  { %v3639_v49 = vadd.f32 %v7372_v9, %v3638_v59 }
 0x950   :  { %v3464_v37 = vmul.f32 0.5, %v3463_v58  ;;  %v3457_v19 = vsel %vm3456_vm4, %v9804_v40, %v3455_v1  ;;  %v3353_v14 = vpop.xlane.xlu2 %3352 }
 0x951   :  { %v3643_v43 = vsel %vm3642_vm3, %v7372_v9, %v3639_v49  ;;  %v3460_v8 = vsel %vm3458_vm5, %v3459_v47, %v3457_v19  ;;  %v3387_v38 = vmul.f32 %v3353_v14, %v7826_v20 }
 0x952   :  { %v3648_v3 = vsel %vm3645_vm6, %v3647_v34, %v3643_v43  ;;  %v3465_v4 = vsub.f32 1.5, %v3464_v37  ;;  %7377 = vrcp.f32 %v3460_v8  ;;  %v3661_v37 = vand.u32 2147483648, %v3460_v8 }
 0x953   :  { %v3649_v32 = vmul.f32 %v3648_v3, %v9724_v18  ;;  %v7376_v23 = vpop.eup %7375  ;;  %v9855_v46 = vadd.f32 1e-06, %v3387_v38  ;;  %v3471_v18 = vand.u32 2147483648, %v9830_v53  ;;  %v3659_v14 = vand.u32 2147483647, %v3460_v8 }
 0x954   :  { %v3466_v35 = vmul.f32 %v7374_v22, %v3465_v4  ;;  %v3474_v33 = vmul.f32 %v7376_v23, %v9843_v27  ;;  %vm3655_vm12 = vweird.f32 %v3460_v8 }
 0x955   :  { %v3850_v9 = vmul.f32 %v9791_v12, %v3649_v32  ;;  %7379 = vrsqrt.f32 %v9855_v46  ;;  %v3662_v32 = vor.u32 1.1754944e-38, %v3661_v37  ;;  %vm3660_vm1 = vcmp.eq.f32.partialorder %v3659_v14, 8.507059e+37 }
 0x956   :  { %v3467_v51 = vmul.f32 %v3466_v35, %v9830_v53  ;;  %v3475_v40 = vmul.f32 %v7376_v23, %v3474_v33  ;;  %vm3492_vm5 = vcmp.eq.f32.partialorder %v9855_v46, inf  ;;  %vm3494_vm6 = vcmp.eq.f32.partialorder %v9855_v46, 0.0 }
 0x957   :  { %v3869_v63 = vadd.f32 %v9798_v31, %v3850_v9 }
 0x958   :  { %v7378_v17 = vpop.eup %7377  ;;  %v3476_v21 = vmul.f32 0.5, %v3475_v40  ;;  %v3469_v22 = vsel %vm3468_vm7, %v9830_v53, %v3467_v51 }
 0x959   :  { %6692 = vmatmul.msk.f32.gmra.mxu1 %vm63_vm0, %v3869_v63  ;;  %v3651_v59 = vmul.f32 %v7378_v17, %v3460_v8  ;;  %v3472_v1 = vsel %vm3470_vm10, %v3471_v18, %v3469_v22  ;;  %vm3656_vm11 = vweird.f32 %v7378_v17 }
 0x95a   :  { %v3477_v58 = vsub.f32 1.5, %v3476_v21  ;;  %7381 = vrcp.f32 %v3472_v1  ;;  %vm3657_vm14 = vmor %vm3655_vm12, %vm3656_vm11  ;;  %v3674_v22 = vand.u32 2147483647, %v3472_v1  ;;  %vm3670_vm3 = vweird.f32 %v3472_v1 }
 0x95b   :  { %v3652_v49 = vsub.f32 1.0, %v3651_v59  ;;  %v7380_v34 = vpop.eup %7379  ;;  %v3676_v59 = vand.u32 2147483648, %v3472_v1 }
 0x95c   :  { %v3478_v47 = vmul.f32 %v7376_v23, %v3477_v58  ;;  %v3486_v43 = vmul.f32 %v7380_v34, %v9855_v46  ;;  %v3483_v23 = vand.u32 2147483648, %v9843_v27  ;;  %vm3675_vm7 = vcmp.eq.f32.partialorder %v3674_v22, 8.507059e+37 }
 0x95d   :  { %v3653_v19 = vmul.f32 %v7378_v17, %v3652_v49 }
 0x95e   :  { %v3479_v3 = vmul.f32 %v3478_v47, %v9843_v27  ;;  %v3487_v4 = vmul.f32 %v7380_v34, %v3486_v43 }
 0x95f   :  { %v3654_v38 = vadd.f32 %v7378_v17, %v3653_v19 }
 0x960   :  { %v7382_v53 = vpop.eup %7381  ;;  %v3481_v35 = vsel %vm3480_vm13, %v9843_v27, %v3479_v3  ;;  %v3488_v33 = vmul.f32 0.5, %v3487_v4 }
 0x961   :  { %v3658_v9 = vsel %vm3657_vm14, %v7378_v17, %v3654_v38  ;;  %v3666_v51 = vmul.f32 %v7382_v53, %v3472_v1  ;;  %v3484_v63 = vsel %vm3482_vm15, %v3483_v23, %v3481_v35  ;;  %vm3671_vm2 = vweird.f32 %v7382_v53  ;;  %v7680_v1 = vld [vmem:[%s11401_s0 + $0x50] sm:$0xff] }
 0x962   :  { %v3663_v40 = vsel %vm3660_vm1, %v3662_v32, %v3658_v9  ;;  %v3489_v18 = vsub.f32 1.5, %v3488_v33  ;;  %7383 = vrcp.f32 %v3484_v63  ;;  %vm3672_vm4 = vmor %vm3670_vm3, %vm3671_vm2  ;;  %vm3685_vm11 = vweird.f32 %v3484_v63 }
 0x963   :  { %v3664_v8 = vmul.f32 %v3663_v40, %v9731_v16  ;;  %v3667_v21 = vsub.f32 1.0, %v3666_v51  ;;  %v3677_v16 = vor.u32 1.1754944e-38, %v3676_v59 }
 0x964   :  { %v3490_v58 = vmul.f32 %v7380_v34, %v3489_v18  ;;  %v3495_v34 = vand.u32 2147483648, %v9855_v46  ;;  %v3691_v18 = vand.u32 2147483648, %v3484_v63 }
 0x965   :  { %v3851_v49 = vmul.f32 %v9791_v12, %v3664_v8  ;;  %v3668_v47 = vmul.f32 %v7382_v53, %v3667_v21 }
 0x966   :  { %v3199_v37 = vpop.f32.mrf.mxu3  ;;  %v3491_v27 = vmul.f32 %v3490_v58, %v9855_v46 }
 0x967   :  { %v3200_v17 = vadd.f32 %v9810_v25, %v3199_v37  ;;  %v3870_v43 = vadd.f32 %v9798_v31, %v3851_v49  ;;  %v3669_v19 = vadd.f32 %v7382_v53, %v3668_v47  ;;  %v3692_v47 = vor.u32 1.1754944e-38, %v3691_v18 }
 0x968   :  { %v7384_v14 = vpop.eup %7383  ;;  %v3493_v38 = vsel %vm3492_vm5, %v9855_v46, %v3491_v27 }
 0x969   :  { %v9883_v3 = vadd.f32 %v7680_v1, %v3200_v17  ;;  %6693 = vmatmul.msk.f32.gmra.mxu1 %vm63_vm0, %v3870_v43  ;;  %v3673_v4 = vsel %vm3672_vm4, %v7382_v53, %v3669_v19  ;;  %v3681_v35 = vmul.f32 %v7384_v14, %v3484_v63  ;;  %v3496_v23 = vsel %vm3494_vm6, %v3495_v34, %v3493_v38 }
 0x96a   :  { %v3678_v32 = vsel %vm3675_vm7, %v3677_v16, %v3673_v4  ;;  %7385 = vrcp.f32 %v3496_v23  ;;  %vm3686_vm10 = vweird.f32 %v7384_v14  ;;  %v3689_v53 = vand.u32 2147483647, %v3484_v63 }
 0x96b   :  { %11483 = vst [vmem:[#allocation27_spill] sm:$0xff] %v9883_v3  ;;  %v3267_v33 = vsel %vm63_vm0, %v9883_v3, 0.0  ;;  %v3679_v9 = vmul.f32 %v3678_v32, %v9738_v61  ;;  %v3682_v51 = vsub.f32 1.0, %v3681_v35  ;;  %v7681_v61 = vld [vmem:[%s11401_s0 + $0x58] sm:$0xff]  ;;  %vm3687_vm12 = vmor %vm3685_vm11, %vm3686_vm10  ;;  %v3706_v16 = vand.u32 2147483648, %v3496_v23 }
 0x96c   :  { %3268 = vadd.xlane.f32.xlu0 %v3267_v33  ;;  %vm3690_vm13 = vcmp.eq.f32.partialorder %v3689_v53, 8.507059e+37  ;;  %v3704_v38 = vand.u32 2147483647, %v3496_v23  ;;  %vm3700_vm15 = vweird.f32 %v3496_v23  ;;  %v7682_v33 = vld [vmem:[%s11401_s0 + $0x60] sm:$0xff] }
 0x96d   :  { %v3852_v40 = vmul.f32 %v9791_v12, %v3679_v9  ;;  %v3683_v21 = vmul.f32 %v7384_v14, %v3682_v51 }
 0x96e   :  { %v3202_v8 = vpop.f32.mrf.mxu3  ;;  %vm3705_vm2 = vcmp.eq.f32.partialorder %v3704_v38, 8.507059e+37 }
 0x96f   :  { %v3203_v46 = vadd.f32 %v9810_v25, %v3202_v8  ;;  %v3871_v22 = vadd.f32 %v9798_v31, %v3852_v40  ;;  %v3684_v59 = vadd.f32 %v7384_v14, %v3683_v21 }
 0x970   :  { %v7386_v58 = vpop.eup %7385 }
 0x971   :  { %v9896_v49 = vadd.f32 %v7681_v61, %v3203_v46  ;;  %6694 = vmatmul.msk.f32.gmra.mxu1 %vm63_vm0, %v3871_v22  ;;  %v3688_v37 = vsel %vm3687_vm12, %v7384_v14, %v3684_v59  ;;  %v3696_v27 = vmul.f32 %v7386_v58, %v3496_v23  ;;  %vm3701_vm14 = vweird.f32 %v7386_v58  ;;  %v7683_v22 = vld [vmem:[%s11401_s0 + $0x68] sm:$0xff] }
 0x972   :  { %v3693_v43 = vsel %vm3690_vm13, %v3692_v47, %v3688_v37  ;;  %vm3702_vm1 = vmor %vm3700_vm15, %vm3701_vm14  ;;  %v7684_v47 = vld [vmem:[%s11401_s0 + $0x70] sm:$0xff] }
 0x973   :  { %11484 = vst [vmem:[#allocation28_spill] sm:$0xff] %v9896_v49  ;;  %v3270_v17 = vsel %vm63_vm0, %v9896_v49, 0.0  ;;  %v3694_v63 = vmul.f32 %v3693_v43, %v9746_v0  ;;  %v3697_v19 = vsub.f32 1.0, %v3696_v27  ;;  %v3707_v0 = vor.u32 1.1754944e-38, %v3706_v16 }
 0x974   :  { %3271 = vadd.xlane.f32.xlu1 %v3270_v17 }
 0x975   :  { %v3853_v1 = vmul.f32 %v9791_v12, %v3694_v63  ;;  %v3698_v4 = vmul.f32 %v7386_v58, %v3697_v19 }
 0x976   :  { %v3205_v34 = vpop.f32.mrf.mxu3 }
 0x977   :  { %v3206_v32 = vadd.f32 %v9810_v25, %v3205_v34  ;;  %v3872_v14 = vadd.f32 %v9798_v31, %v3853_v1  ;;  %v3699_v35 = vadd.f32 %v7386_v58, %v3698_v4 }
 0x979   :  { %v9908_v9 = vadd.f32 %v7682_v33, %v3206_v32  ;;  %6695 = vmatmul.msk.f32.gmra.mxu1 %vm63_vm0, %v3872_v14  ;;  %v3703_v51 = vsel %vm3702_vm1, %v7386_v58, %v3699_v35 }
 0x97a   :  { %v3708_v18 = vsel %vm3705_vm2, %v3707_v0, %v3703_v51 }
 0x97b   :  { %11485 = vst [vmem:[#allocation29_spill] sm:$0xff] %v9908_v9  ;;  %v3273_v40 = vsel %vm63_vm0, %v9908_v9, 0.0  ;;  %v3709_v8 = vmul.f32 %v3708_v18, %v9754_v2 }
 0x97c   :  { %3274 = vadd.xlane.f32.xlu2 %v3273_v40 }
 0x97d   :  { %v3854_v21 = vmul.f32 %v9791_v12, %v3709_v8 }
 0x97e   :  { %v3208_v23 = vpop.f32.mrf.mxu3 }
 0x97f   :  { %v3209_v53 = vadd.f32 %v9810_v25, %v3208_v23  ;;  %v3873_v46 = vadd.f32 %v9798_v31, %v3854_v21 }
 0x981   :  { %v9920_v59 = vadd.f32 %v7683_v22, %v3209_v53  ;;  %6696 = vmatmul.msk.f32.gmra.mxu1 %vm63_vm0, %v3873_v46 }
 0x983   :  { %11486 = vst [vmem:[#allocation30_spill] sm:$0xff] %v9920_v59  ;;  %v3276_v58 = vsel %vm63_vm0, %v9920_v59, 0.0 }
 0x984   :  { %3277 = vadd.xlane.f32.xlu0 %v3276_v58 }
 0x986   :  { %v3211_v2 = vpop.f32.mrf.mxu3 }
 0x987   :  { %v3212_v61 = vadd.f32 %v9810_v25, %v3211_v2 }
 0x989   :  { %v9929_v37 = vadd.f32 %v7684_v47, %v3212_v61 }
 0x98b   :  { %11487 = vst [vmem:[#allocation31_spill] sm:$0xff] %v9929_v37  ;;  %v3279_v17 = vsel %vm63_vm0, %v9929_v37, 0.0 }
 0x98c   :  { %v3356_v27 = vpop.xlane.xlu0 %3355  ;;  %3280 = vadd.xlane.f32.xlu2 %v3279_v17 }
 0x98d   :  { %v3388_v43 = vmul.f32 %v3356_v27, %v7826_v20 }
 0x98f   :  { %v3404_v63 = vadd.f32 1e-06, %v3388_v43 }
 0x991   :  { %7387 = vrsqrt.f32 %v3404_v63  ;;  %vm3504_vm3 = vcmp.eq.f32.partialorder %v3404_v63, inf  ;;  %v3507_v14 = vand.u32 2147483648, %v3404_v63  ;;  %vm3506_vm4 = vcmp.eq.f32.partialorder %v3404_v63, 0.0 }
 0x997   :  { %v7388_v19 = vpop.eup %7387 }
 0x998   :  { %v3498_v16 = vmul.f32 %v7388_v19, %v3404_v63 }
 0x99a   :  { %v3499_v34 = vmul.f32 %v7388_v19, %v3498_v16 }
 0x99c   :  { %v3500_v1 = vmul.f32 0.5, %v3499_v34 }
 0x99e   :  { %v3501_v4 = vsub.f32 1.5, %v3500_v1 }
 0x9a0   :  { %v3502_v38 = vmul.f32 %v7388_v19, %v3501_v4  ;;  %v7685_v4 = vld [vmem:[%s11401_s0 + $0x78] sm:$0xff] }
 0x9a2   :  { %v3503_v32 = vmul.f32 %v3502_v38, %v3404_v63 }
 0x9a4   :  { %v3505_v35 = vsel %vm3504_vm3, %v3404_v63, %v3503_v32 }
 0x9a5   :  { %v3508_v33 = vsel %vm3506_vm4, %v3507_v14, %v3505_v35 }
 0x9a6   :  { %7389 = vrcp.f32 %v3508_v33  ;;  %v3721_v18 = vand.u32 2147483648, %v3508_v33  ;;  %v3719_v23 = vand.u32 2147483647, %v3508_v33  ;;  %vm3715_vm6 = vweird.f32 %v3508_v33 }
 0x9a8   :  { %v3722_v53 = vor.u32 1.1754944e-38, %v3721_v18  ;;  %vm3720_vm10 = vcmp.eq.f32.partialorder %v3719_v23, 8.507059e+37 }
 0x9ac   :  { %v7390_v0 = vpop.eup %7389 }
 0x9ad   :  { %v3711_v51 = vmul.f32 %v7390_v0, %v3508_v33  ;;  %vm3716_vm5 = vweird.f32 %v7390_v0 }
 0x9ae   :  { %vm3717_vm7 = vmor %vm3715_vm6, %vm3716_vm5 }
 0x9af   :  { %v3712_v40 = vsub.f32 1.0, %v3711_v51 }
 0x9b1   :  { %v3713_v8 = vmul.f32 %v7390_v0, %v3712_v40 }
 0x9b3   :  { %v3714_v21 = vadd.f32 %v7390_v0, %v3713_v8 }
 0x9b4   :  { %v3263_v46 = vpop.xlane.xlu1 %3262 }
 0x9b5   :  { %v3718_v22 = vsel %vm3717_vm7, %v7390_v0, %v3714_v21  ;;  %v3293_v58 = vmul.f32 %v3263_v46, %v7826_v20 }
 0x9b6   :  { %v3723_v2 = vsel %vm3720_vm10, %v3722_v53, %v3718_v22 }
 0x9b7   :  { %v3724_v61 = vmul.f32 %v3723_v2, %v9766_v29  ;;  %v9937_v47 = vsub.f32 %v9819_v11, %v3293_v58  ;;  %v9960_v33 = vpop.f32.mrf.mxu1 }
 0x9b9   :  { %v3855_v27 = vmul.f32 %v9791_v12, %v3724_v61  ;;  %v3325_v17 = vmul.f32 %v9937_v47, %v9937_v47 }
 0x9bb   :  { %v3874_v43 = vadd.f32 %v9798_v31, %v3855_v27  ;;  %v3357_v63 = vsel %vm63_vm0, %v3325_v17, 0.0 }
 0x9bc   :  { %v3266_v19 = vpop.xlane.xlu2 %3265  ;;  %3358 = vadd.xlane.f32.xlu1 %v3357_v63 }
 0x9bd   :  { %6697 = vmatmul.msk.f32.gmra.mxu1 %vm63_vm0, %v3874_v43  ;;  %v3294_v16 = vmul.f32 %v3266_v19, %v7826_v20 }
 0x9be   :  { %v3214_v34 = vpop.f32.mrf.mxu3 }
 0x9bf   :  { %v9947_v29 = vsub.f32 %v9838_v56, %v3294_v16  ;;  %v3215_v1 = vadd.f32 %v9810_v25, %v3214_v34  ;;  %v9969_v23 = vpop.f32.mrf.mxu1 }
 0x9c1   :  { %v9953_v38 = vadd.f32 %v7685_v4, %v3215_v1  ;;  %v3326_v32 = vmul.f32 %v9947_v29, %v9947_v29 }
 0x9c3   :  { %11488 = vst [vmem:[#allocation32_spill] sm:$0xff] %v9953_v38  ;;  %v3360_v14 = vsel %vm63_vm0, %v3326_v32, 0.0  ;;  %v3282_v35 = vsel %vm63_vm0, %v9953_v38, 0.0 }
 0x9c4   :  { %3361 = vadd.xlane.f32.xlu0 %v3360_v14  ;;  %3283 = vadd.xlane.f32.xlu1 %v3282_v35 }
 0x9d6   :  { %v3964_v2 = vpop.f32.mrf.mxu1 }
 0x9df   :  { %v3269_v0 = vpop.xlane.xlu0 %3268 }
 0x9e0   :  { %v3295_v25 = vmul.f32 %v3269_v0, %v7826_v20 }
 0x9e2   :  { %v9964_v51 = vsub.f32 %v9883_v3, %v3295_v25 }
 0x9e4   :  { %v3327_v40 = vmul.f32 %v9964_v51, %v9964_v51 }
 0x9e6   :  { %v3363_v18 = vsel %vm63_vm0, %v3327_v40, 0.0  ;;  %v3967_v19 = vpop.f32.mrf.mxu1 }
 0x9e7   :  { %3364 = vadd.xlane.f32.xlu2 %v3363_v18  ;;  %v3272_v8 = vpop.xlane.xlu1 %3271 }
 0x9e8   :  { %v3296_v21 = vmul.f32 %v3272_v8, %v7826_v20 }
 0x9ea   :  { %v9973_v53 = vsub.f32 %v9896_v49, %v3296_v21  ;;  %v10002_v21 = vld [vmem:[%s11403_s2 + $0x1] ss:$0 sm:$0xff] }
 0x9ec   :  { %v3328_v46 = vmul.f32 %v9973_v53, %v9973_v53 }
 0x9ee   :  { %v3366_v22 = vsel %vm63_vm0, %v3328_v46, 0.0  ;;  %v3970_v35 = vpop.f32.mrf.mxu1 }
 0x9ef   :  { %v3275_v58 = vpop.xlane.xlu2 %3274  ;;  %3367 = vadd.xlane.f32.xlu0 %v3366_v22  ;;  %v10010_v22 = vadd.f32 %v10002_v21, %v3970_v35 }
 0x9f0   :  { %v3297_v61 = vmul.f32 %v3275_v58, %v7826_v20  ;;  %v10015_v58 = vadd.f32 %v10002_v21, %v3964_v2 }
 0x9f2   :  { %v9980_v27 = vsub.f32 %v9908_v9, %v3297_v61 }
 0x9f4   :  { %v3329_v17 = vmul.f32 %v9980_v27, %v9980_v27 }
 0x9f6   :  { %v3369_v43 = vsel %vm63_vm0, %v3329_v17, 0.0  ;;  %v3973_v18 = vpop.f32.mrf.mxu1 }
 0x9f7   :  { %v3278_v63 = vpop.xlane.xlu0 %3277  ;;  %3370 = vadd.xlane.f32.xlu1 %v3369_v43  ;;  %v10020_v61 = vadd.f32 %v10002_v21, %v3973_v18 }
 0x9f8   :  { %v3298_v16 = vmul.f32 %v3278_v63, %v7826_v20 }
 0x9f9   :  { %v10025_v63 = vpack.i.bf16 %v10010_v22, %v10020_v61 }
 0x9fa   :  { %v9987_v34 = vsub.f32 %v9920_v59, %v3298_v16 }
 0x9fc   :  { %v3330_v1 = vmul.f32 %v9987_v34, %v9987_v34 }
 0x9fe   :  { %v3372_v4 = vsel %vm63_vm0, %v3330_v1, 0.0  ;;  %v3976_v8 = vpop.f32.mrf.mxu1 }
 0x9ff   :  { %3373 = vadd.xlane.f32.xlu2 %v3372_v4  ;;  %v3281_v32 = vpop.xlane.xlu2 %3280  ;;  %v10005_v46 = vadd.f32 %v10002_v21, %v3976_v8 }
 0xa00   :  { %v3299_v14 = vmul.f32 %v3281_v32, %v7826_v20 }
 0xa02   :  { %v9994_v0 = vsub.f32 %v9929_v37, %v3299_v14  ;;  %v10032_v14 = vadd.f32 %v10002_v21, %v3967_v19 }
 0xa04   :  { %v3331_v25 = vmul.f32 %v9994_v0, %v9994_v0 }
 0xa06   :  { %v3375_v40 = vsel %vm63_vm0, %v3331_v25, 0.0 }
 0xa07   :  { %3376 = vadd.xlane.f32.xlu0 %v3375_v40 }
 0xa1b   :  { %4026 = vrot.lane.b32.xlu0 %v10005_v46, %s7719_s20 }
 0xa23   :  { %4022 = vrot.lane.b32.xlu0 %v10010_v22, %s7719_s20 }
 0xa2b   :  { %4018 = vrot.lane.b32.xlu0 %v10015_v58, %s7719_s20 }
 0xa2f   :  { %v3359_v17 = vpop.xlane.xlu1 %3358 }
 0xa30   :  { %v3389_v43 = vmul.f32 %v3359_v17, %v7826_v20 }
 0xa32   :  { %v3405_v16 = vadd.f32 1e-06, %v3389_v43 }
 0xa33   :  { %6974 = vrot.lane.b32.xlu0 %v10025_v63, %s7722_s23 }
 0xa34   :  { %7391 = vrsqrt.f32 %v3405_v16  ;;  %vm3516_vm11 = vcmp.eq.f32.partialorder %v3405_v16, inf  ;;  %v3519_v9 = vand.u32 2147483648, %v3405_v16  ;;  %vm3518_vm12 = vcmp.eq.f32.partialorder %v3405_v16, 0.0 }
 0xa37   :  { %v3362_v2 = vpop.xlane.xlu0 %3361  ;;  %v3284_v1 = vpop.xlane.xlu1 %3283 }
 0xa38   :  { %v3390_v4 = vmul.f32 %v3362_v2, %v7826_v20  ;;  %v3300_v32 = vmul.f32 %v3284_v1, %v7826_v20 }
 0xa3a   :  { %v3979_v35 = vpop.f32.mrf.mxu1  ;;  %v7392_v25 = vpop.eup %7391  ;;  %v3406_v40 = vadd.f32 1e-06, %v3390_v4  ;;  %v10035_v18 = vsub.f32 %v9953_v38, %v3300_v32 }
 0xa3b   :  { %v10038_v8 = vadd.f32 %v10002_v21, %v3979_v35  ;;  %v3510_v17 = vmul.f32 %v7392_v25, %v3405_v16  ;;  %4579 = vrot.lane.b32.xlu0 %v10032_v14, %s7720_s21 }
 0xa3c   :  { %7393 = vrsqrt.f32 %v3406_v40  ;;  %v3332_v19 = vmul.f32 %v10035_v18, %v10035_v18  ;;  %vm3528_vm13 = vcmp.eq.f32.partialorder %v3406_v40, inf  ;;  %vm3530_vm14 = vcmp.eq.f32.partialorder %v3406_v40, 0.0 }
 0xa3d   :  { %4028 = vrot.lane.b32.xlu2 %v10038_v8, %s7719_s20  ;;  %v3511_v43 = vmul.f32 %v7392_v25, %v3510_v17 }
 0xa3e   :  { %v3378_v2 = vsel %vm63_vm0, %v3332_v19, 0.0 }
 0xa3f   :  { %v3512_v1 = vmul.f32 0.5, %v3511_v43  ;;  %3379 = vadd.xlane.f32.xlu1 %v3378_v2  ;;  %v10053_v43 = vadd.f32 %v10002_v21, %v9969_v23  ;;  %v10057_v2 = vadd.f32 %v10002_v21, %v9960_v33 }
 0xa41   :  { %v3513_v4 = vsub.f32 1.5, %v3512_v1  ;;  %v10065_v33 = vpack.i.bf16 %v10057_v2, %v10053_v43 }
 0xa42   :  { %v7394_v32 = vpop.eup %7393 }
 0xa43   :  { %v3514_v35 = vmul.f32 %v7392_v25, %v3513_v4  ;;  %v3522_v38 = vmul.f32 %v7394_v32, %v3406_v40  ;;  %4577 = vrot.lane.b32.xlu0 %v10015_v58, %s7720_s21 }
 0xa45   :  { %4020 = vrot.lane.b32.xlu2 %v10032_v14, %s7719_s20  ;;  %v3515_v37 = vmul.f32 %v3514_v35, %v3405_v16  ;;  %v3523_v59 = vmul.f32 %v7394_v32, %v3522_v38 }
 0xa47   :  { %v3524_v49 = vmul.f32 0.5, %v3523_v59  ;;  %v3517_v17 = vsel %vm3516_vm11, %v3405_v16, %v3515_v37 }
 0xa48   :  { %v3520_v19 = vsel %vm3518_vm12, %v3519_v9, %v3517_v17  ;;  %v3531_v9 = vand.u32 2147483648, %v3406_v40 }
 0xa49   :  { %v3525_v25 = vsub.f32 1.5, %v3524_v49  ;;  %7395 = vrcp.f32 %v3520_v19  ;;  %v3736_v4 = vand.u32 2147483648, %v3520_v19  ;;  %v3734_v35 = vand.u32 2147483647, %v3520_v19 }
 0xa4a   :  { %vm3730_vm1 = vweird.f32 %v3520_v19 }
 0xa4b   :  { %v3526_v1 = vmul.f32 %v7394_v32, %v3525_v25  ;;  %4559 = vrot.lane.b32.xlu0 %v10053_v43, %s7721_s22  ;;  %v3737_v25 = vor.u32 1.1754944e-38, %v3736_v4  ;;  %vm3735_vm3 = vcmp.eq.f32.partialorder %v3734_v35, 8.507059e+37 }
 0xa4d   :  { %4014 = vrot.lane.b32.xlu2 %v10057_v2, %s7719_s20  ;;  %v3527_v59 = vmul.f32 %v3526_v1, %v3406_v40 }
 0xa4f   :  { %v7396_v37 = vpop.eup %7395  ;;  %v3529_v38 = vsel %vm3528_vm13, %v3406_v40, %v3527_v59 }
 0xa50   :  { %v3726_v23 = vmul.f32 %v7396_v37, %v3520_v19  ;;  %v3532_v49 = vsel %vm3530_vm14, %v3531_v9, %v3529_v38  ;;  %vm3731_vm15 = vweird.f32 %v7396_v37  ;;  %v10075_v9 = vpack.i.bf16 %v10005_v46, %v10038_v8 }
 0xa51   :  { %7397 = vrcp.f32 %v3532_v49  ;;  %vm3732_vm2 = vmor %vm3730_vm1, %vm3731_vm15  ;;  %v3751_v4 = vand.u32 2147483648, %v3532_v49  ;;  %v3749_v35 = vand.u32 2147483647, %v3532_v49  ;;  %vm3745_vm5 = vweird.f32 %v3532_v49 }
 0xa52   :  { %v3727_v16 = vsub.f32 1.0, %v3726_v23 }
 0xa53   :  { %4561 = vrot.lane.b32.xlu0 %v10015_v58, %s7721_s22  ;;  %vm3750_vm7 = vcmp.eq.f32.partialorder %v3749_v35, 8.507059e+37 }
 0xa54   :  { %v3728_v32 = vmul.f32 %v7396_v37, %v3727_v16 }
 0xa55   :  { %6984 = vrot.lane.b32.xlu2 %v10065_v33, %s7722_s23 }
 0xa56   :  { %v3729_v17 = vadd.f32 %v7396_v37, %v3728_v32 }
 0xa57   :  { %v7398_v40 = vpop.eup %7397 }
 0xa58   :  { %4024 = vrot.lane.b32.xlu1 %v10020_v61, %s7719_s20  ;;  %v3733_v1 = vsel %vm3732_vm2, %v7396_v37, %v3729_v17  ;;  %v3741_v59 = vmul.f32 %v7398_v40, %v3532_v49  ;;  %vm3746_vm4 = vweird.f32 %v7398_v40 }
 0xa59   :  { %v3738_v38 = vsel %vm3735_vm3, %v3737_v25, %v3733_v1  ;;  %vm3747_vm6 = vmor %vm3745_vm5, %vm3746_vm4 }
 0xa5a   :  { %v3365_v23 = vpop.xlane.xlu2 %3364  ;;  %v3739_v16 = vmul.f32 %v3738_v38, %v9937_v47  ;;  %v3742_v3 = vsub.f32 1.0, %v3741_v59  ;;  %v3752_v47 = vor.u32 1.1754944e-38, %v3751_v4 }
 0xa5b   :  { %v3391_v19 = vmul.f32 %v3365_v23, %v7826_v20  ;;  %6989 = vrot.lane.b32.xlu0 %v10075_v9, %s7722_s23 }
 0xa5c   :  { %v3856_v37 = vmul.f32 %v9791_v12, %v3739_v16  ;;  %v3743_v32 = vmul.f32 %v7398_v40, %v3742_v3 }
 0xa5d   :  { %4557 = vrot.lane.b32.xlu2 %v10057_v2, %s7721_s22  ;;  %v3407_v17 = vadd.f32 1e-06, %v3391_v19 }
 0xa5e   :  { %v3875_v25 = vadd.f32 %v9798_v31, %v3856_v37  ;;  %v3744_v1 = vadd.f32 %v7398_v40, %v3743_v32 }
 0xa5f   :  { %7399 = vrsqrt.f32 %v3407_v17  ;;  %vm3540_vm10 = vcmp.eq.f32.partialorder %v3407_v17, inf  ;;  %vm3542_vm11 = vcmp.eq.f32.partialorder %v3407_v17, 0.0 }
 0xa60   :  { %6698 = vmatmul.msk.f32.gmra.mxu1 %vm63_vm0, %v3875_v25  ;;  %4016 = vrot.lane.b32.xlu1 %v10053_v43, %s7719_s20  ;;  %v3748_v59 = vsel %vm3747_vm6, %v7398_v40, %v3744_v1 }
 0xa61   :  { %v3753_v38 = vsel %vm3750_vm7, %v3752_v47, %v3748_v59 }
 0xa62   :  { %v3368_v23 = vpop.xlane.xlu0 %3367  ;;  %v3754_v3 = vmul.f32 %v3753_v38, %v9947_v29 }
 0xa63   :  { %v3392_v16 = vmul.f32 %v3368_v23, %v7826_v20 }
 0xa64   :  { %v3857_v49 = vmul.f32 %v9791_v12, %v3754_v3  ;;  %v3543_v3 = vand.u32 2147483648, %v3407_v17 }
 0xa65   :  { %4587 = vrot.lane.b32.xlu2 %v10038_v8, %s7720_s21  ;;  %v7400_v19 = vpop.eup %7399  ;;  %v3408_v4 = vadd.f32 1e-06, %v3392_v16 }
 0xa66   :  { %v3534_v37 = vmul.f32 %v7400_v19, %v3407_v17  ;;  %v3876_v32 = vadd.f32 %v9798_v31, %v3857_v49 }
 0xa67   :  { %7401 = vrsqrt.f32 %v3408_v4  ;;  %vm3552_vm12 = vcmp.eq.f32.partialorder %v3408_v4, inf  ;;  %vm3554_vm13 = vcmp.eq.f32.partialorder %v3408_v4, 0.0 }
 0xa68   :  { %v3535_v25 = vmul.f32 %v7400_v19, %v3534_v37  ;;  %6699 = vmatmul.msk.f32.gmra.mxu1 %vm63_vm0, %v3876_v32  ;;  %4585 = vrot.lane.b32.xlu1 %v10005_v46, %s7720_s21 }
 0xa6a   :  { %v3536_v29 = vmul.f32 0.5, %v3535_v25  ;;  %v3371_v40 = vpop.xlane.xlu1 %3370 }
 0xa6b   :  { %v3393_v35 = vmul.f32 %v3371_v40, %v7826_v20 }
 0xa6c   :  { %v3537_v1 = vsub.f32 1.5, %v3536_v29 }
 0xa6d   :  { %4571 = vrot.lane.b32.xlu2 %v10038_v8, %s7721_s22  ;;  %v7402_v12 = vpop.eup %7401  ;;  %v10100_v47 = vadd.f32 1e-06, %v3393_v35 }
 0xa6e   :  { %v3538_v59 = vmul.f32 %v7400_v19, %v3537_v1  ;;  %v3546_v31 = vmul.f32 %v7402_v12, %v3408_v4 }
 0xa6f   :  { %7403 = vrsqrt.f32 %v10100_v47  ;;  %vm3564_vm1 = vcmp.eq.f32.partialorder %v10100_v47, inf  ;;  %vm3566_vm3 = vcmp.eq.f32.partialorder %v10100_v47, 0.0 }
 0xa70   :  { %v3539_v38 = vmul.f32 %v3538_v59, %v3407_v17  ;;  %v3547_v23 = vmul.f32 %v7402_v12, %v3546_v31  ;;  %4583 = vrot.lane.b32.xlu1 %v10020_v61, %s7720_s21  ;;  %v10111_v59 = vpack.i.bf16 %v10015_v58, %v10032_v14 }
 0xa72   :  { %v3548_v16 = vmul.f32 0.5, %v3547_v23  ;;  %v3374_v49 = vpop.xlane.xlu2 %3373  ;;  %v3541_v37 = vsel %vm3540_vm10, %v3407_v17, %v3539_v38  ;;  %v3555_v17 = vand.u32 2147483648, %v3408_v4 }
 0xa73   :  { %v3394_v32 = vmul.f32 %v3374_v49, %v7826_v20  ;;  %v3544_v25 = vsel %vm3542_vm11, %v3543_v3, %v3541_v37 }
 0xa74   :  { %v3549_v29 = vsub.f32 1.5, %v3548_v16  ;;  %7405 = vrcp.f32 %v3544_v25  ;;  %v3766_v36 = vand.u32 2147483648, %v3544_v25  ;;  %vm3760_vm15 = vweird.f32 %v3544_v25 }
 0xa75   :  { %v7404_v19 = vpop.eup %7403  ;;  %v10106_v40 = vadd.f32 1e-06, %v3394_v32 }
 0xa76   :  { %v3550_v35 = vmul.f32 %v7402_v12, %v3549_v29  ;;  %v3558_v1 = vmul.f32 %v7404_v19, %v10100_v47 }
 0xa77   :  { %7407 = vrsqrt.f32 %v10106_v40  ;;  %vm3576_vm6 = vcmp.eq.f32.partialorder %v10106_v40, inf  ;;  %vm3578_vm11 = vcmp.eq.f32.partialorder %v10106_v40, 0.0 }
 0xa78   :  { %v3551_v31 = vmul.f32 %v3550_v35, %v3408_v4  ;;  %v3559_v38 = vmul.f32 %v7404_v19, %v3558_v1  ;;  %6979 = vrot.lane.b32.xlu1 %v10111_v59, %s7722_s23 }
 0xa7a   :  { %v7406_v23 = vpop.eup %7405  ;;  %v3560_v3 = vmul.f32 0.5, %v3559_v38  ;;  %v3377_v16 = vpop.xlane.xlu0 %3376  ;;  %v3553_v49 = vsel %vm3552_vm12, %v3408_v4, %v3551_v31  ;;  %v3764_v31 = vand.u32 2147483647, %v3544_v25 }
 0xa7b   :  { %v3395_v12 = vmul.f32 %v3377_v16, %v7826_v20  ;;  %v3756_v37 = vmul.f32 %v7406_v23, %v3544_v25  ;;  %v3556_v32 = vsel %vm3554_vm13, %v3555_v17, %v3553_v49  ;;  %vm3761_vm14 = vweird.f32 %v7406_v23 }
 0xa7c   :  { %v3561_v29 = vsub.f32 1.5, %v3560_v3  ;;  %7409 = vrcp.f32 %v3556_v32  ;;  %vm3762_vm2 = vmor %vm3760_vm15, %vm3761_vm14  ;;  %vm3765_vm4 = vcmp.eq.f32.partialorder %v3764_v31, 8.507059e+37  ;;  %v3781_v13 = vand.u32 2147483648, %v3556_v32 }
 0xa7d   :  { %v7408_v56 = vpop.eup %7407  ;;  %v10117_v11 = vadd.f32 1e-06, %v3395_v12  ;;  %v3757_v35 = vsub.f32 1.0, %v3756_v37  ;;  %v3767_v12 = vor.u32 1.1754944e-38, %v3766_v36  ;;  %v10133_v36 = vld [vmem:[%s11404_s3 + $0x1] ss:$0 sm:$0xff]  ;;  %vm3775_vm7 = vweird.f32 %v3556_v32 }
 0xa7e   :  { %v3562_v1 = vmul.f32 %v7404_v19, %v3561_v29  ;;  %v3570_v39 = vmul.f32 %v7408_v56, %v10106_v40  ;;  %v3567_v19 = vand.u32 2147483648, %v10100_v47  ;;  %v3779_v31 = vand.u32 2147483647, %v3556_v32 }
 0xa7f   :  { %7411 = vrsqrt.f32 %v10117_v11  ;;  %v3758_v38 = vmul.f32 %v7406_v23, %v3757_v35  ;;  %vm3588_vm14 = vcmp.eq.f32.partialorder %v10117_v11, inf }
 0xa80   :  { %v3563_v4 = vmul.f32 %v3562_v1, %v10100_v47  ;;  %v3571_v16 = vmul.f32 %v7408_v56, %v3570_v39  ;;  %4581 = vrot.lane.b32.xlu1 %v10010_v22, %s7720_s21  ;;  %vm3780_vm12 = vcmp.eq.f32.partialorder %v3779_v31, 8.507059e+37 }
 0xa81   :  { %v3759_v17 = vadd.f32 %v7406_v23, %v3758_v38 }
 0xa82   :  { %v7410_v3 = vpop.eup %7409  ;;  %v3572_v49 = vmul.f32 0.5, %v3571_v16  ;;  %v3565_v37 = vsel %vm3564_vm1, %v10100_v47, %v3563_v4 }
 0xa83   :  { %v3763_v29 = vsel %vm3762_vm2, %v7406_v23, %v3759_v17  ;;  %v3771_v39 = vmul.f32 %v7410_v3, %v3556_v32  ;;  %v3568_v35 = vsel %vm3566_vm3, %v3567_v19, %v3565_v37  ;;  %vm3776_vm5 = vweird.f32 %v7410_v3 }
 0xa84   :  { %v3573_v1 = vsub.f32 1.5, %v3572_v49  ;;  %v3768_v57 = vsel %vm3765_vm4, %v3767_v12, %v3763_v29  ;;  %7413 = vrcp.f32 %v3568_v35  ;;  %vm3777_vm10 = vmor %vm3775_vm7, %vm3776_vm5  ;;  %vm3790_vm15 = vweird.f32 %v3568_v35 }
 0xa85   :  { %v7412_v25 = vpop.eup %7411  ;;  %v3769_v38 = vmul.f32 %v3768_v57, %v9964_v51  ;;  %v3772_v10 = vsub.f32 1.0, %v3771_v39  ;;  %v10143_v57 = vld [vmem:[%s11405_s4 + $0x1] ss:$0 sm:$0xff]  ;;  %vm3590_vm2 = vcmp.eq.f32.partialorder %v10117_v11, 0.0 }
 0xa86   :  { %v3574_v6 = vmul.f32 %v7408_v56, %v3573_v1  ;;  %v3582_v16 = vmul.f32 %v7412_v25, %v10117_v11 }
 0xa87   :  { %v3858_v47 = vmul.f32 %v10133_v36, %v3769_v38  ;;  %v3773_v23 = vmul.f32 %v7410_v3, %v3772_v10  ;;  %v3579_v10 = vand.u32 2147483648, %v10106_v40 }
 0xa88   :  { %v3575_v4 = vmul.f32 %v3574_v6, %v10106_v40  ;;  %v3583_v17 = vmul.f32 %v7412_v25, %v3582_v16  ;;  %4575 = vrot.lane.b32.xlu1 %v10053_v43, %s7720_s21  ;;  %v3782_v6 = vor.u32 1.1754944e-38, %v3781_v13 }
 0xa89   :  { %v3877_v56 = vadd.f32 %v10143_v57, %v3858_v47  ;;  %v3774_v51 = vadd.f32 %v7410_v3, %v3773_v23 }
 0xa8a   :  { %v7414_v19 = vpop.eup %7413  ;;  %v3584_v49 = vmul.f32 0.5, %v3583_v17  ;;  %v3577_v12 = vsel %vm3576_vm6, %v10106_v40, %v3575_v4  ;;  %v3796_v17 = vand.u32 2147483648, %v3568_v35  ;;  %v3794_v40 = vand.u32 2147483647, %v3568_v35 }
 0xa8b   :  { %6700 = vmatmul.msk.f32.gmra.mxu1 %vm63_vm0, %v3877_v56  ;;  %v3778_v37 = vsel %vm3777_vm10, %v7410_v3, %v3774_v51  ;;  %v3786_v29 = vmul.f32 %v7414_v19, %v3568_v35  ;;  %v3580_v39 = vsel %vm3578_vm11, %v3579_v10, %v3577_v12  ;;  %vm3791_vm13 = vweird.f32 %v7414_v19 }
 0xa8c   :  { %v3585_v1 = vsub.f32 1.5, %v3584_v49  ;;  %v3783_v38 = vsel %vm3780_vm12, %v3782_v6, %v3778_v37  ;;  %7415 = vrcp.f32 %v3580_v39  ;;  %vm3792_vm1 = vmor %vm3790_vm15, %vm3791_vm13  ;;  %v3797_v51 = vor.u32 1.1754944e-38, %v3796_v17 }
 0xa8d   :  { %v4027_v32 = vpop.permute.xlu0 %4026  ;;  %v3784_v16 = vmul.f32 %v3783_v38, %v9973_v53  ;;  %v3787_v47 = vsub.f32 1.0, %v3786_v29  ;;  %v3591_v53 = vand.u32 2147483648, %v10117_v11  ;;  %vm3795_vm3 = vcmp.eq.f32.partialorder %v3794_v40, 8.507059e+37 }
 0xa8e   :  { %v3586_v23 = vmul.f32 %v7412_v25, %v3585_v1  ;;  %vm3805_vm5 = vweird.f32 %v3580_v39 }
 0xa8f   :  { %v3859_v13 = vmul.f32 %v10133_v36, %v3784_v16  ;;  %v3788_v4 = vmul.f32 %v7414_v19, %v3787_v47  ;;  %v3811_v16 = vand.u32 2147483648, %v3580_v39 }
 0xa90   :  { %v3587_v56 = vmul.f32 %v3586_v23, %v10117_v11  ;;  %4573 = vrot.lane.b32.xlu1 %v10057_v2, %s7720_s21  ;;  %v3809_v23 = vand.u32 2147483647, %v3580_v39 }
 0xa91   :  { %v3878_v3 = vadd.f32 %v10143_v57, %v3859_v13  ;;  %v3789_v31 = vadd.f32 %v7414_v19, %v3788_v4 }
 0xa92   :  { %v7416_v25 = vpop.eup %7415  ;;  %v3589_v10 = vsel %vm3588_vm14, %v10117_v11, %v3587_v56  ;;  %vm3810_vm7 = vcmp.eq.f32.partialorder %v3809_v23, 8.507059e+37 }
 0xa93   :  { %6701 = vmatmul.msk.f32.gmra.mxu1 %vm63_vm0, %v3878_v3  ;;  %v3793_v49 = vsel %vm3792_vm1, %v7414_v19, %v3789_v31  ;;  %v3801_v6 = vmul.f32 %v7416_v25, %v3580_v39  ;;  %v3592_v12 = vsel %vm3590_vm2, %v3591_v53, %v3589_v10  ;;  %vm3806_vm4 = vweird.f32 %v7416_v25 }
 0xa94   :  { %v3798_v37 = vsel %vm3795_vm3, %v3797_v51, %v3793_v49  ;;  %7417 = vrcp.f32 %v3592_v12  ;;  %vm3807_vm6 = vmor %vm3805_vm5, %vm3806_vm4  ;;  %v3826_v51 = vand.u32 2147483648, %v3592_v12  ;;  %v3824_v49 = vand.u32 2147483647, %v3592_v12 }
 0xa95   :  { %v10161_v29 = vpop.permute.xlu0 %4022  ;;  %v3799_v35 = vmul.f32 %v3798_v37, %v9980_v27  ;;  %v3802_v1 = vsub.f32 1.0, %v3801_v6  ;;  %v3812_v27 = vor.u32 1.1754944e-38, %v3811_v16  ;;  %vm3820_vm11 = vweird.f32 %v3592_v12 }
 0xa96   :  { %v3827_v6 = vor.u32 1.1754944e-38, %v3826_v51  ;;  %vm3825_vm13 = vcmp.eq.f32.partialorder %v3824_v49, 8.507059e+37 }
 0xa97   :  { %v4029_v38 = vpop.permute.xlu2 %4028  ;;  %v3860_v47 = vmul.f32 %v10133_v36, %v3799_v35  ;;  %v3803_v11 = vmul.f32 %v7416_v25, %v3802_v1 }
 0xa98   :  { %6706 = vmatpush.xpose.msk.msrb.mxu2 %vm862_vm8, %v4029_v38  ;;  %4563 = vrot.lane.b32.xlu1 %v10032_v14, %s7721_s22 }
 0xa99   :  { %v3879_v19 = vadd.f32 %v10143_v57, %v3860_v47  ;;  %v3804_v17 = vadd.f32 %v7416_v25, %v3803_v11 }
 0xa9a   :  { %v7418_v13 = vpop.eup %7417 }
 0xa9b   :  { %6702 = vmatmul.msk.f32.gmra.mxu1 %vm63_vm0, %v3879_v19  ;;  %v3808_v4 = vsel %vm3807_vm6, %v7416_v25, %v3804_v17  ;;  %v3816_v40 = vmul.f32 %v7418_v13, %v3592_v12  ;;  %vm3821_vm10 = vweird.f32 %v7418_v13 }
 0xa9c   :  { %6707 = vmatpush.xpose.msk.msrb.mxu2 %vm862_vm8, %v4027_v32  ;;  %v3813_v56 = vsel %vm3810_vm7, %v3812_v27, %v3808_v4  ;;  %vm3822_vm12 = vmor %vm3820_vm11, %vm3821_vm10 }
 0xa9d   :  { %v10171_v3 = vpop.permute.xlu0 %4018  ;;  %v3814_v31 = vmul.f32 %v3813_v56, %v9987_v34  ;;  %v3817_v53 = vsub.f32 1.0, %v3816_v40 }
 0xa9f   :  { %v3861_v10 = vmul.f32 %v10133_v36, %v3814_v31  ;;  %v3818_v39 = vmul.f32 %v7418_v13, %v3817_v53 }
 0xaa0   :  { %4565 = vrot.lane.b32.xlu1 %v10010_v22, %s7721_s22 }
 0xaa1   :  { %v3880_v32 = vadd.f32 %v10143_v57, %v3861_v10  ;;  %v3819_v25 = vadd.f32 %v7418_v13, %v3818_v39 }
 0xaa3   :  { %6703 = vmatmul.msk.f32.gmra.mxu1 %vm63_vm0, %v3880_v32  ;;  %v3823_v37 = vsel %vm3822_vm12, %v7418_v13, %v3819_v25 }
 0xaa4   :  { %v3828_v34 = vsel %vm3825_vm13, %v3827_v6, %v3823_v37 }
 0xaa5   :  { %v6975_v35 = vpop.permute.xlu0 %6974  ;;  %v3829_v1 = vmul.f32 %v3828_v34, %v9994_v0  ;;  %v4021_v34 = vpop.permute.xlu2 %4020 }
 0xaa7   :  { %v3862_v38 = vmul.f32 %v10133_v36, %v3829_v1  ;;  %v6976_v1 = vunpack.i.l.bf16 %v6975_v35 }
 0xaa8   :  { %4567 = vrot.lane.b32.xlu1 %v10020_v61, %s7721_s22 }
 0xaa9   :  { %v3881_v16 = vadd.f32 %v10143_v57, %v3862_v38 }
 0xaab   :  { %6704 = vmatmul.msk.f32.gmra.mxu1 %vm63_vm0, %v3881_v16 }
 0xaad   :  { %v10185_v12 = vpop.permute.xlu0 %4579 }
 0xab0   :  { %4569 = vrot.lane.b32.xlu1 %v10005_v46, %s7721_s22 }
 0xab2   :  { %v3380_v47 = vpop.xlane.xlu1 %3379 }
 0xab3   :  { %v3396_v11 = vmul.f32 %v3380_v47, %v7826_v20  ;;  %v6977_v47 = vunpack.i.h.bf16 %v6975_v35 }
 0xab5   :  { %v3412_v23 = vadd.f32 1e-06, %v3396_v11  ;;  %v10190_v19 = vpop.permute.xlu0 %4577 }
 0xab7   :  { %7419 = vrsqrt.f32 %v3412_v23  ;;  %vm3600_vm14 = vcmp.eq.f32.partialorder %v3412_v23, inf  ;;  %v3603_v51 = vand.u32 2147483648, %v3412_v23  ;;  %vm3602_vm15 = vcmp.eq.f32.partialorder %v3412_v23, 0.0 }
 0xabd   :  { %v7420_v0 = vpop.eup %7419  ;;  %v10192_v17 = vpop.permute.xlu0 %4559 }
 0xabe   :  { %v3594_v13 = vmul.f32 %v7420_v0, %v3412_v23 }
 0xac0   :  { %v3595_v27 = vmul.f32 %v7420_v0, %v3594_v13 }
 0xac2   :  { %v3596_v4 = vmul.f32 0.5, %v3595_v27 }
 0xac4   :  { %v3597_v40 = vsub.f32 1.5, %v3596_v4 }
 0xac5   :  { %v10194_v56 = vpop.permute.xlu0 %4561 }
 0xac6   :  { %v3598_v31 = vmul.f32 %v7420_v0, %v3597_v40 }
 0xac8   :  { %v3599_v53 = vmul.f32 %v3598_v31, %v3412_v23 }
 0xaca   :  { %v4025_v10 = vpop.permute.xlu1 %4024  ;;  %v3601_v39 = vsel %vm3600_vm14, %v3412_v23, %v3599_v53 }
 0xacb   :  { %6708 = vmatpush.xpose.msk.msrb.mxu2 %vm862_vm8, %v4025_v10  ;;  %v3604_v49 = vsel %vm3602_vm15, %v3603_v51, %v3601_v39  ;;  %v4015_v51 = vpop.permute.xlu2 %4014 }
 0xacc   :  { %7421 = vrcp.f32 %v3604_v49  ;;  %v3841_v23 = vand.u32 2147483648, %v3604_v49  ;;  %vm3835_vm2 = vweird.f32 %v3604_v49 }
 0xacd   :  { %v6990_v32 = vpop.permute.xlu0 %6989 }
 0xace   :  { %v6991_v25 = vunpack.i.l.bf16 %v6990_v32  ;;  %v6992_v6 = vunpack.i.h.bf16 %v6990_v32  ;;  %v3842_v4 = vor.u32 1.1754944e-38, %v3841_v23 }
 0xacf   :  { %6709 = vmatpush.xpose.msk.msrb.mxu2 %vm862_vm8, %v10161_v29  ;;  %v3839_v29 = vand.u32 2147483647, %v3604_v49 }
 0xad0   :  { %4432 = vmatpush.msra.mxu3 %v6991_v25 }
 0xad1   :  { %vm3840_vm4 = vcmp.eq.f32.partialorder %v3839_v29, 8.507059e+37 }
 0xad2   :  { %v7422_v37 = vpop.eup %7421  ;;  %4433 = vmatpush.msra.mxu3 %v6992_v6  ;;  %v4017_v38 = vpop.permute.xlu1 %4016 }
 0xad3   :  { %6710 = vmatpush.xpose.msk.msrb.mxu2 %vm862_vm8, %v4021_v34  ;;  %v3831_v16 = vmul.f32 %v7422_v37, %v3604_v49  ;;  %vm3836_vm1 = vweird.f32 %v7422_v37 }
 0xad4   :  { %4434 = vmatpush.msra.mxu3 %v6976_v1  ;;  %vm3837_vm3 = vmor %vm3835_vm2, %vm3836_vm1 }
 0xad5   :  { %v3832_v11 = vsub.f32 1.0, %v3831_v16 }
 0xad6   :  { %4435 = vmatpush.msra.mxu3 %v6977_v47 }
 0xad7   :  { %6711 = vmatpush.xpose.msk.msrb.mxu2 %vm862_vm8, %v10171_v3  ;;  %v3833_v0 = vmul.f32 %v7422_v37, %v3832_v11 }
 0xad9   :  { %v3834_v13 = vadd.f32 %v7422_v37, %v3833_v0 }
 0xada   :  { %v10202_v27 = vpop.permute.xlu1 %4585 }
 0xadb   :  { %6712 = vmatpush.xpose.msk.msrb.mxu2 %vm862_vm8, %v4017_v38  ;;  %v3838_v40 = vsel %vm3837_vm3, %v7422_v37, %v3834_v13 }
 0xadc   :  { %v3843_v35 = vsel %vm3840_vm4, %v3842_v4, %v3838_v40 }
 0xadd   :  { %v3982_v31 = vpop.f32.mrf.mxu1  ;;  %v3844_v53 = vmul.f32 %v3843_v35, %v10035_v18 }
 0xade   :  { %v10207_v3 = vadd.f32 %v10002_v21, %v3982_v31 }
 0xadf   :  { %6713 = vmatpush.xpose.msk.msrb.mxu2 %vm862_vm8, %v4015_v51  ;;  %v3863_v10 = vmul.f32 %v10133_v36, %v3844_v53 }
 0xae0   :  { %4678 = vrot.lane.b32.xlu0 %v10207_v3, %s7720_s21  ;;  %4111 = vrot.lane.b32.xlu2 %v10207_v3, %s7719_s20 }
 0xae1   :  { %4662 = vrot.lane.b32.xlu1 %v10207_v3, %s7721_s22  ;;  %v3882_v39 = vadd.f32 %v10143_v57, %v3863_v10 }
 0xae2   :  { %6714 = vmatmul.msk.f32.vlgmr.msrb.gmra.mxu2 %vm862_vm8, %v10057_v2  ;;  %v10220_v18 = vpop.permute.xlu1 %4583  ;;  %v6985_v2 = vpop.permute.xlu2 %6984 }
 0xae3   :  { %6705 = vmatmul.msk.f32.gmra.mxu1 %vm63_vm0, %v3882_v39  ;;  %v6986_v6 = vunpack.i.l.bf16 %v6985_v2  ;;  %v6987_v37 = vunpack.i.h.bf16 %v6985_v2 }
 0xae5   :  { %v3985_v49 = vpop.f32.mrf.mxu1 }
 0xae6   :  { %v10224_v36 = vadd.f32 %v10002_v21, %v3985_v49 }
 0xae8   :  { %4664 = vrot.lane.b32.xlu0 %v10224_v36, %s7721_s22 }
 0xae9   :  { %4113 = vrot.lane.b32.xlu1 %v10224_v36, %s7719_s20 }
 0xaea   :  { %6715 = vmatmul.msk.f32.gmra.mxu2 %vm862_vm8, %v10053_v43  ;;  %v6980_v57 = vpop.permute.xlu1 %6979 }
 0xaeb   :  { %v6981_v32 = vunpack.i.l.bf16 %v6980_v57  ;;  %v6982_v25 = vunpack.i.h.bf16 %v6980_v57 }
 0xaed   :  { %4436 = vmatpush.msra.mxu3 %v6981_v32 }
 0xaef   :  { %4437 = vmatpush.msra.mxu3 %v6982_v25 }
 0xaf1   :  { %4680 = vrot.lane.b32.xlu1 %v10224_v36, %s7720_s21  ;;  %4438 = vmatpush.msra.mxu3 %v6986_v6 }
 0xaf2   :  { %6716 = vmatmul.msk.f32.gmra.mxu2 %vm862_vm8, %v10015_v58 }
 0xaf3   :  { %4439 = vmatpush.msra.mxu3 %v6987_v37 }
 0xafa   :  { %6717 = vmatmul.msk.f32.gmra.mxu2 %vm862_vm8, %v10032_v14 }
 0xb02   :  { %6718 = vmatmul.msk.f32.gmra.mxu2 %vm862_vm8, %v10010_v22 }
 0xb08   :  { %v3988_v43 = vpop.f32.mrf.mxu1 }
 0xb09   :  { %v10241_v34 = vadd.f32 %v10002_v21, %v3988_v43 }
 0xb0a   :  { %6719 = vmatmul.msk.f32.gmra.mxu2 %vm862_vm8, %v10020_v61 }
 0xb0b   :  { %4682 = vrot.lane.b32.xlu0 %v10241_v34, %s7720_s21  ;;  %4115 = vrot.lane.b32.xlu2 %v10241_v34, %s7719_s20 }
 0xb0c   :  { %4666 = vrot.lane.b32.xlu1 %v10241_v34, %s7721_s22 }
 0xb10   :  { %v3991_v58 = vpop.f32.mrf.mxu1 }
 0xb11   :  { %v10252_v14 = vadd.f32 %v10002_v21, %v3991_v58 }
 0xb12   :  { %6720 = vmatmul.msk.f32.gmra.mxu2 %vm862_vm8, %v10005_v46 }
 0xb13   :  { %4668 = vrot.lane.b32.xlu0 %v10252_v14, %s7721_s22 }
 0xb14   :  { %4117 = vrot.lane.b32.xlu1 %v10252_v14, %s7719_s20 }
 0xb18   :  { %v3994_v22 = vpop.f32.mrf.mxu1 }
 0xb19   :  { %v10261_v61 = vadd.f32 %v10002_v21, %v3994_v22 }
 0xb1a   :  { %6721 = vmatmul.msk.f32.gmra.mxu2 %vm862_vm8, %v10038_v8  ;;  %v10285_v8 = vpop.permute.xlu1 %4581 }
 0xb1b   :  { %4119 = vrot.lane.b32.xlu0 %v10261_v61, %s7719_s20 }
 0xb1c   :  { %4684 = vrot.lane.b32.xlu1 %v10252_v14, %s7720_s21 }
 0xb20   :  { %v3997_v46 = vpop.f32.mrf.mxu1 }
 0xb21   :  { %v10270_v1 = vadd.f32 %v10002_v21, %v3997_v46 }
 0xb22   :  { %v10287_v47 = vpop.permute.xlu1 %4575 }
 0xb23   :  { %4121 = vrot.lane.b32.xlu2 %v10270_v1, %s7719_s20 }
 0xb24   :  { %4686 = vrot.lane.b32.xlu1 %v10261_v61, %s7720_s21 }
 0xb28   :  { %v4000_v38 = vpop.f32.mrf.mxu1 }
 0xb29   :  { %v10277_v16 = vadd.f32 %v10002_v21, %v4000_v38 }
 0xb2a   :  { %v10294_v0 = vpop.permute.xlu1 %4573 }
 0xb2b   :  { %4688 = vrot.lane.b32.xlu2 %v10270_v1, %s7720_s21  ;;  %4690 = vrot.lane.b32.xlu0 %v10277_v16, %s7720_s21 }
 0xb2c   :  { %4123 = vrot.lane.b32.xlu1 %v10277_v16, %s7719_s20 }
 0xb32   :  { %v10301_v40 = vpop.permute.xlu1 %4563 }
 0xb3a   :  { %v10307_v31 = vpop.permute.xlu1 %4565 }
 0xb42   :  { %v10311_v51 = vpop.permute.xlu1 %4567 }
 0xb4a   :  { %v10315_v39 = vpop.permute.xlu1 %4569 }
 0xb52   :  { %v4679_v58 = vpop.permute.xlu0 %4678 }
 0xb53   :  { %v10323_v2 = vpop.permute.xlu1 %4662 }
 0xb5b   :  { %v4114_v22 = vpop.permute.xlu1 %4113 }
 0xb60   :  { %v4003_v11 = vpop.f32.mrf.mxu1 }
 0xb61   :  { %v10290_v23 = vadd.f32 %v10002_v21, %v4003_v11  ;;  %v10337_v11 = vpop.permute.xlu0 %4664 }
 0xb63   :  { %4125 = vrot.lane.b32.xlu0 %v10290_v23, %s7719_s20 }
 0xb65   :  { %v10296_v29 = vpop.f32.mrf.mxu2 }
 0xb66   :  { %v4200_v32 = vsel %vm1033_vm9, %v10296_v29, -inf }
 0xb6b   :  { %4692 = vrot.lane.b32.xlu0 %v10290_v23, %s7720_s21 }
 0xb6d   :  { %v4082_v13 = vpop.f32.mrf.mxu2 }
 0xb6e   :  { %v4203_v4 = vsel %vm1033_vm9, %v4082_v13, -inf }
 0xb6f   :  { %4204 = vmax.xlane.f32.xlu1 %v4203_v4  ;;  %v4681_v4 = vpop.permute.xlu1 %4680 }
 0xb75   :  { %v10303_v35 = vpop.f32.mrf.mxu2 }
 0xb76   :  { %v4206_v21 = vsel %vm1033_vm9, %v10303_v35, -inf }
 0xb77   :  { %4207 = vmax.xlane.f32.xlu2 %v4206_v21  ;;  %v10339_v21 = vpop.permute.xlu2 %4557 }
 0xb7d   :  { %v10309_v53 = vpop.f32.mrf.mxu2 }
 0xb7e   :  { %v4209_v37 = vsel %vm1033_vm9, %v10309_v53, -inf }
 0xb85   :  { %v10313_v10 = vpop.f32.mrf.mxu2 }
 0xb86   :  { %v4212_v38 = vsel %vm1033_vm9, %v10313_v10, -inf }
 0xb8d   :  { %v10317_v49 = vpop.f32.mrf.mxu2 }
 0xb8e   :  { %v4215_v57 = vsel %vm1033_vm9, %v10317_v49, -inf }
 0xb8f   :  { %4216 = vmax.xlane.f32.xlu1 %v4215_v57  ;;  %v4683_v57 = vpop.permute.xlu0 %4682 }
 0xb95   :  { %4201 = vmax.xlane.f32.xlu0 %v4200_v32  ;;  %v10325_v25 = vpop.f32.mrf.mxu2  ;;  %v10341_v32 = vpop.permute.xlu1 %4666 }
 0xb96   :  { %v4218_v6 = vsel %vm1033_vm9, %v10325_v25, -inf }
 0xb97   :  { %4219 = vmax.xlane.f32.xlu2 %v4218_v6  ;;  %v4588_v6 = vpop.permute.xlu2 %4587 }
 0xb9d   :  { %4210 = vmax.xlane.f32.xlu0 %v4209_v37  ;;  %v10331_v43 = vpop.f32.mrf.mxu2  ;;  %v10347_v37 = vpop.permute.xlu0 %4668 }
 0xb9e   :  { %v4221_v46 = vsel %vm1033_vm9, %v10331_v43, -inf }
 0xb9f   :  { %4222 = vmax.xlane.f32.xlu1 %v4221_v46  ;;  %v4118_v46 = vpop.permute.xlu1 %4117  ;;  %v10349_v41 = vpop.permute.xlu2 %4571 }
 0xba5   :  { %4213 = vmax.xlane.f32.xlu0 %v4212_v38  ;;  %v4120_v38 = vpop.permute.xlu0 %4119 }
 0xba7   :  { %v4685_v50 = vpop.permute.xlu1 %4684  ;;  %v4112_v26 = vpop.permute.xlu2 %4111 }
 0xbad   :  { %v4691_v62 = vpop.permute.xlu0 %4690 }
 0xbaf   :  { %v4687_v28 = vpop.permute.xlu1 %4686  ;;  %v4116_v52 = vpop.permute.xlu2 %4115 }
 0xbb7   :  { %v4124_v54 = vpop.permute.xlu1 %4123  ;;  %v4122_v7 = vpop.permute.xlu2 %4121 }
 0xbb8   :  { %4670 = vrot.lane.b32.xlu1 %v10261_v61, %s7721_s22 }
 0xbb9   :  { %4672 = vrot.lane.b32.xlu0 %v10270_v1, %s7721_s22 }
 0xbbf   :  { %v4689_v24 = vpop.permute.xlu2 %4688 }
 0xbd5   :  { %v4126_v55 = vpop.permute.xlu0 %4125 }
 0xbd6   :  { %6722 = vmatpush.xpose.msk.msrb.mxu0 %vm862_vm8, %v4126_v55 }
 0xbda   :  { %6723 = vmatpush.xpose.msk.msrb.mxu0 %vm862_vm8, %v4124_v54 }
 0xbdd   :  { %v4693_v15 = vpop.permute.xlu0 %4692 }
 0xbde   :  { %6724 = vmatpush.xpose.msk.msrb.mxu0 %vm862_vm8, %v4122_v7  ;;  %6772 = vmatpush.xpose.msk.msrb.mxu3 %vm862_vm8, %v4693_v15 }
 0xbe2   :  { %6725 = vmatpush.xpose.msk.msrb.mxu0 %vm862_vm8, %v4120_v38  ;;  %v4205_v30 = vpop.xlane.xlu1 %4204  ;;  %6773 = vmatpush.xpose.msk.msrb.mxu3 %vm862_vm8, %v4691_v62 }
 0xbe3   :  { %v4249_v48 = vsub.f32 %v4082_v13, %v4205_v30 }
 0xbe5   :  { %v4266_v5 = vmul.f32 1.442695, %v4249_v48 }
 0xbe6   :  { %6726 = vmatpush.xpose.msk.msrb.mxu0 %vm862_vm8, %v4118_v46  ;;  %6774 = vmatpush.xpose.msk.msrb.mxu3 %vm862_vm8, %v4689_v24 }
 0xbe7   :  { %7423 = vpow2.f32 %v4266_v5 }
 0xbea   :  { %6727 = vmatpush.xpose.msk.msrb.mxu0 %vm862_vm8, %v4116_v52  ;;  %6775 = vmatpush.xpose.msk.msrb.mxu3 %vm862_vm8, %v4687_v28  ;;  %v4208_v5 = vpop.xlane.xlu2 %4207 }
 0xbeb   :  { %v4250_v15 = vsub.f32 %v10303_v35, %v4208_v5 }
 0xbed   :  { %v10361_v7 = vpop.eup %7423  ;;  %v4268_v55 = vmul.f32 1.442695, %v4250_v15 }
 0xbee   :  { %6728 = vmatpush.xpose.msk.msrb.mxu0 %vm862_vm8, %v4114_v22  ;;  %6776 = vmatpush.xpose.msk.msrb.mxu3 %vm862_vm8, %v4685_v50  ;;  %v4299_v30 = vsel %vm1033_vm9, %v10361_v7, 0.0 }
 0xbef   :  { %4300 = vadd.xlane.f32.xlu2 %v4299_v30 }
 0xbf2   :  { %6729 = vmatpush.xpose.msk.msrb.mxu0 %vm862_vm8, %v4112_v26  ;;  %6777 = vmatpush.xpose.msk.msrb.mxu3 %vm862_vm8, %v4683_v57 }
 0xbf5   :  { %6730 = vmatmul.msk.f32.vlgmr.msrb.gmra.mxu0 %vm862_vm8, %v10207_v3 }
 0xbf6   :  { %6756 = vmatpush.xpose.msk.msra.mxu0 %vm862_vm8, %v4588_v6  ;;  %6778 = vmatpush.xpose.msk.msrb.mxu3 %vm862_vm8, %v4681_v4 }
 0xbfa   :  { %6757 = vmatpush.xpose.msk.msra.mxu0 %vm862_vm8, %v10202_v27  ;;  %6779 = vmatpush.xpose.msk.msrb.mxu3 %vm862_vm8, %v4679_v58 }
 0xbfd   :  { %6731 = vmatmul.msk.f32.gmra.mxu0 %vm862_vm8, %v10224_v36 }
 0xbfe   :  { %6758 = vmatpush.xpose.msk.msra.mxu0 %vm862_vm8, %v10220_v18 }
 0xc02   :  { %6759 = vmatpush.xpose.msk.msra.mxu0 %vm862_vm8, %v10285_v8  ;;  %v4217_v52 = vpop.xlane.xlu1 %4216 }
 0xc03   :  { %v4253_v50 = vsub.f32 %v10317_v49, %v4217_v52 }
 0xc05   :  { %6732 = vmatmul.msk.f32.gmra.mxu0 %vm862_vm8, %v10241_v34  ;;  %v4274_v27 = vmul.f32 1.442695, %v4253_v50 }
 0xc06   :  { %6760 = vmatpush.xpose.msk.msra.mxu0 %vm862_vm8, %v10185_v12 }
 0xc08   :  { %v4202_v24 = vpop.xlane.xlu0 %4201 }
 0xc09   :  { %v4248_v48 = vsub.f32 %v10296_v29, %v4202_v24 }
 0xc0a   :  { %6761 = vmatpush.xpose.msk.msra.mxu0 %vm862_vm8, %v10190_v19 }
 0xc0b   :  { %v4264_v54 = vmul.f32 1.442695, %v4248_v48 }
 0xc0d   :  { %7425 = vpow2.f32 %v4264_v54  ;;  %6733 = vmatmul.msk.f32.gmra.mxu0 %vm862_vm8, %v10252_v14 }
 0xc0e   :  { %6762 = vmatpush.xpose.msk.msra.mxu0 %vm862_vm8, %v10287_v47  ;;  %7427 = vpow2.f32 %v4268_v55 }
 0xc10   :  { %v4211_v28 = vpop.xlane.xlu0 %4210 }
 0xc11   :  { %v4251_v62 = vsub.f32 %v10309_v53, %v4211_v28 }
 0xc12   :  { %6763 = vmatpush.xpose.msk.msra.mxu0 %vm862_vm8, %v10294_v0 }
 0xc13   :  { %v7426_v26 = vpop.eup %7425  ;;  %v4270_v12 = vmul.f32 1.442695, %v4251_v62 }
 0xc14   :  { %v4296_v19 = vsel %vm1033_vm9, %v7426_v26, 0.0  ;;  %v7428_v8 = vpop.eup %7427 }
 0xc15   :  { %7429 = vpow2.f32 %v4270_v12  ;;  %4297 = vadd.xlane.f32.xlu0 %v4296_v19  ;;  %6734 = vmatmul.msk.f32.gmra.mxu0 %vm862_vm8, %v10261_v61  ;;  %v4302_v13 = vsel %vm1033_vm9, %v7428_v8, 0.0 }
 0xc16   :  { %7431 = vpow2.f32 %v4274_v27 }
 0xc18   :  { %v4214_v18 = vpop.xlane.xlu0 %4213 }
 0xc19   :  { %v4252_v47 = vsub.f32 %v10313_v10, %v4214_v18 }
 0xc1b   :  { %v7430_v0 = vpop.eup %7429  ;;  %v4272_v29 = vmul.f32 1.442695, %v4252_v47 }
 0xc1c   :  { %v4305_v35 = vsel %vm1033_vm9, %v7430_v0, 0.0  ;;  %v10406_v53 = vpop.eup %7431 }
 0xc1d   :  { %7433 = vpow2.f32 %v4272_v29  ;;  %4303 = vadd.xlane.f32.xlu0 %v4302_v13  ;;  %4306 = vadd.xlane.f32.xlu1 %v4305_v35  ;;  %v4311_v10 = vsel %vm1033_vm9, %v10406_v53, 0.0 }
 0xc1e   :  { %6735 = vmatmul.msk.f32.gmra.mxu0 %vm862_vm8, %v10270_v1 }
 0xc23   :  { %v7434_v49 = vpop.eup %7433 }
 0xc24   :  { %v4308_v58 = vsel %vm1033_vm9, %v7434_v49, 0.0 }
 0xc25   :  { %4309 = vadd.xlane.f32.xlu2 %v4308_v58  ;;  %4312 = vadd.xlane.f32.xlu1 %v4311_v10 }
 0xc26   :  { %6736 = vmatmul.msk.f32.gmra.mxu0 %vm862_vm8, %v10277_v16 }
 0xc2e   :  { %6737 = vmatmul.msk.f32.gmra.mxu0 %vm862_vm8, %v10290_v23 }
 0xc36   :  { %6764 = vmatmul.msk.f32.vlgmr.msra.gmra.mxu0 %vm862_vm8, %v10339_v21  ;;  %v4223_v21 = vpop.xlane.xlu1 %4222 }
 0xc37   :  { %v4255_v58 = vsub.f32 %v10331_v43, %v4223_v21 }
 0xc3d   :  { %4676 = vrot.lane.b32.xlu2 %v10290_v23, %s7721_s22 }
 0xc3e   :  { %6765 = vmatmul.msk.f32.gmra.mxu0 %vm862_vm8, %v10192_v17  ;;  %4674 = vrot.lane.b32.xlu1 %v10277_v16, %s7721_s22  ;;  %v10452_v30 = vpop.permute.xlu1 %4670 }
 0xc46   :  { %6766 = vmatmul.msk.f32.gmra.mxu0 %vm862_vm8, %v10194_v56 }
 0xc4e   :  { %6767 = vmatmul.msk.f32.gmra.mxu0 %vm862_vm8, %v10301_v40 }
 0xc56   :  { %6768 = vmatmul.msk.f32.gmra.mxu0 %vm862_vm8, %v10307_v31  ;;  %v10443_v31 = vpop.permute.xlu0 %4672 }
 0xc5e   :  { %6769 = vmatmul.msk.f32.gmra.mxu0 %vm862_vm8, %v10311_v51 }
 0xc66   :  { %6770 = vmatmul.msk.f32.gmra.mxu0 %vm862_vm8, %v10315_v39  ;;  %v4220_v39 = vpop.xlane.xlu2 %4219 }
 0xc6e   :  { %6771 = vmatmul.msk.f32.gmra.mxu0 %vm862_vm8, %v10349_v41  ;;  %v4301_v57 = vpop.xlane.xlu2 %4300 }
 0xc72   :  { %v10435_v17 = vpop.f32.mrf.mxu0 }
 0xc73   :  { %v4224_v56 = vsel %vm1033_vm9, %v10435_v17, -inf }
 0xc74   :  { %4225 = vmax.xlane.f32.xlu0 %v4224_v56  ;;  %v4278_v56 = vmul.f32 1.442695, %v4255_v58 }
 0xc7a   :  { %v10439_v22 = vpop.f32.mrf.mxu0 }
 0xc7b   :  { %v4227_v40 = vsel %vm1033_vm9, %v10439_v22, -inf }
 0xc7c   :  { %4228 = vmax.xlane.f32.xlu2 %v4227_v40  ;;  %v4254_v40 = vsub.f32 %v10325_v25, %v4220_v39 }
 0xc7e   :  { %v4276_v21 = vmul.f32 1.442695, %v4254_v40 }
 0xc82   :  { %v10445_v51 = vpop.f32.mrf.mxu0 }
 0xc83   :  { %v4230_v35 = vsel %vm1033_vm9, %v10445_v51, -inf }
 0xc88   :  { %v4298_v4 = vpop.xlane.xlu0 %4297 }
 0xc89   :  { %7435 = vrcp.f32 %v4298_v4 }
 0xc8a   :  { %v10447_v41 = vpop.f32.mrf.mxu0  ;;  %7437 = vrcp.f32 %v4301_v57 }
 0xc8b   :  { %v4233_v10 = vsel %vm1033_vm9, %v10447_v41, -inf }
 0xc8f   :  { %v7436_v6 = vpop.eup %7435 }
 0xc90   :  { %v4360_v46 = vmul.f32 %v7436_v6, %v7426_v26  ;;  %v4304_v5 = vpop.xlane.xlu0 %4303  ;;  %v7438_v24 = vpop.eup %7437 }
 0xc91   :  { %7439 = vrcp.f32 %v4304_v5  ;;  %v4361_v48 = vmul.f32 %v7438_v24, %v10361_v7  ;;  %v4307_v54 = vpop.xlane.xlu1 %4306 }
 0xc92   :  { %v10449_v38 = vpop.f32.mrf.mxu0  ;;  %6738 = vmatmul.msk.f32.vlgmr.msra.gmra.mxu3 %vm1033_vm9, %v4360_v46  ;;  %7441 = vrcp.f32 %v4307_v54 }
 0xc93   :  { %v4236_v57 = vsel %vm1033_vm9, %v10449_v38, -inf }
 0xc97   :  { %v7440_v55 = vpop.eup %7439 }
 0xc98   :  { %v4362_v52 = vmul.f32 %v7440_v55, %v7428_v8  ;;  %v4310_v62 = vpop.xlane.xlu2 %4309  ;;  %v7442_v26 = vpop.eup %7441 }
 0xc99   :  { %7443 = vrcp.f32 %v4310_v62  ;;  %v4363_v50 = vmul.f32 %v7442_v26, %v7430_v0  ;;  %v4313_v7 = vpop.xlane.xlu1 %4312  ;;  %v10513_v62 = vpack.i.bf16 %v10277_v16, %v10290_v23  ;;  %v10519_v26 = vpack.i.bf16 %v10261_v61, %v10270_v1 }
 0xc9a   :  { %6739 = vmatmul.msk.f32.gmra.mxu3 %vm1033_vm9, %v4361_v48  ;;  %7445 = vrcp.f32 %v4313_v7 }
 0xc9b   :  { %v10456_v15 = vpop.f32.mrf.mxu0  ;;  %7447 = vpow2.f32 %v4278_v56 }
 0xc9c   :  { %7449 = vpow2.f32 %v4276_v21  ;;  %v4239_v39 = vsel %vm1033_vm9, %v10456_v15, -inf }
 0xc9f   :  { %v7444_v19 = vpop.eup %7443 }
 0xca0   :  { %v4364_v27 = vmul.f32 %v7444_v19, %v7434_v49  ;;  %v7446_v47 = vpop.eup %7445  ;;  %v10537_v1 = vpop.permute.xlu2 %4676 }
 0xca1   :  { %v4365_v29 = vmul.f32 %v7446_v47, %v10406_v53  ;;  %v10491_v6 = vpop.eup %7447 }
 0xca2   :  { %6740 = vmatmul.msk.f32.gmra.mxu3 %vm1033_vm9, %v4362_v52  ;;  %v4317_v5 = vsel %vm1033_vm9, %v10491_v6, 0.0  ;;  %v10501_v24 = vpop.eup %7449 }
 0xca3   :  { %v10459_v28 = vpop.f32.mrf.mxu0  ;;  %v4314_v54 = vsel %vm1033_vm9, %v10501_v24, 0.0 }
 0xca4   :  { %v4242_v55 = vsel %vm1033_vm9, %v10459_v28, -inf }
 0xcaa   :  { %6741 = vmatmul.msk.f32.gmra.mxu3 %vm1033_vm9, %v4363_v50  ;;  %v10527_v50 = vpack.i.bf16 %v10241_v34, %v10252_v14 }
 0xcab   :  { %v10462_v12 = vpop.f32.mrf.mxu0 }
 0xcb0   :  { %v10542_v14 = vpop.permute.xlu1 %4674 }
 0xcb2   :  { %6742 = vmatmul.msk.f32.gmra.mxu3 %vm1033_vm9, %v4364_v27 }
 0xcb3   :  { %v10465_v18 = vpop.f32.mrf.mxu0 }
 0xcb4   :  { %v4767_v8 = vsel %vm1033_vm9, %v10465_v18, -inf }
 0xcb5   :  { %4768 = vmax.xlane.f32.xlu1 %v4767_v8 }
 0xcba   :  { %6743 = vmatmul.msk.f32.gmra.mxu3 %vm1033_vm9, %v4365_v29 }
 0xcbb   :  { %v10471_v0 = vpop.f32.mrf.mxu0 }
 0xcbc   :  { %v4770_v13 = vsel %vm1033_vm9, %v10471_v0, -inf }
 0xcbd   :  { %4771 = vmax.xlane.f32.xlu0 %v4770_v13  ;;  %4231 = vmax.xlane.f32.xlu1 %v4230_v35 }
 0xcc3   :  { %v10477_v49 = vpop.f32.mrf.mxu0 }
 0xcc4   :  { %v4773_v53 = vsel %vm1033_vm9, %v10477_v49, -inf }
 0xcc5   :  { %4234 = vmax.xlane.f32.xlu0 %v4233_v10  ;;  %4774 = vmax.xlane.f32.xlu2 %v4773_v53 }
 0xccb   :  { %v10485_v4 = vpop.f32.mrf.mxu0 }
 0xccc   :  { %v4776_v43 = vsel %vm1033_vm9, %v10485_v4, -inf }
 0xccd   :  { %4237 = vmax.xlane.f32.xlu2 %v4236_v57  ;;  %4777 = vmax.xlane.f32.xlu1 %v4776_v43 }
 0xcd3   :  { %v10493_v46 = vpop.f32.mrf.mxu0 }
 0xcd4   :  { %v4779_v25 = vsel %vm1033_vm9, %v10493_v46, -inf }
 0xcd5   :  { %4780 = vmax.xlane.f32.xlu0 %v4779_v25  ;;  %4240 = vmax.xlane.f32.xlu1 %v4239_v39 }
 0xcd6   :  { %4318 = vadd.xlane.f32.xlu2 %v4317_v5 }
 0xcdb   :  { %v10503_v48 = vpop.f32.mrf.mxu0 }
 0xcdc   :  { %v4782_v52 = vsel %vm1033_vm9, %v10503_v48, -inf }
 0xcdd   :  { %4315 = vadd.xlane.f32.xlu0 %v4314_v54  ;;  %4243 = vmax.xlane.f32.xlu1 %v4242_v55 }
 0xcde   :  { %4783 = vmax.xlane.f32.xlu2 %v4782_v52 }
 0xce3   :  { %v10535_v61 = vpop.f32.mrf.mxu0 }
 0xce7   :  { %v4226_v16 = vpop.xlane.xlu0 %4225 }
 0xce8   :  { %v4256_v34 = vsub.f32 %v10435_v17, %v4226_v16  ;;  %v10554_v17 = vpack.i.bf16 %v10207_v3, %v10224_v36 }
 0xcea   :  { %v4280_v23 = vmul.f32 1.442695, %v4256_v34 }
 0xceb   :  { %v10548_v47 = vpop.f32.mrf.mxu0 }
 0xcec   :  { %7451 = vpow2.f32 %v4280_v23 }
 0xcef   :  { %v4229_v7 = vpop.xlane.xlu2 %4228 }
 0xcf1   :  { %6994 = vrot.lane.b32.xlu0 %v10513_v62, %s7722_s23 }
 0xcf2   :  { %v10550_v13 = vpop.eup %7451 }
 0xcf6   :  { %6999 = vrot.lane.b32.xlu2 %v10519_v26, %s7722_s23  ;;  %7004 = vrot.lane.b32.xlu1 %v10075_v9, %s7723_s24  ;;  %v4785_v9 = vsel %vm1033_vm9, %v10535_v61, -inf }
 0xcfe   :  { %7009 = vrot.lane.b32.xlu2 %v10527_v50, %s7722_s23  ;;  %7014 = vrot.lane.b32.xlu1 %v10025_v63, %s7723_s24  ;;  %v4257_v63 = vsub.f32 %v10439_v22, %v4229_v7  ;;  %v4788_v22 = vsel %vm1033_vm9, %v10548_v47, -inf }
 0xd00   :  { %v4282_v27 = vmul.f32 1.442695, %v4257_v63 }
 0xd02   :  { %7453 = vpow2.f32 %v4282_v27 }
 0xd06   :  { %7029 = vrot.lane.b32.xlu1 %v10065_v33, %s7723_s24  ;;  %v4245_v33 = vsel %vm1033_vm9, %v10462_v12, -inf }
 0xd08   :  { %v10565_v53 = vpop.eup %7453 }
 0xd09   :  { %v4323_v56 = vsel %vm1033_vm9, %v10565_v53, 0.0 }
 0xd1b   :  { %4786 = vmax.xlane.f32.xlu0 %v4785_v9 }
 0xd27   :  { %4246 = vmax.xlane.f32.xlu2 %v4245_v33 }
 0xd28   :  { %v4769_v19 = vpop.xlane.xlu1 %4768 }
 0xd29   :  { %v4815_v8 = vsub.f32 %v10465_v18, %v4769_v19  ;;  %v4320_v18 = vsel %vm1033_vm9, %v10550_v13, 0.0 }
 0xd2b   :  { %v4831_v29 = vmul.f32 1.442695, %v4815_v8 }
 0xd2d   :  { %7455 = vpow2.f32 %v4831_v29 }
 0xd2f   :  { %4789 = vmax.xlane.f32.xlu2 %v4788_v22  ;;  %7019 = vrot.lane.b32.xlu0 %v10554_v17, %s7722_s23 }
 0xd30   :  { %v10562_v35 = vpop.xlane.xlu0 %4771  ;;  %4321 = vadd.xlane.f32.xlu1 %v4320_v18  ;;  %v4232_v58 = vpop.xlane.xlu1 %4231 }
 0xd31   :  { %v4258_v10 = vsub.f32 %v10445_v51, %v4232_v58 }
 0xd33   :  { %v4284_v3 = vmul.f32 1.442695, %v4258_v10  ;;  %v10567_v36 = vpop.eup %7455 }
 0xd34   :  { %v4863_v40 = vsel %vm1033_vm9, %v10567_v36, 0.0 }
 0xd35   :  { %7457 = vpow2.f32 %v4284_v3 }
 0xd37   :  { %4324 = vadd.xlane.f32.xlu2 %v4323_v56  ;;  %7024 = vrot.lane.b32.xlu0 %v10111_v59, %s7723_s24 }
 0xd38   :  { %v4235_v57 = vpop.xlane.xlu0 %4234  ;;  %v4775_v43 = vpop.xlane.xlu2 %4774  ;;  %4864 = vadd.xlane.f32.xlu1 %v4863_v40 }
 0xd39   :  { %v4259_v51 = vsub.f32 %v10447_v41, %v4235_v57  ;;  %v4817_v21 = vsub.f32 %v10477_v49, %v4775_v43 }
 0xd3b   :  { %v4286_v25 = vmul.f32 1.442695, %v4259_v51  ;;  %v4835_v39 = vmul.f32 1.442695, %v4817_v21  ;;  %v10577_v5 = vpop.eup %7457 }
 0xd3c   :  { %v4326_v54 = vsel %vm1033_vm9, %v10577_v5, 0.0 }
 0xd3d   :  { %7459 = vpow2.f32 %v4286_v25 }
 0xd3e   :  { %7461 = vpow2.f32 %v4835_v39 }
 0xd3f   :  { %4327 = vadd.xlane.f32.xlu2 %v4326_v54 }
 0xd40   :  { %v4238_v59 = vpop.xlane.xlu2 %4237  ;;  %v4778_v55 = vpop.xlane.xlu1 %4777 }
 0xd41   :  { %v4260_v52 = vsub.f32 %v10449_v38, %v4238_v59  ;;  %v4818_v3 = vsub.f32 %v10485_v4, %v4778_v55 }
 0xd43   :  { %v10582_v9 = vpop.eup %7459  ;;  %v4288_v16 = vmul.f32 1.442695, %v4260_v52  ;;  %v4837_v40 = vmul.f32 1.442695, %v4818_v3 }
 0xd44   :  { %v10584_v41 = vpop.eup %7461  ;;  %v4329_v49 = vsel %vm1033_vm9, %v10582_v9, 0.0 }
 0xd45   :  { %7463 = vpow2.f32 %v4288_v16  ;;  %v4869_v34 = vsel %vm1033_vm9, %v10584_v41, 0.0 }
 0xd46   :  { %4870 = vadd.xlane.f32.xlu1 %v4869_v34 }
 0xd47   :  { %4330 = vadd.xlane.f32.xlu2 %v4329_v49 }
 0xd48   :  { %v10590_v23 = vpop.xlane.xlu0 %4780  ;;  %v4241_v7 = vpop.xlane.xlu1 %4240 }
 0xd49   :  { %v4319_v38 = vpop.xlane.xlu2 %4318  ;;  %v4261_v19 = vsub.f32 %v10456_v15, %v4241_v7 }
 0xd4b   :  { %v10592_v63 = vpop.eup %7463  ;;  %v4290_v22 = vmul.f32 1.442695, %v4261_v19 }
 0xd4c   :  { %v4332_v33 = vsel %vm1033_vm9, %v10592_v63, 0.0 }
 0xd4f   :  { %4333 = vadd.xlane.f32.xlu2 %v4332_v33 }
 0xd50   :  { %v4316_v27 = vpop.xlane.xlu0 %4315  ;;  %v4244_v8 = vpop.xlane.xlu1 %4243 }
 0xd51   :  { %7465 = vrcp.f32 %v4316_v27  ;;  %v4262_v29 = vsub.f32 %v10459_v28, %v4244_v8  ;;  %v4784_v58 = vpop.xlane.xlu2 %4783 }
 0xd52   :  { %v4820_v51 = vsub.f32 %v10503_v48, %v4784_v58 }
 0xd53   :  { %v4292_v18 = vmul.f32 1.442695, %v4262_v29 }
 0xd54   :  { %v4841_v25 = vmul.f32 1.442695, %v4820_v51 }
 0xd55   :  { %7467 = vpow2.f32 %v4292_v18 }
 0xd56   :  { %7469 = vrcp.f32 %v4319_v38 }
 0xd57   :  { %v7466_v10 = vpop.eup %7465  ;;  %7471 = vpow2.f32 %v4290_v22  ;;  %v6755_v22 = vld [vmem:[%s11406_s5 + $0x28] sm:$0xff] }
 0xd58   :  { %v4366_v56 = vmul.f32 %v7466_v10, %v10501_v24  ;;  %7473 = vpow2.f32 %v4837_v40  ;;  %5299 = vmatpush.msra.mxu3 %v6755_v22 }
 0xd59   :  { %v7000_v21 = vpop.permute.xlu2 %6999  ;;  %7475 = vpow2.f32 %v4841_v25 }
 0xd5a   :  { %6744 = vmatmul.msk.f32.gmra.mxu3 %vm1033_vm9, %v4366_v56  ;;  %v7001_v52 = vunpack.i.l.bf16 %v7000_v21 }
 0xd5b   :  { %v10601_v15 = vpop.eup %7467 }
 0xd5c   :  { %v7470_v57 = vpop.eup %7469  ;;  %v4338_v28 = vsel %vm1033_vm9, %v10601_v15, 0.0 }
 0xd5d   :  { %v10605_v43 = vpop.eup %7471  ;;  %4339 = vadd.xlane.f32.xlu2 %v4338_v28  ;;  %v4367_v24 = vmul.f32 %v7470_v57, %v10491_v6  ;;  %v7002_v6 = vunpack.i.h.bf16 %v7000_v21  ;;  %v4441_v57 = vpop.f32.mrf.mxu3 }
 0xd5e   :  { %v4335_v4 = vsel %vm1033_vm9, %v10605_v43, 0.0  ;;  %v10612_v59 = vpop.eup %7473 }
 0xd5f   :  { %v4872_v16 = vsel %vm1033_vm9, %v10612_v59, 0.0  ;;  %v10618_v33 = vpop.eup %7475 }
 0xd60   :  { %v4878_v8 = vsel %vm1033_vm9, %v10618_v33, 0.0 }
 0xd61   :  { %4336 = vadd.xlane.f32.xlu0 %v4335_v4  ;;  %v7010_v49 = vpop.permute.xlu2 %7009 }
 0xd62   :  { %6745 = vmatmul.msk.f32.gmra.mxu3 %vm1033_vm9, %v4367_v24  ;;  %v7011_v38 = vunpack.i.l.bf16 %v7010_v49  ;;  %v7012_v19 = vunpack.i.h.bf16 %v7010_v49 }
 0xd63   :  { %v6995_v39 = vpop.permute.xlu0 %6994 }
 0xd64   :  { %v6996_v54 = vunpack.i.l.bf16 %v6995_v39  ;;  %v6997_v55 = vunpack.i.h.bf16 %v6995_v39 }
 0xd65   :  { %v4444_v24 = vpop.f32.mrf.mxu3 }
 0xd66   :  { %4521 = vmatpush.msra.mxu2 %v6996_v54 }
 0xd68   :  { %4522 = vmatpush.msra.mxu2 %v6997_v55  ;;  %v7005_v48 = vpop.permute.xlu1 %7004 }
 0xd69   :  { %v7006_v34 = vunpack.i.l.bf16 %v7005_v48  ;;  %4873 = vadd.xlane.f32.xlu0 %v4872_v16  ;;  %v7007_v7 = vunpack.i.h.bf16 %v7005_v48 }
 0xd6a   :  { %4523 = vmatpush.msra.mxu2 %v7001_v52  ;;  %6780 = vmatmul.msk.f32.vlgmr.msrb.gmra.mxu3 %vm862_vm8, %v10323_v2 }
 0xd6b   :  { %4999 = vmatpush.msra.mxu1 %v7006_v34 }
 0xd6c   :  { %4524 = vmatpush.msra.mxu2 %v7002_v6 }
 0xd6d   :  { %5000 = vmatpush.msra.mxu1 %v7007_v7 }
 0xd6e   :  { %4525 = vmatpush.msra.mxu2 %v7011_v38 }
 0xd70   :  { %4526 = vmatpush.msra.mxu2 %v7012_v19  ;;  %v7015_v27 = vpop.permute.xlu1 %7014  ;;  %v4447_v19 = vpop.f32.mrf.mxu3 }
 0xd71   :  { %v7016_v29 = vunpack.i.l.bf16 %v7015_v27  ;;  %4879 = vadd.xlane.f32.xlu0 %v4878_v8  ;;  %v7017_v2 = vunpack.i.h.bf16 %v7015_v27 }
 0xd72   :  { %6781 = vmatmul.msk.f32.gmra.mxu3 %vm862_vm8, %v10337_v11  ;;  %v6754_v11 = vld [vmem:[%s11406_s5 + $0x20] sm:$0xff] }
 0xd73   :  { %5001 = vmatpush.msra.mxu1 %v7016_v29  ;;  %5300 = vmatpush.msra.mxu3 %v6754_v11 }
 0xd75   :  { %5002 = vmatpush.msra.mxu1 %v7017_v2 }
 0xd78   :  { %v7030_v3 = vpop.permute.xlu1 %7029 }
 0xd79   :  { %v7032_v34 = vunpack.i.h.bf16 %v7030_v3 }
 0xd7a   :  { %6782 = vmatmul.msk.f32.gmra.mxu3 %vm862_vm8, %v10341_v32 }
 0xd82   :  { %6783 = vmatmul.msk.f32.gmra.mxu3 %vm862_vm8, %v10347_v37 }
 0xd8a   :  { %6784 = vmatmul.msk.f32.gmra.mxu3 %vm862_vm8, %v10452_v30 }
 0xd8e   :  { %v4787_v18 = vpop.xlane.xlu0 %4786 }
 0xd8f   :  { %v4821_v58 = vsub.f32 %v10535_v61, %v4787_v18  ;;  %v4816_v61 = vsub.f32 %v10471_v0, %v10562_v35  ;;  %v4819_v0 = vsub.f32 %v10493_v46, %v10590_v23  ;;  %v7031_v23 = vunpack.i.l.bf16 %v7030_v3  ;;  %v4450_v18 = vpop.f32.mrf.mxu3 }
 0xd91   :  { %v4843_v32 = vmul.f32 1.442695, %v4821_v58  ;;  %v4839_v25 = vmul.f32 1.442695, %v4819_v0 }
 0xd92   :  { %6785 = vmatmul.msk.f32.gmra.mxu3 %vm862_vm8, %v10443_v31  ;;  %v4833_v31 = vmul.f32 1.442695, %v4816_v61 }
 0xd93   :  { %7477 = vpow2.f32 %v4843_v32 }
 0xd97   :  { %v4453_v32 = vpop.f32.mrf.mxu3 }
 0xd99   :  { %v10639_v37 = vpop.eup %7477 }
 0xd9a   :  { %v4247_v30 = vpop.xlane.xlu2 %4246  ;;  %6786 = vmatmul.msk.f32.gmra.mxu3 %vm862_vm8, %v10542_v14  ;;  %v4881_v10 = vsel %vm1033_vm9, %v10639_v37, 0.0 }
 0xd9b   :  { %v4263_v56 = vsub.f32 %v10462_v12, %v4247_v30  ;;  %4882 = vadd.xlane.f32.xlu0 %v4881_v10 }
 0xd9d   :  { %v4294_v40 = vmul.f32 1.442695, %v4263_v56 }
 0xd9f   :  { %7479 = vpow2.f32 %v4294_v40 }
 0xda1   :  { %v7020_v28 = vpop.permute.xlu0 %7019 }
 0xda2   :  { %v7021_v51 = vunpack.i.l.bf16 %v7020_v28  ;;  %v10648_v21 = vpop.xlane.xlu2 %4789  ;;  %6787 = vmatmul.msk.f32.gmra.mxu3 %vm862_vm8, %v10537_v1  ;;  %v7022_v4 = vunpack.i.h.bf16 %v7020_v28 }
 0xda3   :  { %v4322_v14 = vpop.xlane.xlu1 %4321  ;;  %v4822_v0 = vsub.f32 %v10548_v47, %v10648_v21  ;;  %v6804_v47 = vld [vmem:[%s11406_s5 + $0x30] sm:$0xff] }
 0xda4   :  { %7481 = vrcp.f32 %v4322_v14  ;;  %4527 = vmatpush.msra.mxu2 %v7021_v51 }
 0xda5   :  { %v10652_v12 = vpop.eup %7479  ;;  %7483 = vpow2.f32 %v4833_v31 }
 0xda6   :  { %4528 = vmatpush.msra.mxu2 %v7022_v4  ;;  %v4341_v35 = vsel %vm1033_vm9, %v10652_v12, 0.0 }
 0xda7   :  { %4342 = vadd.xlane.f32.xlu2 %v4341_v35 }
 0xda9   :  { %v7025_v39 = vpop.permute.xlu0 %7024 }
 0xdaa   :  { %v7482_v54 = vpop.eup %7481  ;;  %v7026_v1 = vunpack.i.l.bf16 %v7025_v39  ;;  %v4325_v55 = vpop.xlane.xlu2 %4324  ;;  %6822 = vmatmul.msk.f32.vlgmr.msra.gmra.mxu3 %vm862_vm8, %v4441_v57  ;;  %v7027_v46 = vunpack.i.h.bf16 %v7025_v39 }
 0xdab   :  { %v10659_v52 = vpop.eup %7483  ;;  %v4368_v48 = vmul.f32 %v7482_v54, %v10550_v13  ;;  %7485 = vrcp.f32 %v4325_v55  ;;  %v4865_v16 = vpop.xlane.xlu1 %4864 }
 0xdac   :  { %7487 = vrcp.f32 %v4865_v16  ;;  %5003 = vmatpush.msra.mxu1 %v7026_v1  ;;  %v4866_v49 = vsel %vm1033_vm9, %v10659_v52, 0.0  ;;  %v6805_v1 = vld [vmem:[%s11406_s5 + $0x38] sm:$0xff] }
 0xdad   :  { %7489 = vpow2.f32 %v4839_v25  ;;  %6746 = vmatmul.msk.f32.vlgmr.msra.gmra.mxu2 %vm1033_vm9, %v4368_v48  ;;  %v4845_v25 = vmul.f32 1.442695, %v4822_v0  ;;  %5186 = vmatpush.msrb.mxu0 %v6805_v1 }
 0xdae   :  { %5004 = vmatpush.msra.mxu1 %v7027_v46 }
 0xdaf   :  { %4867 = vadd.xlane.f32.xlu2 %v4866_v49  ;;  %5187 = vmatpush.msrb.mxu0 %v6804_v47 }
 0xdb0   :  { %5005 = vmatpush.msra.mxu1 %v7031_v23 }
 0xdb1   :  { %v7486_v6 = vpop.eup %7485 }
 0xdb2   :  { %v7488_v7 = vpop.eup %7487  ;;  %v4328_v38 = vpop.xlane.xlu2 %4327  ;;  %5006 = vmatpush.msra.mxu1 %v7032_v34  ;;  %6823 = vmatmul.msk.f32.gmra.mxu3 %vm862_vm8, %v4444_v24  ;;  %v4369_v8 = vmul.f32 %v7486_v6, %v10565_v53 }
 0xdb3   :  { %v10666_v13 = vpop.eup %7489  ;;  %v4927_v27 = vmul.f32 %v7488_v7, %v10567_v36  ;;  %7491 = vrcp.f32 %v4328_v38 }
 0xdb4   :  { %v4875_v29 = vsel %vm1033_vm9, %v10666_v13, 0.0 }
 0xdb5   :  { %6747 = vmatmul.msk.f32.gmra.mxu2 %vm1033_vm9, %v4369_v8  ;;  %6788 = vmatmul.msk.f32.vlgmr.msra.gmra.mxu1 %vm1033_vm9, %v4927_v27 }
 0xdb7   :  { %4876 = vadd.xlane.f32.xlu2 %v4875_v29 }
 0xdb9   :  { %v7492_v2 = vpop.eup %7491  ;;  %v4871_v6 = vpop.xlane.xlu1 %4870 }
 0xdba   :  { %v4331_v22 = vpop.xlane.xlu2 %4330  ;;  %6824 = vmatmul.msk.f32.gmra.mxu3 %vm862_vm8, %v4447_v19  ;;  %v4370_v11 = vmul.f32 %v7492_v2, %v10577_v5  ;;  %v4456_v5 = vpop.f32.mrf.mxu3 }
 0xdbb   :  { %7493 = vrcp.f32 %v4331_v22 }
 0xdbd   :  { %6748 = vmatmul.msk.f32.gmra.mxu2 %vm1033_vm9, %v4370_v11 }
 0xdc1   :  { %v7494_v36 = vpop.eup %7493 }
 0xdc2   :  { %v4334_v53 = vpop.xlane.xlu2 %4333  ;;  %6825 = vmatmul.msk.f32.gmra.mxu3 %vm862_vm8, %v4450_v18  ;;  %v4371_v58 = vmul.f32 %v7494_v36, %v10582_v9 }
 0xdc3   :  { %7495 = vrcp.f32 %v4334_v53 }
 0xdc5   :  { %6749 = vmatmul.msk.f32.gmra.mxu2 %vm1033_vm9, %v4371_v58 }
 0xdc9   :  { %v7496_v30 = vpop.eup %7495 }
 0xdca   :  { %6826 = vmatmul.msk.f32.gmra.mxu3 %vm862_vm8, %v4453_v32  ;;  %v4372_v10 = vmul.f32 %v7496_v30, %v10592_v63 }
 0xdcd   :  { %6750 = vmatmul.msk.f32.gmra.mxu2 %vm1033_vm9, %v4372_v10 }
 0xdd0   :  { %v4340_v56 = vpop.xlane.xlu2 %4339 }
 0xdd2   :  { %6827 = vmatmul.msk.f32.gmra.mxu3 %vm862_vm8, %v4456_v5 }
 0xdd4   :  { %v4337_v3 = vpop.xlane.xlu0 %4336 }
 0xdd5   :  { %7497 = vrcp.f32 %v4337_v3 }
 0xdd6   :  { %7499 = vrcp.f32 %v4340_v56 }
 0xdd7   :  { %7501 = vpow2.f32 %v4845_v25 }
 0xddb   :  { %v7498_v61 = vpop.eup %7497 }
 0xddc   :  { %v4373_v9 = vmul.f32 %v7498_v61, %v10605_v43  ;;  %v7500_v57 = vpop.eup %7499  ;;  %v4874_v19 = vpop.xlane.xlu0 %4873 }
 0xddd   :  { %v4459_v40 = vpop.f32.mrf.mxu3  ;;  %v4374_v63 = vmul.f32 %v7500_v57, %v10601_v15  ;;  %v10718_v21 = vpop.eup %7501 }
 0xdde   :  { %6751 = vmatmul.msk.f32.gmra.mxu2 %vm1033_vm9, %v4373_v9  ;;  %6828 = vmatmul.msk.f32.gmra.mxu3 %vm862_vm8, %v4459_v40  ;;  %v4884_v48 = vsel %vm1033_vm9, %v10718_v21, 0.0 }
 0xde5   :  { %v4462_v31 = vpop.f32.mrf.mxu3 }
 0xde6   :  { %6752 = vmatmul.msk.f32.gmra.mxu2 %vm1033_vm9, %v4374_v63  ;;  %6829 = vmatmul.msk.f32.gmra.mxu3 %vm862_vm8, %v4462_v31 }
 0xded   :  { %v10690_v28 = vpop.f32.mrf.mxu3 }
 0xdee   :  { %v4791_v51 = vsel %vm1033_vm9, %v10690_v28, -inf }
 0xdef   :  { %4792 = vmax.xlane.f32.xlu0 %v4791_v51 }
 0xdf5   :  { %v10694_v43 = vpop.f32.mrf.mxu3 }
 0xdf6   :  { %v4794_v14 = vsel %vm1033_vm9, %v10694_v43, -inf }
 0xdf7   :  { %4795 = vmax.xlane.f32.xlu2 %v4794_v14 }
 0xdfd   :  { %v10698_v4 = vpop.f32.mrf.mxu3 }
 0xdfe   :  { %v4797_v15 = vsel %vm1033_vm9, %v10698_v4, -inf }
 0xdff   :  { %4798 = vmax.xlane.f32.xlu2 %v4797_v15 }
 0xe05   :  { %v10704_v35 = vpop.f32.mrf.mxu3 }
 0xe06   :  { %v4800_v24 = vsel %vm1033_vm9, %v10704_v35, -inf }
 0xe07   :  { %4801 = vmax.xlane.f32.xlu0 %v4800_v24 }
 0xe0d   :  { %v10708_v39 = vpop.f32.mrf.mxu3 }
 0xe0e   :  { %v4803_v54 = vsel %vm1033_vm9, %v10708_v39, -inf }
 0xe0f   :  { %4804 = vmax.xlane.f32.xlu2 %v4803_v54 }
 0xe15   :  { %v10720_v55 = vpop.f32.mrf.mxu3 }
 0xe16   :  { %v4806_v16 = vsel %vm1033_vm9, %v10720_v55, -inf }
 0xe17   :  { %4885 = vadd.xlane.f32.xlu2 %v4884_v48  ;;  %4807 = vmax.xlane.f32.xlu1 %v4806_v16 }
 0xe1a   :  { %v4343_v46 = vpop.xlane.xlu2 %4342 }
 0xe1b   :  { %7503 = vrcp.f32 %v4343_v46  ;;  %7039 = vrot.lane.b32.xlu0 %v10519_v26, %s7723_s24 }
 0xe1d   :  { %v10741_v36 = vpop.f32.mrf.mxu3 }
 0xe1e   :  { %v4809_v53 = vsel %vm1033_vm9, %v10741_v36, -inf }
 0xe21   :  { %v7504_v23 = vpop.eup %7503 }
 0xe22   :  { %v4868_v49 = vpop.xlane.xlu2 %4867  ;;  %v4375_v34 = vmul.f32 %v7504_v23, %v10652_v12 }
 0xe23   :  { %7505 = vrcp.f32 %v4868_v49 }
 0xe24   :  { %6753 = vmatmul.msk.f32.gmra.mxu2 %vm1033_vm9, %v4375_v34  ;;  %7507 = vrcp.f32 %v4871_v6 }
 0xe25   :  { %7509 = vrcp.f32 %v4874_v19  ;;  %v10754_v3 = vpop.f32.mrf.mxu3 }
 0xe26   :  { %v4812_v56 = vsel %vm1033_vm9, %v10754_v3, -inf }
 0xe29   :  { %v7506_v7 = vpop.eup %7505 }
 0xe2a   :  { %v4928_v38 = vmul.f32 %v7506_v7, %v10659_v52  ;;  %v7508_v27 = vpop.eup %7507  ;;  %v4877_v29 = vpop.xlane.xlu2 %4876 }
 0xe2b   :  { %v4929_v12 = vmul.f32 %v7508_v27, %v10584_v41  ;;  %v7510_v52 = vpop.eup %7509  ;;  %7511 = vrcp.f32 %v4877_v29 }
 0xe2c   :  { %6789 = vmatmul.msk.f32.gmra.mxu1 %vm1033_vm9, %v4928_v38  ;;  %v4930_v22 = vmul.f32 %v7510_v52, %v10612_v59 }
 0xe30   :  { %v4530_v8 = vpop.f32.mrf.mxu2  ;;  %7034 = vrot.lane.b32.xlu1 %v10513_v62, %s7723_s24  ;;  %v4880_v62 = vpop.xlane.xlu0 %4879 }
 0xe31   :  { %6830 = vmatmul.msk.f32.gmra.mxu3 %vm862_vm8, %v4530_v8  ;;  %v7512_v11 = vpop.eup %7511  ;;  %7513 = vrcp.f32 %v4880_v62  ;;  %v5302_v62 = vpop.f32.mrf.mxu3 }
 0xe32   :  { %v5008_v26 = vpop.f32.mrf.mxu1  ;;  %v4931_v41 = vmul.f32 %v7512_v11, %v10666_v13 }
 0xe33   :  { %6806 = vmatmul.msk.f32.vlgmr.msrb.gmra.mxu0 %vm862_vm8, %v5008_v26 }
 0xe34   :  { %6790 = vmatmul.msk.f32.gmra.mxu1 %vm1033_vm9, %v4929_v12 }
 0xe37   :  { %v7514_v59 = vpop.eup %7513 }
 0xe38   :  { %v4533_v2 = vpop.f32.mrf.mxu2  ;;  %v4883_v58 = vpop.xlane.xlu0 %4882  ;;  %v4932_v30 = vmul.f32 %v7514_v59, %v10618_v33 }
 0xe39   :  { %6831 = vmatmul.msk.f32.gmra.mxu3 %vm862_vm8, %v4533_v2  ;;  %7515 = vrcp.f32 %v4883_v58 }
 0xe3c   :  { %6791 = vmatmul.msk.f32.gmra.mxu1 %vm1033_vm9, %v4930_v22 }
 0xe3f   :  { %v7516_v10 = vpop.eup %7515 }
 0xe40   :  { %v4536_v18 = vpop.f32.mrf.mxu2  ;;  %v4933_v13 = vmul.f32 %v7516_v10, %v10639_v37 }
 0xe41   :  { %6832 = vmatmul.msk.f32.gmra.mxu3 %vm862_vm8, %v4536_v18 }
 0xe44   :  { %6792 = vmatmul.msk.f32.gmra.mxu1 %vm1033_vm9, %v4931_v41 }
 0xe45   :  { %4810 = vmax.xlane.f32.xlu0 %v4809_v53 }
 0xe48   :  { %v4539_v32 = vpop.f32.mrf.mxu2 }
 0xe49   :  { %6833 = vmatmul.msk.f32.gmra.mxu3 %vm862_vm8, %v4539_v32 }
 0xe4c   :  { %6793 = vmatmul.msk.f32.gmra.mxu1 %vm1033_vm9, %v4932_v30 }
 0xe50   :  { %v4542_v5 = vpop.f32.mrf.mxu2 }
 0xe51   :  { %6834 = vmatmul.msk.f32.gmra.mxu3 %vm862_vm8, %v4542_v5 }
 0xe54   :  { %6794 = vmatmul.msk.f32.gmra.mxu1 %vm1033_vm9, %v4933_v13 }
 0xe59   :  { %7049 = vrot.lane.b32.xlu0 %v10554_v17, %s7723_s24 }
 0xe5a   :  { %4813 = vmax.xlane.f32.xlu1 %v4812_v56 }
 0xe61   :  { %v4545_v33 = vpop.f32.mrf.mxu2 }
 0xe62   :  { %6835 = vmatmul.msk.f32.gmra.mxu3 %vm862_vm8, %v4545_v33  ;;  %v4793_v61 = vpop.xlane.xlu0 %4792 }
 0xe63   :  { %v4823_v9 = vsub.f32 %v10690_v28, %v4793_v61 }
 0xe65   :  { %v4847_v40 = vmul.f32 1.442695, %v4823_v9 }
 0xe67   :  { %7517 = vpow2.f32 %v4847_v40 }
 0xe69   :  { %v4548_v37 = vpop.f32.mrf.mxu2 }
 0xe6a   :  { %6836 = vmatmul.msk.f32.gmra.mxu3 %vm862_vm8, %v4548_v37  ;;  %v4796_v63 = vpop.xlane.xlu2 %4795 }
 0xe6b   :  { %v4824_v31 = vsub.f32 %v10694_v43, %v4796_v63 }
 0xe6d   :  { %v10763_v57 = vpop.eup %7517  ;;  %v4849_v51 = vmul.f32 1.442695, %v4824_v31 }
 0xe6e   :  { %v4887_v17 = vsel %vm1033_vm9, %v10763_v57, 0.0 }
 0xe6f   :  { %4888 = vadd.xlane.f32.xlu2 %v4887_v17  ;;  %7519 = vpow2.f32 %v4849_v51 }
 0xe72   :  { %v4799_v14 = vpop.xlane.xlu2 %4798 }
 0xe75   :  { %v10769_v24 = vpop.eup %7519 }
 0xe76   :  { %v4890_v54 = vsel %vm1033_vm9, %v10769_v24, 0.0 }
 0xe7a   :  { %v4802_v15 = vpop.xlane.xlu0 %4801 }
 0xe7b   :  { %v4826_v28 = vsub.f32 %v10704_v35, %v4802_v15 }
 0xe7d   :  { %v4853_v0 = vmul.f32 1.442695, %v4826_v28 }
 0xe7f   :  { %7521 = vpow2.f32 %v4853_v0 }
 0xe82   :  { %v4805_v25 = vpop.xlane.xlu2 %4804 }
 0xe83   :  { %v4827_v1 = vsub.f32 %v10708_v39, %v4805_v25  ;;  %4891 = vadd.xlane.f32.xlu0 %v4890_v54 }
 0xe85   :  { %v10774_v47 = vpop.eup %7521  ;;  %v4855_v43 = vmul.f32 1.442695, %v4827_v1 }
 0xe86   :  { %v4896_v48 = vsel %vm1033_vm9, %v10774_v47, 0.0 }
 0xe87   :  { %7523 = vpow2.f32 %v4855_v43  ;;  %7044 = vrot.lane.b32.xlu2 %v10527_v50, %s7723_s24  ;;  %4897 = vadd.xlane.f32.xlu1 %v4896_v48 }
 0xe8a   :  { %v4886_v35 = vpop.xlane.xlu2 %4885  ;;  %v4808_v16 = vpop.xlane.xlu1 %4807 }
 0xe8b   :  { %7525 = vrcp.f32 %v4886_v35  ;;  %v4828_v46 = vsub.f32 %v10720_v55, %v4808_v16  ;;  %v4825_v55 = vsub.f32 %v10698_v4, %v4799_v14  ;;  %v10799_v4 = vld [vmem:[%s11407_s6 + $0x1] ss:$0 sm:$0xff]  ;;  %v5305_v35 = vpop.f32.mrf.mxu3 }
 0xe8d   :  { %v10781_v23 = vpop.eup %7523  ;;  %v4857_v39 = vmul.f32 1.442695, %v4828_v46  ;;  %v4851_v38 = vmul.f32 1.442695, %v4825_v55  ;;  %v7040_v8 = vpop.permute.xlu0 %7039 }
 0xe8e   :  { %v4899_v49 = vsel %vm1033_vm9, %v10781_v23, 0.0  ;;  %v7041_v12 = vunpack.i.l.bf16 %v7040_v8 }
 0xe8f   :  { %7527 = vpow2.f32 %v4857_v39  ;;  %4900 = vadd.xlane.f32.xlu1 %v4899_v49 }
 0xe90   :  { %7529 = vpow2.f32 %v4851_v38 }
 0xe91   :  { %v7526_v34 = vpop.eup %7525 }
 0xe92   :  { %v4934_v6 = vmul.f32 %v7526_v34, %v10718_v21  ;;  %v7042_v21 = vunpack.i.h.bf16 %v7040_v8 }
 0xe94   :  { %6795 = vmatmul.msk.f32.gmra.mxu1 %vm1033_vm9, %v4934_v6 }
 0xe95   :  { %v10787_v50 = vpop.eup %7527 }
 0xe96   :  { %v4902_v7 = vsel %vm1033_vm9, %v10787_v50, 0.0  ;;  %v10794_v2 = vpop.eup %7529 }
 0xe97   :  { %4903 = vadd.xlane.f32.xlu0 %v4902_v7  ;;  %v4893_v22 = vsel %vm1033_vm9, %v10794_v2, 0.0 }
 0xea2   :  { %v7035_v19 = vpop.permute.xlu1 %7034 }
 0xea3   :  { %v7036_v27 = vunpack.i.l.bf16 %v7035_v19  ;;  %v7037_v26 = vunpack.i.h.bf16 %v7035_v19 }
 0xea5   :  { %5088 = vmatpush.msrb.mxu2 %v7036_v27 }
 0xea7   :  { %v4551_v29 = vpop.f32.mrf.mxu2  ;;  %5089 = vmatpush.msrb.mxu2 %v7037_v26 }
 0xea8   :  { %6837 = vmatmul.msk.f32.gmra.mxu3 %vm862_vm8, %v4551_v29 }
 0xea9   :  { %v5011_v52 = vpop.f32.mrf.mxu1  ;;  %5090 = vmatpush.msrb.mxu2 %v7041_v12 }
 0xeaa   :  { %6807 = vmatmul.msk.f32.gmra.mxu0 %vm862_vm8, %v5011_v52 }
 0xeab   :  { %5091 = vmatpush.msrb.mxu2 %v7042_v21 }
 0xeb0   :  { %v5189_v11 = vpop.f32.mrf.mxu0  ;;  %4894 = vadd.xlane.f32.xlu2 %v4893_v22 }
 0xeb1   :  { %v5014_v18 = vpop.f32.mrf.mxu1  ;;  %v5303_v41 = vadd.f32 %v5302_v62, %v5189_v11 }
 0xeb2   :  { %6808 = vmatmul.msk.f32.gmra.mxu0 %vm862_vm8, %v5014_v18 }
 0xeb3   :  { %v5355_v53 = vadd.f32 %v10799_v4, %v5303_v41 }
 0xeb5   :  { %v10806_v58 = vadd.f32 %v5355_v53, %v9116_v45 }
 0xeb7   :  { %v5391_v59 = vsel %vm63_vm0, %v10806_v58, 0.0 }
 0xeb8   :  { %v4811_v32 = vpop.xlane.xlu0 %4810  ;;  %5392 = vadd.xlane.f32.xlu0 %v5391_v59 }
 0xeb9   :  { %v5017_v30 = vpop.f32.mrf.mxu1  ;;  %v4829_v10 = vsub.f32 %v10741_v36, %v4811_v32 }
 0xeba   :  { %6809 = vmatmul.msk.f32.gmra.mxu0 %vm862_vm8, %v5017_v30 }
 0xebb   :  { %v4859_v5 = vmul.f32 1.442695, %v4829_v10 }
 0xebd   :  { %7531 = vpow2.f32 %v4859_v5 }
 0xec1   :  { %v5020_v13 = vpop.f32.mrf.mxu1 }
 0xec2   :  { %6810 = vmatmul.msk.f32.gmra.mxu0 %vm862_vm8, %v5020_v13 }
 0xec3   :  { %v10813_v56 = vpop.eup %7531 }
 0xec4   :  { %v4905_v45 = vsel %vm1033_vm9, %v10813_v56, 0.0 }
 0xec5   :  { %4906 = vadd.xlane.f32.xlu1 %v4905_v45 }
 0xec9   :  { %v5023_v33 = vpop.f32.mrf.mxu1 }
 0xeca   :  { %6811 = vmatmul.msk.f32.gmra.mxu0 %vm862_vm8, %v5023_v33  ;;  %v11489_v33 = vld [vmem:[#allocation5_spill] sm:$0xff] }
 0xecb   :  { %v7050_v14 = vpop.permute.xlu0 %7049 }
 0xecc   :  { %v7052_v0 = vunpack.i.h.bf16 %v7050_v14 }
 0xecd   :  { %v4814_v61 = vpop.xlane.xlu1 %4813 }
 0xece   :  { %v4830_v9 = vsub.f32 %v10754_v3, %v4814_v61  ;;  %v7051_v3 = vunpack.i.l.bf16 %v7050_v14  ;;  %v11490_v14 = vld [vmem:[#allocation6_spill] sm:$0xff] }
 0xed0   :  { %v4861_v36 = vmul.f32 1.442695, %v4830_v9 }
 0xed1   :  { %v5026_v40 = vpop.f32.mrf.mxu1 }
 0xed2   :  { %7533 = vpow2.f32 %v4861_v36  ;;  %6812 = vmatmul.msk.f32.gmra.mxu0 %vm862_vm8, %v5026_v40 }
 0xed8   :  { %v10820_v37 = vpop.eup %7533 }
 0xed9   :  { %v4908_v63 = vsel %vm1033_vm9, %v10820_v37, 0.0 }
 0xeda   :  { %4909 = vadd.xlane.f32.xlu2 %v4908_v63 }
 0xee2   :  { %v4889_v17 = vpop.xlane.xlu2 %4888 }
 0xee3   :  { %7535 = vrcp.f32 %v4889_v17 }
 0xee9   :  { %v7536_v28 = vpop.eup %7535 }
 0xeea   :  { %v7045_v31 = vpop.permute.xlu2 %7044  ;;  %v4935_v25 = vmul.f32 %v7536_v28, %v10763_v57  ;;  %v5308_v57 = vpop.f32.mrf.mxu3 }
 0xeeb   :  { %v7046_v51 = vunpack.i.l.bf16 %v7045_v31  ;;  %v7047_v15 = vunpack.i.h.bf16 %v7045_v31 }
 0xeed   :  { %5092 = vmatpush.msrb.mxu2 %v7046_v51 }
 0xeef   :  { %5093 = vmatpush.msrb.mxu2 %v7047_v15 }
 0xef1   :  { %5094 = vmatpush.msrb.mxu2 %v7051_v3 }
 0xef2   :  { %v5311_v29 = vpop.f32.mrf.mxu3 }
 0xef3   :  { %5095 = vmatpush.msrb.mxu2 %v7052_v0 }
 0xef4   :  { %6796 = vmatmul.msk.f32.vlgmr.msrb.gmra.mxu2 %vm1033_vm9, %v4935_v25 }
 0xef6   :  { %v4892_v54 = vpop.xlane.xlu0 %4891 }
 0xef7   :  { %7537 = vrcp.f32 %v4892_v54 }
 0xefa   :  { %v4898_v46 = vpop.xlane.xlu1 %4897  ;;  %v5314_v53 = vpop.f32.mrf.mxu3 }
 0xefd   :  { %v7538_v1 = vpop.eup %7537 }
 0xefe   :  { %v4936_v43 = vmul.f32 %v7538_v1, %v10769_v24 }
 0xf00   :  { %6797 = vmatmul.msk.f32.gmra.mxu2 %vm1033_vm9, %v4936_v43 }
 0xf02   :  { %v4901_v55 = vpop.xlane.xlu1 %4900  ;;  %v5317_v40 = vpop.f32.mrf.mxu3 }
 0xf0a   :  { %v4904_v19 = vpop.xlane.xlu0 %4903  ;;  %v5320_v0 = vpop.f32.mrf.mxu3 }
 0xf11   :  { %v5029_v48 = vpop.f32.mrf.mxu1 }
 0xf12   :  { %6813 = vmatmul.msk.f32.gmra.mxu0 %vm862_vm8, %v5029_v48  ;;  %v11491_v48 = vld [vmem:[#allocation7_spill] sm:$0xff] }
 0xf23   :  { %v4895_v16 = vpop.xlane.xlu2 %4894 }
 0xf24   :  { %7539 = vrcp.f32 %v4895_v16 }
 0xf25   :  { %7541 = vrcp.f32 %v4898_v46 }
 0xf26   :  { %7543 = vrcp.f32 %v4901_v55 }
 0xf27   :  { %v5192_v39 = vpop.f32.mrf.mxu0  ;;  %7545 = vrcp.f32 %v4904_v19 }
 0xf28   :  { %v5306_v49 = vadd.f32 %v5305_v35, %v5192_v39 }
 0xf2a   :  { %v7540_v34 = vpop.eup %7539  ;;  %v5356_v6 = vadd.f32 %v10799_v4, %v5306_v49  ;;  %v5323_v49 = vpop.f32.mrf.mxu3 }
 0xf2b   :  { %v4937_v7 = vmul.f32 %v7540_v34, %v10794_v2  ;;  %v7542_v8 = vpop.eup %7541  ;;  %v5393_v2 = vpop.xlane.xlu0 %5392 }
 0xf2c   :  { %v10832_v24 = vadd.f32 %v5356_v6, %v9111_v60  ;;  %v4938_v21 = vmul.f32 %v7542_v8, %v10774_v47  ;;  %v7544_v62 = vpop.eup %7543  ;;  %v5439_v18 = vmul.f32 %v5393_v2, %v7826_v20 }
 0xf2d   :  { %6798 = vmatmul.msk.f32.gmra.mxu2 %vm1033_vm9, %v4937_v7  ;;  %v4939_v47 = vmul.f32 %v7544_v62, %v10781_v23  ;;  %v7546_v5 = vpop.eup %7545  ;;  %v11492_v7 = vld [vmem:[#allocation8_spill] sm:$0xff] }
 0xf2e   :  { %v5394_v38 = vsel %vm63_vm0, %v10832_v24, 0.0  ;;  %v10853_v59 = vsub.f32 %v10806_v58, %v5439_v18  ;;  %v4940_v45 = vmul.f32 %v7546_v5, %v10787_v50  ;;  %v6843_v5 = vld [vmem:[%s11410_s9 + $0x30] sm:$0xff] }
 0xf2f   :  { %v5195_v27 = vpop.f32.mrf.mxu0  ;;  %5395 = vadd.xlane.f32.xlu1 %v5394_v38 }
 0xf30   :  { %v5309_v26 = vadd.f32 %v5308_v57, %v5195_v27 }
 0xf32   :  { %v5357_v12 = vadd.f32 %v10799_v4, %v5309_v26 }
 0xf34   :  { %v10840_v60 = vadd.f32 %v5357_v12, %v9128_v44 }
 0xf35   :  { %6799 = vmatmul.msk.f32.gmra.mxu2 %vm1033_vm9, %v4938_v21 }
 0xf36   :  { %v5397_v52 = vsel %vm63_vm0, %v10840_v60, 0.0 }
 0xf37   :  { %v5198_v22 = vpop.f32.mrf.mxu0  ;;  %5398 = vadd.xlane.f32.xlu2 %v5397_v52 }
 0xf38   :  { %v5312_v11 = vadd.f32 %v5311_v29, %v5198_v22  ;;  %v4907_v30 = vpop.xlane.xlu1 %4906 }
 0xf39   :  { %7547 = vrcp.f32 %v4907_v30 }
 0xf3a   :  { %v5358_v41 = vadd.f32 %v10799_v4, %v5312_v11 }
 0xf3c   :  { %v10849_v44 = vadd.f32 %v5358_v41, %v9140_v42  ;;  %v5471_v42 = vmul.f32 %v10853_v59, %v10853_v59 }
 0xf3d   :  { %6800 = vmatmul.msk.f32.gmra.mxu2 %vm1033_vm9, %v4939_v47 }
 0xf3e   :  { %v5400_v32 = vsel %vm63_vm0, %v10849_v44, 0.0  ;;  %v5487_v9 = vsel %vm63_vm0, %v5471_v42, 0.0  ;;  %v6841_v42 = vld [vmem:[%s11410_s9 + $0x20] sm:$0xff] }
 0xf3f   :  { %v5201_v10 = vpop.f32.mrf.mxu0  ;;  %5401 = vadd.xlane.f32.xlu0 %v5400_v32  ;;  %v7548_v17 = vpop.eup %7547 }
 0xf40   :  { %v5315_v13 = vadd.f32 %v5314_v53, %v5201_v10  ;;  %v4941_v50 = vmul.f32 %v7548_v17, %v10813_v56  ;;  %v6844_v10 = vld [vmem:[%s11410_s9 + $0x38] sm:$0xff] }
 0xf41   :  { %6107 = vmatpush.msrb.mxu1 %v6844_v10 }
 0xf42   :  { %v5359_v23 = vadd.f32 %v10799_v4, %v5315_v13 }
 0xf43   :  { %6108 = vmatpush.msrb.mxu1 %v6843_v5  ;;  %v11494_v5 = vld [vmem:[#allocation10_spill] sm:$0xff] }
 0xf44   :  { %v10862_v61 = vadd.f32 %v5359_v23, %v11489_v33  ;;  %v6842_v23 = vld [vmem:[%s11410_s9 + $0x28] sm:$0xff]  ;;  %s7727_s9 = smov 8  }
 0xf45   :  { %6801 = vmatmul.msk.f32.gmra.mxu2 %vm1033_vm9, %v4940_v45  ;;  %6109 = vmatpush.msrb.mxu1 %v6842_v23 }
 0xf46   :  { %v5403_v36 = vsel %vm63_vm0, %v10862_v61, 0.0 }
 0xf47   :  { %v5204_v63 = vpop.f32.mrf.mxu0  ;;  %5488 = vadd.xlane.f32.xlu0 %v5487_v9  ;;  %5404 = vadd.xlane.f32.xlu1 %v5403_v36 }
 0xf48   :  { %v5318_v31 = vadd.f32 %v5317_v40, %v5204_v63  ;;  %6110 = vmatpush.msrb.mxu1 %v6841_v42 }
 0xf4a   :  { %v5360_v51 = vadd.f32 %v10799_v4, %v5318_v31 }
 0xf4c   :  { %v10871_v15 = vadd.f32 %v5360_v51, %v11490_v14 }
 0xf4d   :  { %v4910_v28 = vpop.xlane.xlu2 %4909  ;;  %6802 = vmatmul.msk.f32.gmra.mxu2 %vm1033_vm9, %v4941_v50 }
 0xf4e   :  { %7549 = vrcp.f32 %v4910_v28  ;;  %v5406_v3 = vsel %vm63_vm0, %v10871_v15, 0.0 }
 0xf4f   :  { %v5207_v25 = vpop.f32.mrf.mxu0  ;;  %5407 = vadd.xlane.f32.xlu2 %v5406_v3 }
 0xf50   :  { %v5321_v54 = vadd.f32 %v5320_v0, %v5207_v25 }
 0xf52   :  { %v5361_v1 = vadd.f32 %v10799_v4, %v5321_v54 }
 0xf54   :  { %v7550_v43 = vpop.eup %7549  ;;  %v10878_v35 = vadd.f32 %v5361_v1, %v11491_v48 }
 0xf55   :  { %v4942_v56 = vmul.f32 %v7550_v43, %v10820_v37 }
 0xf56   :  { %v5409_v16 = vsel %vm63_vm0, %v10878_v35, 0.0 }
 0xf57   :  { %5410 = vadd.xlane.f32.xlu1 %v5409_v16  ;;  %6803 = vmatmul.msk.f32.gmra.mxu2 %vm1033_vm9, %v4942_v56 }
 0xf77   :  { %v5097_v46 = vpop.f32.mrf.mxu2 }
 0xf78   :  { %6814 = vmatmul.msk.f32.gmra.mxu0 %vm862_vm8, %v5097_v46 }
 0xf83   :  { %v5100_v39 = vpop.f32.mrf.mxu2 }
 0xf84   :  { %6815 = vmatmul.msk.f32.gmra.mxu0 %vm862_vm8, %v5100_v39 }
 0xf8f   :  { %v5210_v57 = vpop.f32.mrf.mxu0 }
 0xf90   :  { %v5324_v34 = vadd.f32 %v5323_v49, %v5210_v57  ;;  %v10935_v49 = vld [vmem:[%s11408_s7 + $0x1] ss:$0 sm:$0xff] }
 0xf92   :  { %v5362_v6 = vadd.f32 %v10799_v4, %v5324_v34 }
 0xf94   :  { %v10888_v55 = vadd.f32 %v5362_v6, %v11492_v7  ;;  %v10941_v6 = vld [vmem:[%s11409_s8 + $0x1] ss:$0 sm:$0xff] }
 0xf96   :  { %v5412_v37 = vsel %vm63_vm0, %v10888_v55, 0.0 }
 0xf97   :  { %5413 = vadd.xlane.f32.xlu0 %v5412_v37 }
 0xfa2   :  { %v5396_v38 = vpop.xlane.xlu1 %5395 }
 0xfa3   :  { %v5440_v19 = vmul.f32 %v5396_v38, %v7826_v20  ;;  %v5326_v38 = vpop.f32.mrf.mxu3 }
 0xfa5   :  { %v10894_v27 = vsub.f32 %v10832_v24, %v5440_v19 }
 0xfa7   :  { %v5472_v8 = vmul.f32 %v10894_v27, %v10894_v27 }
 0xfa9   :  { %v5490_v26 = vsel %vm63_vm0, %v5472_v8, 0.0 }
 0xfaa   :  { %v5399_v12 = vpop.xlane.xlu2 %5398  ;;  %5491 = vadd.xlane.f32.xlu2 %v5490_v26 }
 0xfab   :  { %v5441_v29 = vmul.f32 %v5399_v12, %v7826_v20 }
 0xfad   :  { %v10901_v21 = vsub.f32 %v10840_v60, %v5441_v29 }
 0xfaf   :  { %v5473_v52 = vmul.f32 %v10901_v21, %v10901_v21 }
 0xfb0   :  { %v5103_v2 = vpop.f32.mrf.mxu2 }
 0xfb1   :  { %6816 = vmatmul.msk.f32.gmra.mxu0 %vm862_vm8, %v5103_v2  ;;  %v5493_v22 = vsel %vm63_vm0, %v5473_v52, 0.0 }
 0xfb2   :  { %v5402_v62 = vpop.xlane.xlu0 %5401  ;;  %5494 = vadd.xlane.f32.xlu1 %v5493_v22 }
 0xfb3   :  { %v5442_v11 = vmul.f32 %v5402_v62, %v7826_v20  ;;  %v5329_v62 = vpop.f32.mrf.mxu3 }
 0xfb5   :  { %v10909_v18 = vsub.f32 %v10849_v44, %v5442_v11 }
 0xfb7   :  { %v5474_v41 = vmul.f32 %v10909_v18, %v10909_v18 }
 0xfb8   :  { %v5106_v47 = vpop.f32.mrf.mxu2 }
 0xfb9   :  { %v5496_v53 = vsel %vm63_vm0, %v5474_v41, 0.0  ;;  %6817 = vmatmul.msk.f32.gmra.mxu0 %vm862_vm8, %v5106_v47 }
 0xfba   :  { %5497 = vadd.xlane.f32.xlu0 %v5496_v53  ;;  %v5489_v32 = vpop.xlane.xlu0 %5488  ;;  %v5405_v19 = vpop.xlane.xlu1 %5404 }
 0xfbb   :  { %v5535_v30 = vmul.f32 %v5489_v32, %v7826_v20  ;;  %v5443_v12 = vmul.f32 %v5405_v19, %v7826_v20 }
 0xfbd   :  { %v5551_v13 = vadd.f32 1e-06, %v5535_v30  ;;  %v10952_v2 = vsub.f32 %v10862_v61, %v5443_v12 }
 0xfbf   :  { %7551 = vrsqrt.f32 %v5551_v13  ;;  %vm5574_vm5 = vcmp.eq.f32.partialorder %v5551_v13, inf  ;;  %v5577_v14 = vand.u32 2147483648, %v5551_v13  ;;  %vm5576_vm6 = vcmp.eq.f32.partialorder %v5551_v13, 0.0 }
 0xfc0   :  { %v5109_v45 = vpop.f32.mrf.mxu2  ;;  %v5475_v11 = vmul.f32 %v10952_v2, %v10952_v2 }
 0xfc1   :  { %6818 = vmatmul.msk.f32.gmra.mxu0 %vm862_vm8, %v5109_v45 }
 0xfc2   :  { %v5408_v41 = vpop.xlane.xlu2 %5407  ;;  %v5499_v10 = vsel %vm63_vm0, %v5475_v11, 0.0 }
 0xfc3   :  { %v5444_v32 = vmul.f32 %v5408_v41, %v7826_v20 }
 0xfc5   :  { %v7552_v33 = vpop.eup %7551  ;;  %v10965_v23 = vsub.f32 %v10871_v15, %v5444_v32 }
 0xfc6   :  { %v5568_v9 = vmul.f32 %v7552_v33, %v5551_v13 }
 0xfc7   :  { %v5476_v45 = vmul.f32 %v10965_v23, %v10965_v23 }
 0xfc8   :  { %v5569_v36 = vmul.f32 %v7552_v33, %v5568_v9  ;;  %v5112_v40 = vpop.f32.mrf.mxu2 }
 0xfc9   :  { %6819 = vmatmul.msk.f32.gmra.mxu0 %vm862_vm8, %v5112_v40 }
 0xfca   :  { %v5570_v63 = vmul.f32 0.5, %v5569_v36  ;;  %v5411_v9 = vpop.xlane.xlu1 %5410 }
 0xfcc   :  { %v5571_v17 = vsub.f32 1.5, %v5570_v63 }
 0xfce   :  { %v5572_v31 = vmul.f32 %v7552_v33, %v5571_v17  ;;  %v5502_v33 = vsel %vm63_vm0, %v5476_v45, 0.0 }
 0xfd0   :  { %v5573_v51 = vmul.f32 %v5572_v31, %v5551_v13  ;;  %v5115_v50 = vpop.f32.mrf.mxu2 }
 0xfd1   :  { %6820 = vmatmul.msk.f32.gmra.mxu0 %vm862_vm8, %v5115_v50 }
 0xfd2   :  { %v5575_v28 = vsel %vm5574_vm5, %v5551_v13, %v5573_v51 }
 0xfd3   :  { %v5578_v3 = vsel %vm5576_vm6, %v5577_v14, %v5575_v28  ;;  %v5332_v14 = vpop.f32.mrf.mxu3 }
 0xfd4   :  { %7553 = vrcp.f32 %v5578_v3  ;;  %v5770_v43 = vand.u32 2147483648, %v5578_v3  ;;  %v5768_v56 = vand.u32 2147483647, %v5578_v3  ;;  %vm5764_vm10 = vweird.f32 %v5578_v3 }
 0xfd6   :  { %v5771_v46 = vor.u32 1.1754944e-38, %v5770_v43  ;;  %vm5769_vm12 = vcmp.eq.f32.partialorder %v5768_v56, 8.507059e+37 }
 0xfda   :  { %v7554_v0 = vpop.eup %7553  ;;  %v5118_v25 = vpop.f32.mrf.mxu2 }
 0xfdb   :  { %6821 = vmatmul.msk.f32.gmra.mxu0 %vm862_vm8, %v5118_v25  ;;  %v5760_v54 = vmul.f32 %v7554_v0, %v5578_v3  ;;  %vm5765_vm7 = vweird.f32 %v7554_v0 }
 0xfdc   :  { %vm5766_vm11 = vmor %vm5764_vm10, %vm5765_vm7 }
 0xfdd   :  { %v5761_v1 = vsub.f32 1.0, %v5760_v54 }
 0xfdf   :  { %v5762_v48 = vmul.f32 %v7554_v0, %v5761_v1 }
 0xfe1   :  { %v5763_v16 = vadd.f32 %v7554_v0, %v5762_v48 }
 0xfe3   :  { %v5767_v39 = vsel %vm5766_vm11, %v7554_v0, %v5763_v16 }
 0xfe4   :  { %v5772_v57 = vsel %vm5769_vm12, %v5771_v46, %v5767_v39  ;;  %v5445_v46 = vmul.f32 %v5411_v9, %v7826_v20 }
 0xfe5   :  { %v5773_v34 = vmul.f32 %v5772_v57, %v10853_v59  ;;  %v11493_v59 = vld [vmem:[#allocation9_spill] sm:$0xff] }
 0xfe6   :  { %v10984_v12 = vsub.f32 %v10878_v35, %v5445_v46 }
 0xfe7   :  { %v6002_v7 = vmul.f32 %v10935_v49, %v5773_v34 }
 0xfe9   :  { %v6021_v37 = vadd.f32 %v10941_v6, %v6002_v7 }
 0xfeb   :  { %6846 = vmatmul.msk.f32.vlgmr.msrb.gmra.mxu1 %vm63_vm0, %v6021_v37  ;;  %v5335_v37 = vpop.f32.mrf.mxu3 }
 0xff5   :  { %v5213_v8 = vpop.f32.mrf.mxu0 }
 0xff6   :  { %v5327_v26 = vadd.f32 %v5326_v38, %v5213_v8  ;;  %v11495_v8 = vld [vmem:[#allocation11_spill] sm:$0xff] }
 0xff8   :  { %v5363_v29 = vadd.f32 %v10799_v4, %v5327_v26 }
 0xffa   :  { %v10949_v52 = vadd.f32 %v5363_v29, %v11493_v59 }
 0xffc   :  { %v5415_v22 = vsel %vm63_vm0, %v10949_v52, 0.0 }
 0xffd   :  { %5416 = vadd.xlane.f32.xlu2 %v5415_v22 }
0x1001   :  { %v5216_v47 = vpop.f32.mrf.mxu0 }
0x1002   :  { %v5330_v53 = vadd.f32 %v5329_v62, %v5216_v47 }
0x1004   :  { %v5364_v30 = vadd.f32 %v10799_v4, %v5330_v53 }
0x1005   :  { %5500 = vadd.xlane.f32.xlu2 %v5499_v10  ;;  %v5477_v10 = vmul.f32 %v10984_v12, %v10984_v12 }
0x1006   :  { %v10962_v13 = vadd.f32 %v5364_v30, %v11494_v5 }
0x1008   :  { %v5418_v42 = vsel %vm63_vm0, %v10962_v13, 0.0 }
0x1009   :  { %5419 = vadd.xlane.f32.xlu1 %v5418_v42 }
0x100a   :  { %v5414_v17 = vpop.xlane.xlu0 %5413 }
0x100b   :  { %v5446_v47 = vmul.f32 %v5414_v17, %v7826_v20  ;;  %v5338_v17 = vpop.f32.mrf.mxu3 }
0x1011   :  { %5503 = vadd.xlane.f32.xlu1 %v5502_v33  ;;  %v10997_v33 = vsub.f32 %v10888_v55, %v5446_v47 }
0x101d   :  { %v5492_v36 = vpop.xlane.xlu2 %5491 }
0x101e   :  { %v5536_v40 = vmul.f32 %v5492_v36, %v7826_v20 }
0x1020   :  { %v5552_v63 = vadd.f32 1e-06, %v5536_v40  ;;  %v11496_v40 = vld [vmem:[#allocation12_spill] sm:$0xff] }
0x1022   :  { %7555 = vrsqrt.f32 %v5552_v63  ;;  %vm5586_vm8 = vcmp.eq.f32.partialorder %v5552_v63, inf  ;;  %v5589_v29 = vand.u32 2147483648, %v5552_v63  ;;  %vm5588_vm13 = vcmp.eq.f32.partialorder %v5552_v63, 0.0 }
0x1025   :  { %v5495_v31 = vpop.xlane.xlu1 %5494 }
0x1026   :  { %v5537_v51 = vmul.f32 %v5495_v31, %v7826_v20 }
0x1028   :  { %v7556_v50 = vpop.eup %7555  ;;  %v5553_v28 = vadd.f32 1e-06, %v5537_v51  ;;  %v5505_v51 = vsel %vm63_vm0, %v5477_v10, 0.0 }
0x1029   :  { %v5580_v3 = vmul.f32 %v7556_v50, %v5552_v63 }
0x102a   :  { %7557 = vrsqrt.f32 %v5553_v28  ;;  %vm5598_vm14 = vcmp.eq.f32.partialorder %v5553_v28, inf  ;;  %v5601_v31 = vand.u32 2147483648, %v5553_v28  ;;  %vm5600_vm15 = vcmp.eq.f32.partialorder %v5553_v28, 0.0 }
0x102b   :  { %v5581_v0 = vmul.f32 %v7556_v50, %v5580_v3 }
0x102d   :  { %v5582_v25 = vmul.f32 0.5, %v5581_v0  ;;  %v5498_v54 = vpop.xlane.xlu0 %5497 }
0x102e   :  { %v5538_v1 = vmul.f32 %v5498_v54, %v7826_v20  ;;  %v5219_v43 = vpop.f32.mrf.mxu0 }
0x102f   :  { %v5583_v48 = vsub.f32 1.5, %v5582_v25  ;;  %v5333_v56 = vadd.f32 %v5332_v14, %v5219_v43  ;;  %v6877_v43 = vld [vmem:[%s11412_s11 + $0xf8] sm:$0xff] }
0x1030   :  { %v7558_v16 = vpop.eup %7557  ;;  %v10976_v39 = vadd.f32 1e-06, %v5538_v1  ;;  %6326 = vmatpush.msra.mxu2 %v6877_v43 }
0x1031   :  { %v5584_v57 = vmul.f32 %v7556_v50, %v5583_v48  ;;  %v5592_v34 = vmul.f32 %v7558_v16, %v5553_v28  ;;  %v5365_v7 = vadd.f32 %v10799_v4, %v5333_v56  ;;  %v6876_v48 = vld [vmem:[%s11412_s11 + $0xf0] sm:$0xff] }
0x1032   :  { %7559 = vrsqrt.f32 %v10976_v39  ;;  %6327 = vmatpush.msra.mxu2 %v6876_v48  ;;  %vm5610_vm2 = vcmp.eq.f32.partialorder %v10976_v39, inf  ;;  %v5613_v47 = vand.u32 2147483648, %v10976_v39  ;;  %vm5612_vm5 = vcmp.eq.f32.partialorder %v10976_v39, 0.0 }
0x1033   :  { %v5585_v38 = vmul.f32 %v5584_v57, %v5552_v63  ;;  %v5593_v19 = vmul.f32 %v7558_v16, %v5592_v34  ;;  %v10981_v26 = vadd.f32 %v5365_v7, %v11495_v8  ;;  %v6875_v57 = vld [vmem:[%s11412_s11 + $0xe8] sm:$0xff]  ;;  %v6874_v8 = vld [vmem:[%s11412_s11 + $0xe0] sm:$0xff] }
0x1034   :  { %6328 = vmatpush.msra.mxu2 %v6875_v57 }
0x1035   :  { %v5594_v59 = vmul.f32 0.5, %v5593_v19  ;;  %v5421_v22 = vsel %vm63_vm0, %v10981_v26, 0.0  ;;  %v5587_v62 = vsel %vm5586_vm8, %v5552_v63, %v5585_v38 }
0x1036   :  { %5422 = vadd.xlane.f32.xlu0 %v5421_v22  ;;  %v5222_v11 = vpop.f32.mrf.mxu0  ;;  %v10988_v41 = vsel %vm5588_vm13, %v5589_v29, %v5587_v62  ;;  %6329 = vmatpush.msra.mxu2 %v6874_v8 }
0x1037   :  { %v5595_v53 = vsub.f32 1.5, %v5594_v59  ;;  %v5336_v32 = vadd.f32 %v5335_v37, %v5222_v11  ;;  %7561 = vrcp.f32 %v10988_v41  ;;  %v5785_v37 = vand.u32 2147483648, %v10988_v41  ;;  %v11497_v59 = vld [vmem:[#allocation13_spill] sm:$0xff]  ;;  %v5341_v11 = vpop.f32.mrf.mxu3 }
0x1038   :  { %v7560_v30 = vpop.eup %7559  ;;  %v5783_v19 = vand.u32 2147483647, %v10988_v41  ;;  %vm5779_vm3 = vweird.f32 %v10988_v41 }
0x1039   :  { %v5596_v5 = vmul.f32 %v7558_v16, %v5595_v53  ;;  %v5604_v42 = vmul.f32 %v7560_v30, %v10976_v39  ;;  %v5366_v45 = vadd.f32 %v10799_v4, %v5336_v32  ;;  %v5786_v10 = vor.u32 1.1754944e-38, %v5785_v37 }
0x103a   :  { %vm5784_vm6 = vcmp.eq.f32.partialorder %v5783_v19, 8.507059e+37 }
0x103b   :  { %v5597_v9 = vmul.f32 %v5596_v5, %v5553_v28  ;;  %v5605_v36 = vmul.f32 %v7560_v30, %v5604_v42  ;;  %v11000_v63 = vadd.f32 %v5366_v45, %v11496_v40 }
0x103d   :  { %v7562_v50 = vpop.eup %7561  ;;  %v5606_v14 = vmul.f32 0.5, %v5605_v36  ;;  %v5424_v3 = vsel %vm63_vm0, %v11000_v63, 0.0  ;;  %v5599_v0 = vsel %vm5598_vm14, %v5553_v28, %v5597_v9  ;;  %v5478_v28 = vmul.f32 %v10997_v33, %v10997_v33 }
0x103e   :  { %v5225_v25 = vpop.f32.mrf.mxu0  ;;  %5425 = vadd.xlane.f32.xlu2 %v5424_v3  ;;  %5506 = vadd.xlane.f32.xlu0 %v5505_v51  ;;  %v5775_v54 = vmul.f32 %v7562_v50, %v10988_v41  ;;  %v11006_v1 = vsel %vm5600_vm15, %v5601_v31, %v5599_v0  ;;  %vm5780_vm1 = vweird.f32 %v7562_v50  ;;  %v11498_v0 = vld [vmem:[#allocation14_spill] sm:$0xff] }
0x103f   :  { %v5607_v56 = vsub.f32 1.5, %v5606_v14  ;;  %v5339_v16 = vadd.f32 %v5338_v17, %v5225_v25  ;;  %7563 = vrcp.f32 %v11006_v1  ;;  %v5508_v62 = vsel %vm63_vm0, %v5478_v28, 0.0  ;;  %vm5781_vm4 = vmor %vm5779_vm3, %vm5780_vm1 }
0x1040   :  { %v5776_v46 = vsub.f32 1.0, %v5775_v54  ;;  %v5800_v14 = vand.u32 2147483648, %v11006_v1  ;;  %vm5794_vm10 = vweird.f32 %v11006_v1 }
0x1041   :  { %v5608_v34 = vmul.f32 %v7560_v30, %v5607_v56  ;;  %v5367_v7 = vadd.f32 %v10799_v4, %v5339_v16  ;;  %v5344_v16 = vpop.f32.mrf.mxu3 }
0x1042   :  { %v5777_v38 = vmul.f32 %v7562_v50, %v5776_v46  ;;  %v5801_v56 = vor.u32 1.1754944e-38, %v5800_v14  ;;  %v6865_v14 = vld [vmem:[%s11412_s11 + $0x98] sm:$0xff] }
0x1043   :  { %v5609_v29 = vmul.f32 %v5608_v34, %v10976_v39  ;;  %v11028_v22 = vadd.f32 %v5367_v7, %v11497_v59 }
0x1044   :  { %v5778_v53 = vadd.f32 %v7562_v50, %v5777_v38 }
0x1045   :  { %v7564_v32 = vpop.eup %7563  ;;  %v5427_v30 = vsel %vm63_vm0, %v11028_v22, 0.0  ;;  %v5611_v5 = vsel %vm5610_vm2, %v10976_v39, %v5609_v29 }
0x1046   :  { %5428 = vadd.xlane.f32.xlu1 %v5427_v30  ;;  %v5228_v42 = vpop.f32.mrf.mxu0  ;;  %5509 = vadd.xlane.f32.xlu2 %v5508_v62  ;;  %v5782_v45 = vsel %vm5781_vm4, %v7562_v50, %v5778_v53  ;;  %v5790_v9 = vmul.f32 %v7564_v32, %v11006_v1  ;;  %v5614_v36 = vsel %vm5612_vm5, %v5613_v47, %v5611_v5  ;;  %vm5795_vm7 = vweird.f32 %v7564_v32  ;;  %v11499_v62 = vld [vmem:[#allocation15_spill] sm:$0xff]  ;;  %v6873_v30 = vld [vmem:[%s11412_s11 + $0xd8] sm:$0xff] }
0x1047   :  { %v5342_v41 = vadd.f32 %v5341_v11, %v5228_v42  ;;  %v5787_v40 = vsel %vm5784_vm6, %v5786_v10, %v5782_v45  ;;  %7565 = vrcp.f32 %v5614_v36  ;;  %v5798_v50 = vand.u32 2147483647, %v11006_v1  ;;  %vm5796_vm11 = vmor %vm5794_vm10, %vm5795_vm7  ;;  %v6872_v5 = vld [vmem:[%s11412_s11 + $0xd0] sm:$0xff]  ;;  %6330 = vmatpush.msra.mxu2 %v6873_v30 }
0x1048   :  { %v5788_v17 = vmul.f32 %v5787_v40, %v10894_v27  ;;  %v5791_v31 = vsub.f32 1.0, %v5790_v9  ;;  %v5815_v19 = vand.u32 2147483648, %v5614_v36  ;;  %v5813_v59 = vand.u32 2147483647, %v5614_v36  ;;  %v6871_v9 = vld [vmem:[%s11412_s11 + $0xc8] sm:$0xff] }
0x1049   :  { %v5368_v51 = vadd.f32 %v10799_v4, %v5342_v41  ;;  %vm5799_vm12 = vcmp.eq.f32.partialorder %v5798_v50, 8.507059e+37  ;;  %vm5809_vm13 = vweird.f32 %v5614_v36  ;;  %6331 = vmatpush.msra.mxu2 %v6872_v5  ;;  %v6870_v41 = vld [vmem:[%s11412_s11 + $0xc0] sm:$0xff] }
0x104a   :  { %v6003_v39 = vmul.f32 %v10935_v49, %v5788_v17  ;;  %v5792_v3 = vmul.f32 %v7564_v32, %v5791_v31  ;;  %vm5814_vm15 = vcmp.eq.f32.partialorder %v5813_v59, 8.507059e+37  ;;  %v6869_v17 = vld [vmem:[%s11412_s11 + $0xb8] sm:$0xff]  ;;  %v6867_v31 = vld [vmem:[%s11412_s11 + $0xa8] sm:$0xff] }
0x104b   :  { %v11045_v25 = vadd.f32 %v5368_v51, %v11498_v0  ;;  %6332 = vmatpush.msra.mxu2 %v6871_v9  ;;  %v6866_v51 = vld [vmem:[%s11412_s11 + $0xa0] sm:$0xff]  ;;  %v6864_v0 = vld [vmem:[%s11412_s11 + $0x90] sm:$0xff] }
0x104c   :  { %v6022_v54 = vadd.f32 %v10941_v6, %v6003_v39  ;;  %v5793_v43 = vadd.f32 %v7564_v32, %v5792_v3  ;;  %v11096_v39 = vld [vmem:[%s11411_s10 + $0x1] ss:$0 sm:$0xff] }
0x104d   :  { %v7566_v27 = vpop.eup %7565  ;;  %v5430_v48 = vsel %vm63_vm0, %v11045_v25, 0.0  ;;  %6333 = vmatpush.msra.mxu2 %v6870_v41 }
0x104e   :  { %6847 = vmatmul.msk.f32.gmra.mxu1 %vm63_vm0, %v6022_v54  ;;  %v5231_v28 = vpop.f32.mrf.mxu0  ;;  %5431 = vadd.xlane.f32.xlu0 %v5430_v48  ;;  %v5797_v46 = vsel %vm5796_vm11, %v7564_v32, %v5793_v43  ;;  %v5805_v57 = vmul.f32 %v7566_v27, %v5614_v36  ;;  %vm5810_vm8 = vweird.f32 %v7566_v27  ;;  %v6863_v43 = vld [vmem:[%s11412_s11 + $0x88] sm:$0xff]  ;;  %v6862_v48 = vld [vmem:[%s11412_s11 + $0x80] sm:$0xff] }
0x104f   :  { %v5345_v34 = vadd.f32 %v5344_v16, %v5231_v28  ;;  %v5802_v7 = vsel %vm5799_vm12, %v5801_v56, %v5797_v46  ;;  %vm5811_vm14 = vmor %vm5809_vm13, %vm5810_vm8  ;;  %6334 = vmatpush.msra.mxu2 %v6869_v17 }
0x1050   :  { %v5803_v37 = vmul.f32 %v5802_v7, %v10901_v21  ;;  %v5806_v38 = vsub.f32 1.0, %v5805_v57  ;;  %v5816_v21 = vor.u32 1.1754944e-38, %v5815_v19 }
0x1051   :  { %v5369_v1 = vadd.f32 %v10799_v4, %v5345_v34  ;;  %v5347_v34 = vpop.f32.mrf.mxu3 }
0x1052   :  { %v6004_v8 = vmul.f32 %v10935_v49, %v5803_v37  ;;  %v5807_v29 = vmul.f32 %v7566_v27, %v5806_v38 }
0x1053   :  { %v11056_v11 = vadd.f32 %v5369_v1, %v11499_v62 }
0x1054   :  { %v6023_v47 = vadd.f32 %v10941_v6, %v6004_v8  ;;  %v5808_v53 = vadd.f32 %v7566_v27, %v5807_v29 }
0x1055   :  { %v5433_v32 = vsel %vm63_vm0, %v11056_v11, 0.0 }
0x1056   :  { %6848 = vmatmul.msk.f32.gmra.mxu1 %vm63_vm0, %v6023_v47  ;;  %5434 = vadd.xlane.f32.xlu2 %v5433_v32  ;;  %v5812_v10 = vsel %vm5811_vm14, %v7566_v27, %v5808_v53  ;;  %v11500_v47 = vld [vmem:[#allocation16_spill] sm:$0xff] }
0x1057   :  { %v5817_v42 = vsel %vm5814_vm15, %v5816_v21, %v5812_v10 }
0x1058   :  { %v5818_v45 = vmul.f32 %v5817_v42, %v10909_v18  ;;  %v6868_v18 = vld [vmem:[%s11412_s11 + $0xb0] sm:$0xff]  ;;  %v5234_v16 = vpop.f32.mrf.mxu0 }
0x1059   :  { %6335 = vmatpush.msra.mxu2 %v6868_v18  ;;  %v5348_v7 = vadd.f32 %v5347_v34, %v5234_v16 }
0x105a   :  { %v6005_v36 = vmul.f32 %v10935_v49, %v5818_v45 }
0x105b   :  { %6336 = vmatpush.msra.mxu2 %v6867_v31  ;;  %v5370_v19 = vadd.f32 %v10799_v4, %v5348_v7 }
0x105c   :  { %v6024_v40 = vadd.f32 %v10941_v6, %v6005_v36 }
0x105d   :  { %6337 = vmatpush.msra.mxu2 %v6866_v51  ;;  %v11118_v53 = vadd.f32 %v5370_v19, %v11500_v47 }
0x105e   :  { %6849 = vmatmul.msk.f32.gmra.mxu1 %vm63_vm0, %v6024_v40 }
0x105f   :  { %6338 = vmatpush.msra.mxu2 %v6865_v14  ;;  %v5436_v45 = vsel %vm63_vm0, %v11118_v53, 0.0 }
0x1061   :  { %6339 = vmatpush.msra.mxu2 %v6864_v0 }
0x1063   :  { %6340 = vmatpush.msra.mxu2 %v6863_v43 }
0x1065   :  { %6341 = vmatpush.msra.mxu2 %v6862_v48 }
0x1068   :  { %v6112_v3 = vpop.f32.mrf.mxu1 }
0x1069   :  { %v6113_v50 = vadd.f32 %v11096_v39, %v6112_v3 }
0x106b   :  { %v6176_v54 = vmul.f32 0.044715, %v6113_v50  ;;  %v6160_v21 = vmul.f32 0.5, %v6113_v50 }
0x106d   :  { %v6192_v27 = vmul.f32 %v6176_v54, %v6113_v50 }
0x106f   :  { %v6208_v56 = vmul.f32 %v6192_v27, %v6113_v50 }
0x1070   :  { %v5417_v28 = vpop.xlane.xlu2 %5416 }
0x1071   :  { %v6224_v46 = vadd.f32 %v6208_v56, %v6113_v50  ;;  %v5447_v57 = vmul.f32 %v5417_v28, %v7826_v20 }
0x1073   :  { %v6240_v37 = vmul.f32 0.7978846, %v6224_v46  ;;  %v11110_v38 = vsub.f32 %v10949_v52, %v5447_v57 }
0x1075   :  { %7567 = vtanh.f32 %v6240_v37  ;;  %v5479_v1 = vmul.f32 %v11110_v38, %v11110_v38 }
0x1077   :  { %v5511_v8 = vsel %vm63_vm0, %v5479_v1, 0.0 }
0x1078   :  { %5512 = vadd.xlane.f32.xlu1 %v5511_v8  ;;  %v5501_v29 = vpop.xlane.xlu2 %5500 }
0x1079   :  { %v5539_v59 = vmul.f32 %v5501_v29, %v7826_v20 }
0x107b   :  { %v7568_v62 = vpop.eup %7567  ;;  %v5555_v32 = vadd.f32 1e-06, %v5539_v59 }
0x107c   :  { %v5420_v30 = vpop.xlane.xlu1 %5419  ;;  %v6272_v10 = vadd.f32 1.0, %v7568_v62 }
0x107d   :  { %7569 = vrsqrt.f32 %v5555_v32  ;;  %v5448_v5 = vmul.f32 %v5420_v30, %v7826_v20  ;;  %vm5622_vm1 = vcmp.eq.f32.partialorder %v5555_v32, inf  ;;  %v5625_v43 = vand.u32 2147483648, %v5555_v32 }
0x107e   :  { %v6288_v42 = vmul.f32 %v6272_v10, %v6160_v21  ;;  %vm5624_vm2 = vcmp.eq.f32.partialorder %v5555_v32, 0.0 }
0x107f   :  { %v11122_v4 = vsub.f32 %v10962_v13, %v5448_v5 }
0x1080   :  { %6342 = vmatmul.f32.vlgmr.msra.gmra.mxu2 %v6288_v42  ;;  %5437 = vadd.xlane.f32.xlu1 %v5436_v45 }
0x1081   :  { %v5480_v9 = vmul.f32 %v11122_v4, %v11122_v4 }
0x1083   :  { %v7570_v36 = vpop.eup %7569  ;;  %v5514_v41 = vsel %vm63_vm0, %v5480_v9, 0.0 }
0x1084   :  { %v5616_v40 = vmul.f32 %v7570_v36, %v5555_v32  ;;  %5515 = vadd.xlane.f32.xlu0 %v5514_v41  ;;  %v5504_v17 = vpop.xlane.xlu1 %5503 }
0x1085   :  { %v5540_v18 = vmul.f32 %v5504_v17, %v7826_v20 }
0x1086   :  { %v5617_v31 = vmul.f32 %v7570_v36, %v5616_v40 }
0x1087   :  { %v5556_v51 = vadd.f32 1e-06, %v5540_v18 }
0x1088   :  { %v5618_v14 = vmul.f32 0.5, %v5617_v31 }
0x1089   :  { %7571 = vrsqrt.f32 %v5556_v51  ;;  %vm5634_vm3 = vcmp.eq.f32.partialorder %v5556_v51, inf  ;;  %v5637_v1 = vand.u32 2147483648, %v5556_v51  ;;  %vm5636_vm4 = vcmp.eq.f32.partialorder %v5556_v51, 0.0 }
0x108a   :  { %v5619_v3 = vsub.f32 1.5, %v5618_v14 }
0x108c   :  { %v5620_v50 = vmul.f32 %v7570_v36, %v5619_v3 }
0x108e   :  { %v5621_v0 = vmul.f32 %v5620_v50, %v5555_v32 }
0x108f   :  { %v7572_v54 = vpop.eup %7571 }
0x1090   :  { %v5628_v27 = vmul.f32 %v7572_v54, %v5556_v51  ;;  %v5623_v48 = vsel %vm5622_vm1, %v5555_v32, %v5621_v0 }
0x1091   :  { %v5626_v56 = vsel %vm5624_vm2, %v5625_v43, %v5623_v48 }
0x1092   :  { %v5629_v16 = vmul.f32 %v7572_v54, %v5628_v27  ;;  %7573 = vrcp.f32 %v5626_v56  ;;  %v5830_v8 = vand.u32 2147483648, %v5626_v56  ;;  %v5828_v62 = vand.u32 2147483647, %v5626_v56 }
0x1093   :  { %vm5824_vm6 = vweird.f32 %v5626_v56 }
0x1094   :  { %v5630_v28 = vmul.f32 0.5, %v5629_v16  ;;  %v5831_v21 = vor.u32 1.1754944e-38, %v5830_v8  ;;  %vm5829_vm10 = vcmp.eq.f32.partialorder %v5828_v62, 8.507059e+37 }
0x1096   :  { %v5631_v46 = vsub.f32 1.5, %v5630_v28 }
0x1098   :  { %v7574_v57 = vpop.eup %7573  ;;  %v5632_v34 = vmul.f32 %v7572_v54, %v5631_v46 }
0x1099   :  { %v5820_v7 = vmul.f32 %v7574_v57, %v5626_v56  ;;  %vm5825_vm5 = vweird.f32 %v7574_v57 }
0x109a   :  { %v5633_v37 = vmul.f32 %v5632_v34, %v5556_v51  ;;  %vm5826_vm7 = vmor %vm5824_vm6, %vm5825_vm5 }
0x109b   :  { %v5821_v19 = vsub.f32 1.0, %v5820_v7 }
0x109c   :  { %v5635_v29 = vsel %vm5634_vm3, %v5556_v51, %v5633_v37 }
0x109d   :  { %v5822_v59 = vmul.f32 %v7574_v57, %v5821_v19  ;;  %v5638_v47 = vsel %vm5636_vm4, %v5637_v1, %v5635_v29 }
0x109e   :  { %7575 = vrcp.f32 %v5638_v47  ;;  %v5845_v40 = vand.u32 2147483648, %v5638_v47  ;;  %v5843_v31 = vand.u32 2147483647, %v5638_v47  ;;  %vm5839_vm12 = vweird.f32 %v5638_v47 }
0x109f   :  { %v5823_v32 = vadd.f32 %v7574_v57, %v5822_v59 }
0x10a0   :  { %v5846_v3 = vor.u32 1.1754944e-38, %v5845_v40  ;;  %vm5844_vm13 = vcmp.eq.f32.partialorder %v5843_v31, 8.507059e+37 }
0x10a1   :  { %v5827_v30 = vsel %vm5826_vm7, %v7574_v57, %v5823_v32 }
0x10a2   :  { %v5832_v10 = vsel %vm5829_vm10, %v5831_v21, %v5827_v30 }
0x10a3   :  { %v5833_v5 = vmul.f32 %v5832_v10, %v10952_v2 }
0x10a4   :  { %v7576_v42 = vpop.eup %7575 }
0x10a5   :  { %v6006_v45 = vmul.f32 %v10935_v49, %v5833_v5  ;;  %v5835_v9 = vmul.f32 %v7576_v42, %v5638_v47  ;;  %vm5840_vm11 = vweird.f32 %v7576_v42 }
0x10a6   :  { %vm5841_vm8 = vmor %vm5839_vm12, %vm5840_vm11 }
0x10a7   :  { %v6025_v36 = vadd.f32 %v10941_v6, %v6006_v45  ;;  %v5836_v41 = vsub.f32 1.0, %v5835_v9 }
0x10a9   :  { %v5423_v17 = vpop.xlane.xlu0 %5422  ;;  %6850 = vmatmul.msk.f32.gmra.mxu1 %vm63_vm0, %v6025_v36  ;;  %v5837_v18 = vmul.f32 %v7576_v42, %v5836_v41 }
0x10aa   :  { %v5449_v51 = vmul.f32 %v5423_v17, %v7826_v20 }
0x10ab   :  { %v5838_v14 = vadd.f32 %v7576_v42, %v5837_v18 }
0x10ac   :  { %v11136_v2 = vsub.f32 %v10981_v26, %v5449_v51 }
0x10ad   :  { %v5842_v50 = vsel %vm5841_vm8, %v7576_v42, %v5838_v14 }
0x10ae   :  { %v5481_v0 = vmul.f32 %v11136_v2, %v11136_v2  ;;  %v5847_v54 = vsel %vm5844_vm13, %v5846_v3, %v5842_v50 }
0x10af   :  { %v5848_v43 = vmul.f32 %v5847_v54, %v10965_v23 }
0x10b0   :  { %v5517_v27 = vsel %vm63_vm0, %v5481_v0, 0.0 }
0x10b1   :  { %5518 = vadd.xlane.f32.xlu2 %v5517_v27  ;;  %v5426_v48 = vpop.xlane.xlu2 %5425  ;;  %v5507_v56 = vpop.xlane.xlu0 %5506  ;;  %v6007_v16 = vmul.f32 %v10935_v49, %v5848_v43 }
0x10b2   :  { %v5450_v28 = vmul.f32 %v5426_v48, %v7826_v20  ;;  %v5541_v46 = vmul.f32 %v5507_v56, %v7826_v20 }
0x10b3   :  { %v6026_v57 = vadd.f32 %v10941_v6, %v6007_v16 }
0x10b4   :  { %v11147_v34 = vsub.f32 %v11000_v63, %v5450_v28  ;;  %v5557_v7 = vadd.f32 1e-06, %v5541_v46 }
0x10b5   :  { %6851 = vmatmul.msk.f32.gmra.mxu1 %vm63_vm0, %v6026_v57 }
0x10b6   :  { %7577 = vrsqrt.f32 %v5557_v7  ;;  %v5482_v23 = vmul.f32 %v11147_v34, %v11147_v34  ;;  %vm5646_vm14 = vcmp.eq.f32.partialorder %v5557_v7, inf  ;;  %v5649_v14 = vand.u32 2147483648, %v5557_v7 }
0x10b7   :  { %vm5648_vm15 = vcmp.eq.f32.partialorder %v5557_v7, 0.0 }
0x10b8   :  { %v5520_v37 = vsel %vm63_vm0, %v5482_v23, 0.0 }
0x10b9   :  { %v5510_v1 = vpop.xlane.xlu2 %5509  ;;  %5521 = vadd.xlane.f32.xlu0 %v5520_v37  ;;  %v5429_v19 = vpop.xlane.xlu1 %5428 }
0x10ba   :  { %v5542_v8 = vmul.f32 %v5510_v1, %v7826_v20  ;;  %v5451_v29 = vmul.f32 %v5429_v19, %v7826_v20 }
0x10bc   :  { %v7578_v59 = vpop.eup %7577  ;;  %v5558_v62 = vadd.f32 1e-06, %v5542_v8  ;;  %v11156_v47 = vsub.f32 %v11028_v22, %v5451_v29 }
0x10bd   :  { %v5640_v32 = vmul.f32 %v7578_v59, %v5557_v7 }
0x10be   :  { %7579 = vrsqrt.f32 %v5558_v62  ;;  %v5483_v21 = vmul.f32 %v11156_v47, %v11156_v47  ;;  %vm5658_vm1 = vcmp.eq.f32.partialorder %v5558_v62, inf  ;;  %v5661_v1 = vand.u32 2147483648, %v5558_v62 }
0x10bf   :  { %v5641_v30 = vmul.f32 %v7578_v59, %v5640_v32  ;;  %vm5660_vm2 = vcmp.eq.f32.partialorder %v5558_v62, 0.0 }
0x10c0   :  { %v5523_v10 = vsel %vm63_vm0, %v5483_v21, 0.0 }
0x10c1   :  { %v5642_v5 = vmul.f32 0.5, %v5641_v30  ;;  %v5432_v42 = vpop.xlane.xlu0 %5431  ;;  %5524 = vadd.xlane.f32.xlu1 %v5523_v10 }
0x10c2   :  { %v5452_v45 = vmul.f32 %v5432_v42, %v7826_v20 }
0x10c3   :  { %v5643_v9 = vsub.f32 1.5, %v5642_v5 }
0x10c4   :  { %v7580_v36 = vpop.eup %7579  ;;  %v11163_v41 = vsub.f32 %v11045_v25, %v5452_v45 }
0x10c5   :  { %v5644_v40 = vmul.f32 %v7578_v59, %v5643_v9  ;;  %v5652_v17 = vmul.f32 %v7580_v36, %v5558_v62 }
0x10c6   :  { %v5484_v18 = vmul.f32 %v11163_v41, %v11163_v41 }
0x10c7   :  { %v5645_v31 = vmul.f32 %v5644_v40, %v5557_v7  ;;  %v5653_v51 = vmul.f32 %v7580_v36, %v5652_v17 }
0x10c8   :  { %v5526_v3 = vsel %vm63_vm0, %v5484_v18, 0.0 }
0x10c9   :  { %v5654_v50 = vmul.f32 0.5, %v5653_v51  ;;  %v5435_v0 = vpop.xlane.xlu2 %5434  ;;  %5527 = vadd.xlane.f32.xlu2 %v5526_v3  ;;  %v5647_v54 = vsel %vm5646_vm14, %v5557_v7, %v5645_v31 }
0x10ca   :  { %v5453_v43 = vmul.f32 %v5435_v0, %v7826_v20  ;;  %v5650_v27 = vsel %vm5648_vm15, %v5649_v14, %v5647_v54 }
0x10cb   :  { %v5655_v48 = vsub.f32 1.5, %v5654_v50  ;;  %v6115_v56 = vpop.f32.mrf.mxu1  ;;  %7581 = vrcp.f32 %v5650_v27  ;;  %v5858_v45 = vand.u32 2147483647, %v5650_v27  ;;  %v5860_v9 = vand.u32 2147483648, %v5650_v27 }
0x10cc   :  { %v11170_v16 = vsub.f32 %v11056_v11, %v5453_v43  ;;  %v6116_v28 = vadd.f32 %v11096_v39, %v6115_v56  ;;  %vm5854_vm4 = vweird.f32 %v5650_v27 }
0x10cd   :  { %v5656_v46 = vmul.f32 %v7580_v36, %v5655_v48  ;;  %v5861_v51 = vor.u32 1.1754944e-38, %v5860_v9  ;;  %vm5859_vm6 = vcmp.eq.f32.partialorder %v5858_v45, 8.507059e+37 }
0x10ce   :  { %v6177_v57 = vmul.f32 0.044715, %v6116_v28  ;;  %v5485_v23 = vmul.f32 %v11170_v16, %v11170_v16 }
0x10cf   :  { %v5657_v37 = vmul.f32 %v5656_v46, %v5558_v62 }
0x10d0   :  { %v5529_v7 = vsel %vm63_vm0, %v5485_v23, 0.0  ;;  %v6193_v19 = vmul.f32 %v6177_v57, %v6116_v28 }
0x10d1   :  { %v7582_v8 = vpop.eup %7581  ;;  %5530 = vadd.xlane.f32.xlu0 %v5529_v7  ;;  %v5659_v29 = vsel %vm5658_vm1, %v5558_v62, %v5657_v37 }
0x10d2   :  { %v5850_v59 = vmul.f32 %v7582_v8, %v5650_v27  ;;  %v6209_v32 = vmul.f32 %v6193_v19, %v6116_v28  ;;  %v5662_v21 = vsel %vm5660_vm2, %v5661_v1, %v5659_v29  ;;  %vm5855_vm3 = vweird.f32 %v7582_v8 }
0x10d3   :  { %v6118_v30 = vpop.f32.mrf.mxu1  ;;  %7583 = vrcp.f32 %v5662_v21  ;;  %vm5856_vm5 = vmor %vm5854_vm4, %vm5855_vm3  ;;  %v5873_v57 = vand.u32 2147483647, %v5662_v21  ;;  %v5875_v27 = vand.u32 2147483648, %v5662_v21  ;;  %vm5869_vm10 = vweird.f32 %v5662_v21 }
0x10d4   :  { %v6119_v10 = vadd.f32 %v11096_v39, %v6118_v30  ;;  %v5851_v5 = vsub.f32 1.0, %v5850_v59  ;;  %v6225_v42 = vadd.f32 %v6209_v32, %v6116_v28 }
0x10d5   :  { %vm5874_vm12 = vcmp.eq.f32.partialorder %v5873_v57, 8.507059e+37 }
0x10d6   :  { %v6178_v36 = vmul.f32 0.044715, %v6119_v10  ;;  %v5852_v40 = vmul.f32 %v7582_v8, %v5851_v5  ;;  %v6241_v17 = vmul.f32 0.7978846, %v6225_v42  ;;  %v5876_v5 = vor.u32 1.1754944e-38, %v5875_v27 }
0x10d8   :  { %v5853_v18 = vadd.f32 %v7582_v8, %v5852_v40  ;;  %7585 = vtanh.f32 %v6241_v17  ;;  %v6194_v31 = vmul.f32 %v6178_v36, %v6119_v10 }
0x10d9   :  { %v7584_v62 = vpop.eup %7583 }
0x10da   :  { %v5857_v14 = vsel %vm5856_vm5, %v7582_v8, %v5853_v18  ;;  %v5865_v3 = vmul.f32 %v7584_v62, %v5662_v21  ;;  %v6210_v50 = vmul.f32 %v6194_v31, %v6119_v10  ;;  %vm5870_vm7 = vweird.f32 %v7584_v62 }
0x10db   :  { %v6121_v0 = vpop.f32.mrf.mxu1  ;;  %v5862_v54 = vsel %vm5859_vm6, %v5861_v51, %v5857_v14  ;;  %v6161_v8 = vmul.f32 0.5, %v6116_v28  ;;  %vm5871_vm11 = vmor %vm5869_vm10, %vm5870_vm7  ;;  %v6162_v18 = vmul.f32 0.5, %v6119_v10 }
0x10dc   :  { %v6122_v43 = vadd.f32 %v11096_v39, %v6121_v0  ;;  %v5863_v48 = vmul.f32 %v5862_v54, %v10984_v12  ;;  %v5866_v56 = vsub.f32 1.0, %v5865_v3  ;;  %v6226_v46 = vadd.f32 %v6210_v50, %v6119_v10 }
0x10de   :  { %v7586_v23 = vpop.eup %7585  ;;  %v6179_v37 = vmul.f32 0.044715, %v6122_v43  ;;  %v6008_v1 = vmul.f32 %v10935_v49, %v5863_v48  ;;  %v5867_v7 = vmul.f32 %v7584_v62, %v5866_v56  ;;  %v6242_v19 = vmul.f32 0.7978846, %v6226_v46 }
0x10df   :  { %v6273_v29 = vadd.f32 1.0, %v7586_v23 }
0x10e0   :  { %v6027_v59 = vadd.f32 %v10941_v6, %v6008_v1  ;;  %v5868_v32 = vadd.f32 %v7584_v62, %v5867_v7  ;;  %7587 = vtanh.f32 %v6242_v19  ;;  %v6195_v30 = vmul.f32 %v6179_v37, %v6122_v43 }
0x10e1   :  { %v6289_v12 = vmul.f32 %v6273_v29, %v6161_v8  ;;  %v11199_v29 = vld [vmem:[%s11413_s12 + $0x1] ss:$0 sm:$0xff] }
0x10e2   :  { %6852 = vmatmul.msk.f32.gmra.mxu1 %vm63_vm0, %v6027_v59  ;;  %v5872_v42 = vsel %vm5871_vm11, %v7584_v62, %v5868_v32  ;;  %v6211_v45 = vmul.f32 %v6195_v30, %v6122_v43 }
0x10e3   :  { %6345 = vmatmul.f32.gmra.mxu2 %v6289_v12  ;;  %v5877_v9 = vsel %vm5874_vm12, %v5876_v5, %v5872_v42 }
0x10e4   :  { %v5878_v28 = vmul.f32 %v5877_v9, %v10997_v33  ;;  %v6227_v36 = vadd.f32 %v6211_v45, %v6122_v43  ;;  %v6163_v33 = vmul.f32 0.5, %v6122_v43 }
0x10e6   :  { %v7588_v21 = vpop.eup %7587  ;;  %v6009_v40 = vmul.f32 %v10935_v49, %v5878_v28  ;;  %v6243_v17 = vmul.f32 0.7978846, %v6227_v36  ;;  %v11501_v36 = vld [vmem:[#allocation17_spill] sm:$0xff] }
0x10e7   :  { %v6274_v31 = vadd.f32 1.0, %v7588_v21 }
0x10e8   :  { %v6028_v51 = vadd.f32 %v10941_v6, %v6009_v40  ;;  %7589 = vtanh.f32 %v6243_v17 }
0x10e9   :  { %v6290_v14 = vmul.f32 %v6274_v31, %v6162_v18 }
0x10ea   :  { %6853 = vmatmul.msk.f32.gmra.mxu1 %vm63_vm0, %v6028_v51 }
0x10eb   :  { %6348 = vmatmul.f32.gmra.mxu2 %v6290_v14  ;;  %v5513_v62 = vpop.xlane.xlu1 %5512 }
0x10ec   :  { %v5543_v3 = vmul.f32 %v5513_v62, %v7826_v20 }
0x10ee   :  { %v7590_v50 = vpop.eup %7589  ;;  %v5559_v0 = vadd.f32 1e-06, %v5543_v3 }
0x10ef   :  { %v6275_v54 = vadd.f32 1.0, %v7590_v50 }
0x10f0   :  { %7591 = vrsqrt.f32 %v5559_v0  ;;  %vm5670_vm8 = vcmp.eq.f32.partialorder %v5559_v0, inf  ;;  %v5673_v30 = vand.u32 2147483648, %v5559_v0  ;;  %vm5672_vm13 = vcmp.eq.f32.partialorder %v5559_v0, 0.0 }
0x10f1   :  { %v6291_v48 = vmul.f32 %v6275_v54, %v6163_v33 }
0x10f3   :  { %6351 = vmatmul.f32.gmra.mxu2 %v6291_v48  ;;  %v5438_v49 = vpop.xlane.xlu1 %5437 }
0x10f4   :  { %v5454_v10 = vmul.f32 %v5438_v49, %v7826_v20 }
0x10f6   :  { %v7592_v56 = vpop.eup %7591  ;;  %v11190_v6 = vsub.f32 %v11118_v53, %v5454_v10 }
0x10f7   :  { %v5664_v46 = vmul.f32 %v7592_v56, %v5559_v0  ;;  %v5516_v57 = vpop.xlane.xlu0 %5515 }
0x10f8   :  { %v5544_v27 = vmul.f32 %v5516_v57, %v7826_v20  ;;  %v5486_v23 = vmul.f32 %v11190_v6, %v11190_v6 }
0x10f9   :  { %v5665_v37 = vmul.f32 %v7592_v56, %v5664_v46 }
0x10fa   :  { %v5560_v43 = vadd.f32 1e-06, %v5544_v27  ;;  %v5532_v1 = vsel %vm63_vm0, %v5486_v23, 0.0  ;;  %v11208_v23 = vld [vmem:[%s11408_s7 + $0x1] ss:$0 sm:$0xff] }
0x10fb   :  { %v5666_v7 = vmul.f32 0.5, %v5665_v37  ;;  %5533 = vadd.xlane.f32.xlu1 %v5532_v1  ;;  %v11214_v1 = vld [vmem:[%s11409_s8 + $0x1] ss:$0 sm:$0xff] }
0x10fc   :  { %7593 = vrsqrt.f32 %v5560_v43  ;;  %vm5682_vm14 = vcmp.eq.f32.partialorder %v5560_v43, inf  ;;  %v5685_v62 = vand.u32 2147483648, %v5560_v43  ;;  %vm5684_vm15 = vcmp.eq.f32.partialorder %v5560_v43, 0.0 }
0x10fd   :  { %v5667_v19 = vsub.f32 1.5, %v5666_v7 }
0x10ff   :  { %v5668_v8 = vmul.f32 %v7592_v56, %v5667_v19 }
0x1101   :  { %v5669_v59 = vmul.f32 %v5668_v8, %v5559_v0 }
0x1102   :  { %v7594_v32 = vpop.eup %7593 }
0x1103   :  { %v5676_v12 = vmul.f32 %v7594_v32, %v5560_v43  ;;  %v6343_v5 = vpop.f32.mrf.mxu2  ;;  %v5671_v42 = vsel %vm5670_vm8, %v5559_v0, %v5669_v59 }
0x1104   :  { %v6344_v45 = vadd.f32 %v11199_v29, %v6343_v5  ;;  %v5674_v9 = vsel %vm5672_vm13, %v5673_v30, %v5671_v42 }
0x1105   :  { %v5677_v28 = vmul.f32 %v7594_v32, %v5676_v12  ;;  %7595 = vrcp.f32 %v5674_v9  ;;  %v5890_v50 = vand.u32 2147483648, %v5674_v9  ;;  %v5888_v54 = vand.u32 2147483647, %v5674_v9 }
0x1106   :  { %v6391_v21 = vadd.f32 %v6344_v45, %v11501_v36  ;;  %vm5884_vm2 = vweird.f32 %v5674_v9 }
0x1107   :  { %v5678_v40 = vmul.f32 0.5, %v5677_v28  ;;  %v5891_v10 = vor.u32 1.1754944e-38, %v5890_v50  ;;  %vm5889_vm4 = vcmp.eq.f32.partialorder %v5888_v54, 8.507059e+37 }
0x1108   :  { %6423 = vrot.lane.b32.xlu2 %v6391_v21, %s7724_s14 }
0x1109   :  { %v5679_v17 = vsub.f32 1.5, %v5678_v40 }
0x110b   :  { %v7596_v18 = vpop.eup %7595  ;;  %v5680_v31 = vmul.f32 %v7594_v32, %v5679_v17 }
0x110c   :  { %v5880_v51 = vmul.f32 %v7596_v18, %v5674_v9  ;;  %vm5885_vm1 = vweird.f32 %v7596_v18 }
0x110d   :  { %v5681_v14 = vmul.f32 %v5680_v31, %v5560_v43  ;;  %vm5886_vm3 = vmor %vm5884_vm2, %vm5885_vm1 }
0x110e   :  { %v5881_v3 = vsub.f32 1.0, %v5880_v51 }
0x110f   :  { %v5683_v0 = vsel %vm5682_vm14, %v5560_v43, %v5681_v14 }
0x1110   :  { %v5882_v33 = vmul.f32 %v7596_v18, %v5881_v3  ;;  %v5686_v48 = vsel %vm5684_vm15, %v5685_v62, %v5683_v0 }
0x1111   :  { %7597 = vrcp.f32 %v5686_v48  ;;  %v5905_v8 = vand.u32 2147483648, %v5686_v48  ;;  %v5903_v59 = vand.u32 2147483647, %v5686_v48  ;;  %vm5899_vm6 = vweird.f32 %v5686_v48 }
0x1112   :  { %v5883_v49 = vadd.f32 %v7596_v18, %v5882_v33 }
0x1113   :  { %v5906_v30 = vor.u32 1.1754944e-38, %v5905_v8  ;;  %vm5904_vm10 = vcmp.eq.f32.partialorder %v5903_v59, 8.507059e+37 }
0x1114   :  { %v5887_v56 = vsel %vm5886_vm3, %v7596_v18, %v5883_v49 }
0x1115   :  { %v5892_v46 = vsel %vm5889_vm4, %v5891_v10, %v5887_v56 }
0x1116   :  { %v5893_v57 = vmul.f32 %v5892_v46, %v11110_v38 }
0x1117   :  { %v7598_v27 = vpop.eup %7597 }
0x1118   :  { %v6010_v37 = vmul.f32 %v11208_v23, %v5893_v57  ;;  %v5895_v43 = vmul.f32 %v7598_v27, %v5686_v48  ;;  %vm5900_vm5 = vweird.f32 %v7598_v27 }
0x1119   :  { %vm5901_vm7 = vmor %vm5899_vm6, %vm5900_vm5 }
0x111a   :  { %v6029_v7 = vadd.f32 %v11214_v1, %v6010_v37  ;;  %v5896_v19 = vsub.f32 1.0, %v5895_v43 }
0x111c   :  { %6854 = vmatmul.msk.f32.gmra.mxu1 %vm63_vm0, %v6029_v7  ;;  %v5897_v38 = vmul.f32 %v7598_v27, %v5896_v19 }
0x111e   :  { %v5898_v32 = vadd.f32 %v7598_v27, %v5897_v38 }
0x1120   :  { %v5902_v12 = vsel %vm5901_vm7, %v7598_v27, %v5898_v32 }
0x1121   :  { %v5907_v5 = vsel %vm5904_vm10, %v5906_v30, %v5902_v12 }
0x1122   :  { %v5908_v42 = vmul.f32 %v5907_v5, %v11122_v4 }
0x1124   :  { %v5519_v45 = vpop.xlane.xlu2 %5518  ;;  %v6011_v9 = vmul.f32 %v11208_v23, %v5908_v42 }
0x1125   :  { %v5545_v28 = vmul.f32 %v5519_v45, %v7826_v20 }
0x1126   :  { %v6124_v36 = vpop.f32.mrf.mxu1  ;;  %v6030_v21 = vadd.f32 %v11214_v1, %v6011_v9 }
0x1127   :  { %v5561_v40 = vadd.f32 1e-06, %v5545_v28  ;;  %v6125_v17 = vadd.f32 %v11096_v39, %v6124_v36 }
0x1128   :  { %6855 = vmatmul.msk.f32.gmra.mxu1 %vm63_vm0, %v6030_v21 }
0x1129   :  { %7599 = vrsqrt.f32 %v5561_v40  ;;  %v6180_v18 = vmul.f32 0.044715, %v6125_v17  ;;  %v6164_v12 = vmul.f32 0.5, %v6125_v17  ;;  %vm5694_vm11 = vcmp.eq.f32.partialorder %v5561_v40, inf }
0x112a   :  { %v5697_v42 = vand.u32 2147483648, %v5561_v40  ;;  %vm5696_vm12 = vcmp.eq.f32.partialorder %v5561_v40, 0.0 }
0x112b   :  { %v6196_v31 = vmul.f32 %v6180_v18, %v6125_v17 }
0x112c   :  { %v5522_v51 = vpop.xlane.xlu0 %5521 }
0x112d   :  { %v5546_v14 = vmul.f32 %v5522_v51, %v7826_v20  ;;  %v6212_v4 = vmul.f32 %v6196_v31, %v6125_v17 }
0x112f   :  { %v7600_v62 = vpop.eup %7599  ;;  %v5562_v3 = vadd.f32 1e-06, %v5546_v14  ;;  %v6228_v50 = vadd.f32 %v6212_v4, %v6125_v17 }
0x1130   :  { %v5688_v0 = vmul.f32 %v7600_v62, %v5561_v40 }
0x1131   :  { %7601 = vrsqrt.f32 %v5562_v3  ;;  %v6244_v33 = vmul.f32 0.7978846, %v6228_v50  ;;  %vm5706_vm8 = vcmp.eq.f32.partialorder %v5562_v3, inf  ;;  %vm5708_vm13 = vcmp.eq.f32.partialorder %v5562_v3, 0.0 }
0x1132   :  { %v5689_v54 = vmul.f32 %v7600_v62, %v5688_v0  ;;  %v6127_v48 = vpop.f32.mrf.mxu1 }
0x1133   :  { %v6128_v49 = vadd.f32 %v11096_v39, %v6127_v48  ;;  %7603 = vtanh.f32 %v6244_v33 }
0x1134   :  { %v5690_v10 = vmul.f32 0.5, %v5689_v54  ;;  %v5525_v56 = vpop.xlane.xlu1 %5524 }
0x1135   :  { %v6181_v46 = vmul.f32 0.044715, %v6128_v49  ;;  %v5547_v57 = vmul.f32 %v5525_v56, %v7826_v20 }
0x1136   :  { %v5691_v27 = vsub.f32 1.5, %v5690_v10 }
0x1137   :  { %v7602_v37 = vpop.eup %7601  ;;  %v11227_v43 = vadd.f32 1e-06, %v5547_v57  ;;  %v6197_v7 = vmul.f32 %v6181_v46, %v6128_v49 }
0x1138   :  { %v5692_v19 = vmul.f32 %v7600_v62, %v5691_v27  ;;  %v5700_v8 = vmul.f32 %v7602_v37, %v5562_v3 }
0x1139   :  { %v7604_v38 = vpop.eup %7603  ;;  %7605 = vrsqrt.f32 %v11227_v43  ;;  %v6213_v59 = vmul.f32 %v6197_v7, %v6128_v49  ;;  %vm5718_vm15 = vcmp.eq.f32.partialorder %v11227_v43, inf  ;;  %vm5720_vm3 = vcmp.eq.f32.partialorder %v11227_v43, 0.0 }
0x113a   :  { %v5693_v32 = vmul.f32 %v5692_v19, %v5561_v40  ;;  %v5701_v30 = vmul.f32 %v7602_v37, %v5700_v8  ;;  %v6276_v5 = vadd.f32 1.0, %v7604_v38 }
0x113b   :  { %v6229_v45 = vadd.f32 %v6213_v59, %v6128_v49 }
0x113c   :  { %v5702_v9 = vmul.f32 0.5, %v5701_v30  ;;  %v5528_v28 = vpop.xlane.xlu2 %5527  ;;  %v6292_v36 = vmul.f32 %v6276_v5, %v6164_v12  ;;  %v5695_v21 = vsel %vm5694_vm11, %v5561_v40, %v5693_v32  ;;  %v5709_v40 = vand.u32 2147483648, %v5562_v3 }
0x113d   :  { %v5548_v18 = vmul.f32 %v5528_v28, %v7826_v20  ;;  %v6245_v31 = vmul.f32 0.7978846, %v6229_v45  ;;  %v5698_v51 = vsel %vm5696_vm12, %v5697_v42, %v5695_v21 }
0x113e   :  { %v5703_v14 = vsub.f32 1.5, %v5702_v9  ;;  %6354 = vmatmul.f32.gmra.mxu2 %v6292_v36  ;;  %7607 = vrcp.f32 %v5698_v51  ;;  %v5920_v42 = vand.u32 2147483648, %v5698_v51  ;;  %v5918_v45 = vand.u32 2147483647, %v5698_v51 }
0x113f   :  { %v7606_v4 = vpop.eup %7605  ;;  %v11231_v62 = vadd.f32 1e-06, %v5548_v18  ;;  %7609 = vtanh.f32 %v6245_v31  ;;  %vm5914_vm1 = vweird.f32 %v5698_v51 }
0x1140   :  { %v5704_v17 = vmul.f32 %v7602_v37, %v5703_v14  ;;  %v5712_v50 = vmul.f32 %v7606_v4, %v11227_v43  ;;  %v6165_v37 = vmul.f32 0.5, %v6128_v49  ;;  %v5721_v49 = vand.u32 2147483648, %v11227_v43 }
0x1141   :  { %7611 = vrsqrt.f32 %v11231_v62  ;;  %v5921_v31 = vor.u32 1.1754944e-38, %v5920_v42  ;;  %vm5919_vm4 = vcmp.eq.f32.partialorder %v5918_v45, 8.507059e+37  ;;  %vm5730_vm6 = vcmp.eq.f32.partialorder %v11231_v62, inf }
0x1142   :  { %v5705_v0 = vmul.f32 %v5704_v17, %v5562_v3  ;;  %v5713_v33 = vmul.f32 %v7606_v4, %v5712_v50  ;;  %vm5732_vm11 = vcmp.eq.f32.partialorder %v11231_v62, 0.0 }
0x1144   :  { %v7608_v54 = vpop.eup %7607  ;;  %v5714_v48 = vmul.f32 0.5, %v5713_v33  ;;  %v5531_v10 = vpop.xlane.xlu0 %5530  ;;  %v5707_v56 = vsel %vm5706_vm8, %v5562_v3, %v5705_v0 }
0x1145   :  { %v7610_v46 = vpop.eup %7609  ;;  %v5549_v57 = vmul.f32 %v5531_v10, %v7826_v20  ;;  %v5910_v27 = vmul.f32 %v7608_v54, %v5698_v51  ;;  %v5710_v7 = vsel %vm5708_vm13, %v5709_v40, %v5707_v56  ;;  %vm5915_vm14 = vweird.f32 %v7608_v54 }
0x1146   :  { %v5715_v19 = vsub.f32 1.5, %v5714_v48  ;;  %v6277_v8 = vadd.f32 1.0, %v7610_v46  ;;  %7613 = vrcp.f32 %v5710_v7  ;;  %vm5916_vm2 = vmor %vm5914_vm1, %vm5915_vm14  ;;  %v5935_v46 = vand.u32 2147483648, %v5710_v7 }
0x1147   :  { %v7612_v38 = vpop.eup %7611  ;;  %v11236_v59 = vadd.f32 1e-06, %v5549_v57  ;;  %v5911_v32 = vsub.f32 1.0, %v5910_v27  ;;  %vm5929_vm7 = vweird.f32 %v5710_v7 }
0x1148   :  { %v5716_v30 = vmul.f32 %v7606_v4, %v5715_v19  ;;  %v5724_v12 = vmul.f32 %v7612_v38, %v11231_v62  ;;  %v6293_v5 = vmul.f32 %v6277_v8, %v6165_v37  ;;  %v5733_v37 = vand.u32 2147483648, %v11231_v62 }
0x1149   :  { %7615 = vrsqrt.f32 %v11236_v59  ;;  %v5912_v3 = vmul.f32 %v7608_v54, %v5911_v32  ;;  %vm5742_vm13 = vcmp.eq.f32.partialorder %v11236_v59, inf  ;;  %vm5744_vm1 = vcmp.eq.f32.partialorder %v11236_v59, 0.0 }
0x114a   :  { %v5717_v9 = vmul.f32 %v5716_v30, %v11227_v43  ;;  %v5725_v28 = vmul.f32 %v7612_v38, %v5724_v12  ;;  %6357 = vmatmul.f32.gmra.mxu2 %v6293_v5  ;;  %v5936_v30 = vor.u32 1.1754944e-38, %v5935_v46 }
0x114b   :  { %v5913_v36 = vadd.f32 %v7608_v54, %v5912_v3 }
0x114c   :  { %v7614_v21 = vpop.eup %7613  ;;  %v5726_v18 = vmul.f32 0.5, %v5725_v28  ;;  %v5719_v14 = vsel %vm5718_vm15, %v11227_v43, %v5717_v9  ;;  %v5933_v43 = vand.u32 2147483647, %v5710_v7 }
0x114d   :  { %v5917_v4 = vsel %vm5916_vm2, %v7608_v54, %v5913_v36  ;;  %v5925_v17 = vmul.f32 %v7614_v21, %v5710_v7  ;;  %v5722_v50 = vsel %vm5720_vm3, %v5721_v49, %v5719_v14  ;;  %vm5930_vm5 = vweird.f32 %v7614_v21 }
0x114e   :  { %v5727_v0 = vsub.f32 1.5, %v5726_v18  ;;  %v5922_v33 = vsel %vm5919_vm4, %v5921_v31, %v5917_v4  ;;  %7617 = vrcp.f32 %v5722_v50  ;;  %vm5931_vm10 = vmor %vm5929_vm7, %vm5930_vm5  ;;  %vm5934_vm12 = vcmp.eq.f32.partialorder %v5933_v43, 8.507059e+37 }
0x114f   :  { %v7616_v40 = vpop.eup %7615  ;;  %v5923_v48 = vmul.f32 %v5922_v33, %v11136_v2  ;;  %v5926_v10 = vsub.f32 1.0, %v5925_v17  ;;  %v5950_v36 = vand.u32 2147483648, %v5722_v50  ;;  %v5948_v14 = vand.u32 2147483647, %v5722_v50 }
0x1150   :  { %v5728_v51 = vmul.f32 %v7612_v38, %v5727_v0  ;;  %v5736_v56 = vmul.f32 %v7616_v40, %v11236_v59  ;;  %vm5944_vm14 = vweird.f32 %v5722_v50 }
0x1151   :  { %v6012_v57 = vmul.f32 %v11208_v23, %v5923_v48  ;;  %v5927_v27 = vmul.f32 %v7614_v21, %v5926_v10  ;;  %vm5949_vm2 = vcmp.eq.f32.partialorder %v5948_v14, 8.507059e+37  ;;  %v11502_v14 = vld [vmem:[#allocation18_spill] sm:$0xff] }
0x1152   :  { %v5729_v54 = vmul.f32 %v5728_v51, %v11231_v62  ;;  %v5737_v19 = vmul.f32 %v7616_v40, %v5736_v56 }
0x1153   :  { %v6031_v8 = vadd.f32 %v11214_v1, %v6012_v57  ;;  %v5928_v2 = vadd.f32 %v7614_v21, %v5927_v27 }
0x1154   :  { %v7618_v38 = vpop.eup %7617  ;;  %v5738_v32 = vmul.f32 0.5, %v5737_v19  ;;  %v5731_v12 = vsel %vm5730_vm6, %v11231_v62, %v5729_v54 }
0x1155   :  { %6856 = vmatmul.msk.f32.gmra.mxu1 %vm63_vm0, %v6031_v8  ;;  %v5932_v5 = vsel %vm5931_vm10, %v7614_v21, %v5928_v2  ;;  %v5940_v42 = vmul.f32 %v7618_v38, %v5722_v50  ;;  %v5734_v3 = vsel %vm5732_vm11, %v5733_v37, %v5731_v12  ;;  %vm5945_vm8 = vweird.f32 %v7618_v38 }
0x1156   :  { %v5739_v45 = vsub.f32 1.5, %v5738_v32  ;;  %v5937_v9 = vsel %vm5934_vm12, %v5936_v30, %v5932_v5  ;;  %7619 = vrcp.f32 %v5734_v3  ;;  %v5745_v21 = vand.u32 2147483648, %v11236_v59  ;;  %vm5946_vm15 = vmor %vm5944_vm14, %vm5945_vm8 }
0x1157   :  { %v5938_v28 = vmul.f32 %v5937_v9, %v11147_v34  ;;  %v5941_v7 = vsub.f32 1.0, %v5940_v42  ;;  %v5951_v34 = vor.u32 1.1754944e-38, %v5950_v36  ;;  %v5965_v27 = vand.u32 2147483648, %v5734_v3 }
0x1158   :  { %v5740_v49 = vmul.f32 %v7616_v40, %v5739_v45  ;;  %vm5959_vm4 = vweird.f32 %v5734_v3 }
0x1159   :  { %v6013_v18 = vmul.f32 %v11208_v23, %v5938_v28  ;;  %v5942_v31 = vmul.f32 %v7618_v38, %v5941_v7  ;;  %v11282_v7 = vld [vmem:[%s11411_s10 + $0x1] ss:$0 sm:$0xff] }
0x115a   :  { %v5741_v62 = vmul.f32 %v5740_v49, %v11236_v59 }
0x115b   :  { %v6032_v4 = vadd.f32 %v11214_v1, %v6013_v18  ;;  %v5943_v17 = vadd.f32 %v7618_v38, %v5942_v31 }
0x115c   :  { %v7620_v0 = vpop.eup %7619  ;;  %v5743_v33 = vsel %vm5742_vm13, %v11236_v59, %v5741_v62  ;;  %v5963_v59 = vand.u32 2147483647, %v5734_v3 }
0x115d   :  { %6857 = vmatmul.msk.f32.gmra.mxu1 %vm63_vm0, %v6032_v4  ;;  %v5947_v40 = vsel %vm5946_vm15, %v7618_v38, %v5943_v17  ;;  %v5955_v48 = vmul.f32 %v7620_v0, %v5734_v3  ;;  %v5746_v10 = vsel %vm5744_vm1, %v5745_v21, %v5743_v33  ;;  %vm5960_vm3 = vweird.f32 %v7620_v0 }
0x115e   :  { %v5952_v51 = vsel %vm5949_vm2, %v5951_v34, %v5947_v40  ;;  %7621 = vrcp.f32 %v5746_v10  ;;  %vm5961_vm5 = vmor %vm5959_vm4, %vm5960_vm3  ;;  %vm5964_vm6 = vcmp.eq.f32.partialorder %v5963_v59, 8.507059e+37  ;;  %v5978_v36 = vand.u32 2147483647, %v5746_v10 }
0x115f   :  { %v6130_v56 = vpop.f32.mrf.mxu1  ;;  %v5953_v46 = vmul.f32 %v5952_v51, %v11156_v47  ;;  %v5956_v57 = vsub.f32 1.0, %v5955_v48  ;;  %v5980_v18 = vand.u32 2147483648, %v5746_v10  ;;  %vm5974_vm10 = vweird.f32 %v5746_v10 }
0x1160   :  { %v11266_v50 = vadd.f32 %v11096_v39, %v6130_v56  ;;  %v5966_v39 = vor.u32 1.1754944e-38, %v5965_v27  ;;  %vm5979_vm12 = vcmp.eq.f32.partialorder %v5978_v36, 8.507059e+37 }
0x1161   :  { %v6014_v43 = vmul.f32 %v11208_v23, %v5953_v46  ;;  %v5957_v54 = vmul.f32 %v7620_v0, %v5956_v57  ;;  %v5981_v33 = vor.u32 1.1754944e-38, %v5980_v18 }
0x1162   :  { %v6182_v19 = vmul.f32 0.044715, %v11266_v50  ;;  %v6424_v37 = vpop.permute.xlu2 %6423 }
0x1163   :  { %v6471_v8 = vsel %vm63_vm0, %v10806_v58, %v6424_v37  ;;  %v6033_v2 = vadd.f32 %v11214_v1, %v6014_v43  ;;  %v5958_v38 = vadd.f32 %v7620_v0, %v5957_v54 }
0x1164   :  { %v7622_v47 = vpop.eup %7621  ;;  %6487 = vst.msk [vmem:[#allocation2] sm:$0xff] %vm1033_vm9, %v6471_v8  ;;  %v6198_v32 = vmul.f32 %v6182_v19, %v11266_v50 }
0x1165   :  { %6858 = vmatmul.msk.f32.gmra.mxu1 %vm63_vm0, %v6033_v2  ;;  %v5962_v30 = vsel %vm5961_vm5, %v7620_v0, %v5958_v38  ;;  %v5970_v12 = vmul.f32 %v7622_v47, %v5746_v10  ;;  %vm5975_vm7 = vweird.f32 %v7622_v47  ;;  %v11503_v10 = vld [vmem:[#allocation19_spill] sm:$0xff] }
0x1166   :  { %v6346_v5 = vpop.f32.mrf.mxu2  ;;  %v5967_v42 = vsel %vm5964_vm6, %v5966_v39, %v5962_v30  ;;  %v6214_v58 = vmul.f32 %v6198_v32, %v11266_v50  ;;  %vm5976_vm11 = vmor %vm5974_vm10, %vm5975_vm7  ;;  %v6166_v39 = vmul.f32 0.5, %v11266_v50 }
0x1167   :  { %v6347_v45 = vadd.f32 %v11199_v29, %v6346_v5  ;;  %v6133_v9 = vpop.f32.mrf.mxu1  ;;  %v5968_v3 = vmul.f32 %v5967_v42, %v11163_v41  ;;  %v5971_v28 = vsub.f32 1.0, %v5970_v12  ;;  %v11504_v5 = vld [vmem:[#allocation20_spill] sm:$0xff] }
0x1168   :  { %v6134_v49 = vadd.f32 %v11282_v7, %v6133_v9  ;;  %v6230_v31 = vadd.f32 %v6214_v58, %v11266_v50 }
0x1169   :  { %v6392_v62 = vadd.f32 %v6347_v45, %v11502_v14  ;;  %v6015_v21 = vmul.f32 %v11208_v23, %v5968_v3  ;;  %v5972_v4 = vmul.f32 %v7622_v47, %v5971_v28 }
0x116a   :  { %v6183_v17 = vmul.f32 0.044715, %v6134_v49  ;;  %v6246_v41 = vmul.f32 0.7978846, %v6230_v31  ;;  %v6167_v9 = vmul.f32 0.5, %v6134_v49 }
0x116b   :  { %6425 = vrot.lane.b32.xlu0 %v6392_v62, %s7724_s14  ;;  %v6034_v0 = vadd.f32 %v11214_v1, %v6015_v21  ;;  %v5973_v34 = vadd.f32 %v7622_v47, %v5972_v4 }
0x116c   :  { %7623 = vtanh.f32 %v6246_v41  ;;  %v6199_v40 = vmul.f32 %v6183_v17, %v6134_v49 }
0x116d   :  { %6859 = vmatmul.msk.f32.gmra.mxu1 %vm63_vm0, %v6034_v0  ;;  %v5977_v48 = vsel %vm5976_vm11, %v7622_v47, %v5973_v34 }
0x116e   :  { %v6349_v51 = vpop.f32.mrf.mxu2  ;;  %v5534_v56 = vpop.xlane.xlu1 %5533  ;;  %v5982_v46 = vsel %vm5979_vm12, %v5981_v33, %v5977_v48  ;;  %v6215_v57 = vmul.f32 %v6199_v40, %v6134_v49 }
0x116f   :  { %v6350_v27 = vadd.f32 %v11199_v29, %v6349_v51  ;;  %v5550_v43 = vmul.f32 %v5534_v56, %v7826_v20  ;;  %v5983_v54 = vmul.f32 %v5982_v46, %v11170_v16 }
0x1170   :  { %v6231_v59 = vadd.f32 %v6215_v57, %v6134_v49 }
0x1171   :  { %v6393_v19 = vadd.f32 %v6350_v27, %v11503_v10  ;;  %v5566_v37 = vadd.f32 1e-06, %v5550_v43  ;;  %v6016_v8 = vmul.f32 %v11208_v23, %v5983_v54 }
0x1172   :  { %v7624_v2 = vpop.eup %7623  ;;  %v6247_v38 = vmul.f32 0.7978846, %v6231_v59 }
0x1173   :  { %7625 = vrsqrt.f32 %v5566_v37  ;;  %6427 = vrot.lane.b32.xlu1 %v6393_v19, %s7724_s14  ;;  %v6035_v47 = vadd.f32 %v11214_v1, %v6016_v8  ;;  %v6278_v32 = vadd.f32 1.0, %v7624_v2  ;;  %vm5754_vm8 = vcmp.eq.f32.partialorder %v5566_v37, inf }
0x1174   :  { %7627 = vtanh.f32 %v6247_v38  ;;  %v5757_v62 = vand.u32 2147483648, %v5566_v37  ;;  %vm5756_vm13 = vcmp.eq.f32.partialorder %v5566_v37, 0.0 }
0x1175   :  { %6860 = vmatmul.msk.f32.gmra.mxu1 %vm63_vm0, %v6035_v47  ;;  %v6294_v16 = vmul.f32 %v6278_v32, %v6166_v39 }
0x1176   :  { %v6352_v20 = vpop.f32.mrf.mxu2 }
0x1177   :  { %v6353_v30 = vadd.f32 %v11199_v29, %v6352_v20  ;;  %6360 = vmatmul.f32.gmra.mxu2 %v6294_v16 }
0x1179   :  { %v7626_v12 = vpop.eup %7625  ;;  %v6394_v42 = vadd.f32 %v6353_v30, %v11504_v5 }
0x117a   :  { %v7628_v58 = vpop.eup %7627  ;;  %v5748_v45 = vmul.f32 %v7626_v12, %v5566_v37 }
0x117b   :  { %6429 = vrot.lane.b32.xlu0 %v6394_v42, %s7724_s14  ;;  %v6279_v3 = vadd.f32 1.0, %v7628_v58 }
0x117c   :  { %v5749_v28 = vmul.f32 %v7626_v12, %v5748_v45 }
0x117d   :  { %v6295_v50 = vmul.f32 %v6279_v3, %v6167_v9  ;;  %v11505_v3 = vld [vmem:[#allocation21_spill] sm:$0xff] }
0x117e   :  { %v5750_v36 = vmul.f32 0.5, %v5749_v28 }
0x117f   :  { %6363 = vmatmul.f32.gmra.mxu2 %v6295_v50 }
0x1180   :  { %v5751_v18 = vsub.f32 1.5, %v5750_v36 }
0x1182   :  { %v5752_v31 = vmul.f32 %v7626_v12, %v5751_v18  ;;  %v11506_v18 = vld [vmem:[#allocation22_spill] sm:$0xff] }
0x1184   :  { %v5753_v14 = vmul.f32 %v5752_v31, %v5566_v37 }
0x1186   :  { %v5755_v21 = vsel %vm5754_vm8, %v5566_v37, %v5753_v14 }
0x1187   :  { %v5758_v4 = vsel %vm5756_vm13, %v5757_v62, %v5755_v21 }
0x1188   :  { %7629 = vrcp.f32 %v5758_v4  ;;  %v5995_v34 = vand.u32 2147483648, %v5758_v4  ;;  %v5993_v49 = vand.u32 2147483647, %v5758_v4  ;;  %vm5989_vm15 = vweird.f32 %v5758_v4 }
0x118a   :  { %v5996_v48 = vor.u32 1.1754944e-38, %v5995_v34  ;;  %vm5994_vm2 = vcmp.eq.f32.partialorder %v5993_v49, 8.507059e+37 }
0x118e   :  { %v7630_v17 = vpop.eup %7629 }
0x118f   :  { %v5985_v41 = vmul.f32 %v7630_v17, %v5758_v4  ;;  %vm5990_vm14 = vweird.f32 %v7630_v17 }
0x1190   :  { %vm5991_vm1 = vmor %vm5989_vm15, %vm5990_vm14 }
0x1191   :  { %v5986_v0 = vsub.f32 1.0, %v5985_v41 }
0x1193   :  { %v5987_v33 = vmul.f32 %v7630_v17, %v5986_v0 }
0x1195   :  { %v5988_v40 = vadd.f32 %v7630_v17, %v5987_v33 }
0x1197   :  { %v5992_v51 = vsel %vm5991_vm1, %v7630_v17, %v5988_v40 }
0x1198   :  { %v5997_v56 = vsel %vm5994_vm2, %v5996_v48, %v5992_v51 }
0x1199   :  { %v6136_v46 = vpop.f32.mrf.mxu1  ;;  %v5998_v57 = vmul.f32 %v5997_v56, %v11190_v6 }
0x119a   :  { %v6137_v27 = vadd.f32 %v11282_v7, %v6136_v46 }
0x119b   :  { %v6017_v43 = vmul.f32 %v11208_v23, %v5998_v57 }
0x119c   :  { %v6184_v54 = vmul.f32 0.044715, %v6137_v27  ;;  %v6168_v20 = vmul.f32 0.5, %v6137_v27 }
0x119d   :  { %v6036_v59 = vadd.f32 %v11214_v1, %v6017_v43 }
0x119e   :  { %v6200_v10 = vmul.f32 %v6184_v54, %v6137_v27 }
0x119f   :  { %6861 = vmatmul.msk.f32.gmra.mxu1 %vm63_vm0, %v6036_v59 }
0x11a0   :  { %v6216_v19 = vmul.f32 %v6200_v10, %v6137_v27 }
0x11a2   :  { %v6232_v37 = vadd.f32 %v6216_v19, %v6137_v27 }
0x11a4   :  { %v6248_v8 = vmul.f32 0.7978846, %v6232_v37 }
0x11a5   :  { %v6139_v2 = vpop.f32.mrf.mxu1 }
0x11a6   :  { %v6140_v38 = vadd.f32 %v11282_v7, %v6139_v2  ;;  %7631 = vtanh.f32 %v6248_v8 }
0x11a8   :  { %v6185_v47 = vmul.f32 0.044715, %v6140_v38  ;;  %v6169_v5 = vmul.f32 0.5, %v6140_v38 }
0x11aa   :  { %v6201_v39 = vmul.f32 %v6185_v47, %v6140_v38 }
0x11ac   :  { %v7632_v6 = vpop.eup %7631  ;;  %v6217_v32 = vmul.f32 %v6201_v39, %v6140_v38 }
0x11ad   :  { %v6280_v16 = vadd.f32 1.0, %v7632_v6 }
0x11ae   :  { %v6233_v23 = vadd.f32 %v6217_v32, %v6140_v38 }
0x11af   :  { %v6296_v30 = vmul.f32 %v6280_v16, %v6168_v20 }
0x11b0   :  { %v6249_v12 = vmul.f32 0.7978846, %v6233_v23 }
0x11b1   :  { %6366 = vmatmul.f32.gmra.mxu2 %v6296_v30 }
0x11b2   :  { %7633 = vtanh.f32 %v6249_v12 }
0x11b8   :  { %v7634_v1 = vpop.eup %7633 }
0x11b9   :  { %v6281_v42 = vadd.f32 1.0, %v7634_v1 }
0x11bb   :  { %v6297_v58 = vmul.f32 %v6281_v42, %v6169_v5 }
0x11bd   :  { %6369 = vmatmul.f32.gmra.mxu2 %v6297_v58 }
0x11c1   :  { %v6355_v45 = vpop.f32.mrf.mxu2 }
0x11c2   :  { %v6356_v9 = vadd.f32 %v11199_v29, %v6355_v45 }
0x11c4   :  { %v6395_v28 = vadd.f32 %v6356_v9, %v11505_v3 }
0x11c6   :  { %6431 = vrot.lane.b32.xlu2 %v6395_v28, %s7724_s14 }
0x11cd   :  { %v6358_v50 = vpop.f32.mrf.mxu2 }
0x11ce   :  { %v6359_v36 = vadd.f32 %v11199_v29, %v6358_v50 }
0x11d0   :  { %v6396_v31 = vadd.f32 %v6359_v36, %v11506_v18 }
0x11d2   :  { %v6142_v14 = vpop.f32.mrf.mxu1  ;;  %6433 = vrot.lane.b32.xlu1 %v6396_v31, %s7724_s14 }
0x11d3   :  { %v6143_v62 = vadd.f32 %v11282_v7, %v6142_v14 }
0x11d5   :  { %v6186_v21 = vmul.f32 0.044715, %v6143_v62  ;;  %v6170_v37 = vmul.f32 0.5, %v6143_v62 }
0x11d7   :  { %v6202_v4 = vmul.f32 %v6186_v21, %v6143_v62 }
0x11d9   :  { %v6218_v17 = vmul.f32 %v6202_v4, %v6143_v62 }
0x11da   :  { %v6145_v41 = vpop.f32.mrf.mxu1 }
0x11db   :  { %v6146_v0 = vadd.f32 %v11282_v7, %v6145_v41  ;;  %v6234_v34 = vadd.f32 %v6218_v17, %v6143_v62 }
0x11dd   :  { %v6187_v33 = vmul.f32 0.044715, %v6146_v0  ;;  %v6426_v49 = vpop.permute.xlu0 %6425  ;;  %v6250_v40 = vmul.f32 0.7978846, %v6234_v34  ;;  %v6171_v30 = vmul.f32 0.5, %v6146_v0 }
0x11de   :  { %v6472_v48 = vsel %vm63_vm0, %v10832_v24, %v6426_v49 }
0x11df   :  { %6488 = vst.msk [vmem:[#allocation2 + $0x8] sm:$0xff] %vm1033_vm9, %v6472_v48  ;;  %7635 = vtanh.f32 %v6250_v40  ;;  %v6203_v51 = vmul.f32 %v6187_v33, %v6146_v0 }
0x11e1   :  { %v6219_v56 = vmul.f32 %v6203_v51, %v6146_v0 }
0x11e2   :  { %v6148_v46 = vpop.f32.mrf.mxu1 }
0x11e3   :  { %v6149_v57 = vadd.f32 %v11282_v7, %v6148_v46  ;;  %v6235_v27 = vadd.f32 %v6219_v56, %v6146_v0  ;;  %v11507_v0 = vld [vmem:[#allocation23_spill] sm:$0xff]  ;;  %v11508_v46 = vld [vmem:[#allocation24_spill] sm:$0xff] }
0x11e5   :  { %v7636_v43 = vpop.eup %7635  ;;  %v6188_v54 = vmul.f32 0.044715, %v6149_v57  ;;  %v6428_v59 = vpop.permute.xlu1 %6427  ;;  %v6251_v10 = vmul.f32 0.7978846, %v6235_v27  ;;  %v6172_v36 = vmul.f32 0.5, %v6149_v57 }
0x11e6   :  { %v6473_v19 = vsel %vm63_vm0, %v10840_v60, %v6428_v59  ;;  %v6282_v8 = vadd.f32 1.0, %v7636_v43 }
0x11e7   :  { %6489 = vst.msk [vmem:[#allocation2 + $0x10] sm:$0xff] %vm1033_vm9, %v6473_v19  ;;  %7637 = vtanh.f32 %v6251_v10  ;;  %v6204_v24 = vmul.f32 %v6188_v54, %v6149_v57 }
0x11e8   :  { %v6298_v2 = vmul.f32 %v6282_v8, %v6170_v37 }
0x11e9   :  { %v6220_v38 = vmul.f32 %v6204_v24, %v6149_v57 }
0x11ea   :  { %v6151_v47 = vpop.f32.mrf.mxu1  ;;  %6372 = vmatmul.f32.gmra.mxu2 %v6298_v2 }
0x11eb   :  { %v6152_v39 = vadd.f32 %v11282_v7, %v6151_v47  ;;  %v6236_v6 = vadd.f32 %v6220_v38, %v6149_v57 }
0x11ed   :  { %v7638_v32 = vpop.eup %7637  ;;  %v6189_v20 = vmul.f32 0.044715, %v6152_v39  ;;  %v6430_v16 = vpop.permute.xlu0 %6429  ;;  %v6252_v23 = vmul.f32 0.7978846, %v6236_v6  ;;  %v6173_v33 = vmul.f32 0.5, %v6152_v39 }
0x11ee   :  { %v6474_v60 = vsel %vm63_vm0, %v10849_v44, %v6430_v16  ;;  %v6283_v12 = vadd.f32 1.0, %v7638_v32 }
0x11ef   :  { %6490 = vst.msk [vmem:[#allocation2 + $0x18] sm:$0xff] %vm1033_vm9, %v6474_v60  ;;  %7639 = vtanh.f32 %v6252_v23  ;;  %v6205_v1 = vmul.f32 %v6189_v20, %v6152_v39  ;;  %v11509_v23 = vld [vmem:[#allocation25_spill] sm:$0xff] }
0x11f0   :  { %v6299_v5 = vmul.f32 %v6283_v12, %v6171_v30  ;;  %v11510_v12 = vld [vmem:[#allocation26_spill] sm:$0xff] }
0x11f1   :  { %v6221_v42 = vmul.f32 %v6205_v1, %v6152_v39 }
0x11f2   :  { %v6154_v58 = vpop.f32.mrf.mxu1  ;;  %6375 = vmatmul.f32.gmra.mxu2 %v6299_v5 }
0x11f3   :  { %v6155_v45 = vadd.f32 %v11282_v7, %v6154_v58  ;;  %v6237_v9 = vadd.f32 %v6221_v42, %v6152_v39 }
0x11f5   :  { %v7640_v3 = vpop.eup %7639  ;;  %v6190_v28 = vmul.f32 0.044715, %v6155_v45  ;;  %v6253_v50 = vmul.f32 0.7978846, %v6237_v9  ;;  %v6174_v27 = vmul.f32 0.5, %v6155_v45 }
0x11f6   :  { %v6284_v18 = vadd.f32 1.0, %v7640_v3 }
0x11f7   :  { %7641 = vtanh.f32 %v6253_v50  ;;  %v6206_v44 = vmul.f32 %v6190_v28, %v6155_v45  ;;  %v11511_v28 = vld [vmem:[#allocation27_spill] sm:$0xff] }
0x11f8   :  { %v6300_v31 = vmul.f32 %v6284_v18, %v6172_v36 }
0x11f9   :  { %v6222_v14 = vmul.f32 %v6206_v44, %v6155_v45 }
0x11fa   :  { %6378 = vmatmul.f32.gmra.mxu2 %v6300_v31  ;;  %v6361_v62 = vpop.f32.mrf.mxu2  ;;  %v11512_v31 = vld [vmem:[#allocation28_spill] sm:$0xff] }
0x11fb   :  { %v6238_v21 = vadd.f32 %v6222_v14, %v6155_v45  ;;  %v6362_v4 = vadd.f32 %v11199_v29, %v6361_v62 }
0x11fd   :  { %v7642_v17 = vpop.eup %7641  ;;  %v6254_v41 = vmul.f32 0.7978846, %v6238_v21  ;;  %v6397_v34 = vadd.f32 %v6362_v4, %v11507_v0  ;;  %v11513_v21 = vld [vmem:[#allocation29_spill] sm:$0xff] }
0x11fe   :  { %v6285_v49 = vadd.f32 1.0, %v7642_v17 }
0x11ff   :  { %7643 = vtanh.f32 %v6254_v41  ;;  %6435 = vrot.lane.b32.xlu0 %v6397_v34, %s7724_s14 }
0x1200   :  { %v6301_v40 = vmul.f32 %v6285_v49, %v6173_v33  ;;  %v11515_v49 = vld [vmem:[#allocation31_spill] sm:$0xff] }
0x1202   :  { %6381 = vmatmul.f32.gmra.mxu2 %v6301_v40  ;;  %v6364_v48 = vpop.f32.mrf.mxu2 }
0x1203   :  { %v6365_v51 = vadd.f32 %v11199_v29, %v6364_v48 }
0x1205   :  { %v7644_v56 = vpop.eup %7643  ;;  %v6398_v57 = vadd.f32 %v6365_v51, %v11508_v46 }
0x1206   :  { %v6286_v43 = vadd.f32 1.0, %v7644_v56 }
0x1207   :  { %6437 = vrot.lane.b32.xlu2 %v6398_v57, %s7724_s14 }
0x1208   :  { %v6302_v54 = vmul.f32 %v6286_v43, %v6174_v27  ;;  %v7691_v27 = vld [vmem:[%s11413_s12 + $0x1] ss:$0 sm:$0xff]  ;;  %v11516_v43 = vld [vmem:[#allocation32_spill] sm:$0xff]  ;;  %s7725_s12 = smov [#allocation2]  }
0x1209   :  { %s6507_s17 = sshll.u32 %s7725_s12, 4  ;;  %s6508_s17 = int_to_ptr.vmem [resolvable:$true] %s6507_s17 }
0x120a   :  { %6384 = vmatmul.f32.gmra.mxu2 %v6302_v54 }
0x121c   :  { %v6157_v59 = vpop.f32.mrf.mxu1 }
0x121d   :  { %v6158_v10 = vadd.f32 %v11282_v7, %v6157_v59 }
0x121f   :  { %v6191_v19 = vmul.f32 0.044715, %v6158_v10  ;;  %v6175_v6 = vmul.f32 0.5, %v6158_v10 }
0x1220   :  { %v6432_v37 = vpop.permute.xlu2 %6431 }
0x1221   :  { %v6475_v8 = vsel %vm63_vm0, %v10862_v61, %v6432_v37  ;;  %v6207_v24 = vmul.f32 %v6191_v19, %v6158_v10 }
0x1222   :  { %6491 = vst.msk [vmem:[#allocation2 + $0x20] sm:$0xff] %vm1033_vm9, %v6475_v8 }
0x1223   :  { %v6223_v2 = vmul.f32 %v6207_v24, %v6158_v10 }
0x1225   :  { %v6239_v38 = vadd.f32 %v6223_v2, %v6158_v10 }
0x1227   :  { %v6255_v47 = vmul.f32 0.7978846, %v6239_v38 }
0x1229   :  { %7645 = vtanh.f32 %v6255_v47 }
0x122f   :  { %v7646_v39 = vpop.eup %7645 }
0x1230   :  { %v6287_v32 = vadd.f32 1.0, %v7646_v39 }
0x1232   :  { %v6303_v20 = vmul.f32 %v6287_v32, %v6175_v6 }
0x1234   :  { %v6367_v16 = vpop.f32.mrf.mxu2  ;;  %6387 = vmatmul.f32.gmra.mxu2 %v6303_v20 }
0x1235   :  { %v6368_v7 = vadd.f32 %v11199_v29, %v6367_v16 }
0x1237   :  { %v6399_v60 = vadd.f32 %v6368_v7, %v11509_v23 }
0x1239   :  { %6439 = vrot.lane.b32.xlu1 %v6399_v60, %s7724_s14 }
0x1240   :  { %v6370_v61 = vpop.f32.mrf.mxu2 }
0x1241   :  { %v6371_v30 = vadd.f32 %v11199_v29, %v6370_v61 }
0x1243   :  { %v6400_v1 = vadd.f32 %v6371_v30, %v11510_v12 }
0x1244   :  { %v6434_v5 = vpop.permute.xlu1 %6433 }
0x1245   :  { %v6476_v42 = vsel %vm63_vm0, %v10871_v15, %v6434_v5  ;;  %6441 = vrot.lane.b32.xlu0 %v6400_v1, %s7724_s14 }
0x1246   :  { %6492 = vst.msk [vmem:[#allocation2 + $0x28] sm:$0xff] %vm1033_vm9, %v6476_v42 }
0x1261   :  { %v6438_v58 = vpop.permute.xlu2 %6437 }
0x1262   :  { %v6478_v45 = vsel %vm63_vm0, %v10888_v55, %v6438_v58 }
0x1263   :  { %6494 = vst.msk [vmem:[#allocation2 + $0x38] sm:$0xff] %vm1033_vm9, %v6478_v45 }
0x126d   :  { %v6373_v9 = vpop.f32.mrf.mxu2 }
0x126e   :  { %v6374_v3 = vadd.f32 %v11199_v29, %v6373_v9 }
0x1270   :  { %v6401_v50 = vadd.f32 %v6374_v3, %v11511_v28 }
0x1271   :  { %v6436_v36 = vpop.permute.xlu0 %6435 }
0x1272   :  { %6443 = vrot.lane.b32.xlu2 %v6401_v50, %s7724_s14  ;;  %v6477_v15 = vsel %vm63_vm0, %v10878_v35, %v6436_v36  ;;  %v11514_v35 = vld [vmem:[#allocation30_spill] sm:$0xff] }
0x1273   :  { %6493 = vst.msk [vmem:[#allocation2 + $0x30] sm:$0xff] %vm1033_vm9, %v6477_v15 }
0x1275   :  { %v6376_v18 = vpop.f32.mrf.mxu2 }
0x1276   :  { %v6377_v44 = vadd.f32 %v11199_v29, %v6376_v18 }
0x1278   :  { %v6402_v55 = vadd.f32 %v6377_v44, %v11512_v31 }
0x127a   :  { %6445 = vrot.lane.b32.xlu1 %v6402_v55, %s7724_s14 }
0x127d   :  { %v6379_v14 = vpop.f32.mrf.mxu2 }
0x127e   :  { %v6380_v62 = vadd.f32 %v11199_v29, %v6379_v14 }
0x1280   :  { %v6403_v4 = vadd.f32 %v6380_v62, %v11513_v21 }
0x1282   :  { %6447 = vrot.lane.b32.xlu0 %v6403_v4, %s7724_s14 }
0x1285   :  { %v6382_v17 = vpop.f32.mrf.mxu2 }
0x1286   :  { %v6383_v41 = vadd.f32 %v11199_v29, %v6382_v17 }
0x1288   :  { %v6404_v0 = vadd.f32 %v6383_v41, %v11514_v35 }
0x128a   :  { %6449 = vrot.lane.b32.xlu2 %v6404_v0, %s7724_s14 }
0x128d   :  { %v6385_v34 = vpop.f32.mrf.mxu2 }
0x128e   :  { %v6386_v33 = vadd.f32 %v11199_v29, %v6385_v34 }
0x1290   :  { %v6405_v40 = vadd.f32 %v6386_v33, %v11515_v49 }
0x1292   :  { %6451 = vrot.lane.b32.xlu1 %v6405_v40, %s7724_s14 }
0x12ab   :  { %v6440_v48 = vpop.permute.xlu1 %6439 }
0x12ac   :  { %v6479_v51 = vsel %vm63_vm0, %v10949_v52, %v6440_v48 }
0x12ad   :  { %6495 = vst.msk [vmem:[#allocation2 + $0x40] sm:$0xff] %vm1033_vm9, %v6479_v51 }
0x12b7   :  { %v6442_v56 = vpop.permute.xlu0 %6441  ;;  %v6388_v46 = vpop.f32.mrf.mxu2 }
0x12b8   :  { %v6480_v57 = vsel %vm63_vm0, %v10962_v13, %v6442_v56  ;;  %v6389_v29 = vadd.f32 %v7691_v27, %v6388_v46 }
0x12b9   :  { %6496 = vst.msk [vmem:[#allocation2 + $0x48] sm:$0xff] %vm1033_vm9, %v6480_v57 }
0x12ba   :  { %v6406_v54 = vadd.f32 %v6389_v29, %v11516_v43 }
0x12bc   :  { %6453 = vrot.lane.b32.xlu0 %v6406_v54, %s7724_s14 }
0x12cc   :  { %v6444_v59 = vpop.permute.xlu2 %6443 }
0x12cd   :  { %v6481_v52 = vsel %vm63_vm0, %v10981_v26, %v6444_v59 }
0x12ce   :  { %6497 = vst.msk [vmem:[#allocation2 + $0x50] sm:$0xff] %vm1033_vm9, %v6481_v52 }
0x12e4   :  { %v6450_v10 = vpop.permute.xlu2 %6449 }
0x12e5   :  { %v6484_v13 = vsel %vm63_vm0, %v11045_v25, %v6450_v10 }
0x12e6   :  { %6500 = vst.msk [vmem:[#allocation2 + $0x68] sm:$0xff] %vm1033_vm9, %v6484_v13 }
0x12ec   :  { %v6446_v19 = vpop.permute.xlu1 %6445 }
0x12ed   :  { %v6482_v37 = vsel %vm63_vm0, %v11000_v63, %v6446_v19 }
0x12ee   :  { %6498 = vst.msk [vmem:[#allocation2 + $0x58] sm:$0xff] %vm1033_vm9, %v6482_v37 }
0x12f4   :  { %v6448_v8 = vpop.permute.xlu0 %6447 }
0x12f5   :  { %v6483_v24 = vsel %vm63_vm0, %v11028_v22, %v6448_v8 }
0x12f6   :  { %6499 = vst.msk [vmem:[#allocation2 + $0x60] sm:$0xff] %vm1033_vm9, %v6483_v24 }
0x1304   :  { %v6452_v26 = vpop.permute.xlu1 %6451 }
0x1305   :  { %v6485_v2 = vsel %vm63_vm0, %v11056_v11, %v6452_v26 }
0x1306   :  { %6501 = vst.msk [vmem:[#allocation2 + $0x70] sm:$0xff] %vm1033_vm9, %v6485_v2 }
0x132e   :  { %v6454_v63 = vpop.permute.xlu0 %6453 }
0x132f   :  { %v6486_v22 = vsel %vm63_vm0, %v11118_v53, %v6454_v63 }
0x1330   :  { %6502 = vst.msk [vmem:[#allocation2 + $0x78] sm:$0xff] %vm1033_vm9, %v6486_v22 }
0x1331   :  { %6515 = dma.vmem_to_hbm [thread:$0]  %s6508_s17, 2048, %s6510_s25, [#allocation3], %s7726_s26, %s7726_s26, %s7727_s9  }
0x1332   :  { %7716 = dma.done.wait [#allocation3], 2048  }
0x1333   :  { %7717 = vsyncadd [#allocation3], 4294965248 }
0x1334   :  { %6520 = vsyncpa [#allocation3], 1 }

</bundles_post_ra>
